<compile_context>
chip_gen: v7x
topology: tpu7x:2x2x1
jax: 0.10.0
libtpu: 0.0.40
codegen_flags: <defaults>
</compile_context>

<pallas_src>
import functools

import jax
import jax.numpy as jnp
from jax import lax
from jax.experimental import pallas as pl
from jax.experimental.pallas import tpu as pltpu


# ----------------------------- small helpers -----------------------------

def _round_up(x, m):
    return (x + m - 1) // m * m


def _largest_divisor_leq(n, cap):
    best = None
    for d in range(1, min(n, cap) + 1):
        if n % d == 0 and (d % 8 == 0 or d == n):
            best = d
    return best if best is not None else n


def _pick_row_tile(total_rows, width, max_m=2048):
    divs = [d for d in range(1, total_rows + 1) if total_rows % d == 0]
    ok = [d for d in divs if d * width <= max_m] or [1]
    pref = [d for d in ok if total_rows // d >= 2]   # keep >=2 grid programs (v7x)
    return max(pref) if pref else max(ok)


def _compiler_params(need_bytes, dims=("parallel", "parallel")):
    limit = int(min(48 << 20, max(24 << 20, need_bytes + (4 << 20))))
    return pltpu.CompilerParams(dimension_semantics=dims, vmem_limit_bytes=limit)


def _pre_activate(x, pre_act):
    if pre_act == "leaky_relu":
        return jnp.where(x > 0, x, 0.2 * x)
    if pre_act == "relu":
        return jnp.maximum(x, 0)
    return x


# ------------------- fallback: im2col + tiled matmul (tiny layers) -------------------

def _matmul_kernel(x_ref, w_ref, b_ref, o_ref, *, pre_act, post_act):
    x = _pre_activate(x_ref[...], pre_act)                 # (tm, K) bf16
    y = jnp.dot(x, w_ref[...], preferred_element_type=jnp.float32)
    y = y + b_ref[...]                                     # (tm, N) + (1, N)
    if post_act == "tanh":
        y = jnp.tanh(y)
    o_ref[...] = y.astype(o_ref.dtype)


def matmul_bias(x, w, b, pre_act="none", post_act="none",
                out_dtype=jnp.bfloat16, tm=512):
    """Batched (B, M, K) @ (B, K, N) + b, bf16 operands, f32 accumulation."""
    B, M, K = x.shape
    _, _, N = w.shape
    Mp = max(8, _round_up(M, 8))
    if Mp != M:
        x = jnp.pad(x, ((0, 0), (0, Mp - M), (0, 0)))
    tm = min(tm, Mp)
    grid = (B, pl.cdiv(Mp, tm))

    need = 2 * (tm * K * 2) + 2 * (K * N * 2) + 2 * (tm * N * 4) + (2 << 20)
    kern = functools.partial(_matmul_kernel, pre_act=pre_act, post_act=post_act)
    out = pl.pallas_call(
        kern,
        out_shape=jax.ShapeDtypeStruct((B, Mp, N), out_dtype),
        grid=grid,
        in_specs=[
            pl.BlockSpec((None, tm, K), lambda bi, i: (bi, i, 0)),
            pl.BlockSpec((None, K, N), lambda bi, i: (bi, 0, 0)),
            pl.BlockSpec((1, N), lambda bi, i: (0, 0)),
        ],
        out_specs=pl.BlockSpec((None, tm, N), lambda bi, i: (bi, i, 0)),
        compiler_params=_compiler_params(need),
    )(x.astype(jnp.bfloat16), w.astype(jnp.bfloat16),
      b.reshape(1, N).astype(jnp.float32))
    return out[:, :M, :]


def _im2col_nhwc(x, k, stride):
    """x already spatially padded NHWC. Returns (N*Ho*Wo, k*k*C), K order (kh,kw,c)."""
    N, Hp, Wp, C = x.shape
    Ho = (Hp - k) // stride + 1
    Wo = (Wp - k) // stride + 1
    cols = []
    for i in range(k):
        for j in range(k):
            cols.append(x[:, i:i + stride * Ho:stride, j:j + stride * Wo:stride, :])
    col = jnp.concatenate(cols, axis=-1)
    return col.reshape(N * Ho * Wo, k * k * C), Ho, Wo


def _conv_down_im2col(x, w, b, pre_act):
    N, H, W, Cin = x.shape
    Cout = w.shape[0]
    xp = jnp.pad(x, ((0, 0), (1, 1), (1, 1), (0, 0)))
    col, Ho, Wo = _im2col_nhwc(xp, 4, 2)
    wmat = jnp.transpose(w, (2, 3, 1, 0)).reshape(16 * Cin, Cout)
    y = matmul_bias(col[None], wmat[None], b, pre_act=pre_act)
    return y[0].reshape(N, Ho, Wo, Cout)


# kernel-tap indices per output parity for the stride-2, k=4, p=1 transpose conv
_PHASE_TAPS = ((3, 1), (2, 0))


def _conv_up_im2col(x, wt, b, pre_act, post_act, out_dtype):
    N, H, W, Cin = x.shape
    Cout = wt.shape[1]
    xp = jnp.pad(x, ((0, 0), (1, 1), (1, 1), (0, 0)))
    cols, wsubs = [], []
    for ph in range(2):
        for pw in range(2):
            xs = xp[:, ph:ph + H + 1, pw:pw + W + 1, :]
            col, _, _ = _im2col_nhwc(xs, 2, 1)                        # (N*H*W, 4*Cin)
            cols.append(col)
            wsub = wt[:, :, _PHASE_TAPS[ph], :][:, :, :, _PHASE_TAPS[pw]]   # (ci,co,dh,dw)
            wsubs.append(jnp.transpose(wsub, (2, 3, 0, 1)).reshape(4 * Cin, Cout))
    xb = jnp.stack(cols, axis=0)                                      # (4, N*H*W, 4*Cin)
    wb = jnp.stack(wsubs, axis=0)                                     # (4, 4*Cin, Cout)
    y = matmul_bias(xb, wb, b, pre_act=pre_act, post_act=post_act, out_dtype=out_dtype)
    y = y.reshape(2, 2, N, H, W, Cout).transpose(2, 3, 0, 4, 1, 5)
    return y.reshape(N, 2 * H, 2 * W, Cout)


# --------------------- fused Conv2d(k=4,s=2,p=1) kernel (big layers) ---------------------

def _down_kernel(y_ref, h_ref, w_ref, b_ref, o_ref, *, th, wo, pre_act):
    cout = o_ref.shape[-1]
    acc = jnp.zeros((th * wo, cout), jnp.float32)
    for dw in (0, 1):
        win = jnp.concatenate(
            [y_ref[:, dw:dw + wo, :], h_ref[:, dw:dw + wo, :]], axis=0)   # (th+1, wo, 4Cin)
        win = _pre_activate(win, pre_act)
        for dh in (0, 1):
            lhs = win[dh:dh + th].reshape(th * wo, win.shape[-1])
            acc = acc + jnp.dot(lhs, w_ref[2 * dh + dw],
                                preferred_element_type=jnp.float32)
    acc = acc + b_ref[...]
    o_ref[...] = acc.reshape(th, wo, cout).astype(o_ref.dtype)


def _conv_down_fused(x, w, b, pre_act):
    N, H, W, Cin = x.shape
    Cout = w.shape[0]
    Ho, Wo = H // 2, W // 2
    xp = jnp.pad(x, ((0, 0), (1, 1), (1, 1), (0, 0)))
    # space-to-depth: z[n, r, s, (hp, wp, ci)] = xp[n, 2r+hp, 2s+wp, ci]
    z = xp.reshape(N, Ho + 1, 2, Wo + 1, 2, Cin)
    z = jnp.transpose(z, (0, 1, 3, 2, 4, 5)).reshape(N, Ho + 1, Wo + 1, 4 * Cin)

    # w2[(dh,dw), (hp,wp,ci), co] = W[co, ci, 2dh+hp, 2dw+wp]
    wt = jnp.transpose(w, (2, 3, 1, 0)).reshape(2, 2, 2, 2, Cin, Cout)   # [dh,hp,dw,wp,ci,co]
    w2 = jnp.transpose(wt, (0, 2, 1, 3, 4, 5)).reshape(4, 4 * Cin, Cout).astype(jnp.bfloat16)
    bias = b.reshape(1, Cout).astype(jnp.float32)

    th = _pick_row_tile(Ho, Wo)
    grid = (N, Ho // th)

    blk_in = th * (Wo + 1) * 4 * Cin * 2
    blk_w = 4 * 4 * Cin * Cout * 2
    blk_out = th * Wo * Cout * 2
    temps = 2 * blk_in + th * Wo * Cout * 4
    need = 2 * (blk_in + blk_w + blk_out) + temps

    kern = functools.partial(_down_kernel, th=th, wo=Wo, pre_act=pre_act)
    return pl.pallas_call(
        kern,
        out_shape=jax.ShapeDtypeStruct((N, Ho, Wo, Cout), jnp.bfloat16),
        grid=grid,
        in_specs=[
            pl.BlockSpec((None, th, Wo + 1, 4 * Cin), lambda n, i: (n, i, 0, 0)),
            pl.BlockSpec((None, 1, Wo + 1, 4 * Cin), lambda n, i: (n, (i + 1) * th, 0, 0)),
            pl.BlockSpec((4, 4 * Cin, Cout), lambda n, i: (0, 0, 0)),
            pl.BlockSpec((1, Cout), lambda n, i: (0, 0)),
        ],
        out_specs=pl.BlockSpec((None, th, Wo, Cout), lambda n, i: (n, i, 0, 0)),
        compiler_params=_compiler_params(need),
    )(z, z, w2, bias)


# ----------------- fused ConvTranspose2d(k=4,s=2,p=1) kernel (big layers) -----------------

def _up_kernel(x_ref, h1_ref, h2_ref, w_ref, b_ref, o_ref, *, th, width, pre_act, post_act):
    cin = x_ref.shape[-1]
    c2 = o_ref.shape[-1]                                    # 2 * Cout
    # column-shifted input windows, rows [i*th, i*th + th + 2)
    xe = []
    for e in range(3):
        v = jnp.concatenate(
            [x_ref[:, e:e + width, :], h1_ref[:, e:e + width, :],
             h2_ref[:, e:e + width, :]], axis=0)            # (th+2, width, Cin)
        xe.append(_pre_activate(v, pre_act))
    phs = []
    for ph in range(2):
        acc = jnp.zeros((th * width, c2), jnp.float32)
        for dh in range(2):
            for e in range(3):
                lhs = xe[e][ph + dh:ph + dh + th].reshape(th * width, cin)
                acc = acc + jnp.dot(lhs, w_ref[(ph * 2 + dh) * 3 + e],
                                    preferred_element_type=jnp.float32)
        acc = acc + b_ref[...]
        if post_act == "tanh":
            acc = jnp.tanh(acc)
        phs.append(acc.reshape(th, width, c2))
    out = jnp.stack(phs, axis=1)                            # (th, 2, width, 2*Cout)
    o_ref[...] = out.astype(o_ref.dtype)


def _conv_up_fused(x, wt, b, pre_act, post_act, out_dtype):
    N, H, W, Cin = x.shape
    Cout = wt.shape[1]
    xp = jnp.pad(x, ((0, 0), (1, 1), (1, 1), (0, 0)))       # (N, H+2, W+2, Cin) bf16

    # B[(ph,dh,e)][ci, pw*Cout+co] = wt[ci, co, taps[ph][dh], taps[pw][e-pw]]  (0 if e-pw not in {0,1})
    wf = wt.astype(jnp.float32)
    blocks = []
    for ph in range(2):
        for dh in range(2):
            for e in range(3):
                parts = []
                for pw in range(2):
                    dw = e - pw
                    if 0 <= dw <= 1:
                        parts.append(wf[:, :, _PHASE_TAPS[ph][dh], _PHASE_TAPS[pw][dw]])
                    else:
                        parts.append(jnp.zeros((Cin, Cout), jnp.float32))
                blocks.append(jnp.concatenate(parts, axis=1))
    wB = jnp.stack(blocks, axis=0).astype(jnp.bfloat16)      # (12, Cin, 2*Cout)
    bias2 = jnp.concatenate([b, b]).reshape(1, 2 * Cout).astype(jnp.float32)

    th = _pick_row_tile(H, W)
    grid = (N, H // th)
    osize = jnp.dtype(out_dtype).itemsize

    blk_in = th * (W + 2) * Cin * 2
    blk_w = 12 * Cin * 2 * Cout * 2
    blk_out = th * 2 * W * 2 * Cout * osize
    temps = 3 * blk_in + 2 * th * W * 2 * Cout * 4
    need = 2 * (blk_in + blk_w + blk_out) + temps

    kern = functools.partial(_up_kernel, th=th, width=W, pre_act=pre_act, post_act=post_act)
    out5 = pl.pallas_call(
        kern,
        out_shape=jax.ShapeDtypeStruct((N, H, 2, W, 2 * Cout), out_dtype),
        grid=grid,
        in_specs=[
            pl.BlockSpec((None, th, W + 2, Cin), lambda n, i: (n, i, 0, 0)),
            pl.BlockSpec((None, 1, W + 2, Cin), lambda n, i: (n, (i + 1) * th, 0, 0)),
            pl.BlockSpec((None, 1, W + 2, Cin), lambda n, i: (n, (i + 1) * th + 1, 0, 0)),
            pl.BlockSpec((12, Cin, 2 * Cout), lambda n, i: (0, 0, 0)),
            pl.BlockSpec((1, 2 * Cout), lambda n, i: (0, 0)),
        ],
        out_specs=pl.BlockSpec((None, th, 2, W, 2 * Cout), lambda n, i: (n, i, 0, 0, 0)),
        compiler_params=_compiler_params(need),
    )(xp, xp, xp, wB, bias2)
    # (N, H, 2, W, 2*Cout) -> (N, 2H, 2W, Cout): pure row-major re-view (free).
    return out5.reshape(N, 2 * H, 2 * W, Cout)


# --------------------------- instance norm (stats kernel only) ---------------------------

def _in_stats_kernel(x_ref, stat_ref, *, inv_count, eps):
    s = pl.program_id(1)

    @pl.when(s == 0)
    def _():
        stat_ref[...] = jnp.zeros_like(stat_ref)

    x = x_ref[...].astype(jnp.float32)                       # (ts, C)
    ps = jnp.sum(x, axis=0, keepdims=True)
    pq = jnp.sum(x * x, axis=0, keepdims=True)
    stat_ref[...] += jnp.concatenate([ps, pq], axis=0)

    @pl.when(s == pl.num_programs(1) - 1)
    def _():
        acc = stat_ref[...]
        mean = acc[0:1] * inv_count
        var = jnp.maximum(acc[1:2] * inv_count - mean * mean, 0.0)
        rstd = lax.rsqrt(var + eps)
        stat_ref[...] = jnp.concatenate([mean, rstd], axis=0)


def instance_norm_stats(x, eps=1e-5):
    """Per-(n, c) mean / rstd of a bf16 NHWC activation (nn.InstanceNorm2d defaults)."""
    N, H, W, C = x.shape
    S = H * W
    xr = x.reshape(N, S, C)
    ts = _largest_divisor_leq(S, 1024)
    grid = (N, S // ts)
    return pl.pallas_call(
        functools.partial(_in_stats_kernel, inv_count=1.0 / float(S), eps=eps),
        out_shape=jax.ShapeDtypeStruct((N, 2, C), jnp.float32),
        grid=grid,
        in_specs=[pl.BlockSpec((None, ts, C), lambda n, s: (n, s, 0))],
        out_specs=pl.BlockSpec((None, 2, C), lambda n, s: (n, 0, 0)),
        compiler_params=pltpu.CompilerParams(
            dimension_semantics=("parallel", "arbitrary")),
    )(xr)


# ---------------- lazy-normalized activations (norm apply fused into consumer prep) ----------------

def _apply_stats(x, stats):
    if stats is None:
        return x
    mean = stats[:, 0][:, None, None, :]
    rstd = stats[:, 1][:, None, None, :]
    return ((x.astype(jnp.float32) - mean) * rstd)


def _identity_stats(x):
    N = x.shape[0]
    C = x.shape[-1]
    return jnp.concatenate([jnp.zeros((N, 1, C), jnp.float32),
                            jnp.ones((N, 1, C), jnp.float32)], axis=1)


def _concat_act(a, b):
    xa, sa = a
    xb, sb = b
    x = jnp.concatenate([xa, xb], axis=-1)
    if sa is None and sb is None:
        return x, None
    sa = sa if sa is not None else _identity_stats(xa)
    sb = sb if sb is not None else _identity_stats(xb)
    return x, jnp.concatenate([sa, sb], axis=-1)


# --------------------------- conv wrappers ---------------------------

def conv2d_down(act, w, b, pre_act):
    """nn.Conv2d(Cin, Cout, 4, stride=2, padding=1); input NHWC (data, lazy stats)."""
    x, stats = act
    x = _apply_stats(x, stats).astype(jnp.bfloat16)
    Wo = x.shape[2] // 2
    if Wo >= 8 and Wo % 8 == 0:
        return _conv_down_fused(x, w, b, pre_act)
    return _conv_down_im2col(x, w, b, pre_act)


def conv_transpose2d_up(act, wt, b, pre_act, post_act="none", out_dtype=jnp.bfloat16):
    """nn.ConvTranspose2d(Cin, Cout, 4, stride=2, padding=1); input NHWC (data, lazy stats)."""
    x, stats = act
    x = _apply_stats(x, stats).astype(jnp.bfloat16)
    W = x.shape[2]
    if W >= 8 and W % 8 == 0:
        return _conv_up_fused(x, wt, b, pre_act, post_act, out_dtype)
    return _conv_up_im2col(x, wt, b, pre_act, post_act, out_dtype)


# --------------------------- U-Net structure ---------------------------

def init_block(key, outer_nc, inner_nc, input_nc=None, sub=None,
               outermost=False, innermost=False):
    if input_nc is None:
        input_nc = outer_nc
    k1, k2, k3, k4 = jax.random.split(key, 4)
    up_in = inner_nc if innermost else inner_nc * 2
    return {
        "dw": 0.02 * jax.random.normal(k1, (inner_nc, input_nc, 4, 4), jnp.float32),
        "db": 0.01 * jax.random.normal(k2, (inner_nc,), jnp.float32),
        "uw": 0.02 * jax.random.normal(k3, (up_in, outer_nc, 4, 4), jnp.float32),
        "ub": 0.01 * jax.random.normal(k4, (outer_nc,), jnp.float32),
        "sub": sub,
        "outermost": outermost,
        "innermost": innermost,
    }


def init_unet(key, input_nc, output_nc, num_downs, ngf=64):
    keys = jax.random.split(key, num_downs + 1)
    ki = 0
    block = init_block(keys[ki], ngf * 8, ngf * 8, innermost=True); ki += 1
    for _ in range(num_downs - 5):
        block = init_block(keys[ki], ngf * 8, ngf * 8, sub=block); ki += 1
    block = init_block(keys[ki], ngf * 4, ngf * 8, sub=block); ki += 1
    block = init_block(keys[ki], ngf * 2, ngf * 4, sub=block); ki += 1
    block = init_block(keys[ki], ngf, ngf * 2, sub=block); ki += 1
    block = init_block(keys[ki], output_nc, ngf, input_nc=input_nc, sub=block,
                       outermost=True)
    return block


def block_forward(params, act):
    if params["outermost"]:
        # down = [downconv]; up = [ReLU, upconv, Tanh]; no skip concat.
        h = conv2d_down(act, params["dw"], params["db"], pre_act="none")
        sub_out = block_forward(params["sub"], (h, None))
        return conv_transpose2d_up(sub_out, params["uw"], params["ub"],
                                   pre_act="relu", post_act="tanh",
                                   out_dtype=jnp.float32)
    elif params["innermost"]:
        # down = [LeakyReLU, downconv]; up = [ReLU, upconv, InstanceNorm].
        h = conv2d_down(act, params["dw"], params["db"], pre_act="leaky_relu")
        up = conv_transpose2d_up((h, None), params["uw"], params["ub"], pre_act="relu")
        up_stats = instance_norm_stats(up)
        return _concat_act(act, (up, up_stats))
    else:
        # down = [LeakyReLU, downconv, InstanceNorm]; up = [ReLU, upconv, InstanceNorm].
        h = conv2d_down(act, params["dw"], params["db"], pre_act="leaky_relu")
        h_stats = instance_norm_stats(h)
        sub_out = block_forward(params["sub"], (h, h_stats))
        up = conv_transpose2d_up(sub_out, params["uw"], params["ub"], pre_act="relu")
        up_stats = instance_norm_stats(up)
        return _concat_act(act, (up, up_stats))


def unet_generator_forward(params, x):
    # External interface is NCHW (PyTorch); internal compute is NHWC + lazy norm stats.
    xh = jnp.transpose(x, (0, 2, 3, 1))
    yh = block_forward(params, (xh, None))
    return jnp.transpose(yh, (0, 3, 1, 2))


# --------------------------- pure-JAX reference (f32, NCHW) ---------------------------

def _ref_conv_down(x, w, b):
    y = lax.conv_general_dilated(x, w, window_strides=(2, 2),
                                 padding=((1, 1), (1, 1)),
                                 dimension_numbers=("NCHW", "OIHW", "NCHW"))
    return y + b[None, :, None, None]


def _ref_conv_up(x, wt, b):
    w_flip = wt[:, :, ::-1, ::-1]
    w_oihw = jnp.transpose(w_flip, (1, 0, 2, 3))
    y = lax.conv_general_dilated(x, w_oihw, window_strides=(1, 1),
                                 padding=((2, 2), (2, 2)), lhs_dilation=(2, 2),
                                 dimension_numbers=("NCHW", "OIHW", "NCHW"))
    return y + b[None, :, None, None]


def _ref_in(x):
    mean = x.mean((2, 3), keepdims=True)
    var = x.var((2, 3), keepdims=True)
    return (x - mean) / jnp.sqrt(var + 1e-5)


def _ref_block(params, x):
    if params["outermost"]:
        h = _ref_conv_down(x, params["dw"], params["db"])
        h = _ref_block(params["sub"], h)
        return jnp.tanh(_ref_conv_up(jax.nn.relu(h), params["uw"], params["ub"]))
    elif params["innermost"]:
        h = _ref_conv_down(jax.nn.leaky_relu(x, 0.2), params["dw"], params["db"])
        u = _ref_in(_ref_conv_up(jax.nn.relu(h), params["uw"], params["ub"]))
        return jnp.concatenate([x, u], axis=1)
    else:
        h = _ref_conv_down(jax.nn.leaky_relu(x, 0.2), params["dw"], params["db"])
        h = _ref_in(h)
        h = _ref_block(params["sub"], h)
        u = _ref_in(_ref_conv_up(jax.nn.relu(h), params["uw"], params["ub"]))
        return jnp.concatenate([x, u], axis=1)


if __name__ == "__main__":
    # Small config: input_nc=3, output_nc=3, num_downs=5, ngf=8, spatial=32 (=2**5).
    key = jax.random.PRNGKey(0)
    pkey, xkey = jax.random.split(key)
    params = init_unet(pkey, input_nc=3, output_nc=3, num_downs=5, ngf=8)
    x = jax.random.normal(xkey, (2, 3, 32, 32), jnp.float32)   # NCHW

    fwd = jax.jit(lambda inp: unet_generator_forward(params, inp))
    out = jax.block_until_ready(fwd(x))
    assert out.shape == (2, 3, 32, 32), out.shape
    assert bool(jnp.all(jnp.isfinite(out)))

    # Numerical check against a pure-JAX f32 reference of the same forward pass.
    ref = jax.block_until_ready(jax.jit(lambda inp: _ref_block(params, inp))(x))
    err = float(jnp.max(jnp.abs(out - ref)))
    scale = float(jnp.max(jnp.abs(ref)))
    assert err <= 0.05 * (1.0 + scale), (err, scale)
    print("KERNEL_OK")
</pallas_src>

<mosaic_0001>
module attributes {stable_mosaic.version = 11 : i64} {
  func.func @_down_kernel(%arg0: i32, %arg1: i32, %arg2: memref<1x8x17x12xbf16, #tpu.memory_space<vmem>>, %arg3: memref<1x1x17x12xbf16, #tpu.memory_space<vmem>>, %arg4: memref<4x12x8xbf16, #tpu.memory_space<vmem>>, %arg5: memref<1x8xf32, #tpu.memory_space<vmem>>, %arg6: memref<1x8x16x8xbf16, #tpu.memory_space<vmem>>) attributes {dimension_semantics = [#tpu.dimension_semantics<parallel>, #tpu.dimension_semantics<parallel>], iteration_bounds = array<i64: 2, 2>, scalar_prefetch = 0 : i64, scratch_operands = 0 : i64, tpu.core_type = #tpu.core_type<tc>, window_params = [{transform_indices = @transform_0, window_bounds = array<i64: 1, 8, 17, 12>}, {transform_indices = @transform_1, window_bounds = array<i64: 1, 1, 17, 12>}, {pipeline_mode = #tpu.pipeline_mode<synchronous>, transform_indices = @transform_2, window_bounds = array<i64: 4, 12, 8>}, {pipeline_mode = #tpu.pipeline_mode<synchronous>, transform_indices = @transform_3, window_bounds = array<i64: 1, 8>}, {transform_indices = @transform_4, window_bounds = array<i64: 1, 8, 16, 8>}]} {
    %cst = arith.constant 0.000000e+00 : f32
    %0 = vector.broadcast %cst : f32 to vector<128x8xf32>
    %c0 = arith.constant 0 : index
    %c0_0 = arith.constant 0 : index
    %c0_1 = arith.constant 0 : index
    %c0_2 = arith.constant 0 : index
    %1 = vector.load %arg2[%c0, %c0_0, %c0_1, %c0_2] : memref<1x8x17x12xbf16, #tpu.memory_space<vmem>>, vector<1x8x16x12xbf16>
    %2 = vector.shape_cast %1 : vector<1x8x16x12xbf16> to vector<8x16x12xbf16>
    %c0_3 = arith.constant 0 : index
    %c0_4 = arith.constant 0 : index
    %c0_5 = arith.constant 0 : index
    %c0_6 = arith.constant 0 : index
    %3 = vector.load %arg3[%c0_3, %c0_4, %c0_5, %c0_6] : memref<1x1x17x12xbf16, #tpu.memory_space<vmem>>, vector<1x1x16x12xbf16>
    %4 = vector.shape_cast %3 : vector<1x1x16x12xbf16> to vector<1x16x12xbf16>
    %5 = tpu.concatenate %2, %4 in 0 : vector<8x16x12xbf16>, vector<1x16x12xbf16> -> vector<9x16x12xbf16>
    %6 = vector.extract_strided_slice %5 {offsets = [0, 0, 0], sizes = [8, 16, 12], strides = [1, 1, 1]} : vector<9x16x12xbf16> to vector<8x16x12xbf16>
    %7 = vector.shape_cast %6 : vector<8x16x12xbf16> to vector<128x12xbf16>
    %c0_7 = arith.constant 0 : index
    %c0_8 = arith.constant 0 : index
    %c0_9 = arith.constant 0 : index
    %8 = vector.load %arg4[%c0_7, %c0_8, %c0_9] : memref<4x12x8xbf16, #tpu.memory_space<vmem>>, vector<1x12x8xbf16>
    %9 = vector.shape_cast %8 : vector<1x12x8xbf16> to vector<12x8xbf16>
    %cst_10 = arith.constant dense<0.000000e+00> : vector<128x8xf32>
    %10 = tpu.matmul %7, %9, %cst_10 {dimension_numbers = #tpu.dot_dimension_numbers<[1], [0], [0], [1], [0, 0, 1, 1], [], []>} : vector<128x12xbf16>, vector<12x8xbf16>, vector<128x8xf32> -> vector<128x8xf32>
    %11 = arith.addf %0, %10 : vector<128x8xf32>
    %12 = vector.extract_strided_slice %5 {offsets = [1, 0, 0], sizes = [8, 16, 12], strides = [1, 1, 1]} : vector<9x16x12xbf16> to vector<8x16x12xbf16>
    %13 = vector.shape_cast %12 : vector<8x16x12xbf16> to vector<128x12xbf16>
    %c2 = arith.constant 2 : index
    %c0_11 = arith.constant 0 : index
    %c0_12 = arith.constant 0 : index
    %14 = vector.load %arg4[%c2, %c0_11, %c0_12] : memref<4x12x8xbf16, #tpu.memory_space<vmem>>, vector<1x12x8xbf16>
    %15 = vector.shape_cast %14 : vector<1x12x8xbf16> to vector<12x8xbf16>
    %cst_13 = arith.constant dense<0.000000e+00> : vector<128x8xf32>
    %16 = tpu.matmul %13, %15, %cst_13 {dimension_numbers = #tpu.dot_dimension_numbers<[1], [0], [0], [1], [0, 0, 1, 1], [], []>} : vector<128x12xbf16>, vector<12x8xbf16>, vector<128x8xf32> -> vector<128x8xf32>
    %17 = arith.addf %11, %16 : vector<128x8xf32>
    %c0_14 = arith.constant 0 : index
    %c0_15 = arith.constant 0 : index
    %c1 = arith.constant 1 : index
    %c0_16 = arith.constant 0 : index
    %18 = vector.load %arg2[%c0_14, %c0_15, %c1, %c0_16] : memref<1x8x17x12xbf16, #tpu.memory_space<vmem>>, vector<1x8x16x12xbf16>
    %19 = vector.shape_cast %18 : vector<1x8x16x12xbf16> to vector<8x16x12xbf16>
    %c0_17 = arith.constant 0 : index
    %c0_18 = arith.constant 0 : index
    %c1_19 = arith.constant 1 : index
    %c0_20 = arith.constant 0 : index
    %20 = vector.load %arg3[%c0_17, %c0_18, %c1_19, %c0_20] : memref<1x1x17x12xbf16, #tpu.memory_space<vmem>>, vector<1x1x16x12xbf16>
    %21 = vector.shape_cast %20 : vector<1x1x16x12xbf16> to vector<1x16x12xbf16>
    %22 = tpu.concatenate %19, %21 in 0 : vector<8x16x12xbf16>, vector<1x16x12xbf16> -> vector<9x16x12xbf16>
    %23 = vector.extract_strided_slice %22 {offsets = [0, 0, 0], sizes = [8, 16, 12], strides = [1, 1, 1]} : vector<9x16x12xbf16> to vector<8x16x12xbf16>
    %24 = vector.shape_cast %23 : vector<8x16x12xbf16> to vector<128x12xbf16>
    %c1_21 = arith.constant 1 : index
    %c0_22 = arith.constant 0 : index
    %c0_23 = arith.constant 0 : index
    %25 = vector.load %arg4[%c1_21, %c0_22, %c0_23] : memref<4x12x8xbf16, #tpu.memory_space<vmem>>, vector<1x12x8xbf16>
    %26 = vector.shape_cast %25 : vector<1x12x8xbf16> to vector<12x8xbf16>
    %cst_24 = arith.constant dense<0.000000e+00> : vector<128x8xf32>
    %27 = tpu.matmul %24, %26, %cst_24 {dimension_numbers = #tpu.dot_dimension_numbers<[1], [0], [0], [1], [0, 0, 1, 1], [], []>} : vector<128x12xbf16>, vector<12x8xbf16>, vector<128x8xf32> -> vector<128x8xf32>
    %28 = arith.addf %17, %27 : vector<128x8xf32>
    %29 = vector.extract_strided_slice %22 {offsets = [1, 0, 0], sizes = [8, 16, 12], strides = [1, 1, 1]} : vector<9x16x12xbf16> to vector<8x16x12xbf16>
    %30 = vector.shape_cast %29 : vector<8x16x12xbf16> to vector<128x12xbf16>
    %c3 = arith.constant 3 : index
    %c0_25 = arith.constant 0 : index
    %c0_26 = arith.constant 0 : index
    %31 = vector.load %arg4[%c3, %c0_25, %c0_26] : memref<4x12x8xbf16, #tpu.memory_space<vmem>>, vector<1x12x8xbf16>
    %32 = vector.shape_cast %31 : vector<1x12x8xbf16> to vector<12x8xbf16>
    %cst_27 = arith.constant dense<0.000000e+00> : vector<128x8xf32>
    %33 = tpu.matmul %30, %32, %cst_27 {dimension_numbers = #tpu.dot_dimension_numbers<[1], [0], [0], [1], [0, 0, 1, 1], [], []>} : vector<128x12xbf16>, vector<12x8xbf16>, vector<128x8xf32> -> vector<128x8xf32>
    %34 = arith.addf %28, %33 : vector<128x8xf32>
    %c0_28 = arith.constant 0 : index
    %c0_29 = arith.constant 0 : index
    %35 = vector.load %arg5[%c0_28, %c0_29] : memref<1x8xf32, #tpu.memory_space<vmem>>, vector<1x8xf32>
    %36 = vector.broadcast %35 : vector<1x8xf32> to vector<128x8xf32>
    %37 = arith.addf %34, %36 : vector<128x8xf32>
    %38 = vector.shape_cast %37 : vector<128x8xf32> to vector<8x16x8xf32>
    %39 = arith.truncf %38 : vector<8x16x8xf32> to vector<8x16x8xbf16>
    %c0_30 = arith.constant 0 : index
    %c0_31 = arith.constant 0 : index
    %c0_32 = arith.constant 0 : index
    %c0_33 = arith.constant 0 : index
    %40 = vector.load %arg6[%c0_30, %c0_31, %c0_32, %c0_33] : memref<1x8x16x8xbf16, #tpu.memory_space<vmem>>, vector<1x8x16x8xbf16>
    %41 = vector.shape_cast %40 : vector<1x8x16x8xbf16> to vector<8x16x8xbf16>
    %42 = vector.shape_cast %39 : vector<8x16x8xbf16> to vector<1x8x16x8xbf16>
    tpu.vector_store %arg6[%c0_30, %c0_31, %c0_32, %c0_33], %42 {strides = array<i32>} : memref<1x8x16x8xbf16, #tpu.memory_space<vmem>>, vector<1x8x16x8xbf16>,
    return
  }
  func.func @transform_0(%arg0: i32, %arg1: i32) -> (i32, i32, i32, i32) {
    %c0_i32 = arith.constant 0 : i32
    %c0_i32_0 = arith.constant 0 : i32
    %c0_i32_1 = arith.constant 0 : i32
    return %arg0, %arg1, %c0_i32, %c0_i32_0 : i32, i32, i32, i32
  }
  func.func @transform_1(%arg0: i32, %arg1: i32) -> (i32, i32, i32, i32) {
    %c1_i32 = arith.constant 1 : i32
    %0 = arith.addi %arg1, %c1_i32 : i32
    %c8_i32 = arith.constant 8 : i32
    %1 = arith.muli %0, %c8_i32 : i32
    %c0_i32 = arith.constant 0 : i32
    %c0_i32_0 = arith.constant 0 : i32
    %c0_i32_1 = arith.constant 0 : i32
    return %arg0, %1, %c0_i32, %c0_i32_0 : i32, i32, i32, i32
  }
  func.func @transform_2(%arg0: i32, %arg1: i32) -> (i32, i32, i32) {
    %c0_i32 = arith.constant 0 : i32
    %c0_i32_0 = arith.constant 0 : i32
    %c0_i32_1 = arith.constant 0 : i32
    %c0_i32_2 = arith.constant 0 : i32
    return %c0_i32, %c0_i32_0, %c0_i32_1 : i32, i32, i32
  }
  func.func @transform_3(%arg0: i32, %arg1: i32) -> (i32, i32) {
    %c0_i32 = arith.constant 0 : i32
    %c0_i32_0 = arith.constant 0 : i32
    %c0_i32_1 = arith.constant 0 : i32
    return %c0_i32, %c0_i32_0 : i32, i32
  }
  func.func @transform_4(%arg0: i32, %arg1: i32) -> (i32, i32, i32, i32) {
    %c0_i32 = arith.constant 0 : i32
    %c0_i32_0 = arith.constant 0 : i32
    %c0_i32_1 = arith.constant 0 : i32
    return %arg0, %arg1, %c0_i32, %c0_i32_0 : i32, i32, i32, i32
  }
}

module attributes {stable_mosaic.version = 11 : i64} {
  func.func @_down_kernel(%arg0: i32, %arg1: i32, %arg2: memref<1x4x9x32xbf16, #tpu.memory_space<vmem>>, %arg3: memref<1x1x9x32xbf16, #tpu.memory_space<vmem>>, %arg4: memref<4x32x16xbf16, #tpu.memory_space<vmem>>, %arg5: memref<1x16xf32, #tpu.memory_space<vmem>>, %arg6: memref<1x4x8x16xbf16, #tpu.memory_space<vmem>>) attributes {dimension_semantics = [#tpu.dimension_semantics<parallel>, #tpu.dimension_semantics<parallel>], iteration_bounds = array<i64: 2, 2>, scalar_prefetch = 0 : i64, scratch_operands = 0 : i64, tpu.core_type = #tpu.core_type<tc>, window_params = [{transform_indices = @transform_0, window_bounds = array<i64: 1, 4, 9, 32>}, {transform_indices = @transform_1, window_bounds = array<i64: 1, 1, 9, 32>}, {pipeline_mode = #tpu.pipeline_mode<synchronous>, transform_indices = @transform_2, window_bounds = array<i64: 4, 32, 16>}, {pipeline_mode = #tpu.pipeline_mode<synchronous>, transform_indices = @transform_3, window_bounds = array<i64: 1, 16>}, {transform_indices = @transform_4, window_bounds = array<i64: 1, 4, 8, 16>}]} {
    %cst = arith.constant 0.000000e+00 : f32
    %0 = vector.broadcast %cst : f32 to vector<32x16xf32>
    %c0 = arith.constant 0 : index
    %c0_0 = arith.constant 0 : index
    %c0_1 = arith.constant 0 : index
    %c0_2 = arith.constant 0 : index
    %1 = vector.load %arg2[%c0, %c0_0, %c0_1, %c0_2] : memref<1x4x9x32xbf16, #tpu.memory_space<vmem>>, vector<1x4x8x32xbf16>
    %2 = vector.shape_cast %1 : vector<1x4x8x32xbf16> to vector<4x8x32xbf16>
    %c0_3 = arith.constant 0 : index
    %c0_4 = arith.constant 0 : index
    %c0_5 = arith.constant 0 : index
    %c0_6 = arith.constant 0 : index
    %3 = vector.load %arg3[%c0_3, %c0_4, %c0_5, %c0_6] : memref<1x1x9x32xbf16, #tpu.memory_space<vmem>>, vector<1x1x8x32xbf16>
    %4 = vector.shape_cast %3 : vector<1x1x8x32xbf16> to vector<1x8x32xbf16>
    %5 = tpu.concatenate %2, %4 in 0 : vector<4x8x32xbf16>, vector<1x8x32xbf16> -> vector<5x8x32xbf16>
    %cst_7 = arith.constant 0.000000e+00 : bf16
    %6 = vector.broadcast %cst_7 : bf16 to vector<5x8x32xbf16>
    %7 = arith.cmpf ogt, %5, %6 : vector<5x8x32xbf16>
    %cst_8 = arith.constant 2.001950e-01 : bf16
    %8 = vector.broadcast %cst_8 : bf16 to vector<5x8x32xbf16>
    %9 = arith.mulf %8, %5 : vector<5x8x32xbf16>
    %10 = arith.select %7, %5, %9 : vector<5x8x32xi1>, vector<5x8x32xbf16>
    %11 = vector.extract_strided_slice %10 {offsets = [0, 0, 0], sizes = [4, 8, 32], strides = [1, 1, 1]} : vector<5x8x32xbf16> to vector<4x8x32xbf16>
    %12 = vector.shape_cast %11 : vector<4x8x32xbf16> to vector<32x32xbf16>
    %c0_9 = arith.constant 0 : index
    %c0_10 = arith.constant 0 : index
    %c0_11 = arith.constant 0 : index
    %13 = vector.load %arg4[%c0_9, %c0_10, %c0_11] : memref<4x32x16xbf16, #tpu.memory_space<vmem>>, vector<1x32x16xbf16>
    %14 = vector.shape_cast %13 : vector<1x32x16xbf16> to vector<32x16xbf16>
    %cst_12 = arith.constant dense<0.000000e+00> : vector<32x16xf32>
    %15 = tpu.matmul %12, %14, %cst_12 {dimension_numbers = #tpu.dot_dimension_numbers<[1], [0], [0], [1], [0, 0, 1, 1], [], []>} : vector<32x32xbf16>, vector<32x16xbf16>, vector<32x16xf32> -> vector<32x16xf32>
    %16 = arith.addf %0, %15 : vector<32x16xf32>
    %17 = vector.extract_strided_slice %10 {offsets = [1, 0, 0], sizes = [4, 8, 32], strides = [1, 1, 1]} : vector<5x8x32xbf16> to vector<4x8x32xbf16>
    %18 = vector.shape_cast %17 : vector<4x8x32xbf16> to vector<32x32xbf16>
    %c2 = arith.constant 2 : index
    %c0_13 = arith.constant 0 : index
    %c0_14 = arith.constant 0 : index
    %19 = vector.load %arg4[%c2, %c0_13, %c0_14] : memref<4x32x16xbf16, #tpu.memory_space<vmem>>, vector<1x32x16xbf16>
    %20 = vector.shape_cast %19 : vector<1x32x16xbf16> to vector<32x16xbf16>
    %cst_15 = arith.constant dense<0.000000e+00> : vector<32x16xf32>
    %21 = tpu.matmul %18, %20, %cst_15 {dimension_numbers = #tpu.dot_dimension_numbers<[1], [0], [0], [1], [0, 0, 1, 1], [], []>} : vector<32x32xbf16>, vector<32x16xbf16>, vector<32x16xf32> -> vector<32x16xf32>
    %22 = arith.addf %16, %21 : vector<32x16xf32>
    %c0_16 = arith.constant 0 : index
    %c0_17 = arith.constant 0 : index
    %c1 = arith.constant 1 : index
    %c0_18 = arith.constant 0 : index
    %23 = vector.load %arg2[%c0_16, %c0_17, %c1, %c0_18] : memref<1x4x9x32xbf16, #tpu.memory_space<vmem>>, vector<1x4x8x32xbf16>
    %24 = vector.shape_cast %23 : vector<1x4x8x32xbf16> to vector<4x8x32xbf16>
    %c0_19 = arith.constant 0 : index
    %c0_20 = arith.constant 0 : index
    %c1_21 = arith.constant 1 : index
    %c0_22 = arith.constant 0 : index
    %25 = vector.load %arg3[%c0_19, %c0_20, %c1_21, %c0_22] : memref<1x1x9x32xbf16, #tpu.memory_space<vmem>>, vector<1x1x8x32xbf16>
    %26 = vector.shape_cast %25 : vector<1x1x8x32xbf16> to vector<1x8x32xbf16>
    %27 = tpu.concatenate %24, %26 in 0 : vector<4x8x32xbf16>, vector<1x8x32xbf16> -> vector<5x8x32xbf16>
    %cst_23 = arith.constant 0.000000e+00 : bf16
    %28 = vector.broadcast %cst_23 : bf16 to vector<5x8x32xbf16>
    %29 = arith.cmpf ogt, %27, %28 : vector<5x8x32xbf16>
    %cst_24 = arith.constant 2.001950e-01 : bf16
    %30 = vector.broadcast %cst_24 : bf16 to vector<5x8x32xbf16>
    %31 = arith.mulf %30, %27 : vector<5x8x32xbf16>
    %32 = arith.select %29, %27, %31 : vector<5x8x32xi1>, vector<5x8x32xbf16>
    %33 = vector.extract_strided_slice %32 {offsets = [0, 0, 0], sizes = [4, 8, 32], strides = [1, 1, 1]} : vector<5x8x32xbf16> to vector<4x8x32xbf16>
    %34 = vector.shape_cast %33 : vector<4x8x32xbf16> to vector<32x32xbf16>
    %c1_25 = arith.constant 1 : index
    %c0_26 = arith.constant 0 : index
    %c0_27 = arith.constant 0 : index
    %35 = vector.load %arg4[%c1_25, %c0_26, %c0_27] : memref<4x32x16xbf16, #tpu.memory_space<vmem>>, vector<1x32x16xbf16>
    %36 = vector.shape_cast %35 : vector<1x32x16xbf16> to vector<32x16xbf16>
    %cst_28 = arith.constant dense<0.000000e+00> : vector<32x16xf32>
    %37 = tpu.matmul %34, %36, %cst_28 {dimension_numbers = #tpu.dot_dimension_numbers<[1], [0], [0], [1], [0, 0, 1, 1], [], []>} : vector<32x32xbf16>, vector<32x16xbf16>, vector<32x16xf32> -> vector<32x16xf32>
    %38 = arith.addf %22, %37 : vector<32x16xf32>
    %39 = vector.extract_strided_slice %32 {offsets = [1, 0, 0], sizes = [4, 8, 32], strides = [1, 1, 1]} : vector<5x8x32xbf16> to vector<4x8x32xbf16>
    %40 = vector.shape_cast %39 : vector<4x8x32xbf16> to vector<32x32xbf16>
    %c3 = arith.constant 3 : index
    %c0_29 = arith.constant 0 : index
    %c0_30 = arith.constant 0 : index
    %41 = vector.load %arg4[%c3, %c0_29, %c0_30] : memref<4x32x16xbf16, #tpu.memory_space<vmem>>, vector<1x32x16xbf16>
    %42 = vector.shape_cast %41 : vector<1x32x16xbf16> to vector<32x16xbf16>
    %cst_31 = arith.constant dense<0.000000e+00> : vector<32x16xf32>
    %43 = tpu.matmul %40, %42, %cst_31 {dimension_numbers = #tpu.dot_dimension_numbers<[1], [0], [0], [1], [0, 0, 1, 1], [], []>} : vector<32x32xbf16>, vector<32x16xbf16>, vector<32x16xf32> -> vector<32x16xf32>
    %44 = arith.addf %38, %43 : vector<32x16xf32>
    %c0_32 = arith.constant 0 : index
    %c0_33 = arith.constant 0 : index
    %45 = vector.load %arg5[%c0_32, %c0_33] : memref<1x16xf32, #tpu.memory_space<vmem>>, vector<1x16xf32>
    %46 = vector.broadcast %45 : vector<1x16xf32> to vector<32x16xf32>
    %47 = arith.addf %44, %46 : vector<32x16xf32>
    %48 = vector.shape_cast %47 : vector<32x16xf32> to vector<4x8x16xf32>
    %49 = arith.truncf %48 : vector<4x8x16xf32> to vector<4x8x16xbf16>
    %c0_34 = arith.constant 0 : index
    %c0_35 = arith.constant 0 : index
    %c0_36 = arith.constant 0 : index
    %c0_37 = arith.constant 0 : index
    %50 = vector.load %arg6[%c0_34, %c0_35, %c0_36, %c0_37] : memref<1x4x8x16xbf16, #tpu.memory_space<vmem>>, vector<1x4x8x16xbf16>
    %51 = vector.shape_cast %50 : vector<1x4x8x16xbf16> to vector<4x8x16xbf16>
    %52 = vector.shape_cast %49 : vector<4x8x16xbf16> to vector<1x4x8x16xbf16>
    tpu.vector_store %arg6[%c0_34, %c0_35, %c0_36, %c0_37], %52 {strides = array<i32>} : memref<1x4x8x16xbf16, #tpu.memory_space<vmem>>, vector<1x4x8x16xbf16>,
    return
  }
  func.func @transform_0(%arg0: i32, %arg1: i32) -> (i32, i32, i32, i32) {
    %c0_i32 = arith.constant 0 : i32
    %c0_i32_0 = arith.constant 0 : i32
    %c0_i32_1 = arith.constant 0 : i32
    return %arg0, %arg1, %c0_i32, %c0_i32_0 : i32, i32, i32, i32
  }
  func.func @transform_1(%arg0: i32, %arg1: i32) -> (i32, i32, i32, i32) {
    %c1_i32 = arith.constant 1 : i32
    %0 = arith.addi %arg1, %c1_i32 : i32
    %c4_i32 = arith.constant 4 : i32
    %1 = arith.muli %0, %c4_i32 : i32
    %c0_i32 = arith.constant 0 : i32
    %c0_i32_0 = arith.constant 0 : i32
    %c0_i32_1 = arith.constant 0 : i32
    return %arg0, %1, %c0_i32, %c0_i32_0 : i32, i32, i32, i32
  }
  func.func @transform_2(%arg0: i32, %arg1: i32) -> (i32, i32, i32) {
    %c0_i32 = arith.constant 0 : i32
    %c0_i32_0 = arith.constant 0 : i32
    %c0_i32_1 = arith.constant 0 : i32
    %c0_i32_2 = arith.constant 0 : i32
    return %c0_i32, %c0_i32_0, %c0_i32_1 : i32, i32, i32
  }
  func.func @transform_3(%arg0: i32, %arg1: i32) -> (i32, i32) {
    %c0_i32 = arith.constant 0 : i32
    %c0_i32_0 = arith.constant 0 : i32
    %c0_i32_1 = arith.constant 0 : i32
    return %c0_i32, %c0_i32_0 : i32, i32
  }
  func.func @transform_4(%arg0: i32, %arg1: i32) -> (i32, i32, i32, i32) {
    %c0_i32 = arith.constant 0 : i32
    %c0_i32_0 = arith.constant 0 : i32
    %c0_i32_1 = arith.constant 0 : i32
    return %arg0, %arg1, %c0_i32, %c0_i32_0 : i32, i32, i32, i32
  }
}

module attributes {stable_mosaic.version = 11 : i64} {
  func.func @_in_stats_kernel(%arg0: i32, %arg1: i32, %arg2: memref<1x64x16xbf16, #tpu.memory_space<vmem>>, %arg3: memref<1x2x16xf32, #tpu.memory_space<vmem>>) attributes {dimension_semantics = [#tpu.dimension_semantics<parallel>, #tpu.dimension_semantics<arbitrary>], iteration_bounds = array<i64: 2, 1>, scalar_prefetch = 0 : i64, scratch_operands = 0 : i64, tpu.core_type = #tpu.core_type<tc>, window_params = [{transform_indices = @transform_0, window_bounds = array<i64: 1, 64, 16>}, {transform_indices = @transform_1, window_bounds = array<i64: 1, 2, 16>}]} {
    %c0_i32 = arith.constant 0 : i32
    %0 = arith.cmpi eq, %arg1, %c0_i32 : i32
    %1 = arith.extui %0 : i1 to i32
    %c0_i32_0 = arith.constant 0 : i32
    %2 = arith.cmpi ne, %1, %c0_i32_0 : i32
    scf.if %2 {
      %cst_12 = arith.constant 0.000000e+00 : f32
      %21 = vector.broadcast %cst_12 : f32 to vector<2x16xf32>
      %c0_13 = arith.constant 0 : index
      %c0_14 = arith.constant 0 : index
      %c0_15 = arith.constant 0 : index
      %22 = vector.load %arg3[%c0_13, %c0_14, %c0_15] : memref<1x2x16xf32, #tpu.memory_space<vmem>>, vector<1x2x16xf32>
      %23 = vector.shape_cast %22 : vector<1x2x16xf32> to vector<2x16xf32>
      %24 = vector.shape_cast %21 : vector<2x16xf32> to vector<1x2x16xf32>
      tpu.vector_store %arg3[%c0_13, %c0_14, %c0_15], %24 {strides = array<i32>} : memref<1x2x16xf32, #tpu.memory_space<vmem>>, vector<1x2x16xf32>,
    } else {
    }
    %c0 = arith.constant 0 : index
    %c0_1 = arith.constant 0 : index
    %c0_2 = arith.constant 0 : index
    %3 = vector.load %arg2[%c0, %c0_1, %c0_2] : memref<1x64x16xbf16, #tpu.memory_space<vmem>>, vector<1x64x16xbf16>
    %4 = vector.shape_cast %3 : vector<1x64x16xbf16> to vector<64x16xbf16>
    %5 = arith.extf %4 : vector<64x16xbf16> to vector<64x16xf32>
    %cst = arith.constant dense<0.000000e+00> : vector<16xf32>
    %6 = vector.multi_reduction <add>, %5, %cst [0] : vector<64x16xf32> to vector<16xf32>
    %7 = vector.shape_cast %6 : vector<16xf32> to vector<1x16xf32>
    %8 = arith.mulf %5, %5 : vector<64x16xf32>
    %cst_3 = arith.constant dense<0.000000e+00> : vector<16xf32>
    %9 = vector.multi_reduction <add>, %8, %cst_3 [0] : vector<64x16xf32> to vector<16xf32>
    %10 = vector.shape_cast %9 : vector<16xf32> to vector<1x16xf32>
    %c0_4 = arith.constant 0 : index
    %c0_5 = arith.constant 0 : index
    %c0_6 = arith.constant 0 : index
    %11 = vector.load %arg3[%c0_4, %c0_5, %c0_6] : memref<1x2x16xf32, #tpu.memory_space<vmem>>, vector<1x2x16xf32>
    %12 = vector.shape_cast %11 : vector<1x2x16xf32> to vector<2x16xf32>
    %13 = tpu.concatenate %7, %10 in 0 : vector<1x16xf32>, vector<1x16xf32> -> vector<2x16xf32>
    %14 = arith.addf %12, %13 : vector<2x16xf32>
    %c0_7 = arith.constant 0 : index
    %c0_8 = arith.constant 0 : index
    %c0_9 = arith.constant 0 : index
    %15 = vector.load %arg3[%c0_7, %c0_8, %c0_9] : memref<1x2x16xf32, #tpu.memory_space<vmem>>, vector<1x2x16xf32>
    %16 = vector.shape_cast %15 : vector<1x2x16xf32> to vector<2x16xf32>
    %17 = vector.shape_cast %14 : vector<2x16xf32> to vector<1x2x16xf32>
    tpu.vector_store %arg3[%c0_7, %c0_8, %c0_9], %17 {strides = array<i32>} : memref<1x2x16xf32, #tpu.memory_space<vmem>>, vector<1x2x16xf32>,
    %c0_i32_10 = arith.constant 0 : i32
    %18 = arith.cmpi eq, %arg1, %c0_i32_10 : i32
    %19 = arith.extui %18 : i1 to i32
    %c0_i32_11 = arith.constant 0 : i32
    %20 = arith.cmpi ne, %19, %c0_i32_11 : i32
    scf.if %20 {
      %c0_12 = arith.constant 0 : index
      %c0_13 = arith.constant 0 : index
      %c0_14 = arith.constant 0 : index
      %21 = vector.load %arg3[%c0_12, %c0_13, %c0_14] : memref<1x2x16xf32, #tpu.memory_space<vmem>>, vector<1x2x16xf32>
      %22 = vector.shape_cast %21 : vector<1x2x16xf32> to vector<2x16xf32>
      %23 = vector.extract_strided_slice %22 {offsets = [0, 0], sizes = [1, 16], strides = [1, 1]} : vector<2x16xf32> to vector<1x16xf32>
      %cst_15 = arith.constant 1.562500e-02 : f32
      %24 = vector.broadcast %cst_15 : f32 to vector<1x16xf32>
      %25 = arith.mulf %23, %24 : vector<1x16xf32>
      %26 = vector.extract_strided_slice %22 {offsets = [1, 0], sizes = [1, 16], strides = [1, 1]} : vector<2x16xf32> to vector<1x16xf32>
      %cst_16 = arith.constant 1.562500e-02 : f32
      %27 = vector.broadcast %cst_16 : f32 to vector<1x16xf32>
      %28 = arith.mulf %26, %27 : vector<1x16xf32>
      %29 = arith.mulf %25, %25 : vector<1x16xf32>
      %30 = arith.subf %28, %29 : vector<1x16xf32>
      %cst_17 = arith.constant 0.000000e+00 : f32
      %31 = vector.broadcast %cst_17 : f32 to vector<1x16xf32>
      %32 = arith.maximumf %30, %31 : vector<1x16xf32>
      %cst_18 = arith.constant 9.99999974E-6 : f32
      %33 = vector.broadcast %cst_18 : f32 to vector<1x16xf32>
      %34 = arith.addf %32, %33 : vector<1x16xf32>
      %35 = math.rsqrt %34 : vector<1x16xf32>
      %36 = tpu.concatenate %25, %35 in 0 : vector<1x16xf32>, vector<1x16xf32> -> vector<2x16xf32>
      %c0_19 = arith.constant 0 : index
      %c0_20 = arith.constant 0 : index
      %c0_21 = arith.constant 0 : index
      %37 = vector.load %arg3[%c0_19, %c0_20, %c0_21] : memref<1x2x16xf32, #tpu.memory_space<vmem>>, vector<1x2x16xf32>
      %38 = vector.shape_cast %37 : vector<1x2x16xf32> to vector<2x16xf32>
      %39 = vector.shape_cast %36 : vector<2x16xf32> to vector<1x2x16xf32>
      tpu.vector_store %arg3[%c0_19, %c0_20, %c0_21], %39 {strides = array<i32>} : memref<1x2x16xf32, #tpu.memory_space<vmem>>, vector<1x2x16xf32>,
    } else {
    }
    return
  }
  func.func @transform_0(%arg0: i32, %arg1: i32) -> (i32, i32, i32) {
    %c0_i32 = arith.constant 0 : i32
    %c0_i32_0 = arith.constant 0 : i32
    return %arg0, %arg1, %c0_i32 : i32, i32, i32
  }
  func.func @transform_1(%arg0: i32, %arg1: i32) -> (i32, i32, i32) {
    %c0_i32 = arith.constant 0 : i32
    %c0_i32_0 = arith.constant 0 : i32
    %c0_i32_1 = arith.constant 0 : i32
    return %arg0, %c0_i32, %c0_i32_0 : i32, i32, i32
  }
}

module attributes {stable_mosaic.version = 11 : i64} {
  func.func @_matmul_kernel(%arg0: i32, %arg1: i32, %arg2: memref<1x32x256xbf16, #tpu.memory_space<vmem>>, %arg3: memref<1x256x32xbf16, #tpu.memory_space<vmem>>, %arg4: memref<1x32xf32, #tpu.memory_space<vmem>>, %arg5: memref<1x32x32xbf16, #tpu.memory_space<vmem>>) attributes {dimension_semantics = [#tpu.dimension_semantics<parallel>, #tpu.dimension_semantics<parallel>], iteration_bounds = array<i64: 1, 1>, scalar_prefetch = 0 : i64, scratch_operands = 0 : i64, tpu.core_type = #tpu.core_type<tc>, window_params = [{transform_indices = @transform_0, window_bounds = array<i64: 1, 32, 256>}, {transform_indices = @transform_1, window_bounds = array<i64: 1, 256, 32>}, {pipeline_mode = #tpu.pipeline_mode<synchronous>, transform_indices = @transform_2, window_bounds = array<i64: 1, 32>}, {transform_indices = @transform_3, window_bounds = array<i64: 1, 32, 32>}]} {
    %c0 = arith.constant 0 : index
    %c0_0 = arith.constant 0 : index
    %c0_1 = arith.constant 0 : index
    %0 = vector.load %arg2[%c0, %c0_0, %c0_1] : memref<1x32x256xbf16, #tpu.memory_space<vmem>>, vector<1x32x256xbf16>
    %1 = vector.shape_cast %0 : vector<1x32x256xbf16> to vector<32x256xbf16>
    %cst = arith.constant 0.000000e+00 : bf16
    %2 = vector.broadcast %cst : bf16 to vector<32x256xbf16>
    %3 = arith.cmpf ogt, %1, %2 : vector<32x256xbf16>
    %cst_2 = arith.constant 2.001950e-01 : bf16
    %4 = vector.broadcast %cst_2 : bf16 to vector<32x256xbf16>
    %5 = arith.mulf %4, %1 : vector<32x256xbf16>
    %6 = arith.select %3, %1, %5 : vector<32x256xi1>, vector<32x256xbf16>
    %c0_3 = arith.constant 0 : index
    %c0_4 = arith.constant 0 : index
    %c0_5 = arith.constant 0 : index
    %7 = vector.load %arg3[%c0_3, %c0_4, %c0_5] : memref<1x256x32xbf16, #tpu.memory_space<vmem>>, vector<1x256x32xbf16>
    %8 = vector.shape_cast %7 : vector<1x256x32xbf16> to vector<256x32xbf16>
    %cst_6 = arith.constant dense<0.000000e+00> : vector<32x32xf32>
    %9 = tpu.matmul %6, %8, %cst_6 {dimension_numbers = #tpu.dot_dimension_numbers<[1], [0], [0], [1], [0, 0, 1, 1], [], []>} : vector<32x256xbf16>, vector<256x32xbf16>, vector<32x32xf32> -> vector<32x32xf32>
    %c0_7 = arith.constant 0 : index
    %c0_8 = arith.constant 0 : index
    %10 = vector.load %arg4[%c0_7, %c0_8] : memref<1x32xf32, #tpu.memory_space<vmem>>, vector<1x32xf32>
    %11 = vector.broadcast %10 : vector<1x32xf32> to vector<32x32xf32>
    %12 = arith.addf %9, %11 : vector<32x32xf32>
    %13 = arith.truncf %12 : vector<32x32xf32> to vector<32x32xbf16>
    %c0_9 = arith.constant 0 : index
    %c0_10 = arith.constant 0 : index
    %c0_11 = arith.constant 0 : index
    %14 = vector.load %arg5[%c0_9, %c0_10, %c0_11] : memref<1x32x32xbf16, #tpu.memory_space<vmem>>, vector<1x32x32xbf16>
    %15 = vector.shape_cast %14 : vector<1x32x32xbf16> to vector<32x32xbf16>
    %16 = vector.shape_cast %13 : vector<32x32xbf16> to vector<1x32x32xbf16>
    tpu.vector_store %arg5[%c0_9, %c0_10, %c0_11], %16 {strides = array<i32>} : memref<1x32x32xbf16, #tpu.memory_space<vmem>>, vector<1x32x32xbf16>,
    return
  }
  func.func @transform_0(%arg0: i32, %arg1: i32) -> (i32, i32, i32) {
    %c0_i32 = arith.constant 0 : i32
    %c0_i32_0 = arith.constant 0 : i32
    return %arg0, %arg1, %c0_i32 : i32, i32, i32
  }
  func.func @transform_1(%arg0: i32, %arg1: i32) -> (i32, i32, i32) {
    %c0_i32 = arith.constant 0 : i32
    %c0_i32_0 = arith.constant 0 : i32
    %c0_i32_1 = arith.constant 0 : i32
    return %arg0, %c0_i32, %c0_i32_0 : i32, i32, i32
  }
  func.func @transform_2(%arg0: i32, %arg1: i32) -> (i32, i32) {
    %c0_i32 = arith.constant 0 : i32
    %c0_i32_0 = arith.constant 0 : i32
    %c0_i32_1 = arith.constant 0 : i32
    return %c0_i32, %c0_i32_0 : i32, i32
  }
  func.func @transform_3(%arg0: i32, %arg1: i32) -> (i32, i32, i32) {
    %c0_i32 = arith.constant 0 : i32
    %c0_i32_0 = arith.constant 0 : i32
    return %arg0, %arg1, %c0_i32 : i32, i32, i32
  }
}

module attributes {stable_mosaic.version = 11 : i64} {
  func.func @_in_stats_kernel(%arg0: i32, %arg1: i32, %arg2: memref<1x16x32xbf16, #tpu.memory_space<vmem>>, %arg3: memref<1x2x32xf32, #tpu.memory_space<vmem>>) attributes {dimension_semantics = [#tpu.dimension_semantics<parallel>, #tpu.dimension_semantics<arbitrary>], iteration_bounds = array<i64: 2, 1>, scalar_prefetch = 0 : i64, scratch_operands = 0 : i64, tpu.core_type = #tpu.core_type<tc>, window_params = [{transform_indices = @transform_0, window_bounds = array<i64: 1, 16, 32>}, {transform_indices = @transform_1, window_bounds = array<i64: 1, 2, 32>}]} {
    %c0_i32 = arith.constant 0 : i32
    %0 = arith.cmpi eq, %arg1, %c0_i32 : i32
    %1 = arith.extui %0 : i1 to i32
    %c0_i32_0 = arith.constant 0 : i32
    %2 = arith.cmpi ne, %1, %c0_i32_0 : i32
    scf.if %2 {
      %cst_12 = arith.constant 0.000000e+00 : f32
      %21 = vector.broadcast %cst_12 : f32 to vector<2x32xf32>
      %c0_13 = arith.constant 0 : index
      %c0_14 = arith.constant 0 : index
      %c0_15 = arith.constant 0 : index
      %22 = vector.load %arg3[%c0_13, %c0_14, %c0_15] : memref<1x2x32xf32, #tpu.memory_space<vmem>>, vector<1x2x32xf32>
      %23 = vector.shape_cast %22 : vector<1x2x32xf32> to vector<2x32xf32>
      %24 = vector.shape_cast %21 : vector<2x32xf32> to vector<1x2x32xf32>
      tpu.vector_store %arg3[%c0_13, %c0_14, %c0_15], %24 {strides = array<i32>} : memref<1x2x32xf32, #tpu.memory_space<vmem>>, vector<1x2x32xf32>,
    } else {
    }
    %c0 = arith.constant 0 : index
    %c0_1 = arith.constant 0 : index
    %c0_2 = arith.constant 0 : index
    %3 = vector.load %arg2[%c0, %c0_1, %c0_2] : memref<1x16x32xbf16, #tpu.memory_space<vmem>>, vector<1x16x32xbf16>
    %4 = vector.shape_cast %3 : vector<1x16x32xbf16> to vector<16x32xbf16>
    %5 = arith.extf %4 : vector<16x32xbf16> to vector<16x32xf32>
    %cst = arith.constant dense<0.000000e+00> : vector<32xf32>
    %6 = vector.multi_reduction <add>, %5, %cst [0] : vector<16x32xf32> to vector<32xf32>
    %7 = vector.shape_cast %6 : vector<32xf32> to vector<1x32xf32>
    %8 = arith.mulf %5, %5 : vector<16x32xf32>
    %cst_3 = arith.constant dense<0.000000e+00> : vector<32xf32>
    %9 = vector.multi_reduction <add>, %8, %cst_3 [0] : vector<16x32xf32> to vector<32xf32>
    %10 = vector.shape_cast %9 : vector<32xf32> to vector<1x32xf32>
    %c0_4 = arith.constant 0 : index
    %c0_5 = arith.constant 0 : index
    %c0_6 = arith.constant 0 : index
    %11 = vector.load %arg3[%c0_4, %c0_5, %c0_6] : memref<1x2x32xf32, #tpu.memory_space<vmem>>, vector<1x2x32xf32>
    %12 = vector.shape_cast %11 : vector<1x2x32xf32> to vector<2x32xf32>
    %13 = tpu.concatenate %7, %10 in 0 : vector<1x32xf32>, vector<1x32xf32> -> vector<2x32xf32>
    %14 = arith.addf %12, %13 : vector<2x32xf32>
    %c0_7 = arith.constant 0 : index
    %c0_8 = arith.constant 0 : index
    %c0_9 = arith.constant 0 : index
    %15 = vector.load %arg3[%c0_7, %c0_8, %c0_9] : memref<1x2x32xf32, #tpu.memory_space<vmem>>, vector<1x2x32xf32>
    %16 = vector.shape_cast %15 : vector<1x2x32xf32> to vector<2x32xf32>
    %17 = vector.shape_cast %14 : vector<2x32xf32> to vector<1x2x32xf32>
    tpu.vector_store %arg3[%c0_7, %c0_8, %c0_9], %17 {strides = array<i32>} : memref<1x2x32xf32, #tpu.memory_space<vmem>>, vector<1x2x32xf32>,
    %c0_i32_10 = arith.constant 0 : i32
    %18 = arith.cmpi eq, %arg1, %c0_i32_10 : i32
    %19 = arith.extui %18 : i1 to i32
    %c0_i32_11 = arith.constant 0 : i32
    %20 = arith.cmpi ne, %19, %c0_i32_11 : i32
    scf.if %20 {
      %c0_12 = arith.constant 0 : index
      %c0_13 = arith.constant 0 : index
      %c0_14 = arith.constant 0 : index
      %21 = vector.load %arg3[%c0_12, %c0_13, %c0_14] : memref<1x2x32xf32, #tpu.memory_space<vmem>>, vector<1x2x32xf32>
      %22 = vector.shape_cast %21 : vector<1x2x32xf32> to vector<2x32xf32>
      %23 = vector.extract_strided_slice %22 {offsets = [0, 0], sizes = [1, 32], strides = [1, 1]} : vector<2x32xf32> to vector<1x32xf32>
      %cst_15 = arith.constant 6.250000e-02 : f32
      %24 = vector.broadcast %cst_15 : f32 to vector<1x32xf32>
      %25 = arith.mulf %23, %24 : vector<1x32xf32>
      %26 = vector.extract_strided_slice %22 {offsets = [1, 0], sizes = [1, 32], strides = [1, 1]} : vector<2x32xf32> to vector<1x32xf32>
      %cst_16 = arith.constant 6.250000e-02 : f32
      %27 = vector.broadcast %cst_16 : f32 to vector<1x32xf32>
      %28 = arith.mulf %26, %27 : vector<1x32xf32>
      %29 = arith.mulf %25, %25 : vector<1x32xf32>
      %30 = arith.subf %28, %29 : vector<1x32xf32>
      %cst_17 = arith.constant 0.000000e+00 : f32
      %31 = vector.broadcast %cst_17 : f32 to vector<1x32xf32>
      %32 = arith.maximumf %30, %31 : vector<1x32xf32>
      %cst_18 = arith.constant 9.99999974E-6 : f32
      %33 = vector.broadcast %cst_18 : f32 to vector<1x32xf32>
      %34 = arith.addf %32, %33 : vector<1x32xf32>
      %35 = math.rsqrt %34 : vector<1x32xf32>
      %36 = tpu.concatenate %25, %35 in 0 : vector<1x32xf32>, vector<1x32xf32> -> vector<2x32xf32>
      %c0_19 = arith.constant 0 : index
      %c0_20 = arith.constant 0 : index
      %c0_21 = arith.constant 0 : index
      %37 = vector.load %arg3[%c0_19, %c0_20, %c0_21] : memref<1x2x32xf32, #tpu.memory_space<vmem>>, vector<1x2x32xf32>
      %38 = vector.shape_cast %37 : vector<1x2x32xf32> to vector<2x32xf32>
      %39 = vector.shape_cast %36 : vector<2x32xf32> to vector<1x2x32xf32>
      tpu.vector_store %arg3[%c0_19, %c0_20, %c0_21], %39 {strides = array<i32>} : memref<1x2x32xf32, #tpu.memory_space<vmem>>, vector<1x2x32xf32>,
    } else {
    }
    return
  }
  func.func @transform_0(%arg0: i32, %arg1: i32) -> (i32, i32, i32) {
    %c0_i32 = arith.constant 0 : i32
    %c0_i32_0 = arith.constant 0 : i32
    return %arg0, %arg1, %c0_i32 : i32, i32, i32
  }
  func.func @transform_1(%arg0: i32, %arg1: i32) -> (i32, i32, i32) {
    %c0_i32 = arith.constant 0 : i32
    %c0_i32_0 = arith.constant 0 : i32
    %c0_i32_1 = arith.constant 0 : i32
    return %arg0, %c0_i32, %c0_i32_0 : i32, i32, i32
  }
}

module attributes {stable_mosaic.version = 11 : i64} {
  func.func @_matmul_kernel(%arg0: i32, %arg1: i32, %arg2: memref<1x8x512xbf16, #tpu.memory_space<vmem>>, %arg3: memref<1x512x64xbf16, #tpu.memory_space<vmem>>, %arg4: memref<1x64xf32, #tpu.memory_space<vmem>>, %arg5: memref<1x8x64xbf16, #tpu.memory_space<vmem>>) attributes {dimension_semantics = [#tpu.dimension_semantics<parallel>, #tpu.dimension_semantics<parallel>], iteration_bounds = array<i64: 1, 1>, scalar_prefetch = 0 : i64, scratch_operands = 0 : i64, tpu.core_type = #tpu.core_type<tc>, window_params = [{transform_indices = @transform_0, window_bounds = array<i64: 1, 8, 512>}, {transform_indices = @transform_1, window_bounds = array<i64: 1, 512, 64>}, {pipeline_mode = #tpu.pipeline_mode<synchronous>, transform_indices = @transform_2, window_bounds = array<i64: 1, 64>}, {transform_indices = @transform_3, window_bounds = array<i64: 1, 8, 64>}]} {
    %c0 = arith.constant 0 : index
    %c0_0 = arith.constant 0 : index
    %c0_1 = arith.constant 0 : index
    %0 = vector.load %arg2[%c0, %c0_0, %c0_1] : memref<1x8x512xbf16, #tpu.memory_space<vmem>>, vector<1x8x512xbf16>
    %1 = vector.shape_cast %0 : vector<1x8x512xbf16> to vector<8x512xbf16>
    %cst = arith.constant 0.000000e+00 : bf16
    %2 = vector.broadcast %cst : bf16 to vector<8x512xbf16>
    %3 = arith.cmpf ogt, %1, %2 : vector<8x512xbf16>
    %cst_2 = arith.constant 2.001950e-01 : bf16
    %4 = vector.broadcast %cst_2 : bf16 to vector<8x512xbf16>
    %5 = arith.mulf %4, %1 : vector<8x512xbf16>
    %6 = arith.select %3, %1, %5 : vector<8x512xi1>, vector<8x512xbf16>
    %c0_3 = arith.constant 0 : index
    %c0_4 = arith.constant 0 : index
    %c0_5 = arith.constant 0 : index
    %7 = vector.load %arg3[%c0_3, %c0_4, %c0_5] : memref<1x512x64xbf16, #tpu.memory_space<vmem>>, vector<1x512x64xbf16>
    %8 = vector.shape_cast %7 : vector<1x512x64xbf16> to vector<512x64xbf16>
    %cst_6 = arith.constant dense<0.000000e+00> : vector<8x64xf32>
    %9 = tpu.matmul %6, %8, %cst_6 {dimension_numbers = #tpu.dot_dimension_numbers<[1], [0], [0], [1], [0, 0, 1, 1], [], []>} : vector<8x512xbf16>, vector<512x64xbf16>, vector<8x64xf32> -> vector<8x64xf32>
    %c0_7 = arith.constant 0 : index
    %c0_8 = arith.constant 0 : index
    %10 = vector.load %arg4[%c0_7, %c0_8] : memref<1x64xf32, #tpu.memory_space<vmem>>, vector<1x64xf32>
    %11 = vector.broadcast %10 : vector<1x64xf32> to vector<8x64xf32>
    %12 = arith.addf %9, %11 : vector<8x64xf32>
    %13 = arith.truncf %12 : vector<8x64xf32> to vector<8x64xbf16>
    %c0_9 = arith.constant 0 : index
    %c0_10 = arith.constant 0 : index
    %c0_11 = arith.constant 0 : index
    %14 = vector.load %arg5[%c0_9, %c0_10, %c0_11] : memref<1x8x64xbf16, #tpu.memory_space<vmem>>, vector<1x8x64xbf16>
    %15 = vector.shape_cast %14 : vector<1x8x64xbf16> to vector<8x64xbf16>
    %16 = vector.shape_cast %13 : vector<8x64xbf16> to vector<1x8x64xbf16>
    tpu.vector_store %arg5[%c0_9, %c0_10, %c0_11], %16 {strides = array<i32>} : memref<1x8x64xbf16, #tpu.memory_space<vmem>>, vector<1x8x64xbf16>,
    return
  }
  func.func @transform_0(%arg0: i32, %arg1: i32) -> (i32, i32, i32) {
    %c0_i32 = arith.constant 0 : i32
    %c0_i32_0 = arith.constant 0 : i32
    return %arg0, %arg1, %c0_i32 : i32, i32, i32
  }
  func.func @transform_1(%arg0: i32, %arg1: i32) -> (i32, i32, i32) {
    %c0_i32 = arith.constant 0 : i32
    %c0_i32_0 = arith.constant 0 : i32
    %c0_i32_1 = arith.constant 0 : i32
    return %arg0, %c0_i32, %c0_i32_0 : i32, i32, i32
  }
  func.func @transform_2(%arg0: i32, %arg1: i32) -> (i32, i32) {
    %c0_i32 = arith.constant 0 : i32
    %c0_i32_0 = arith.constant 0 : i32
    %c0_i32_1 = arith.constant 0 : i32
    return %c0_i32, %c0_i32_0 : i32, i32
  }
  func.func @transform_3(%arg0: i32, %arg1: i32) -> (i32, i32, i32) {
    %c0_i32 = arith.constant 0 : i32
    %c0_i32_0 = arith.constant 0 : i32
    return %arg0, %arg1, %c0_i32 : i32, i32, i32
  }
}

module attributes {stable_mosaic.version = 11 : i64} {
  func.func @_in_stats_kernel(%arg0: i32, %arg1: i32, %arg2: memref<1x4x64xbf16, #tpu.memory_space<vmem>>, %arg3: memref<1x2x64xf32, #tpu.memory_space<vmem>>) attributes {dimension_semantics = [#tpu.dimension_semantics<parallel>, #tpu.dimension_semantics<arbitrary>], iteration_bounds = array<i64: 2, 1>, scalar_prefetch = 0 : i64, scratch_operands = 0 : i64, tpu.core_type = #tpu.core_type<tc>, window_params = [{transform_indices = @transform_0, window_bounds = array<i64: 1, 4, 64>}, {transform_indices = @transform_1, window_bounds = array<i64: 1, 2, 64>}]} {
    %c0_i32 = arith.constant 0 : i32
    %0 = arith.cmpi eq, %arg1, %c0_i32 : i32
    %1 = arith.extui %0 : i1 to i32
    %c0_i32_0 = arith.constant 0 : i32
    %2 = arith.cmpi ne, %1, %c0_i32_0 : i32
    scf.if %2 {
      %cst_12 = arith.constant 0.000000e+00 : f32
      %21 = vector.broadcast %cst_12 : f32 to vector<2x64xf32>
      %c0_13 = arith.constant 0 : index
      %c0_14 = arith.constant 0 : index
      %c0_15 = arith.constant 0 : index
      %22 = vector.load %arg3[%c0_13, %c0_14, %c0_15] : memref<1x2x64xf32, #tpu.memory_space<vmem>>, vector<1x2x64xf32>
      %23 = vector.shape_cast %22 : vector<1x2x64xf32> to vector<2x64xf32>
      %24 = vector.shape_cast %21 : vector<2x64xf32> to vector<1x2x64xf32>
      tpu.vector_store %arg3[%c0_13, %c0_14, %c0_15], %24 {strides = array<i32>} : memref<1x2x64xf32, #tpu.memory_space<vmem>>, vector<1x2x64xf32>,
    } else {
    }
    %c0 = arith.constant 0 : index
    %c0_1 = arith.constant 0 : index
    %c0_2 = arith.constant 0 : index
    %3 = vector.load %arg2[%c0, %c0_1, %c0_2] : memref<1x4x64xbf16, #tpu.memory_space<vmem>>, vector<1x4x64xbf16>
    %4 = vector.shape_cast %3 : vector<1x4x64xbf16> to vector<4x64xbf16>
    %5 = arith.extf %4 : vector<4x64xbf16> to vector<4x64xf32>
    %cst = arith.constant dense<0.000000e+00> : vector<64xf32>
    %6 = vector.multi_reduction <add>, %5, %cst [0] : vector<4x64xf32> to vector<64xf32>
    %7 = vector.shape_cast %6 : vector<64xf32> to vector<1x64xf32>
    %8 = arith.mulf %5, %5 : vector<4x64xf32>
    %cst_3 = arith.constant dense<0.000000e+00> : vector<64xf32>
    %9 = vector.multi_reduction <add>, %8, %cst_3 [0] : vector<4x64xf32> to vector<64xf32>
    %10 = vector.shape_cast %9 : vector<64xf32> to vector<1x64xf32>
    %c0_4 = arith.constant 0 : index
    %c0_5 = arith.constant 0 : index
    %c0_6 = arith.constant 0 : index
    %11 = vector.load %arg3[%c0_4, %c0_5, %c0_6] : memref<1x2x64xf32, #tpu.memory_space<vmem>>, vector<1x2x64xf32>
    %12 = vector.shape_cast %11 : vector<1x2x64xf32> to vector<2x64xf32>
    %13 = tpu.concatenate %7, %10 in 0 : vector<1x64xf32>, vector<1x64xf32> -> vector<2x64xf32>
    %14 = arith.addf %12, %13 : vector<2x64xf32>
    %c0_7 = arith.constant 0 : index
    %c0_8 = arith.constant 0 : index
    %c0_9 = arith.constant 0 : index
    %15 = vector.load %arg3[%c0_7, %c0_8, %c0_9] : memref<1x2x64xf32, #tpu.memory_space<vmem>>, vector<1x2x64xf32>
    %16 = vector.shape_cast %15 : vector<1x2x64xf32> to vector<2x64xf32>
    %17 = vector.shape_cast %14 : vector<2x64xf32> to vector<1x2x64xf32>
    tpu.vector_store %arg3[%c0_7, %c0_8, %c0_9], %17 {strides = array<i32>} : memref<1x2x64xf32, #tpu.memory_space<vmem>>, vector<1x2x64xf32>,
    %c0_i32_10 = arith.constant 0 : i32
    %18 = arith.cmpi eq, %arg1, %c0_i32_10 : i32
    %19 = arith.extui %18 : i1 to i32
    %c0_i32_11 = arith.constant 0 : i32
    %20 = arith.cmpi ne, %19, %c0_i32_11 : i32
    scf.if %20 {
      %c0_12 = arith.constant 0 : index
      %c0_13 = arith.constant 0 : index
      %c0_14 = arith.constant 0 : index
      %21 = vector.load %arg3[%c0_12, %c0_13, %c0_14] : memref<1x2x64xf32, #tpu.memory_space<vmem>>, vector<1x2x64xf32>
      %22 = vector.shape_cast %21 : vector<1x2x64xf32> to vector<2x64xf32>
      %23 = vector.extract_strided_slice %22 {offsets = [0, 0], sizes = [1, 64], strides = [1, 1]} : vector<2x64xf32> to vector<1x64xf32>
      %cst_15 = arith.constant 2.500000e-01 : f32
      %24 = vector.broadcast %cst_15 : f32 to vector<1x64xf32>
      %25 = arith.mulf %23, %24 : vector<1x64xf32>
      %26 = vector.extract_strided_slice %22 {offsets = [1, 0], sizes = [1, 64], strides = [1, 1]} : vector<2x64xf32> to vector<1x64xf32>
      %cst_16 = arith.constant 2.500000e-01 : f32
      %27 = vector.broadcast %cst_16 : f32 to vector<1x64xf32>
      %28 = arith.mulf %26, %27 : vector<1x64xf32>
      %29 = arith.mulf %25, %25 : vector<1x64xf32>
      %30 = arith.subf %28, %29 : vector<1x64xf32>
      %cst_17 = arith.constant 0.000000e+00 : f32
      %31 = vector.broadcast %cst_17 : f32 to vector<1x64xf32>
      %32 = arith.maximumf %30, %31 : vector<1x64xf32>
      %cst_18 = arith.constant 9.99999974E-6 : f32
      %33 = vector.broadcast %cst_18 : f32 to vector<1x64xf32>
      %34 = arith.addf %32, %33 : vector<1x64xf32>
      %35 = math.rsqrt %34 : vector<1x64xf32>
      %36 = tpu.concatenate %25, %35 in 0 : vector<1x64xf32>, vector<1x64xf32> -> vector<2x64xf32>
      %c0_19 = arith.constant 0 : index
      %c0_20 = arith.constant 0 : index
      %c0_21 = arith.constant 0 : index
      %37 = vector.load %arg3[%c0_19, %c0_20, %c0_21] : memref<1x2x64xf32, #tpu.memory_space<vmem>>, vector<1x2x64xf32>
      %38 = vector.shape_cast %37 : vector<1x2x64xf32> to vector<2x64xf32>
      %39 = vector.shape_cast %36 : vector<2x64xf32> to vector<1x2x64xf32>
      tpu.vector_store %arg3[%c0_19, %c0_20, %c0_21], %39 {strides = array<i32>} : memref<1x2x64xf32, #tpu.memory_space<vmem>>, vector<1x2x64xf32>,
    } else {
    }
    return
  }
  func.func @transform_0(%arg0: i32, %arg1: i32) -> (i32, i32, i32) {
    %c0_i32 = arith.constant 0 : i32
    %c0_i32_0 = arith.constant 0 : i32
    return %arg0, %arg1, %c0_i32 : i32, i32, i32
  }
  func.func @transform_1(%arg0: i32, %arg1: i32) -> (i32, i32, i32) {
    %c0_i32 = arith.constant 0 : i32
    %c0_i32_0 = arith.constant 0 : i32
    %c0_i32_1 = arith.constant 0 : i32
    return %arg0, %c0_i32, %c0_i32_0 : i32, i32, i32
  }
}

module attributes {stable_mosaic.version = 11 : i64} {
  func.func @_matmul_kernel(%arg0: i32, %arg1: i32, %arg2: memref<1x8x1024xbf16, #tpu.memory_space<vmem>>, %arg3: memref<1x1024x64xbf16, #tpu.memory_space<vmem>>, %arg4: memref<1x64xf32, #tpu.memory_space<vmem>>, %arg5: memref<1x8x64xbf16, #tpu.memory_space<vmem>>) attributes {dimension_semantics = [#tpu.dimension_semantics<parallel>, #tpu.dimension_semantics<parallel>], iteration_bounds = array<i64: 1, 1>, scalar_prefetch = 0 : i64, scratch_operands = 0 : i64, tpu.core_type = #tpu.core_type<tc>, window_params = [{transform_indices = @transform_0, window_bounds = array<i64: 1, 8, 1024>}, {transform_indices = @transform_1, window_bounds = array<i64: 1, 1024, 64>}, {pipeline_mode = #tpu.pipeline_mode<synchronous>, transform_indices = @transform_2, window_bounds = array<i64: 1, 64>}, {transform_indices = @transform_3, window_bounds = array<i64: 1, 8, 64>}]} {
    %c0 = arith.constant 0 : index
    %c0_0 = arith.constant 0 : index
    %c0_1 = arith.constant 0 : index
    %0 = vector.load %arg2[%c0, %c0_0, %c0_1] : memref<1x8x1024xbf16, #tpu.memory_space<vmem>>, vector<1x8x1024xbf16>
    %1 = vector.shape_cast %0 : vector<1x8x1024xbf16> to vector<8x1024xbf16>
    %cst = arith.constant 0.000000e+00 : bf16
    %2 = vector.broadcast %cst : bf16 to vector<8x1024xbf16>
    %3 = arith.cmpf ogt, %1, %2 : vector<8x1024xbf16>
    %cst_2 = arith.constant 2.001950e-01 : bf16
    %4 = vector.broadcast %cst_2 : bf16 to vector<8x1024xbf16>
    %5 = arith.mulf %4, %1 : vector<8x1024xbf16>
    %6 = arith.select %3, %1, %5 : vector<8x1024xi1>, vector<8x1024xbf16>
    %c0_3 = arith.constant 0 : index
    %c0_4 = arith.constant 0 : index
    %c0_5 = arith.constant 0 : index
    %7 = vector.load %arg3[%c0_3, %c0_4, %c0_5] : memref<1x1024x64xbf16, #tpu.memory_space<vmem>>, vector<1x1024x64xbf16>
    %8 = vector.shape_cast %7 : vector<1x1024x64xbf16> to vector<1024x64xbf16>
    %cst_6 = arith.constant dense<0.000000e+00> : vector<8x64xf32>
    %9 = tpu.matmul %6, %8, %cst_6 {dimension_numbers = #tpu.dot_dimension_numbers<[1], [0], [0], [1], [0, 0, 1, 1], [], []>} : vector<8x1024xbf16>, vector<1024x64xbf16>, vector<8x64xf32> -> vector<8x64xf32>
    %c0_7 = arith.constant 0 : index
    %c0_8 = arith.constant 0 : index
    %10 = vector.load %arg4[%c0_7, %c0_8] : memref<1x64xf32, #tpu.memory_space<vmem>>, vector<1x64xf32>
    %11 = vector.broadcast %10 : vector<1x64xf32> to vector<8x64xf32>
    %12 = arith.addf %9, %11 : vector<8x64xf32>
    %13 = arith.truncf %12 : vector<8x64xf32> to vector<8x64xbf16>
    %c0_9 = arith.constant 0 : index
    %c0_10 = arith.constant 0 : index
    %c0_11 = arith.constant 0 : index
    %14 = vector.load %arg5[%c0_9, %c0_10, %c0_11] : memref<1x8x64xbf16, #tpu.memory_space<vmem>>, vector<1x8x64xbf16>
    %15 = vector.shape_cast %14 : vector<1x8x64xbf16> to vector<8x64xbf16>
    %16 = vector.shape_cast %13 : vector<8x64xbf16> to vector<1x8x64xbf16>
    tpu.vector_store %arg5[%c0_9, %c0_10, %c0_11], %16 {strides = array<i32>} : memref<1x8x64xbf16, #tpu.memory_space<vmem>>, vector<1x8x64xbf16>,
    return
  }
  func.func @transform_0(%arg0: i32, %arg1: i32) -> (i32, i32, i32) {
    %c0_i32 = arith.constant 0 : i32
    %c0_i32_0 = arith.constant 0 : i32
    return %arg0, %arg1, %c0_i32 : i32, i32, i32
  }
  func.func @transform_1(%arg0: i32, %arg1: i32) -> (i32, i32, i32) {
    %c0_i32 = arith.constant 0 : i32
    %c0_i32_0 = arith.constant 0 : i32
    %c0_i32_1 = arith.constant 0 : i32
    return %arg0, %c0_i32, %c0_i32_0 : i32, i32, i32
  }
  func.func @transform_2(%arg0: i32, %arg1: i32) -> (i32, i32) {
    %c0_i32 = arith.constant 0 : i32
    %c0_i32_0 = arith.constant 0 : i32
    %c0_i32_1 = arith.constant 0 : i32
    return %c0_i32, %c0_i32_0 : i32, i32
  }
  func.func @transform_3(%arg0: i32, %arg1: i32) -> (i32, i32, i32) {
    %c0_i32 = arith.constant 0 : i32
    %c0_i32_0 = arith.constant 0 : i32
    return %arg0, %arg1, %c0_i32 : i32, i32, i32
  }
}

module attributes {stable_mosaic.version = 11 : i64} {
  func.func @_matmul_kernel(%arg0: i32, %arg1: i32, %arg2: memref<1x8x256xbf16, #tpu.memory_space<vmem>>, %arg3: memref<1x256x64xbf16, #tpu.memory_space<vmem>>, %arg4: memref<1x64xf32, #tpu.memory_space<vmem>>, %arg5: memref<1x8x64xbf16, #tpu.memory_space<vmem>>) attributes {dimension_semantics = [#tpu.dimension_semantics<parallel>, #tpu.dimension_semantics<parallel>], iteration_bounds = array<i64: 4, 1>, scalar_prefetch = 0 : i64, scratch_operands = 0 : i64, tpu.core_type = #tpu.core_type<tc>, window_params = [{transform_indices = @transform_0, window_bounds = array<i64: 1, 8, 256>}, {transform_indices = @transform_1, window_bounds = array<i64: 1, 256, 64>}, {pipeline_mode = #tpu.pipeline_mode<synchronous>, transform_indices = @transform_2, window_bounds = array<i64: 1, 64>}, {transform_indices = @transform_3, window_bounds = array<i64: 1, 8, 64>}]} {
    %c0 = arith.constant 0 : index
    %c0_0 = arith.constant 0 : index
    %c0_1 = arith.constant 0 : index
    %0 = vector.load %arg2[%c0, %c0_0, %c0_1] : memref<1x8x256xbf16, #tpu.memory_space<vmem>>, vector<1x8x256xbf16>
    %1 = vector.shape_cast %0 : vector<1x8x256xbf16> to vector<8x256xbf16>
    %cst = arith.constant 0.000000e+00 : bf16
    %2 = vector.broadcast %cst : bf16 to vector<8x256xbf16>
    %3 = arith.maximumf %1, %2 : vector<8x256xbf16>
    %c0_2 = arith.constant 0 : index
    %c0_3 = arith.constant 0 : index
    %c0_4 = arith.constant 0 : index
    %4 = vector.load %arg3[%c0_2, %c0_3, %c0_4] : memref<1x256x64xbf16, #tpu.memory_space<vmem>>, vector<1x256x64xbf16>
    %5 = vector.shape_cast %4 : vector<1x256x64xbf16> to vector<256x64xbf16>
    %cst_5 = arith.constant dense<0.000000e+00> : vector<8x64xf32>
    %6 = tpu.matmul %3, %5, %cst_5 {dimension_numbers = #tpu.dot_dimension_numbers<[1], [0], [0], [1], [0, 0, 1, 1], [], []>} : vector<8x256xbf16>, vector<256x64xbf16>, vector<8x64xf32> -> vector<8x64xf32>
    %c0_6 = arith.constant 0 : index
    %c0_7 = arith.constant 0 : index
    %7 = vector.load %arg4[%c0_6, %c0_7] : memref<1x64xf32, #tpu.memory_space<vmem>>, vector<1x64xf32>
    %8 = vector.broadcast %7 : vector<1x64xf32> to vector<8x64xf32>
    %9 = arith.addf %6, %8 : vector<8x64xf32>
    %10 = arith.truncf %9 : vector<8x64xf32> to vector<8x64xbf16>
    %c0_8 = arith.constant 0 : index
    %c0_9 = arith.constant 0 : index
    %c0_10 = arith.constant 0 : index
    %11 = vector.load %arg5[%c0_8, %c0_9, %c0_10] : memref<1x8x64xbf16, #tpu.memory_space<vmem>>, vector<1x8x64xbf16>
    %12 = vector.shape_cast %11 : vector<1x8x64xbf16> to vector<8x64xbf16>
    %13 = vector.shape_cast %10 : vector<8x64xbf16> to vector<1x8x64xbf16>
    tpu.vector_store %arg5[%c0_8, %c0_9, %c0_10], %13 {strides = array<i32>} : memref<1x8x64xbf16, #tpu.memory_space<vmem>>, vector<1x8x64xbf16>,
    return
  }
  func.func @transform_0(%arg0: i32, %arg1: i32) -> (i32, i32, i32) {
    %c0_i32 = arith.constant 0 : i32
    %c0_i32_0 = arith.constant 0 : i32
    return %arg0, %arg1, %c0_i32 : i32, i32, i32
  }
  func.func @transform_1(%arg0: i32, %arg1: i32) -> (i32, i32, i32) {
    %c0_i32 = arith.constant 0 : i32
    %c0_i32_0 = arith.constant 0 : i32
    %c0_i32_1 = arith.constant 0 : i32
    return %arg0, %c0_i32, %c0_i32_0 : i32, i32, i32
  }
  func.func @transform_2(%arg0: i32, %arg1: i32) -> (i32, i32) {
    %c0_i32 = arith.constant 0 : i32
    %c0_i32_0 = arith.constant 0 : i32
    %c0_i32_1 = arith.constant 0 : i32
    return %c0_i32, %c0_i32_0 : i32, i32
  }
  func.func @transform_3(%arg0: i32, %arg1: i32) -> (i32, i32, i32) {
    %c0_i32 = arith.constant 0 : i32
    %c0_i32_0 = arith.constant 0 : i32
    return %arg0, %arg1, %c0_i32 : i32, i32, i32
  }
}

module attributes {stable_mosaic.version = 11 : i64} {
  func.func @_matmul_kernel(%arg0: i32, %arg1: i32, %arg2: memref<1x8x512xbf16, #tpu.memory_space<vmem>>, %arg3: memref<1x512x32xbf16, #tpu.memory_space<vmem>>, %arg4: memref<1x32xf32, #tpu.memory_space<vmem>>, %arg5: memref<1x8x32xbf16, #tpu.memory_space<vmem>>) attributes {dimension_semantics = [#tpu.dimension_semantics<parallel>, #tpu.dimension_semantics<parallel>], iteration_bounds = array<i64: 4, 1>, scalar_prefetch = 0 : i64, scratch_operands = 0 : i64, tpu.core_type = #tpu.core_type<tc>, window_params = [{transform_indices = @transform_0, window_bounds = array<i64: 1, 8, 512>}, {transform_indices = @transform_1, window_bounds = array<i64: 1, 512, 32>}, {pipeline_mode = #tpu.pipeline_mode<synchronous>, transform_indices = @transform_2, window_bounds = array<i64: 1, 32>}, {transform_indices = @transform_3, window_bounds = array<i64: 1, 8, 32>}]} {
    %c0 = arith.constant 0 : index
    %c0_0 = arith.constant 0 : index
    %c0_1 = arith.constant 0 : index
    %0 = vector.load %arg2[%c0, %c0_0, %c0_1] : memref<1x8x512xbf16, #tpu.memory_space<vmem>>, vector<1x8x512xbf16>
    %1 = vector.shape_cast %0 : vector<1x8x512xbf16> to vector<8x512xbf16>
    %cst = arith.constant 0.000000e+00 : bf16
    %2 = vector.broadcast %cst : bf16 to vector<8x512xbf16>
    %3 = arith.maximumf %1, %2 : vector<8x512xbf16>
    %c0_2 = arith.constant 0 : index
    %c0_3 = arith.constant 0 : index
    %c0_4 = arith.constant 0 : index
    %4 = vector.load %arg3[%c0_2, %c0_3, %c0_4] : memref<1x512x32xbf16, #tpu.memory_space<vmem>>, vector<1x512x32xbf16>
    %5 = vector.shape_cast %4 : vector<1x512x32xbf16> to vector<512x32xbf16>
    %cst_5 = arith.constant dense<0.000000e+00> : vector<8x32xf32>
    %6 = tpu.matmul %3, %5, %cst_5 {dimension_numbers = #tpu.dot_dimension_numbers<[1], [0], [0], [1], [0, 0, 1, 1], [], []>} : vector<8x512xbf16>, vector<512x32xbf16>, vector<8x32xf32> -> vector<8x32xf32>
    %c0_6 = arith.constant 0 : index
    %c0_7 = arith.constant 0 : index
    %7 = vector.load %arg4[%c0_6, %c0_7] : memref<1x32xf32, #tpu.memory_space<vmem>>, vector<1x32xf32>
    %8 = vector.broadcast %7 : vector<1x32xf32> to vector<8x32xf32>
    %9 = arith.addf %6, %8 : vector<8x32xf32>
    %10 = arith.truncf %9 : vector<8x32xf32> to vector<8x32xbf16>
    %c0_8 = arith.constant 0 : index
    %c0_9 = arith.constant 0 : index
    %c0_10 = arith.constant 0 : index
    %11 = vector.load %arg5[%c0_8, %c0_9, %c0_10] : memref<1x8x32xbf16, #tpu.memory_space<vmem>>, vector<1x8x32xbf16>
    %12 = vector.shape_cast %11 : vector<1x8x32xbf16> to vector<8x32xbf16>
    %13 = vector.shape_cast %10 : vector<8x32xbf16> to vector<1x8x32xbf16>
    tpu.vector_store %arg5[%c0_8, %c0_9, %c0_10], %13 {strides = array<i32>} : memref<1x8x32xbf16, #tpu.memory_space<vmem>>, vector<1x8x32xbf16>,
    return
  }
  func.func @transform_0(%arg0: i32, %arg1: i32) -> (i32, i32, i32) {
    %c0_i32 = arith.constant 0 : i32
    %c0_i32_0 = arith.constant 0 : i32
    return %arg0, %arg1, %c0_i32 : i32, i32, i32
  }
  func.func @transform_1(%arg0: i32, %arg1: i32) -> (i32, i32, i32) {
    %c0_i32 = arith.constant 0 : i32
    %c0_i32_0 = arith.constant 0 : i32
    %c0_i32_1 = arith.constant 0 : i32
    return %arg0, %c0_i32, %c0_i32_0 : i32, i32, i32
  }
  func.func @transform_2(%arg0: i32, %arg1: i32) -> (i32, i32) {
    %c0_i32 = arith.constant 0 : i32
    %c0_i32_0 = arith.constant 0 : i32
    %c0_i32_1 = arith.constant 0 : i32
    return %c0_i32, %c0_i32_0 : i32, i32
  }
  func.func @transform_3(%arg0: i32, %arg1: i32) -> (i32, i32, i32) {
    %c0_i32 = arith.constant 0 : i32
    %c0_i32_0 = arith.constant 0 : i32
    return %arg0, %arg1, %c0_i32 : i32, i32, i32
  }
}

module attributes {stable_mosaic.version = 11 : i64} {
  func.func @_matmul_kernel(%arg0: i32, %arg1: i32, %arg2: memref<1x32x256xbf16, #tpu.memory_space<vmem>>, %arg3: memref<1x256x16xbf16, #tpu.memory_space<vmem>>, %arg4: memref<1x16xf32, #tpu.memory_space<vmem>>, %arg5: memref<1x32x16xbf16, #tpu.memory_space<vmem>>) attributes {dimension_semantics = [#tpu.dimension_semantics<parallel>, #tpu.dimension_semantics<parallel>], iteration_bounds = array<i64: 4, 1>, scalar_prefetch = 0 : i64, scratch_operands = 0 : i64, tpu.core_type = #tpu.core_type<tc>, window_params = [{transform_indices = @transform_0, window_bounds = array<i64: 1, 32, 256>}, {transform_indices = @transform_1, window_bounds = array<i64: 1, 256, 16>}, {pipeline_mode = #tpu.pipeline_mode<synchronous>, transform_indices = @transform_2, window_bounds = array<i64: 1, 16>}, {transform_indices = @transform_3, window_bounds = array<i64: 1, 32, 16>}]} {
    %c0 = arith.constant 0 : index
    %c0_0 = arith.constant 0 : index
    %c0_1 = arith.constant 0 : index
    %0 = vector.load %arg2[%c0, %c0_0, %c0_1] : memref<1x32x256xbf16, #tpu.memory_space<vmem>>, vector<1x32x256xbf16>
    %1 = vector.shape_cast %0 : vector<1x32x256xbf16> to vector<32x256xbf16>
    %cst = arith.constant 0.000000e+00 : bf16
    %2 = vector.broadcast %cst : bf16 to vector<32x256xbf16>
    %3 = arith.maximumf %1, %2 : vector<32x256xbf16>
    %c0_2 = arith.constant 0 : index
    %c0_3 = arith.constant 0 : index
    %c0_4 = arith.constant 0 : index
    %4 = vector.load %arg3[%c0_2, %c0_3, %c0_4] : memref<1x256x16xbf16, #tpu.memory_space<vmem>>, vector<1x256x16xbf16>
    %5 = vector.shape_cast %4 : vector<1x256x16xbf16> to vector<256x16xbf16>
    %cst_5 = arith.constant dense<0.000000e+00> : vector<32x16xf32>
    %6 = tpu.matmul %3, %5, %cst_5 {dimension_numbers = #tpu.dot_dimension_numbers<[1], [0], [0], [1], [0, 0, 1, 1], [], []>} : vector<32x256xbf16>, vector<256x16xbf16>, vector<32x16xf32> -> vector<32x16xf32>
    %c0_6 = arith.constant 0 : index
    %c0_7 = arith.constant 0 : index
    %7 = vector.load %arg4[%c0_6, %c0_7] : memref<1x16xf32, #tpu.memory_space<vmem>>, vector<1x16xf32>
    %8 = vector.broadcast %7 : vector<1x16xf32> to vector<32x16xf32>
    %9 = arith.addf %6, %8 : vector<32x16xf32>
    %10 = arith.truncf %9 : vector<32x16xf32> to vector<32x16xbf16>
    %c0_8 = arith.constant 0 : index
    %c0_9 = arith.constant 0 : index
    %c0_10 = arith.constant 0 : index
    %11 = vector.load %arg5[%c0_8, %c0_9, %c0_10] : memref<1x32x16xbf16, #tpu.memory_space<vmem>>, vector<1x32x16xbf16>
    %12 = vector.shape_cast %11 : vector<1x32x16xbf16> to vector<32x16xbf16>
    %13 = vector.shape_cast %10 : vector<32x16xbf16> to vector<1x32x16xbf16>
    tpu.vector_store %arg5[%c0_8, %c0_9, %c0_10], %13 {strides = array<i32>} : memref<1x32x16xbf16, #tpu.memory_space<vmem>>, vector<1x32x16xbf16>,
    return
  }
  func.func @transform_0(%arg0: i32, %arg1: i32) -> (i32, i32, i32) {
    %c0_i32 = arith.constant 0 : i32
    %c0_i32_0 = arith.constant 0 : i32
    return %arg0, %arg1, %c0_i32 : i32, i32, i32
  }
  func.func @transform_1(%arg0: i32, %arg1: i32) -> (i32, i32, i32) {
    %c0_i32 = arith.constant 0 : i32
    %c0_i32_0 = arith.constant 0 : i32
    %c0_i32_1 = arith.constant 0 : i32
    return %arg0, %c0_i32, %c0_i32_0 : i32, i32, i32
  }
  func.func @transform_2(%arg0: i32, %arg1: i32) -> (i32, i32) {
    %c0_i32 = arith.constant 0 : i32
    %c0_i32_0 = arith.constant 0 : i32
    %c0_i32_1 = arith.constant 0 : i32
    return %c0_i32, %c0_i32_0 : i32, i32
  }
  func.func @transform_3(%arg0: i32, %arg1: i32) -> (i32, i32, i32) {
    %c0_i32 = arith.constant 0 : i32
    %c0_i32_0 = arith.constant 0 : i32
    return %arg0, %arg1, %c0_i32 : i32, i32, i32
  }
}

module attributes {stable_mosaic.version = 11 : i64} {
  func.func @_in_stats_kernel(%arg0: i32, %arg1: i32, %arg2: memref<1x256x8xbf16, #tpu.memory_space<vmem>>, %arg3: memref<1x2x8xf32, #tpu.memory_space<vmem>>) attributes {dimension_semantics = [#tpu.dimension_semantics<parallel>, #tpu.dimension_semantics<arbitrary>], iteration_bounds = array<i64: 2, 1>, scalar_prefetch = 0 : i64, scratch_operands = 0 : i64, tpu.core_type = #tpu.core_type<tc>, window_params = [{transform_indices = @transform_0, window_bounds = array<i64: 1, 256, 8>}, {transform_indices = @transform_1, window_bounds = array<i64: 1, 2, 8>}]} {
    %c0_i32 = arith.constant 0 : i32
    %0 = arith.cmpi eq, %arg1, %c0_i32 : i32
    %1 = arith.extui %0 : i1 to i32
    %c0_i32_0 = arith.constant 0 : i32
    %2 = arith.cmpi ne, %1, %c0_i32_0 : i32
    scf.if %2 {
      %cst_12 = arith.constant 0.000000e+00 : f32
      %21 = vector.broadcast %cst_12 : f32 to vector<2x8xf32>
      %c0_13 = arith.constant 0 : index
      %c0_14 = arith.constant 0 : index
      %c0_15 = arith.constant 0 : index
      %22 = vector.load %arg3[%c0_13, %c0_14, %c0_15] : memref<1x2x8xf32, #tpu.memory_space<vmem>>, vector<1x2x8xf32>
      %23 = vector.shape_cast %22 : vector<1x2x8xf32> to vector<2x8xf32>
      %24 = vector.shape_cast %21 : vector<2x8xf32> to vector<1x2x8xf32>
      tpu.vector_store %arg3[%c0_13, %c0_14, %c0_15], %24 {strides = array<i32>} : memref<1x2x8xf32, #tpu.memory_space<vmem>>, vector<1x2x8xf32>,
    } else {
    }
    %c0 = arith.constant 0 : index
    %c0_1 = arith.constant 0 : index
    %c0_2 = arith.constant 0 : index
    %3 = vector.load %arg2[%c0, %c0_1, %c0_2] : memref<1x256x8xbf16, #tpu.memory_space<vmem>>, vector<1x256x8xbf16>
    %4 = vector.shape_cast %3 : vector<1x256x8xbf16> to vector<256x8xbf16>
    %5 = arith.extf %4 : vector<256x8xbf16> to vector<256x8xf32>
    %cst = arith.constant dense<0.000000e+00> : vector<8xf32>
    %6 = vector.multi_reduction <add>, %5, %cst [0] : vector<256x8xf32> to vector<8xf32>
    %7 = vector.shape_cast %6 : vector<8xf32> to vector<1x8xf32>
    %8 = arith.mulf %5, %5 : vector<256x8xf32>
    %cst_3 = arith.constant dense<0.000000e+00> : vector<8xf32>
    %9 = vector.multi_reduction <add>, %8, %cst_3 [0] : vector<256x8xf32> to vector<8xf32>
    %10 = vector.shape_cast %9 : vector<8xf32> to vector<1x8xf32>
    %c0_4 = arith.constant 0 : index
    %c0_5 = arith.constant 0 : index
    %c0_6 = arith.constant 0 : index
    %11 = vector.load %arg3[%c0_4, %c0_5, %c0_6] : memref<1x2x8xf32, #tpu.memory_space<vmem>>, vector<1x2x8xf32>
    %12 = vector.shape_cast %11 : vector<1x2x8xf32> to vector<2x8xf32>
    %13 = tpu.concatenate %7, %10 in 0 : vector<1x8xf32>, vector<1x8xf32> -> vector<2x8xf32>
    %14 = arith.addf %12, %13 : vector<2x8xf32>
    %c0_7 = arith.constant 0 : index
    %c0_8 = arith.constant 0 : index
    %c0_9 = arith.constant 0 : index
    %15 = vector.load %arg3[%c0_7, %c0_8, %c0_9] : memref<1x2x8xf32, #tpu.memory_space<vmem>>, vector<1x2x8xf32>
    %16 = vector.shape_cast %15 : vector<1x2x8xf32> to vector<2x8xf32>
    %17 = vector.shape_cast %14 : vector<2x8xf32> to vector<1x2x8xf32>
    tpu.vector_store %arg3[%c0_7, %c0_8, %c0_9], %17 {strides = array<i32>} : memref<1x2x8xf32, #tpu.memory_space<vmem>>, vector<1x2x8xf32>,
    %c0_i32_10 = arith.constant 0 : i32
    %18 = arith.cmpi eq, %arg1, %c0_i32_10 : i32
    %19 = arith.extui %18 : i1 to i32
    %c0_i32_11 = arith.constant 0 : i32
    %20 = arith.cmpi ne, %19, %c0_i32_11 : i32
    scf.if %20 {
      %c0_12 = arith.constant 0 : index
      %c0_13 = arith.constant 0 : index
      %c0_14 = arith.constant 0 : index
      %21 = vector.load %arg3[%c0_12, %c0_13, %c0_14] : memref<1x2x8xf32, #tpu.memory_space<vmem>>, vector<1x2x8xf32>
      %22 = vector.shape_cast %21 : vector<1x2x8xf32> to vector<2x8xf32>
      %23 = vector.extract_strided_slice %22 {offsets = [0, 0], sizes = [1, 8], strides = [1, 1]} : vector<2x8xf32> to vector<1x8xf32>
      %cst_15 = arith.constant 3.906250e-03 : f32
      %24 = vector.broadcast %cst_15 : f32 to vector<1x8xf32>
      %25 = arith.mulf %23, %24 : vector<1x8xf32>
      %26 = vector.extract_strided_slice %22 {offsets = [1, 0], sizes = [1, 8], strides = [1, 1]} : vector<2x8xf32> to vector<1x8xf32>
      %cst_16 = arith.constant 3.906250e-03 : f32
      %27 = vector.broadcast %cst_16 : f32 to vector<1x8xf32>
      %28 = arith.mulf %26, %27 : vector<1x8xf32>
      %29 = arith.mulf %25, %25 : vector<1x8xf32>
      %30 = arith.subf %28, %29 : vector<1x8xf32>
      %cst_17 = arith.constant 0.000000e+00 : f32
      %31 = vector.broadcast %cst_17 : f32 to vector<1x8xf32>
      %32 = arith.maximumf %30, %31 : vector<1x8xf32>
      %cst_18 = arith.constant 9.99999974E-6 : f32
      %33 = vector.broadcast %cst_18 : f32 to vector<1x8xf32>
      %34 = arith.addf %32, %33 : vector<1x8xf32>
      %35 = math.rsqrt %34 : vector<1x8xf32>
      %36 = tpu.concatenate %25, %35 in 0 : vector<1x8xf32>, vector<1x8xf32> -> vector<2x8xf32>
      %c0_19 = arith.constant 0 : index
      %c0_20 = arith.constant 0 : index
      %c0_21 = arith.constant 0 : index
      %37 = vector.load %arg3[%c0_19, %c0_20, %c0_21] : memref<1x2x8xf32, #tpu.memory_space<vmem>>, vector<1x2x8xf32>
      %38 = vector.shape_cast %37 : vector<1x2x8xf32> to vector<2x8xf32>
      %39 = vector.shape_cast %36 : vector<2x8xf32> to vector<1x2x8xf32>
      tpu.vector_store %arg3[%c0_19, %c0_20, %c0_21], %39 {strides = array<i32>} : memref<1x2x8xf32, #tpu.memory_space<vmem>>, vector<1x2x8xf32>,
    } else {
    }
    return
  }
  func.func @transform_0(%arg0: i32, %arg1: i32) -> (i32, i32, i32) {
    %c0_i32 = arith.constant 0 : i32
    %c0_i32_0 = arith.constant 0 : i32
    return %arg0, %arg1, %c0_i32 : i32, i32, i32
  }
  func.func @transform_1(%arg0: i32, %arg1: i32) -> (i32, i32, i32) {
    %c0_i32 = arith.constant 0 : i32
    %c0_i32_0 = arith.constant 0 : i32
    %c0_i32_1 = arith.constant 0 : i32
    return %arg0, %c0_i32, %c0_i32_0 : i32, i32, i32
  }
}

module attributes {stable_mosaic.version = 11 : i64} {
  func.func @_up_kernel(%arg0: i32, %arg1: i32, %arg2: memref<1x4x10x32xbf16, #tpu.memory_space<vmem>>, %arg3: memref<1x1x10x32xbf16, #tpu.memory_space<vmem>>, %arg4: memref<1x1x10x32xbf16, #tpu.memory_space<vmem>>, %arg5: memref<12x32x16xbf16, #tpu.memory_space<vmem>>, %arg6: memref<1x16xf32, #tpu.memory_space<vmem>>, %arg7: memref<1x4x2x8x16xbf16, #tpu.memory_space<vmem>>) attributes {dimension_semantics = [#tpu.dimension_semantics<parallel>, #tpu.dimension_semantics<parallel>], iteration_bounds = array<i64: 2, 2>, scalar_prefetch = 0 : i64, scratch_operands = 0 : i64, tpu.core_type = #tpu.core_type<tc>, window_params = [{transform_indices = @transform_0, window_bounds = array<i64: 1, 4, 10, 32>}, {transform_indices = @transform_1, window_bounds = array<i64: 1, 1, 10, 32>}, {transform_indices = @transform_2, window_bounds = array<i64: 1, 1, 10, 32>}, {pipeline_mode = #tpu.pipeline_mode<synchronous>, transform_indices = @transform_3, window_bounds = array<i64: 12, 32, 16>}, {pipeline_mode = #tpu.pipeline_mode<synchronous>, transform_indices = @transform_4, window_bounds = array<i64: 1, 16>}, {transform_indices = @transform_5, window_bounds = array<i64: 1, 4, 2, 8, 16>}]} {
    %c0 = arith.constant 0 : index
    %c0_0 = arith.constant 0 : index
    %c0_1 = arith.constant 0 : index
    %c0_2 = arith.constant 0 : index
    %0 = vector.load %arg2[%c0, %c0_0, %c0_1, %c0_2] : memref<1x4x10x32xbf16, #tpu.memory_space<vmem>>, vector<1x4x8x32xbf16>
    %1 = vector.shape_cast %0 : vector<1x4x8x32xbf16> to vector<4x8x32xbf16>
    %c0_3 = arith.constant 0 : index
    %c0_4 = arith.constant 0 : index
    %c0_5 = arith.constant 0 : index
    %c0_6 = arith.constant 0 : index
    %2 = vector.load %arg3[%c0_3, %c0_4, %c0_5, %c0_6] : memref<1x1x10x32xbf16, #tpu.memory_space<vmem>>, vector<1x1x8x32xbf16>
    %3 = vector.shape_cast %2 : vector<1x1x8x32xbf16> to vector<1x8x32xbf16>
    %c0_7 = arith.constant 0 : index
    %c0_8 = arith.constant 0 : index
    %c0_9 = arith.constant 0 : index
    %c0_10 = arith.constant 0 : index
    %4 = vector.load %arg4[%c0_7, %c0_8, %c0_9, %c0_10] : memref<1x1x10x32xbf16, #tpu.memory_space<vmem>>, vector<1x1x8x32xbf16>
    %5 = vector.shape_cast %4 : vector<1x1x8x32xbf16> to vector<1x8x32xbf16>
    %6 = tpu.concatenate %1, %3, %5 in 0 : vector<4x8x32xbf16>, vector<1x8x32xbf16>, vector<1x8x32xbf16> -> vector<6x8x32xbf16>
    %cst = arith.constant 0.000000e+00 : bf16
    %7 = vector.broadcast %cst : bf16 to vector<6x8x32xbf16>
    %8 = arith.maximumf %6, %7 : vector<6x8x32xbf16>
    %c0_11 = arith.constant 0 : index
    %c0_12 = arith.constant 0 : index
    %c1 = arith.constant 1 : index
    %c0_13 = arith.constant 0 : index
    %9 = vector.load %arg2[%c0_11, %c0_12, %c1, %c0_13] : memref<1x4x10x32xbf16, #tpu.memory_space<vmem>>, vector<1x4x8x32xbf16>
    %10 = vector.shape_cast %9 : vector<1x4x8x32xbf16> to vector<4x8x32xbf16>
    %c0_14 = arith.constant 0 : index
    %c0_15 = arith.constant 0 : index
    %c1_16 = arith.constant 1 : index
    %c0_17 = arith.constant 0 : index
    %11 = vector.load %arg3[%c0_14, %c0_15, %c1_16, %c0_17] : memref<1x1x10x32xbf16, #tpu.memory_space<vmem>>, vector<1x1x8x32xbf16>
    %12 = vector.shape_cast %11 : vector<1x1x8x32xbf16> to vector<1x8x32xbf16>
    %c0_18 = arith.constant 0 : index
    %c0_19 = arith.constant 0 : index
    %c1_20 = arith.constant 1 : index
    %c0_21 = arith.constant 0 : index
    %13 = vector.load %arg4[%c0_18, %c0_19, %c1_20, %c0_21] : memref<1x1x10x32xbf16, #tpu.memory_space<vmem>>, vector<1x1x8x32xbf16>
    %14 = vector.shape_cast %13 : vector<1x1x8x32xbf16> to vector<1x8x32xbf16>
    %15 = tpu.concatenate %10, %12, %14 in 0 : vector<4x8x32xbf16>, vector<1x8x32xbf16>, vector<1x8x32xbf16> -> vector<6x8x32xbf16>
    %cst_22 = arith.constant 0.000000e+00 : bf16
    %16 = vector.broadcast %cst_22 : bf16 to vector<6x8x32xbf16>
    %17 = arith.maximumf %15, %16 : vector<6x8x32xbf16>
    %c0_23 = arith.constant 0 : index
    %c0_24 = arith.constant 0 : index
    %c2 = arith.constant 2 : index
    %c0_25 = arith.constant 0 : index
    %18 = vector.load %arg2[%c0_23, %c0_24, %c2, %c0_25] : memref<1x4x10x32xbf16, #tpu.memory_space<vmem>>, vector<1x4x8x32xbf16>
    %19 = vector.shape_cast %18 : vector<1x4x8x32xbf16> to vector<4x8x32xbf16>
    %c0_26 = arith.constant 0 : index
    %c0_27 = arith.constant 0 : index
    %c2_28 = arith.constant 2 : index
    %c0_29 = arith.constant 0 : index
    %20 = vector.load %arg3[%c0_26, %c0_27, %c2_28, %c0_29] : memref<1x1x10x32xbf16, #tpu.memory_space<vmem>>, vector<1x1x8x32xbf16>
    %21 = vector.shape_cast %20 : vector<1x1x8x32xbf16> to vector<1x8x32xbf16>
    %c0_30 = arith.constant 0 : index
    %c0_31 = arith.constant 0 : index
    %c2_32 = arith.constant 2 : index
    %c0_33 = arith.constant 0 : index
    %22 = vector.load %arg4[%c0_30, %c0_31, %c2_32, %c0_33] : memref<1x1x10x32xbf16, #tpu.memory_space<vmem>>, vector<1x1x8x32xbf16>
    %23 = vector.shape_cast %22 : vector<1x1x8x32xbf16> to vector<1x8x32xbf16>
    %24 = tpu.concatenate %19, %21, %23 in 0 : vector<4x8x32xbf16>, vector<1x8x32xbf16>, vector<1x8x32xbf16> -> vector<6x8x32xbf16>
    %cst_34 = arith.constant 0.000000e+00 : bf16
    %25 = vector.broadcast %cst_34 : bf16 to vector<6x8x32xbf16>
    %26 = arith.maximumf %24, %25 : vector<6x8x32xbf16>
    %cst_35 = arith.constant 0.000000e+00 : f32
    %27 = vector.broadcast %cst_35 : f32 to vector<32x16xf32>
    %28 = vector.extract_strided_slice %8 {offsets = [0, 0, 0], sizes = [4, 8, 32], strides = [1, 1, 1]} : vector<6x8x32xbf16> to vector<4x8x32xbf16>
    %29 = vector.shape_cast %28 : vector<4x8x32xbf16> to vector<32x32xbf16>
    %c0_36 = arith.constant 0 : index
    %c0_37 = arith.constant 0 : index
    %c0_38 = arith.constant 0 : index
    %30 = vector.load %arg5[%c0_36, %c0_37, %c0_38] : memref<12x32x16xbf16, #tpu.memory_space<vmem>>, vector<1x32x16xbf16>
    %31 = vector.shape_cast %30 : vector<1x32x16xbf16> to vector<32x16xbf16>
    %cst_39 = arith.constant dense<0.000000e+00> : vector<32x16xf32>
    %32 = tpu.matmul %29, %31, %cst_39 {dimension_numbers = #tpu.dot_dimension_numbers<[1], [0], [0], [1], [0, 0, 1, 1], [], []>} : vector<32x32xbf16>, vector<32x16xbf16>, vector<32x16xf32> -> vector<32x16xf32>
    %33 = arith.addf %27, %32 : vector<32x16xf32>
    %34 = vector.extract_strided_slice %17 {offsets = [0, 0, 0], sizes = [4, 8, 32], strides = [1, 1, 1]} : vector<6x8x32xbf16> to vector<4x8x32xbf16>
    %35 = vector.shape_cast %34 : vector<4x8x32xbf16> to vector<32x32xbf16>
    %c1_40 = arith.constant 1 : index
    %c0_41 = arith.constant 0 : index
    %c0_42 = arith.constant 0 : index
    %36 = vector.load %arg5[%c1_40, %c0_41, %c0_42] : memref<12x32x16xbf16, #tpu.memory_space<vmem>>, vector<1x32x16xbf16>
    %37 = vector.shape_cast %36 : vector<1x32x16xbf16> to vector<32x16xbf16>
    %cst_43 = arith.constant dense<0.000000e+00> : vector<32x16xf32>
    %38 = tpu.matmul %35, %37, %cst_43 {dimension_numbers = #tpu.dot_dimension_numbers<[1], [0], [0], [1], [0, 0, 1, 1], [], []>} : vector<32x32xbf16>, vector<32x16xbf16>, vector<32x16xf32> -> vector<32x16xf32>
    %39 = arith.addf %33, %38 : vector<32x16xf32>
    %40 = vector.extract_strided_slice %26 {offsets = [0, 0, 0], sizes = [4, 8, 32], strides = [1, 1, 1]} : vector<6x8x32xbf16> to vector<4x8x32xbf16>
    %41 = vector.shape_cast %40 : vector<4x8x32xbf16> to vector<32x32xbf16>
    %c2_44 = arith.constant 2 : index
    %c0_45 = arith.constant 0 : index
    %c0_46 = arith.constant 0 : index
    %42 = vector.load %arg5[%c2_44, %c0_45, %c0_46] : memref<12x32x16xbf16, #tpu.memory_space<vmem>>, vector<1x32x16xbf16>
    %43 = vector.shape_cast %42 : vector<1x32x16xbf16> to vector<32x16xbf16>
    %cst_47 = arith.constant dense<0.000000e+00> : vector<32x16xf32>
    %44 = tpu.matmul %41, %43, %cst_47 {dimension_numbers = #tpu.dot_dimension_numbers<[1], [0], [0], [1], [0, 0, 1, 1], [], []>} : vector<32x32xbf16>, vector<32x16xbf16>, vector<32x16xf32> -> vector<32x16xf32>
    %45 = arith.addf %39, %44 : vector<32x16xf32>
    %46 = vector.extract_strided_slice %8 {offsets = [1, 0, 0], sizes = [4, 8, 32], strides = [1, 1, 1]} : vector<6x8x32xbf16> to vector<4x8x32xbf16>
    %47 = vector.shape_cast %46 : vector<4x8x32xbf16> to vector<32x32xbf16>
    %c3 = arith.constant 3 : index
    %c0_48 = arith.constant 0 : index
    %c0_49 = arith.constant 0 : index
    %48 = vector.load %arg5[%c3, %c0_48, %c0_49] : memref<12x32x16xbf16, #tpu.memory_space<vmem>>, vector<1x32x16xbf16>
    %49 = vector.shape_cast %48 : vector<1x32x16xbf16> to vector<32x16xbf16>
    %cst_50 = arith.constant dense<0.000000e+00> : vector<32x16xf32>
    %50 = tpu.matmul %47, %49, %cst_50 {dimension_numbers = #tpu.dot_dimension_numbers<[1], [0], [0], [1], [0, 0, 1, 1], [], []>} : vector<32x32xbf16>, vector<32x16xbf16>, vector<32x16xf32> -> vector<32x16xf32>
    %51 = arith.addf %45, %50 : vector<32x16xf32>
    %52 = vector.extract_strided_slice %17 {offsets = [1, 0, 0], sizes = [4, 8, 32], strides = [1, 1, 1]} : vector<6x8x32xbf16> to vector<4x8x32xbf16>
    %53 = vector.shape_cast %52 : vector<4x8x32xbf16> to vector<32x32xbf16>
    %c4 = arith.constant 4 : index
    %c0_51 = arith.constant 0 : index
    %c0_52 = arith.constant 0 : index
    %54 = vector.load %arg5[%c4, %c0_51, %c0_52] : memref<12x32x16xbf16, #tpu.memory_space<vmem>>, vector<1x32x16xbf16>
    %55 = vector.shape_cast %54 : vector<1x32x16xbf16> to vector<32x16xbf16>
    %cst_53 = arith.constant dense<0.000000e+00> : vector<32x16xf32>
    %56 = tpu.matmul %53, %55, %cst_53 {dimension_numbers = #tpu.dot_dimension_numbers<[1], [0], [0], [1], [0, 0, 1, 1], [], []>} : vector<32x32xbf16>, vector<32x16xbf16>, vector<32x16xf32> -> vector<32x16xf32>
    %57 = arith.addf %51, %56 : vector<32x16xf32>
    %58 = vector.extract_strided_slice %26 {offsets = [1, 0, 0], sizes = [4, 8, 32], strides = [1, 1, 1]} : vector<6x8x32xbf16> to vector<4x8x32xbf16>
    %59 = vector.shape_cast %58 : vector<4x8x32xbf16> to vector<32x32xbf16>
    %c5 = arith.constant 5 : index
    %c0_54 = arith.constant 0 : index
    %c0_55 = arith.constant 0 : index
    %60 = vector.load %arg5[%c5, %c0_54, %c0_55] : memref<12x32x16xbf16, #tpu.memory_space<vmem>>, vector<1x32x16xbf16>
    %61 = vector.shape_cast %60 : vector<1x32x16xbf16> to vector<32x16xbf16>
    %cst_56 = arith.constant dense<0.000000e+00> : vector<32x16xf32>
    %62 = tpu.matmul %59, %61, %cst_56 {dimension_numbers = #tpu.dot_dimension_numbers<[1], [0], [0], [1], [0, 0, 1, 1], [], []>} : vector<32x32xbf16>, vector<32x16xbf16>, vector<32x16xf32> -> vector<32x16xf32>
    %63 = arith.addf %57, %62 : vector<32x16xf32>
    %c0_57 = arith.constant 0 : index
    %c0_58 = arith.constant 0 : index
    %64 = vector.load %arg6[%c0_57, %c0_58] : memref<1x16xf32, #tpu.memory_space<vmem>>, vector<1x16xf32>
    %65 = vector.broadcast %64 : vector<1x16xf32> to vector<32x16xf32>
    %66 = arith.addf %63, %65 : vector<32x16xf32>
    %67 = vector.shape_cast %66 : vector<32x16xf32> to vector<4x8x16xf32>
    %cst_59 = arith.constant 0.000000e+00 : f32
    %68 = vector.broadcast %cst_59 : f32 to vector<32x16xf32>
    %69 = vector.extract_strided_slice %8 {offsets = [1, 0, 0], sizes = [4, 8, 32], strides = [1, 1, 1]} : vector<6x8x32xbf16> to vector<4x8x32xbf16>
    %70 = vector.shape_cast %69 : vector<4x8x32xbf16> to vector<32x32xbf16>
    %c6 = arith.constant 6 : index
    %c0_60 = arith.constant 0 : index
    %c0_61 = arith.constant 0 : index
    %71 = vector.load %arg5[%c6, %c0_60, %c0_61] : memref<12x32x16xbf16, #tpu.memory_space<vmem>>, vector<1x32x16xbf16>
    %72 = vector.shape_cast %71 : vector<1x32x16xbf16> to vector<32x16xbf16>
    %cst_62 = arith.constant dense<0.000000e+00> : vector<32x16xf32>
    %73 = tpu.matmul %70, %72, %cst_62 {dimension_numbers = #tpu.dot_dimension_numbers<[1], [0], [0], [1], [0, 0, 1, 1], [], []>} : vector<32x32xbf16>, vector<32x16xbf16>, vector<32x16xf32> -> vector<32x16xf32>
    %74 = arith.addf %68, %73 : vector<32x16xf32>
    %75 = vector.extract_strided_slice %17 {offsets = [1, 0, 0], sizes = [4, 8, 32], strides = [1, 1, 1]} : vector<6x8x32xbf16> to vector<4x8x32xbf16>
    %76 = vector.shape_cast %75 : vector<4x8x32xbf16> to vector<32x32xbf16>
    %c7 = arith.constant 7 : index
    %c0_63 = arith.constant 0 : index
    %c0_64 = arith.constant 0 : index
    %77 = vector.load %arg5[%c7, %c0_63, %c0_64] : memref<12x32x16xbf16, #tpu.memory_space<vmem>>, vector<1x32x16xbf16>
    %78 = vector.shape_cast %77 : vector<1x32x16xbf16> to vector<32x16xbf16>
    %cst_65 = arith.constant dense<0.000000e+00> : vector<32x16xf32>
    %79 = tpu.matmul %76, %78, %cst_65 {dimension_numbers = #tpu.dot_dimension_numbers<[1], [0], [0], [1], [0, 0, 1, 1], [], []>} : vector<32x32xbf16>, vector<32x16xbf16>, vector<32x16xf32> -> vector<32x16xf32>
    %80 = arith.addf %74, %79 : vector<32x16xf32>
    %81 = vector.extract_strided_slice %26 {offsets = [1, 0, 0], sizes = [4, 8, 32], strides = [1, 1, 1]} : vector<6x8x32xbf16> to vector<4x8x32xbf16>
    %82 = vector.shape_cast %81 : vector<4x8x32xbf16> to vector<32x32xbf16>
    %c8 = arith.constant 8 : index
    %c0_66 = arith.constant 0 : index
    %c0_67 = arith.constant 0 : index
    %83 = vector.load %arg5[%c8, %c0_66, %c0_67] : memref<12x32x16xbf16, #tpu.memory_space<vmem>>, vector<1x32x16xbf16>
    %84 = vector.shape_cast %83 : vector<1x32x16xbf16> to vector<32x16xbf16>
    %cst_68 = arith.constant dense<0.000000e+00> : vector<32x16xf32>
    %85 = tpu.matmul %82, %84, %cst_68 {dimension_numbers = #tpu.dot_dimension_numbers<[1], [0], [0], [1], [0, 0, 1, 1], [], []>} : vector<32x32xbf16>, vector<32x16xbf16>, vector<32x16xf32> -> vector<32x16xf32>
    %86 = arith.addf %80, %85 : vector<32x16xf32>
    %87 = vector.extract_strided_slice %8 {offsets = [2, 0, 0], sizes = [4, 8, 32], strides = [1, 1, 1]} : vector<6x8x32xbf16> to vector<4x8x32xbf16>
    %88 = vector.shape_cast %87 : vector<4x8x32xbf16> to vector<32x32xbf16>
    %c9 = arith.constant 9 : index
    %c0_69 = arith.constant 0 : index
    %c0_70 = arith.constant 0 : index
    %89 = vector.load %arg5[%c9, %c0_69, %c0_70] : memref<12x32x16xbf16, #tpu.memory_space<vmem>>, vector<1x32x16xbf16>
    %90 = vector.shape_cast %89 : vector<1x32x16xbf16> to vector<32x16xbf16>
    %cst_71 = arith.constant dense<0.000000e+00> : vector<32x16xf32>
    %91 = tpu.matmul %88, %90, %cst_71 {dimension_numbers = #tpu.dot_dimension_numbers<[1], [0], [0], [1], [0, 0, 1, 1], [], []>} : vector<32x32xbf16>, vector<32x16xbf16>, vector<32x16xf32> -> vector<32x16xf32>
    %92 = arith.addf %86, %91 : vector<32x16xf32>
    %93 = vector.extract_strided_slice %17 {offsets = [2, 0, 0], sizes = [4, 8, 32], strides = [1, 1, 1]} : vector<6x8x32xbf16> to vector<4x8x32xbf16>
    %94 = vector.shape_cast %93 : vector<4x8x32xbf16> to vector<32x32xbf16>
    %c10 = arith.constant 10 : index
    %c0_72 = arith.constant 0 : index
    %c0_73 = arith.constant 0 : index
    %95 = vector.load %arg5[%c10, %c0_72, %c0_73] : memref<12x32x16xbf16, #tpu.memory_space<vmem>>, vector<1x32x16xbf16>
    %96 = vector.shape_cast %95 : vector<1x32x16xbf16> to vector<32x16xbf16>
    %cst_74 = arith.constant dense<0.000000e+00> : vector<32x16xf32>
    %97 = tpu.matmul %94, %96, %cst_74 {dimension_numbers = #tpu.dot_dimension_numbers<[1], [0], [0], [1], [0, 0, 1, 1], [], []>} : vector<32x32xbf16>, vector<32x16xbf16>, vector<32x16xf32> -> vector<32x16xf32>
    %98 = arith.addf %92, %97 : vector<32x16xf32>
    %99 = vector.extract_strided_slice %26 {offsets = [2, 0, 0], sizes = [4, 8, 32], strides = [1, 1, 1]} : vector<6x8x32xbf16> to vector<4x8x32xbf16>
    %100 = vector.shape_cast %99 : vector<4x8x32xbf16> to vector<32x32xbf16>
    %c11 = arith.constant 11 : index
    %c0_75 = arith.constant 0 : index
    %c0_76 = arith.constant 0 : index
    %101 = vector.load %arg5[%c11, %c0_75, %c0_76] : memref<12x32x16xbf16, #tpu.memory_space<vmem>>, vector<1x32x16xbf16>
    %102 = vector.shape_cast %101 : vector<1x32x16xbf16> to vector<32x16xbf16>
    %cst_77 = arith.constant dense<0.000000e+00> : vector<32x16xf32>
    %103 = tpu.matmul %100, %102, %cst_77 {dimension_numbers = #tpu.dot_dimension_numbers<[1], [0], [0], [1], [0, 0, 1, 1], [], []>} : vector<32x32xbf16>, vector<32x16xbf16>, vector<32x16xf32> -> vector<32x16xf32>
    %104 = arith.addf %98, %103 : vector<32x16xf32>
    %c0_78 = arith.constant 0 : index
    %c0_79 = arith.constant 0 : index
    %105 = vector.load %arg6[%c0_78, %c0_79] : memref<1x16xf32, #tpu.memory_space<vmem>>, vector<1x16xf32>
    %106 = vector.broadcast %105 : vector<1x16xf32> to vector<32x16xf32>
    %107 = arith.addf %104, %106 : vector<32x16xf32>
    %108 = vector.shape_cast %107 : vector<32x16xf32> to vector<4x8x16xf32>
    %109 = vector.shape_cast %67 : vector<4x8x16xf32> to vector<4x1x8x16xf32>
    %110 = vector.shape_cast %108 : vector<4x8x16xf32> to vector<4x1x8x16xf32>
    %111 = tpu.concatenate %109, %110 in 1 : vector<4x1x8x16xf32>, vector<4x1x8x16xf32> -> vector<4x2x8x16xf32>
    %112 = arith.truncf %111 : vector<4x2x8x16xf32> to vector<4x2x8x16xbf16>
    %c0_80 = arith.constant 0 : index
    %c0_81 = arith.constant 0 : index
    %c0_82 = arith.constant 0 : index
    %c0_83 = arith.constant 0 : index
    %c0_84 = arith.constant 0 : index
    %113 = vector.load %arg7[%c0_80, %c0_81, %c0_82, %c0_83, %c0_84] : memref<1x4x2x8x16xbf16, #tpu.memory_space<vmem>>, vector<1x4x2x8x16xbf16>
    %114 = vector.shape_cast %113 : vector<1x4x2x8x16xbf16> to vector<4x2x8x16xbf16>
    %115 = vector.shape_cast %112 : vector<4x2x8x16xbf16> to vector<1x4x2x8x16xbf16>
    tpu.vector_store %arg7[%c0_80, %c0_81, %c0_82, %c0_83, %c0_84], %115 {strides = array<i32>} : memref<1x4x2x8x16xbf16, #tpu.memory_space<vmem>>, vector<1x4x2x8x16xbf16>,
    return
  }
  func.func @transform_0(%arg0: i32, %arg1: i32) -> (i32, i32, i32, i32) {
    %c0_i32 = arith.constant 0 : i32
    %c0_i32_0 = arith.constant 0 : i32
    %c0_i32_1 = arith.constant 0 : i32
    return %arg0, %arg1, %c0_i32, %c0_i32_0 : i32, i32, i32, i32
  }
  func.func @transform_1(%arg0: i32, %arg1: i32) -> (i32, i32, i32, i32) {
    %c1_i32 = arith.constant 1 : i32
    %0 = arith.addi %arg1, %c1_i32 : i32
    %c4_i32 = arith.constant 4 : i32
    %1 = arith.muli %0, %c4_i32 : i32
    %c0_i32 = arith.constant 0 : i32
    %c0_i32_0 = arith.constant 0 : i32
    %c0_i32_1 = arith.constant 0 : i32
    return %arg0, %1, %c0_i32, %c0_i32_0 : i32, i32, i32, i32
  }
  func.func @transform_2(%arg0: i32, %arg1: i32) -> (i32, i32, i32, i32) {
    %c1_i32 = arith.constant 1 : i32
    %0 = arith.addi %arg1, %c1_i32 : i32
    %c4_i32 = arith.constant 4 : i32
    %1 = arith.muli %0, %c4_i32 : i32
    %c1_i32_0 = arith.constant 1 : i32
    %2 = arith.addi %1, %c1_i32_0 : i32
    %c0_i32 = arith.constant 0 : i32
    %c0_i32_1 = arith.constant 0 : i32
    %c0_i32_2 = arith.constant 0 : i32
    return %arg0, %2, %c0_i32, %c0_i32_1 : i32, i32, i32, i32
  }
  func.func @transform_3(%arg0: i32, %arg1: i32) -> (i32, i32, i32) {
    %c0_i32 = arith.constant 0 : i32
    %c0_i32_0 = arith.constant 0 : i32
    %c0_i32_1 = arith.constant 0 : i32
    %c0_i32_2 = arith.constant 0 : i32
    return %c0_i32, %c0_i32_0, %c0_i32_1 : i32, i32, i32
  }
  func.func @transform_4(%arg0: i32, %arg1: i32) -> (i32, i32) {
    %c0_i32 = arith.constant 0 : i32
    %c0_i32_0 = arith.constant 0 : i32
    %c0_i32_1 = arith.constant 0 : i32
    return %c0_i32, %c0_i32_0 : i32, i32
  }
  func.func @transform_5(%arg0: i32, %arg1: i32) -> (i32, i32, i32, i32, i32) {
    %c0_i32 = arith.constant 0 : i32
    %c0_i32_0 = arith.constant 0 : i32
    %c0_i32_1 = arith.constant 0 : i32
    %c0_i32_2 = arith.constant 0 : i32
    return %arg0, %arg1, %c0_i32, %c0_i32_0, %c0_i32_1 : i32, i32, i32, i32, i32
  }
}

module attributes {stable_mosaic.version = 11 : i64} {
  func.func @_up_kernel(%arg0: i32, %arg1: i32, %arg2: memref<1x8x18x16xbf16, #tpu.memory_space<vmem>>, %arg3: memref<1x1x18x16xbf16, #tpu.memory_space<vmem>>, %arg4: memref<1x1x18x16xbf16, #tpu.memory_space<vmem>>, %arg5: memref<12x16x6xbf16, #tpu.memory_space<vmem>>, %arg6: memref<1x6xf32, #tpu.memory_space<vmem>>, %arg7: memref<1x8x2x16x6xf32, #tpu.memory_space<vmem>>) attributes {dimension_semantics = [#tpu.dimension_semantics<parallel>, #tpu.dimension_semantics<parallel>], iteration_bounds = array<i64: 2, 2>, scalar_prefetch = 0 : i64, scratch_operands = 0 : i64, tpu.core_type = #tpu.core_type<tc>, window_params = [{transform_indices = @transform_0, window_bounds = array<i64: 1, 8, 18, 16>}, {transform_indices = @transform_1, window_bounds = array<i64: 1, 1, 18, 16>}, {transform_indices = @transform_2, window_bounds = array<i64: 1, 1, 18, 16>}, {pipeline_mode = #tpu.pipeline_mode<synchronous>, transform_indices = @transform_3, window_bounds = array<i64: 12, 16, 6>}, {pipeline_mode = #tpu.pipeline_mode<synchronous>, transform_indices = @transform_4, window_bounds = array<i64: 1, 6>}, {transform_indices = @transform_5, window_bounds = array<i64: 1, 8, 2, 16, 6>}]} {
    %c0 = arith.constant 0 : index
    %c0_0 = arith.constant 0 : index
    %c0_1 = arith.constant 0 : index
    %c0_2 = arith.constant 0 : index
    %0 = vector.load %arg2[%c0, %c0_0, %c0_1, %c0_2] : memref<1x8x18x16xbf16, #tpu.memory_space<vmem>>, vector<1x8x16x16xbf16>
    %1 = vector.shape_cast %0 : vector<1x8x16x16xbf16> to vector<8x16x16xbf16>
    %c0_3 = arith.constant 0 : index
    %c0_4 = arith.constant 0 : index
    %c0_5 = arith.constant 0 : index
    %c0_6 = arith.constant 0 : index
    %2 = vector.load %arg3[%c0_3, %c0_4, %c0_5, %c0_6] : memref<1x1x18x16xbf16, #tpu.memory_space<vmem>>, vector<1x1x16x16xbf16>
    %3 = vector.shape_cast %2 : vector<1x1x16x16xbf16> to vector<1x16x16xbf16>
    %c0_7 = arith.constant 0 : index
    %c0_8 = arith.constant 0 : index
    %c0_9 = arith.constant 0 : index
    %c0_10 = arith.constant 0 : index
    %4 = vector.load %arg4[%c0_7, %c0_8, %c0_9, %c0_10] : memref<1x1x18x16xbf16, #tpu.memory_space<vmem>>, vector<1x1x16x16xbf16>
    %5 = vector.shape_cast %4 : vector<1x1x16x16xbf16> to vector<1x16x16xbf16>
    %6 = tpu.concatenate %1, %3, %5 in 0 : vector<8x16x16xbf16>, vector<1x16x16xbf16>, vector<1x16x16xbf16> -> vector<10x16x16xbf16>
    %cst = arith.constant 0.000000e+00 : bf16
    %7 = vector.broadcast %cst : bf16 to vector<10x16x16xbf16>
    %8 = arith.maximumf %6, %7 : vector<10x16x16xbf16>
    %c0_11 = arith.constant 0 : index
    %c0_12 = arith.constant 0 : index
    %c1 = arith.constant 1 : index
    %c0_13 = arith.constant 0 : index
    %9 = vector.load %arg2[%c0_11, %c0_12, %c1, %c0_13] : memref<1x8x18x16xbf16, #tpu.memory_space<vmem>>, vector<1x8x16x16xbf16>
    %10 = vector.shape_cast %9 : vector<1x8x16x16xbf16> to vector<8x16x16xbf16>
    %c0_14 = arith.constant 0 : index
    %c0_15 = arith.constant 0 : index
    %c1_16 = arith.constant 1 : index
    %c0_17 = arith.constant 0 : index
    %11 = vector.load %arg3[%c0_14, %c0_15, %c1_16, %c0_17] : memref<1x1x18x16xbf16, #tpu.memory_space<vmem>>, vector<1x1x16x16xbf16>
    %12 = vector.shape_cast %11 : vector<1x1x16x16xbf16> to vector<1x16x16xbf16>
    %c0_18 = arith.constant 0 : index
    %c0_19 = arith.constant 0 : index
    %c1_20 = arith.constant 1 : index
    %c0_21 = arith.constant 0 : index
    %13 = vector.load %arg4[%c0_18, %c0_19, %c1_20, %c0_21] : memref<1x1x18x16xbf16, #tpu.memory_space<vmem>>, vector<1x1x16x16xbf16>
    %14 = vector.shape_cast %13 : vector<1x1x16x16xbf16> to vector<1x16x16xbf16>
    %15 = tpu.concatenate %10, %12, %14 in 0 : vector<8x16x16xbf16>, vector<1x16x16xbf16>, vector<1x16x16xbf16> -> vector<10x16x16xbf16>
    %cst_22 = arith.constant 0.000000e+00 : bf16
    %16 = vector.broadcast %cst_22 : bf16 to vector<10x16x16xbf16>
    %17 = arith.maximumf %15, %16 : vector<10x16x16xbf16>
    %c0_23 = arith.constant 0 : index
    %c0_24 = arith.constant 0 : index
    %c2 = arith.constant 2 : index
    %c0_25 = arith.constant 0 : index
    %18 = vector.load %arg2[%c0_23, %c0_24, %c2, %c0_25] : memref<1x8x18x16xbf16, #tpu.memory_space<vmem>>, vector<1x8x16x16xbf16>
    %19 = vector.shape_cast %18 : vector<1x8x16x16xbf16> to vector<8x16x16xbf16>
    %c0_26 = arith.constant 0 : index
    %c0_27 = arith.constant 0 : index
    %c2_28 = arith.constant 2 : index
    %c0_29 = arith.constant 0 : index
    %20 = vector.load %arg3[%c0_26, %c0_27, %c2_28, %c0_29] : memref<1x1x18x16xbf16, #tpu.memory_space<vmem>>, vector<1x1x16x16xbf16>
    %21 = vector.shape_cast %20 : vector<1x1x16x16xbf16> to vector<1x16x16xbf16>
    %c0_30 = arith.constant 0 : index
    %c0_31 = arith.constant 0 : index
    %c2_32 = arith.constant 2 : index
    %c0_33 = arith.constant 0 : index
    %22 = vector.load %arg4[%c0_30, %c0_31, %c2_32, %c0_33] : memref<1x1x18x16xbf16, #tpu.memory_space<vmem>>, vector<1x1x16x16xbf16>
    %23 = vector.shape_cast %22 : vector<1x1x16x16xbf16> to vector<1x16x16xbf16>
    %24 = tpu.concatenate %19, %21, %23 in 0 : vector<8x16x16xbf16>, vector<1x16x16xbf16>, vector<1x16x16xbf16> -> vector<10x16x16xbf16>
    %cst_34 = arith.constant 0.000000e+00 : bf16
    %25 = vector.broadcast %cst_34 : bf16 to vector<10x16x16xbf16>
    %26 = arith.maximumf %24, %25 : vector<10x16x16xbf16>
    %cst_35 = arith.constant 0.000000e+00 : f32
    %27 = vector.broadcast %cst_35 : f32 to vector<128x6xf32>
    %28 = vector.extract_strided_slice %8 {offsets = [0, 0, 0], sizes = [8, 16, 16], strides = [1, 1, 1]} : vector<10x16x16xbf16> to vector<8x16x16xbf16>
    %29 = vector.shape_cast %28 : vector<8x16x16xbf16> to vector<128x16xbf16>
    %c0_36 = arith.constant 0 : index
    %c0_37 = arith.constant 0 : index
    %c0_38 = arith.constant 0 : index
    %30 = vector.load %arg5[%c0_36, %c0_37, %c0_38] : memref<12x16x6xbf16, #tpu.memory_space<vmem>>, vector<1x16x6xbf16>
    %31 = vector.shape_cast %30 : vector<1x16x6xbf16> to vector<16x6xbf16>
    %cst_39 = arith.constant dense<0.000000e+00> : vector<128x6xf32>
    %32 = tpu.matmul %29, %31, %cst_39 {dimension_numbers = #tpu.dot_dimension_numbers<[1], [0], [0], [1], [0, 0, 1, 1], [], []>} : vector<128x16xbf16>, vector<16x6xbf16>, vector<128x6xf32> -> vector<128x6xf32>
    %33 = arith.addf %27, %32 : vector<128x6xf32>
    %34 = vector.extract_strided_slice %17 {offsets = [0, 0, 0], sizes = [8, 16, 16], strides = [1, 1, 1]} : vector<10x16x16xbf16> to vector<8x16x16xbf16>
    %35 = vector.shape_cast %34 : vector<8x16x16xbf16> to vector<128x16xbf16>
    %c1_40 = arith.constant 1 : index
    %c0_41 = arith.constant 0 : index
    %c0_42 = arith.constant 0 : index
    %36 = vector.load %arg5[%c1_40, %c0_41, %c0_42] : memref<12x16x6xbf16, #tpu.memory_space<vmem>>, vector<1x16x6xbf16>
    %37 = vector.shape_cast %36 : vector<1x16x6xbf16> to vector<16x6xbf16>
    %cst_43 = arith.constant dense<0.000000e+00> : vector<128x6xf32>
    %38 = tpu.matmul %35, %37, %cst_43 {dimension_numbers = #tpu.dot_dimension_numbers<[1], [0], [0], [1], [0, 0, 1, 1], [], []>} : vector<128x16xbf16>, vector<16x6xbf16>, vector<128x6xf32> -> vector<128x6xf32>
    %39 = arith.addf %33, %38 : vector<128x6xf32>
    %40 = vector.extract_strided_slice %26 {offsets = [0, 0, 0], sizes = [8, 16, 16], strides = [1, 1, 1]} : vector<10x16x16xbf16> to vector<8x16x16xbf16>
    %41 = vector.shape_cast %40 : vector<8x16x16xbf16> to vector<128x16xbf16>
    %c2_44 = arith.constant 2 : index
    %c0_45 = arith.constant 0 : index
    %c0_46 = arith.constant 0 : index
    %42 = vector.load %arg5[%c2_44, %c0_45, %c0_46] : memref<12x16x6xbf16, #tpu.memory_space<vmem>>, vector<1x16x6xbf16>
    %43 = vector.shape_cast %42 : vector<1x16x6xbf16> to vector<16x6xbf16>
    %cst_47 = arith.constant dense<0.000000e+00> : vector<128x6xf32>
    %44 = tpu.matmul %41, %43, %cst_47 {dimension_numbers = #tpu.dot_dimension_numbers<[1], [0], [0], [1], [0, 0, 1, 1], [], []>} : vector<128x16xbf16>, vector<16x6xbf16>, vector<128x6xf32> -> vector<128x6xf32>
    %45 = arith.addf %39, %44 : vector<128x6xf32>
    %46 = vector.extract_strided_slice %8 {offsets = [1, 0, 0], sizes = [8, 16, 16], strides = [1, 1, 1]} : vector<10x16x16xbf16> to vector<8x16x16xbf16>
    %47 = vector.shape_cast %46 : vector<8x16x16xbf16> to vector<128x16xbf16>
    %c3 = arith.constant 3 : index
    %c0_48 = arith.constant 0 : index
    %c0_49 = arith.constant 0 : index
    %48 = vector.load %arg5[%c3, %c0_48, %c0_49] : memref<12x16x6xbf16, #tpu.memory_space<vmem>>, vector<1x16x6xbf16>
    %49 = vector.shape_cast %48 : vector<1x16x6xbf16> to vector<16x6xbf16>
    %cst_50 = arith.constant dense<0.000000e+00> : vector<128x6xf32>
    %50 = tpu.matmul %47, %49, %cst_50 {dimension_numbers = #tpu.dot_dimension_numbers<[1], [0], [0], [1], [0, 0, 1, 1], [], []>} : vector<128x16xbf16>, vector<16x6xbf16>, vector<128x6xf32> -> vector<128x6xf32>
    %51 = arith.addf %45, %50 : vector<128x6xf32>
    %52 = vector.extract_strided_slice %17 {offsets = [1, 0, 0], sizes = [8, 16, 16], strides = [1, 1, 1]} : vector<10x16x16xbf16> to vector<8x16x16xbf16>
    %53 = vector.shape_cast %52 : vector<8x16x16xbf16> to vector<128x16xbf16>
    %c4 = arith.constant 4 : index
    %c0_51 = arith.constant 0 : index
    %c0_52 = arith.constant 0 : index
    %54 = vector.load %arg5[%c4, %c0_51, %c0_52] : memref<12x16x6xbf16, #tpu.memory_space<vmem>>, vector<1x16x6xbf16>
    %55 = vector.shape_cast %54 : vector<1x16x6xbf16> to vector<16x6xbf16>
    %cst_53 = arith.constant dense<0.000000e+00> : vector<128x6xf32>
    %56 = tpu.matmul %53, %55, %cst_53 {dimension_numbers = #tpu.dot_dimension_numbers<[1], [0], [0], [1], [0, 0, 1, 1], [], []>} : vector<128x16xbf16>, vector<16x6xbf16>, vector<128x6xf32> -> vector<128x6xf32>
    %57 = arith.addf %51, %56 : vector<128x6xf32>
    %58 = vector.extract_strided_slice %26 {offsets = [1, 0, 0], sizes = [8, 16, 16], strides = [1, 1, 1]} : vector<10x16x16xbf16> to vector<8x16x16xbf16>
    %59 = vector.shape_cast %58 : vector<8x16x16xbf16> to vector<128x16xbf16>
    %c5 = arith.constant 5 : index
    %c0_54 = arith.constant 0 : index
    %c0_55 = arith.constant 0 : index
    %60 = vector.load %arg5[%c5, %c0_54, %c0_55] : memref<12x16x6xbf16, #tpu.memory_space<vmem>>, vector<1x16x6xbf16>
    %61 = vector.shape_cast %60 : vector<1x16x6xbf16> to vector<16x6xbf16>
    %cst_56 = arith.constant dense<0.000000e+00> : vector<128x6xf32>
    %62 = tpu.matmul %59, %61, %cst_56 {dimension_numbers = #tpu.dot_dimension_numbers<[1], [0], [0], [1], [0, 0, 1, 1], [], []>} : vector<128x16xbf16>, vector<16x6xbf16>, vector<128x6xf32> -> vector<128x6xf32>
    %63 = arith.addf %57, %62 : vector<128x6xf32>
    %c0_57 = arith.constant 0 : index
    %c0_58 = arith.constant 0 : index
    %64 = vector.load %arg6[%c0_57, %c0_58] : memref<1x6xf32, #tpu.memory_space<vmem>>, vector<1x6xf32>
    %65 = vector.broadcast %64 : vector<1x6xf32> to vector<128x6xf32>
    %66 = arith.addf %63, %65 : vector<128x6xf32>
    %67 = math.tanh %66 : vector<128x6xf32>
    %68 = vector.shape_cast %67 : vector<128x6xf32> to vector<8x16x6xf32>
    %cst_59 = arith.constant 0.000000e+00 : f32
    %69 = vector.broadcast %cst_59 : f32 to vector<128x6xf32>
    %70 = vector.extract_strided_slice %8 {offsets = [1, 0, 0], sizes = [8, 16, 16], strides = [1, 1, 1]} : vector<10x16x16xbf16> to vector<8x16x16xbf16>
    %71 = vector.shape_cast %70 : vector<8x16x16xbf16> to vector<128x16xbf16>
    %c6 = arith.constant 6 : index
    %c0_60 = arith.constant 0 : index
    %c0_61 = arith.constant 0 : index
    %72 = vector.load %arg5[%c6, %c0_60, %c0_61] : memref<12x16x6xbf16, #tpu.memory_space<vmem>>, vector<1x16x6xbf16>
    %73 = vector.shape_cast %72 : vector<1x16x6xbf16> to vector<16x6xbf16>
    %cst_62 = arith.constant dense<0.000000e+00> : vector<128x6xf32>
    %74 = tpu.matmul %71, %73, %cst_62 {dimension_numbers = #tpu.dot_dimension_numbers<[1], [0], [0], [1], [0, 0, 1, 1], [], []>} : vector<128x16xbf16>, vector<16x6xbf16>, vector<128x6xf32> -> vector<128x6xf32>
    %75 = arith.addf %69, %74 : vector<128x6xf32>
    %76 = vector.extract_strided_slice %17 {offsets = [1, 0, 0], sizes = [8, 16, 16], strides = [1, 1, 1]} : vector<10x16x16xbf16> to vector<8x16x16xbf16>
    %77 = vector.shape_cast %76 : vector<8x16x16xbf16> to vector<128x16xbf16>
    %c7 = arith.constant 7 : index
    %c0_63 = arith.constant 0 : index
    %c0_64 = arith.constant 0 : index
    %78 = vector.load %arg5[%c7, %c0_63, %c0_64] : memref<12x16x6xbf16, #tpu.memory_space<vmem>>, vector<1x16x6xbf16>
    %79 = vector.shape_cast %78 : vector<1x16x6xbf16> to vector<16x6xbf16>
    %cst_65 = arith.constant dense<0.000000e+00> : vector<128x6xf32>
    %80 = tpu.matmul %77, %79, %cst_65 {dimension_numbers = #tpu.dot_dimension_numbers<[1], [0], [0], [1], [0, 0, 1, 1], [], []>} : vector<128x16xbf16>, vector<16x6xbf16>, vector<128x6xf32> -> vector<128x6xf32>
    %81 = arith.addf %75, %80 : vector<128x6xf32>
    %82 = vector.extract_strided_slice %26 {offsets = [1, 0, 0], sizes = [8, 16, 16], strides = [1, 1, 1]} : vector<10x16x16xbf16> to vector<8x16x16xbf16>
    %83 = vector.shape_cast %82 : vector<8x16x16xbf16> to vector<128x16xbf16>
    %c8 = arith.constant 8 : index
    %c0_66 = arith.constant 0 : index
    %c0_67 = arith.constant 0 : index
    %84 = vector.load %arg5[%c8, %c0_66, %c0_67] : memref<12x16x6xbf16, #tpu.memory_space<vmem>>, vector<1x16x6xbf16>
    %85 = vector.shape_cast %84 : vector<1x16x6xbf16> to vector<16x6xbf16>
    %cst_68 = arith.constant dense<0.000000e+00> : vector<128x6xf32>
    %86 = tpu.matmul %83, %85, %cst_68 {dimension_numbers = #tpu.dot_dimension_numbers<[1], [0], [0], [1], [0, 0, 1, 1], [], []>} : vector<128x16xbf16>, vector<16x6xbf16>, vector<128x6xf32> -> vector<128x6xf32>
    %87 = arith.addf %81, %86 : vector<128x6xf32>
    %88 = vector.extract_strided_slice %8 {offsets = [2, 0, 0], sizes = [8, 16, 16], strides = [1, 1, 1]} : vector<10x16x16xbf16> to vector<8x16x16xbf16>
    %89 = vector.shape_cast %88 : vector<8x16x16xbf16> to vector<128x16xbf16>
    %c9 = arith.constant 9 : index
    %c0_69 = arith.constant 0 : index
    %c0_70 = arith.constant 0 : index
    %90 = vector.load %arg5[%c9, %c0_69, %c0_70] : memref<12x16x6xbf16, #tpu.memory_space<vmem>>, vector<1x16x6xbf16>
    %91 = vector.shape_cast %90 : vector<1x16x6xbf16> to vector<16x6xbf16>
    %cst_71 = arith.constant dense<0.000000e+00> : vector<128x6xf32>
    %92 = tpu.matmul %89, %91, %cst_71 {dimension_numbers = #tpu.dot_dimension_numbers<[1], [0], [0], [1], [0, 0, 1, 1], [], []>} : vector<128x16xbf16>, vector<16x6xbf16>, vector<128x6xf32> -> vector<128x6xf32>
    %93 = arith.addf %87, %92 : vector<128x6xf32>
    %94 = vector.extract_strided_slice %17 {offsets = [2, 0, 0], sizes = [8, 16, 16], strides = [1, 1, 1]} : vector<10x16x16xbf16> to vector<8x16x16xbf16>
    %95 = vector.shape_cast %94 : vector<8x16x16xbf16> to vector<128x16xbf16>
    %c10 = arith.constant 10 : index
    %c0_72 = arith.constant 0 : index
    %c0_73 = arith.constant 0 : index
    %96 = vector.load %arg5[%c10, %c0_72, %c0_73] : memref<12x16x6xbf16, #tpu.memory_space<vmem>>, vector<1x16x6xbf16>
    %97 = vector.shape_cast %96 : vector<1x16x6xbf16> to vector<16x6xbf16>
    %cst_74 = arith.constant dense<0.000000e+00> : vector<128x6xf32>
    %98 = tpu.matmul %95, %97, %cst_74 {dimension_numbers = #tpu.dot_dimension_numbers<[1], [0], [0], [1], [0, 0, 1, 1], [], []>} : vector<128x16xbf16>, vector<16x6xbf16>, vector<128x6xf32> -> vector<128x6xf32>
    %99 = arith.addf %93, %98 : vector<128x6xf32>
    %100 = vector.extract_strided_slice %26 {offsets = [2, 0, 0], sizes = [8, 16, 16], strides = [1, 1, 1]} : vector<10x16x16xbf16> to vector<8x16x16xbf16>
    %101 = vector.shape_cast %100 : vector<8x16x16xbf16> to vector<128x16xbf16>
    %c11 = arith.constant 11 : index
    %c0_75 = arith.constant 0 : index
    %c0_76 = arith.constant 0 : index
    %102 = vector.load %arg5[%c11, %c0_75, %c0_76] : memref<12x16x6xbf16, #tpu.memory_space<vmem>>, vector<1x16x6xbf16>
    %103 = vector.shape_cast %102 : vector<1x16x6xbf16> to vector<16x6xbf16>
    %cst_77 = arith.constant dense<0.000000e+00> : vector<128x6xf32>
    %104 = tpu.matmul %101, %103, %cst_77 {dimension_numbers = #tpu.dot_dimension_numbers<[1], [0], [0], [1], [0, 0, 1, 1], [], []>} : vector<128x16xbf16>, vector<16x6xbf16>, vector<128x6xf32> -> vector<128x6xf32>
    %105 = arith.addf %99, %104 : vector<128x6xf32>
    %c0_78 = arith.constant 0 : index
    %c0_79 = arith.constant 0 : index
    %106 = vector.load %arg6[%c0_78, %c0_79] : memref<1x6xf32, #tpu.memory_space<vmem>>, vector<1x6xf32>
    %107 = vector.broadcast %106 : vector<1x6xf32> to vector<128x6xf32>
    %108 = arith.addf %105, %107 : vector<128x6xf32>
    %109 = math.tanh %108 : vector<128x6xf32>
    %110 = vector.shape_cast %109 : vector<128x6xf32> to vector<8x16x6xf32>
    %111 = vector.shape_cast %68 : vector<8x16x6xf32> to vector<8x1x16x6xf32>
    %112 = vector.shape_cast %110 : vector<8x16x6xf32> to vector<8x1x16x6xf32>
    %113 = tpu.concatenate %111, %112 in 1 : vector<8x1x16x6xf32>, vector<8x1x16x6xf32> -> vector<8x2x16x6xf32>
    %c0_80 = arith.constant 0 : index
    %c0_81 = arith.constant 0 : index
    %c0_82 = arith.constant 0 : index
    %c0_83 = arith.constant 0 : index
    %c0_84 = arith.constant 0 : index
    %114 = vector.load %arg7[%c0_80, %c0_81, %c0_82, %c0_83, %c0_84] : memref<1x8x2x16x6xf32, #tpu.memory_space<vmem>>, vector<1x8x2x16x6xf32>
    %115 = vector.shape_cast %114 : vector<1x8x2x16x6xf32> to vector<8x2x16x6xf32>
    %116 = vector.shape_cast %113 : vector<8x2x16x6xf32> to vector<1x8x2x16x6xf32>
    tpu.vector_store %arg7[%c0_80, %c0_81, %c0_82, %c0_83, %c0_84], %116 {strides = array<i32>} : memref<1x8x2x16x6xf32, #tpu.memory_space<vmem>>, vector<1x8x2x16x6xf32>,
    return
  }
  func.func @transform_0(%arg0: i32, %arg1: i32) -> (i32, i32, i32, i32) {
    %c0_i32 = arith.constant 0 : i32
    %c0_i32_0 = arith.constant 0 : i32
    %c0_i32_1 = arith.constant 0 : i32
    return %arg0, %arg1, %c0_i32, %c0_i32_0 : i32, i32, i32, i32
  }
  func.func @transform_1(%arg0: i32, %arg1: i32) -> (i32, i32, i32, i32) {
    %c1_i32 = arith.constant 1 : i32
    %0 = arith.addi %arg1, %c1_i32 : i32
    %c8_i32 = arith.constant 8 : i32
    %1 = arith.muli %0, %c8_i32 : i32
    %c0_i32 = arith.constant 0 : i32
    %c0_i32_0 = arith.constant 0 : i32
    %c0_i32_1 = arith.constant 0 : i32
    return %arg0, %1, %c0_i32, %c0_i32_0 : i32, i32, i32, i32
  }
  func.func @transform_2(%arg0: i32, %arg1: i32) -> (i32, i32, i32, i32) {
    %c1_i32 = arith.constant 1 : i32
    %0 = arith.addi %arg1, %c1_i32 : i32
    %c8_i32 = arith.constant 8 : i32
    %1 = arith.muli %0, %c8_i32 : i32
    %c1_i32_0 = arith.constant 1 : i32
    %2 = arith.addi %1, %c1_i32_0 : i32
    %c0_i32 = arith.constant 0 : i32
    %c0_i32_1 = arith.constant 0 : i32
    %c0_i32_2 = arith.constant 0 : i32
    return %arg0, %2, %c0_i32, %c0_i32_1 : i32, i32, i32, i32
  }
  func.func @transform_3(%arg0: i32, %arg1: i32) -> (i32, i32, i32) {
    %c0_i32 = arith.constant 0 : i32
    %c0_i32_0 = arith.constant 0 : i32
    %c0_i32_1 = arith.constant 0 : i32
    %c0_i32_2 = arith.constant 0 : i32
    return %c0_i32, %c0_i32_0, %c0_i32_1 : i32, i32, i32
  }
  func.func @transform_4(%arg0: i32, %arg1: i32) -> (i32, i32) {
    %c0_i32 = arith.constant 0 : i32
    %c0_i32_0 = arith.constant 0 : i32
    %c0_i32_1 = arith.constant 0 : i32
    return %c0_i32, %c0_i32_0 : i32, i32
  }
  func.func @transform_5(%arg0: i32, %arg1: i32) -> (i32, i32, i32, i32, i32) {
    %c0_i32 = arith.constant 0 : i32
    %c0_i32_0 = arith.constant 0 : i32
    %c0_i32_1 = arith.constant 0 : i32
    %c0_i32_2 = arith.constant 0 : i32
    return %arg0, %arg1, %c0_i32, %c0_i32_0, %c0_i32_1 : i32, i32, i32, i32, i32
  }
}

</mosaic_0001>

<bundles_post_ra>
// kernel: _lambda_.17
= control target key start
LH: loop header
LB: loop body
LE: loop exit
PB: predicated region body
PF: predicated region fallthrough
CT: control target
= control target key end

     0   :  { %s1792_s15 = smov 0   ;;  %s1794_s16 = smov 0   ;;  %s2101_s0 = inlined_call_operand.vmem [shape: bf16[2,17,17,12], index: 0, kind: input, shape index: {}, may-alias: {0,1}]   ;;  %s2102_s1 = inlined_call_operand.vmem [shape: bf16[2,17,17,12], index: 1, kind: input, shape index: {}, may-alias: {0,1}]   ;;  %s2103_s2 = inlined_call_operand.vmem [shape: bf16[4,12,8], index: 2, kind: input, shape index: {}]   ;;  %s2104_s3 = inlined_call_operand.vmem [shape: f32[1,8], index: 3, kind: input, shape index: {}]   ;;  %s2105_s4 = inlined_call_operand.vmem [shape: bf16[2,16,16,8], index: 4, kind: output, shape index: {}]  }
   0x1   :  { %s1796_s17 = smov 0   ;;  %s1798_s18 = smov 0  }
   0x2   :  { %s1800_s19 = smov 0  }
   0x3 LB: > { %s23_s20 = sadd.s32 1, %s1757_s17  ;;  %s26_s21 = sadd.s32 1, %s1761_s18  ;;  %s1765_s19 = sphi %s1800_s19, %s14_s19   ;;  %s1761_s18 = sphi %s1798_s18, %s2111_s18   ;;  %s1757_s17 = sphi %s1796_s17, %s2110_s17   ;;  %s1753_s16 = sphi %s1794_s16, %s2109_s16   ;;  %s1749_s15 = sphi %s1792_s15, %s2108_s15  }
   0x4   : > { %p24_p0 = scmp.ge.s32.totalorder %s23_s20, 2  ;;  %p1401_p1 = scmp.ge.s32.totalorder %s1765_s19, 1 }
   0x5   : > { %p218_p2 = scmp.lt.s32.totalorder %s1765_s19, 5 }
   0x6   : > { %s2113_s20 = smov (%p24_p0, %s23_s20), 0  ;;  %s2115_s21 = smov (!%p24_p0, %s26_s21), %s1761_s18 }
   0x7   : > { %p219_p3 = pnand %p1401_p1, %p218_p2  ;;  %p28_p4 = scmp.ge.s32.totalorder %s2115_s21, 2 }
   0x8   : > { %v1714_v0 = vld [vmem:[%s2103_s2 + $0x10] sm:$0x3f] (!%p219_p3)   ;;  %vm409_vm0 = vcmask (!%p219_p3), 1045504   ;;  %s1825_s24 = sshll.u32 (!%p219_p3), %s1749_s15, 3  ;;  %p276_p5 = scmp.lt.s32.totalorder (!%p219_p3), %s1753_s16, 1  ;;  %vm384_vm1 = vcmask (!%p219_p3), 97280  }
   0x9   : > { %s2117_s21 = smov (%p28_p4, %s2115_s21), 0  ;;  %222 = sbr.rel (%p219_p3) target bundleno = 321 (0x141), region = 36 }
   0xa   : > { %1667 = vmatprep.subr.msk.bf16.mxu1 (!%p219_p3), %vm409_vm0, %v1714_v0  ;;  %v411_v1 = vsel (!%p219_p3), %vm409_vm0, %v1714_v0, 0  ;;  %p278_p6 = scmp.lt.s32.totalorder (!%p219_p3), %s1825_s24, 16  ;;  %v1717_v2 = vld [vmem:[%s2103_s2 + $0x8] sm:$0x3f] (!%p219_p3)   ;;  %v1720_v4 = vld [vmem:[%s2103_s2] sm:$0x3f] (!%p219_p3)  }
   0xb   : > { %1548 = vmatpush3.bf16.msra.mxu1 (!%p219_p3), %v411_v1  ;;  %1669 = vmatprep.subr.msk.bf16.mxu0 (!%p219_p3), %vm409_vm0, %v1717_v2  ;;  %v902_v3 = vsel (!%p219_p3), %vm409_vm0, %v1717_v2, 0  ;;  %s1494_s5 = sadd.s32 (!%p219_p3), 8, %s1825_s24  ;;  %v1721_v5 = vld [vmem:[%s2103_s2 + $0x18] sm:$0x3f] (!%p219_p3)   ;;  %vm650_vm2 = vsmask.f32 (!%p219_p3), 3328 }
   0xc   : > { %1584 = vmatpush3.bf16.msra.mxu0 (!%p219_p3), %v902_v3  ;;  %1668 = vmatprep.subr.msk.bf16.mxu1 (!%p219_p3), %vm409_vm0, %v1720_v4  ;;  %p295_p7 = scmp.lt.s32.totalorder (!%p219_p3), %s1494_s5, 16  ;;  %vm651_vm3 = vsmask.f32 (!%p219_p3), 7440  ;;  %v524_v8 = vsel (!%p219_p3), %vm409_vm0, %v1720_v4, 0  ;;  %v1872_v10 = vsel (!%p219_p3), %vm409_vm0, %v1721_v5, 0  ;;  %p307_p8 = scmp.lt.s32.totalorder (!%p219_p3), %s1825_s24, 15 }
   0xd   : > { %1670 = vmatprep.subr.msk.bf16.mxu0 (!%p219_p3), %vm409_vm0, %v1721_v5  ;;  %vm1891_vm4 = vmor (!%p219_p3), %vm650_vm2, %vm651_vm3  ;;  %vm1258_vm5 = vcmask (!%p219_p3), 60416  }
  0x10   : > { %s2119_s16 = smov (!%p276_p5, %s1753_s16), 1  ;;  %s2121_s5 = smov (!%p295_p7, %s1494_s5), 16 }
  0x11   : > { %s279_s27 = scalar_select %p278_p6, %s1825_s24, 16 }
  0x12   : > { %s1672_s30 = smul.u32 51, %s2119_s16  ;;  %s2123_s24 = smov (!%p307_p8, %s1825_s24), 15 }
  0x13   : > { %s1671_s6 = smul.u32 3, %s279_s27  ;;  %s1407_s27 = sshll.u32 %s2123_s24, 1 }
  0x14   : > { %s1673_s14 = smul.u32 3, %s2121_s5  ;;  %s1408_s28 = sshll.u32 %s2119_s16, 5 }
  0x15   : > { %s282_s9 = sadd.s32 %s1672_s30, %s1671_s6  ;;  %s311_s29 = sadd.s32 %s1408_s28, %s1407_s27 }
  0x16   : > { %s1403_s10 = sshll.u32 %s282_s9, 2  ;;  %s1900_s15 = sadd.s32 %s1673_s14, %s1672_s30 }
  0x17   : > { %s1853_s13 = scalar_lea.vmem %s2101_s0, %s1403_s10  ;;  %s1405_s22 = sshll.u32 %s1900_s15, 2 }
  0x18   : > { %v1856_v6 = vld [vmem:[%s1853_s13 + $0xc] sm:$0xff]   ;;  %v1861_v7 = vld [vmem:[%s1853_s13 + $0x18] sm:$0xff]   ;;  %v1867_v9 = vld [vmem:[%s1853_s13 + $0x24] sm:$0xff]   ;;  %s1925_s26 = scalar_lea.vmem %s2102_s1, %s1405_s22  ;;  %s1409_s6 = sshll.u32 %s311_s29, 2 }
  0x19   : > { %1549 = vmatprep.mubr.msk.bf16.mxu1 %vm384_vm1, %v1856_v6  ;;  %v623_v11 = vld [vmem:[%s1853_s13] sm:$0xf]  ;;  %v624_v12 = vld [vmem:[%s1853_s13 + $0x4] sm:$0xf]  ;;  %v625_v13 = vld [vmem:[%s1853_s13 + $0x8] sm:$0x1]  ;;  %s2037_s7 = scalar_lea.vmem %s2105_s4, %s1409_s6 }
  0x1a   : > { %1550 = vmatmul.mubr.msk.bf16.vlgmr.msra.gmra.mrb[0].mxu1 %vm384_vm1, %v1861_v7  ;;  %v1881_v14 = vld [vmem:[%s1853_s13 + $0x30] sm:$0xff]   ;;  %v654_v15 = vshrl.u32 %v623_v11, 16  ;;  %v657_v16 = vshll.u32 %v623_v11, 16  ;;  %v663_v17 = vshll.u32 %v624_v12, 16  ;;  %v667_v18 = vshrl.u32 %v624_v12, 16  ;;  %v1887_v36 = vld [vmem:[%s1853_s13 + $0x3c] sm:$0xff]  }
  0x1b   : > { %1553 = vmatprep.mubr.msk.bf16.mxu1 %vm384_vm1, %v1867_v9  ;;  %1566 = vmatpush3.bf16.msra.mxu1 %v524_v8  ;;  %v626_v19 = vld [vmem:[%s1853_s13 + $0xc] sm:$0xf]  ;;  %v673_v20 = vshll.u32 %v625_v13, 16  ;;  %v627_v21 = vld [vmem:[%s1853_s13 + $0x10] sm:$0xf]  ;;  %v1920_v63 = vld [vmem:[%s1853_s13 + $0x54] sm:$0xff]  }
  0x1c   : > { %v628_v22 = vld [vmem:[%s1853_s13 + $0x14] sm:$0x1]  ;;  %v678_v23 = vshrl.u32 %v626_v19, 16  ;;  %v656_v24 = vrot.slane %v654_v15, 4  ;;  %v659_v25 = vrot.slane %v657_v16, 5  ;;  %v665_v26 = vrot.slane %v663_v17, 5 }
  0x1d   : > { %v669_v27 = vrot.slane %v667_v18, 4  ;;  %v675_v28 = vrot.slane %v673_v20, 5  ;;  %v681_v30 = vshll.u32 %v626_v19, 16  ;;  %v687_v31 = vshll.u32 %v627_v21, 16  ;;  %v629_v40 = vld [vmem:[%s1853_s13 + $0x18] sm:$0xf] }
  0x1e   : > { %v680_v29 = vrot.slane %v678_v23, 4  ;;  %v660_v32 = vor.u32 %v659_v25, %v656_v24  ;;  %v691_v34 = vshrl.u32 %v627_v21, 16  ;;  %v697_v35 = vshll.u32 %v628_v22, 16  ;;  %v630_v45 = vld [vmem:[%s1853_s13 + $0x1c] sm:$0xf]  ;;  %v1913_v54 = vld [vmem:[%s1853_s13 + $0x48] sm:$0xff]  }
  0x1f   : > { %v670_v33 = vor.u32 %v669_v27, %v665_v26  ;;  %v683_v38 = vrot.slane %v681_v30, 5  ;;  %v689_v39 = vrot.slane %v687_v31, 5  ;;  %v631_v47 = vld [vmem:[%s1853_s13 + $0x20] sm:$0x1]  ;;  %v702_v48 = vshrl.u32 %v629_v40, 16 }
  0x20   : > { %v661_v41 = vrot.slane %v660_v32, 4  ;;  %v693_v43 = vrot.slane %v691_v34, 4  ;;  %v699_v44 = vrot.slane %v697_v35, 5  ;;  %v705_v49 = vshll.u32 %v629_v40, 16  ;;  %v632_v56 = vld [vmem:[%s1853_s13 + $0x24] sm:$0xf] }
  0x21   : > { %v671_v42 = vrot.slane %v670_v33, 4  ;;  %v684_v46 = vor.u32 %v683_v38, %v680_v29  ;;  %v711_v50 = vshll.u32 %v630_v45, 16  ;;  %v715_v55 = vshrl.u32 %v630_v45, 16  ;;  %v633_v57 = vld [vmem:[%s1853_s13 + $0x28] sm:$0xf] }
  0x22   : > { %1554 = vmatmul.mubr.msk.bf16.gmra.mrb[4].mxu1 %vm384_vm1, %v1881_v14  ;;  %v666_v51 = vsel %vm1891_vm4, %v661_v41, %v665_v26  ;;  %v694_v53 = vor.u32 %v693_v43, %v689_v39  ;;  %v704_v60 = vrot.slane %v702_v48, 4  ;;  %v707_v61 = vrot.slane %v705_v49, 5  ;;  %v634_v62 = vld [vmem:[%s1853_s13 + $0x2c] sm:$0x1]  ;;  %v635_v21 = vld [vmem:[%s1853_s13 + $0x30] sm:$0xf] }
  0x23   : > { %1557 = vmatprep.mubr.msk.bf16.mxu1 %vm384_vm1, %v1887_v36  ;;  %v676_v52 = vsel %vm1891_vm4, %v671_v42, %v675_v28  ;;  %v685_v59 = vrot.slane %v684_v46, 4  ;;  %v713_v1 = vrot.slane %v711_v50, 5  ;;  %v717_v2 = vrot.slane %v715_v55, 4  ;;  %v636_v26 = vld [vmem:[%s1853_s13 + $0x34] sm:$0xf]  ;;  %v1725_v46 = vld [vmem:[%s1925_s26] sm:$0xff]  }
  0x24   : > { %v1441_v58 = vcombine.low %v666_v51, %v676_v52  ;;  %v695_v0 = vrot.slane %v694_v53, 4  ;;  %v721_v3 = vshll.u32 %v631_v47, 16  ;;  %v708_v5 = vor.u32 %v707_v61, %v704_v60  ;;  %v637_v29 = vld [vmem:[%s1853_s13 + $0x38] sm:$0x1]  ;;  %v638_v38 = vld [vmem:[%s1853_s13 + $0x3c] sm:$0xf] }
  0x25   : > { %v690_v4 = vsel %vm1891_vm4, %v685_v59, %v689_v39  ;;  %v726_v8 = vshrl.u32 %v632_v56, 16  ;;  %v729_v11 = vshll.u32 %v632_v56, 16  ;;  %v718_v13 = vor.u32 %v717_v2, %v713_v1  ;;  %v639_v43 = vld [vmem:[%s1853_s13 + $0x40] sm:$0xf]  ;;  %v640_v51 = vld [vmem:[%s1853_s13 + $0x44] sm:$0x1] }
  0x26   : > { %1585 = vmatprep.mubr.msk.bf16.mxu0 %vm384_vm1, %v1441_v58  ;;  %v700_v12 = vsel %vm1891_vm4, %v695_v0, %v699_v44  ;;  %v723_v15 = vrot.slane %v721_v3, 5  ;;  %v735_v16 = vshll.u32 %v633_v57, 16  ;;  %v709_v18 = vrot.slane %v708_v5, 4  ;;  %v1726_v44 = vld [vmem:[%s1853_s13] sm:$0xff]   ;;  %v641_v0 = vld [vmem:[%s1853_s13 + $0x48] sm:$0xf] }
  0x27   : > { %v1932_v17 = vcombine.low %v690_v4, %v700_v12  ;;  %v728_v19 = vrot.slane %v726_v8, 4  ;;  %v731_v20 = vrot.slane %v729_v11, 5  ;;  %v719_v22 = vrot.slane %v718_v13, 4  ;;  %v642_v5 = vld [vmem:[%s1853_s13 + $0x4c] sm:$0xf] }
  0x28   : > { %v737_v23 = vrot.slane %v735_v16, 5  ;;  %v739_v24 = vshrl.u32 %v633_v57, 16  ;;  %v745_v25 = vshll.u32 %v634_v62, 16  ;;  %v714_v27 = vsel %vm1891_vm4, %v709_v18, %v713_v1 }
  0x29   : > { %1586 = vmatmul.mubr.msk.bf16.vlgmr.msra.gmra.mrb[0].mxu0 %vm384_vm1, %v1932_v17  ;;  %v732_v28 = vor.u32 %v731_v20, %v728_v19  ;;  %v750_v30 = vshrl.u32 %v635_v21, 16  ;;  %v753_v31 = vshll.u32 %v635_v21, 16  ;;  %v724_v32 = vsel %vm1891_vm4, %v719_v22, %v723_v15  ;;  %v643_v15 = vld [vmem:[%s1853_s13 + $0x50] sm:$0x1] }
  0x2a   : > { %1558 = vmatmul.mubr.msk.bf16.gmra.mrb[8].mxu1 %vm384_vm1, %v1913_v54  ;;  %1602 = vmatpush3.bf16.msra.mxu0 %v1872_v10  ;;  %v741_v33 = vrot.slane %v739_v24, 4  ;;  %v747_v34 = vrot.slane %v745_v25, 5  ;;  %v759_v35 = vshll.u32 %v636_v26, 16  ;;  %v1949_v39 = vcombine.low %v714_v27, %v724_v32  ;;  %v644_v25 = vld [vmem:[%s1853_s13 + $0x54] sm:$0xf] }
  0x2b   : > { %1561 = vmatprep.mubr.msk.bf16.mxu1 %vm384_vm1, %v1920_v63  ;;  %v733_v40 = vrot.slane %v732_v28, 4  ;;  %v752_v41 = vrot.slane %v750_v30, 4  ;;  %v755_v42 = vrot.slane %v753_v31, 5  ;;  %v763_v48 = vshrl.u32 %v636_v26, 16  ;;  %v645_v30 = vld [vmem:[%s1853_s13 + $0x58] sm:$0xf] }
  0x2c   : > { %v742_v45 = vor.u32 %v741_v33, %v737_v23  ;;  %v761_v47 = vrot.slane %v759_v35, 5  ;;  %v769_v10 = vshll.u32 %v637_v29, 16  ;;  %1589 = vmatprep.mubr.msk.bf16.mxu0 %vm384_vm1, %v1949_v39  ;;  %v774_v52 = vshrl.u32 %v638_v38, 16 }
  0x2d   : > { %v738_v49 = vsel %vm1891_vm4, %v733_v40, %v737_v23  ;;  %v756_v50 = vor.u32 %v755_v42, %v752_v41  ;;  %v777_v53 = vshll.u32 %v638_v38, 16  ;;  %v765_v56 = vrot.slane %v763_v48, 4  ;;  %v646_v41 = vld [vmem:[%s1853_s13 + $0x5c] sm:$0x1] }
  0x2e   : > { %v743_v55 = vrot.slane %v742_v45, 4  ;;  %v771_v57 = vrot.slane %v769_v10, 5  ;;  %v783_v58 = vshll.u32 %v639_v43, 16  ;;  %v776_v60 = vrot.slane %v774_v52, 4 }
  0x2f   : > { %v757_v59 = vrot.slane %v756_v50, 4  ;;  %v779_v61 = vrot.slane %v777_v53, 5  ;;  %v787_v62 = vshrl.u32 %v639_v43, 16  ;;  %v766_v2 = vor.u32 %v765_v56, %v761_v47 }
  0x30   : > { %v748_v1 = vsel %vm1891_vm4, %v743_v55, %v747_v34  ;;  %v785_v3 = vrot.slane %v783_v58, 5  ;;  %v793_v4 = vshll.u32 %v640_v51, 16  ;;  %v798_v19 = vshrl.u32 %v641_v0, 16 }
  0x31   : > { %v1964_v8 = vcombine.low %v738_v49, %v748_v1  ;;  %v762_v11 = vsel %vm1891_vm4, %v757_v59, %v761_v47  ;;  %v780_v12 = vor.u32 %v779_v61, %v776_v60  ;;  %v789_v13 = vrot.slane %v787_v62, 4 }
  0x32   : > { %1562 = vmatmul.mubr.msk.bf16.gmra.mrb[12].mxu1 %vm384_vm1, %v1725_v46  ;;  %v767_v16 = vrot.slane %v766_v2, 4  ;;  %v795_v18 = vrot.slane %v793_v4, 5  ;;  %v801_v20 = vshll.u32 %v641_v0, 16  ;;  %v807_v23 = vshll.u32 %v642_v5, 16  ;;  %v647_v2 = vld [vmem:[%s1925_s26] sm:$0xf] }
  0x33   : > { %1567 = vmatprep.mubr.msk.bf16.mxu1 %vm384_vm1, %v1726_v44  ;;  %1590 = vmatmul.mubr.msk.bf16.gmra.mrb[4].mxu0 %vm384_vm1, %v1964_v8  ;;  %v781_v21 = vrot.slane %v780_v12, 4  ;;  %v790_v22 = vor.u32 %v789_v13, %v785_v3  ;;  %v811_v24 = vshrl.u32 %v642_v5, 16  ;;  %v800_v27 = vrot.slane %v798_v19, 4 }
  0x34   : > { %v772_v26 = vsel %vm1891_vm4, %v767_v16, %v771_v57  ;;  %v803_v28 = vrot.slane %v801_v20, 5  ;;  %v817_v29 = vshll.u32 %v643_v15, 16  ;;  %v809_v34 = vrot.slane %v807_v23, 5 }
  0x35   : > { %v1445_v31 = vcombine.low %v762_v11, %v772_v26  ;;  %v786_v32 = vsel %vm1891_vm4, %v781_v21, %v785_v3  ;;  %v791_v33 = vrot.slane %v790_v22, 4  ;;  %v813_v38 = vrot.slane %v811_v24, 4  ;;  %v648_v3 = vld [vmem:[%s1925_s26 + $0x4] sm:$0xf] }
  0x36   : > { %v804_v35 = vor.u32 %v803_v28, %v800_v27  ;;  %v819_v40 = vrot.slane %v817_v29, 5  ;;  %v822_v42 = vshrl.u32 %v644_v25, 16  ;;  %v825_v44 = vshll.u32 %v644_v25, 16 }
  0x37   : > { %1593 = vmatprep.mubr.msk.bf16.mxu0 %vm384_vm1, %v1445_v31  ;;  %v796_v43 = vsel %vm1891_vm4, %v791_v33, %v795_v18  ;;  %v831_v45 = vshll.u32 %v645_v30, 16  ;;  %v835_v46 = vshrl.u32 %v645_v30, 16  ;;  %v814_v10 = vor.u32 %v813_v38, %v809_v34 }
  0x38   : > { %v1446_v47 = vcombine.low %v786_v32, %v796_v43  ;;  %v805_v48 = vrot.slane %v804_v35, 4  ;;  %v824_v49 = vrot.slane %v822_v42, 4  ;;  %v827_v50 = vrot.slane %v825_v44, 5  ;;  %v2031_v32 = vld [vmem:[%s2104_s3] ss:$0 sm:$0xff] }
  0x39   : > { %v833_v51 = vrot.slane %v831_v45, 5  ;;  %v837_v52 = vrot.slane %v835_v46, 4  ;;  %v841_v53 = vshll.u32 %v646_v41, 16  ;;  %v815_v56 = vrot.slane %v814_v10, 4 }
  0x3a   : > { %1568 = vmatmul.mubr.msk.bf16.vlgmr.msra.gmra.mrb[0].mxu1 %vm384_vm1, %v1856_v6  ;;  %v810_v55 = vsel %vm1891_vm4, %v805_v48, %v809_v34  ;;  %v828_v57 = vor.u32 %v827_v50, %v824_v49  ;;  %v1027_v4 = vshll.u32 %v648_v3, 16  ;;  %v1031_v5 = vshrl.u32 %v648_v3, 16 }
  0x3b   : > { %1571 = vmatprep.mubr.msk.bf16.mxu1 %vm384_vm1, %v1861_v7  ;;  %1594 = vmatmul.mubr.msk.bf16.gmra.mrb[8].mxu0 %vm384_vm1, %v1446_v47  ;;  %v838_v58 = vor.u32 %v837_v52, %v833_v51  ;;  %v843_v6 = vrot.slane %v841_v53, 5  ;;  %v820_v59 = vsel %vm1891_vm4, %v815_v56, %v819_v40 }
  0x3c   : > { %v1447_v60 = vcombine.low %v810_v55, %v820_v59  ;;  %v829_v61 = vrot.slane %v828_v57, 4  ;;  %v1029_v11 = vrot.slane %v1027_v4, 5  ;;  %v1033_v12 = vrot.slane %v1031_v5, 4 }
  0x3d   : > { %v839_v62 = vrot.slane %v838_v58, 4 }
  0x3e   : > { %1597 = vmatprep.mubr.msk.bf16.mxu0 %vm384_vm1, %v1447_v60  ;;  %v834_v7 = vsel %vm1891_vm4, %v829_v61, %v833_v51  ;;  %v1034_v13 = vor.u32 %v1033_v12, %v1029_v11 }
  0x3f   : > { %v844_v0 = vsel %vm1891_vm4, %v839_v62, %v843_v6 }
  0x40   : > { %v1448_v1 = vcombine.low %v834_v7, %v844_v0  ;;  %v1035_v16 = vrot.slane %v1034_v13, 4 }
  0x42   : > { %1572 = vmatmul.mubr.msk.bf16.gmra.mrb[4].mxu1 %vm384_vm1, %v1867_v9  ;;  %v1018_v9 = vshrl.u32 %v647_v2, 16 }
  0x43   : > { %1575 = vmatprep.mubr.msk.bf16.mxu1 %vm384_vm1, %v1881_v14  ;;  %1598 = vmatmul.mubr.msk.bf16.gmra.mrb[12].mxu0 %vm384_vm1, %v1448_v1  ;;  %v1021_v14 = vshll.u32 %v647_v2, 16 }
  0x44   : > { %1603 = vmatprep.mubr.msk.bf16.mxu0 %vm384_vm1, %v1932_v17  ;;  %v1020_v17 = vrot.slane %v1018_v9, 4 }
  0x4a   : > { %1576 = vmatmul.mubr.msk.bf16.gmra.mrb[8].mxu1 %vm384_vm1, %v1887_v36  ;;  %v1023_v36 = vrot.slane %v1021_v14, 5 }
  0x4b   : > { %1579 = vmatprep.mubr.msk.bf16.mxu1 %vm384_vm1, %v1913_v54  ;;  %1604 = vmatmul.mubr.msk.bf16.vlgmr.msra.gmra.mrb[0].mxu0 %vm384_vm1, %v1949_v39  ;;  %v649_v54 = vld [vmem:[%s1925_s26 + $0x8] sm:$0x1] }
  0x4c   : > { %1607 = vmatprep.mubr.msk.bf16.mxu0 %vm384_vm1, %v1964_v8  ;;  %v1024_v39 = vor.u32 %v1023_v36, %v1020_v17  ;;  %v1037_v8 = vshll.u32 %v649_v54, 16 }
  0x4e   : > { %v1025_v15 = vrot.slane %v1024_v39, 4  ;;  %v1039_v18 = vrot.slane %v1037_v8, 5 }
  0x50   : > { %v1040_v19 = vsel %vm1891_vm4, %v1035_v16, %v1039_v18 }
  0x52   : > { %1580 = vmatmul.mubr.msk.bf16.gmra.mrb[12].mxu1 %vm384_vm1, %v1920_v63  ;;  %v1030_v63 = vsel %vm1891_vm4, %v1025_v15, %v1029_v11 }
  0x53   : > { %1608 = vmatmul.mubr.msk.bf16.gmra.mrb[4].mxu0 %vm384_vm1, %v1445_v31  ;;  %v1460_v20 = vcombine.low %v1030_v63, %v1040_v19 }
  0x54   : > { %1611 = vmatprep.mubr.msk.bf16.mxu0 %vm384_vm1, %v1446_v47 }
  0x5b   : > { %1612 = vmatmul.mubr.msk.bf16.gmra.mrb[8].mxu0 %vm384_vm1, %v1447_v60 }
  0x5c   : > { %1615 = vmatprep.mubr.msk.bf16.mxu0 %vm384_vm1, %v1448_v1 }
  0x63   : > { %1616 = vmatmul.mubr.msk.bf16.gmra.mrb[12].mxu0 %vm384_vm1, %v1460_v20 }
 0x10d   : > { %v1569_v21 = vpop.f32.mrb[0].mxu1 }
 0x10e   : > { %v560_v22 = vpop.f32.mrb[1].mxu1 }
 0x10f   : > { %v1570_v23 = vpop.f32.mrb[2].mxu1 }
 0x110   : > { %v563_v24 = vpop.f32.mrb[3].mxu1 }
 0x115   : > { %v1573_v25 = vpop.f32.mrb[4].mxu1 }
 0x116   : > { %v576_v26 = vpop.f32.mrb[5].mxu1 }
 0x117   : > { %v1574_v27 = vpop.f32.mrb[6].mxu1 }
 0x118   : > { %v579_v28 = vpop.f32.mrb[7].mxu1 }
 0x11d   : > { %v1577_v29 = vpop.f32.mrb[8].mxu1 }
 0x11e   : > { %v592_v30 = vpop.f32.mrb[9].mxu1  ;;  %v1605_v31 = vpop.f32.mrb[0].mxu0 }
 0x11f   : > { %v1578_v37 = vpop.f32.mrb[10].mxu1  ;;  %v1619_v34 = vadd.f32 %v1605_v31, %v1569_v21  ;;  %v1092_v35 = vpop.f32.mrb[1].mxu0 }
 0x120   : > { %v595_v33 = vpop.f32.mrb[11].mxu1  ;;  %v1620_v38 = vadd.f32 %v1092_v35, %v560_v22  ;;  %v1606_v40 = vpop.f32.mrb[2].mxu0 }
 0x121   : > { %v1180_v41 = vadd.f32 %v1619_v34, %v2031_v32  ;;  %v1621_v42 = vadd.f32 %v1606_v40, %v1570_v23  ;;  %v1095_v43 = vpop.f32.mrb[3].mxu0 }
 0x122   : > { %v1178_v44 = vadd.f32 %v1620_v38, %v2031_v32  ;;  %v1622_v45 = vadd.f32 %v1095_v43, %v563_v24 }
 0x123   : > { %v1497_v46 = vpack.c.bf16 %v1180_v41, %v1180_v41  ;;  %v1181_v47 = vadd.f32 %v1621_v42, %v2031_v32 }
 0x124   : > { %v1495_v10 = vpack.c.bf16 %v1178_v44, %v1178_v44  ;;  %v1179_v49 = vadd.f32 %v1622_v45, %v2031_v32 }
 0x125   : > { %v1581_v48 = vpop.f32.mrb[12].mxu1  ;;  %1261 = vst.msk [vmem:[%s2037_s7 + $0x8] sm:$0xf] %vm1258_vm5, %v1497_v46  ;;  %v1498_v51 = vpack.c.bf16 %v1181_v47, %v1181_v47 }
 0x126   : > { %v608_v50 = vpop.f32.mrb[13].mxu1  ;;  %1259 = vst.msk [vmem:[%s2037_s7] sm:$0xf] %vm1258_vm5, %v1495_v10  ;;  %v1496_v53 = vpack.c.bf16 %v1179_v49, %v1179_v49  ;;  %v1609_v55 = vpop.f32.mrb[4].mxu0 }
 0x127   : > { %v1582_v52 = vpop.f32.mrb[14].mxu1  ;;  %1262 = vst.msk [vmem:[%s2037_s7 + $0xc] sm:$0xf] %vm1258_vm5, %v1498_v51  ;;  %v1623_v57 = vadd.f32 %v1609_v55, %v1573_v25  ;;  %v1108_v58 = vpop.f32.mrb[5].mxu0 }
 0x128   : > { %v611_v56 = vpop.f32.mrb[15].mxu1  ;;  %1260 = vst.msk [vmem:[%s2037_s7 + $0x4] sm:$0xf] %vm1258_vm5, %v1496_v53  ;;  %v1624_v6 = vadd.f32 %v1108_v58, %v576_v26  ;;  %v1610_v59 = vpop.f32.mrb[6].mxu0 }
 0x129   : > { %v1184_v60 = vadd.f32 %v1623_v57, %v2031_v32  ;;  %v1625_v61 = vadd.f32 %v1610_v59, %v1574_v27  ;;  %v1111_v62 = vpop.f32.mrb[7].mxu0 }
 0x12a   : > { %v1182_v7 = vadd.f32 %v1624_v6, %v2031_v32  ;;  %v1626_v0 = vadd.f32 %v1111_v62, %v579_v28 }
 0x12b   : > { %v1501_v1 = vpack.c.bf16 %v1184_v60, %v1184_v60  ;;  %v1185_v2 = vadd.f32 %v1625_v61, %v2031_v32 }
 0x12c   : > { %v1499_v3 = vpack.c.bf16 %v1182_v7, %v1182_v7  ;;  %v1183_v9 = vadd.f32 %v1626_v0, %v2031_v32 }
 0x12d   : > { %1265 = vst.msk [vmem:[%s2037_s7 + $0x18] sm:$0xf] %vm1258_vm5, %v1501_v1  ;;  %v1502_v14 = vpack.c.bf16 %v1185_v2, %v1185_v2 }
 0x12e   : > { %1263 = vst.msk [vmem:[%s2037_s7 + $0x10] sm:$0xf] %vm1258_vm5, %v1499_v3  ;;  %v1500_v4 = vpack.c.bf16 %v1183_v9, %v1183_v9  ;;  %v1613_v5 = vpop.f32.mrb[8].mxu0 }
 0x12f   : > { %1266 = vst.msk [vmem:[%s2037_s7 + $0x1c] sm:$0xf] %vm1258_vm5, %v1502_v14  ;;  %v1627_v17 = vadd.f32 %v1613_v5, %v1577_v29  ;;  %v1124_v36 = vpop.f32.mrb[9].mxu0 }
 0x130   : > { %1264 = vst.msk [vmem:[%s2037_s7 + $0x14] sm:$0xf] %vm1258_vm5, %v1500_v4  ;;  %v1628_v11 = vadd.f32 %v1124_v36, %v592_v30  ;;  %v1614_v12 = vpop.f32.mrb[10].mxu0 }
 0x131   : > { %v1188_v54 = vadd.f32 %v1627_v17, %v2031_v32  ;;  %v1629_v39 = vadd.f32 %v1614_v12, %v1578_v37  ;;  %v1127_v13 = vpop.f32.mrb[11].mxu0 }
 0x132   : > { %v1186_v8 = vadd.f32 %v1628_v11, %v2031_v32  ;;  %v1630_v15 = vadd.f32 %v1127_v13, %v595_v33 }
 0x133   : > { %v1505_v16 = vpack.c.bf16 %v1188_v54, %v1188_v54  ;;  %v1189_v18 = vadd.f32 %v1629_v39, %v2031_v32 }
 0x134   : > { %v1503_v63 = vpack.c.bf16 %v1186_v8, %v1186_v8  ;;  %v1187_v19 = vadd.f32 %v1630_v15, %v2031_v32 }
 0x135   : > { %1269 = vst.msk [vmem:[%s2037_s7 + $0x28] sm:$0xf] %vm1258_vm5, %v1505_v16  ;;  %v1506_v20 = vpack.c.bf16 %v1189_v18, %v1189_v18 }
 0x136   : > { %1267 = vst.msk [vmem:[%s2037_s7 + $0x20] sm:$0xf] %vm1258_vm5, %v1503_v63  ;;  %v1504_v21 = vpack.c.bf16 %v1187_v19, %v1187_v19  ;;  %v1617_v22 = vpop.f32.mrb[12].mxu0 }
 0x137   : > { %1270 = vst.msk [vmem:[%s2037_s7 + $0x2c] sm:$0xf] %vm1258_vm5, %v1506_v20  ;;  %v1631_v23 = vadd.f32 %v1617_v22, %v1581_v48  ;;  %v1140_v24 = vpop.f32.mrb[13].mxu0 }
 0x138   : > { %1268 = vst.msk [vmem:[%s2037_s7 + $0x24] sm:$0xf] %vm1258_vm5, %v1504_v21  ;;  %v1632_v25 = vadd.f32 %v1140_v24, %v608_v50  ;;  %v1618_v26 = vpop.f32.mrb[14].mxu0 }
 0x139   : > { %v1192_v27 = vadd.f32 %v1631_v23, %v2031_v32  ;;  %v1633_v28 = vadd.f32 %v1618_v26, %v1582_v52  ;;  %v1143_v29 = vpop.f32.mrb[15].mxu0 }
 0x13a   : > { %v1190_v30 = vadd.f32 %v1632_v25, %v2031_v32  ;;  %v1634_v37 = vadd.f32 %v1143_v29, %v611_v56 }
 0x13b   : > { %v1509_v31 = vpack.c.bf16 %v1192_v27, %v1192_v27  ;;  %v1193_v33 = vadd.f32 %v1633_v28, %v2031_v32 }
 0x13c   : > { %v1507_v34 = vpack.c.bf16 %v1190_v30, %v1190_v30  ;;  %v1191_v35 = vadd.f32 %v1634_v37, %v2031_v32 }
 0x13d   : > { %1273 = vst.msk [vmem:[%s2037_s7 + $0x38] sm:$0xf] %vm1258_vm5, %v1509_v31  ;;  %v1510_v38 = vpack.c.bf16 %v1193_v33, %v1193_v33 }
 0x13e   : > { %1271 = vst.msk [vmem:[%s2037_s7 + $0x30] sm:$0xf] %vm1258_vm5, %v1507_v34  ;;  %v1508_v40 = vpack.c.bf16 %v1191_v35, %v1191_v35 }
 0x13f   : > { %1274 = vst.msk [vmem:[%s2037_s7 + $0x3c] sm:$0xf] %vm1258_vm5, %v1510_v38 }
 0x140   : > { %1272 = vst.msk [vmem:[%s2037_s7 + $0x34] sm:$0xf] %vm1258_vm5, %v1508_v40 }
 0x141 PF: > { %s14_s19 = sadd.s32 1, %s1765_s19   ;;  %s2108_s15 = smov %s1757_s17 }
 0x142   : > { %p11_p9 = scmp.ge.s32.totalorder %s14_s19, 6   ;;  %s2109_s16 = smov %s1761_s18 }
 0x143   : > { %s2110_s17 = smov %s2113_s20  ;;  %s2111_s18 = smov %s2117_s21 }
 0x144   :  { %13 = sbr.rel (!%p11_p9) target bundleno = 3 (0x3), region = 72 }

// kernel: _lambda_.19
= control target key start
LH: loop header
LB: loop body
LE: loop exit
PB: predicated region body
PF: predicated region fallthrough
CT: control target
= control target key end

     0   :  { %s396_s6 = smov 0   ;;  %s398_s7 = smov 0   ;;  %s455_s0 = inlined_call_operand.vmem [shape: bf16[2,64,16], index: 0, kind: input, shape index: {}]   ;;  %s456_s1 = inlined_call_operand.vmem [shape: f32[2,2,16], index: 1, kind: output, shape index: {}]  }
   0x1   :  { %s400_s8 = smov 0  }
   0x2 LB: > { %s23_s9 = sadd.s32 1, %s379_s7  ;;  %p308_p0 = scmp.ge.s32.totalorder %s383_s8, 1  ;;  %s383_s8 = sphi %s400_s8, %s11_s8   ;;  %s379_s7 = sphi %s398_s7, %s458_s7   ;;  %s375_s6 = sphi %s396_s6, %s457_s6  }
   0x3   : > { %p25_p1 = scmp.ge.s32.totalorder %s23_s9, 2  ;;  %p106_p2 = scmp.lt.s32.totalorder %s383_s8, 3 }
   0x5   : > { %s460_s9 = smov (%p25_p1, %s23_s9), 0  ;;  %p107_p3 = pnand %p308_p0, %p106_p2 }
   0x6   : > { %p130_p4 = scmp.lt.s32.totalorder (!%p107_p3), %s375_s6, 1  ;;  %vm147_vm0 = vcmask (!%p107_p3), 123904   ;;  %v385_v0 = vmov (!%p107_p3), 0.0   ;;  %vm165_vm1 = vcmask (!%p107_p3), 130048   ;;  %vm217_vm2 = vcmask (!%p107_p3), 1040384  }
   0x7   : > { %110 = sbr.rel (%p107_p3) target bundleno = 86 (0x56), region = 24 }
   0xe   : > { %s462_s6 = smov (!%p130_p4, %s375_s6), 1 }
   0xf   : > { %s314_s10 = sshll.u32 %s462_s6, 5  ;;  %s311_s11 = sshll.u32 %s462_s6, 1 }
  0x10   : > { %s137_s14 = scalar_lea.vmem %s455_s0, %s314_s10  ;;  %s420_s17 = scalar_lea.vmem %s456_s1, %s311_s11 }
  0x11   : > { %148 = vst.msk [vmem:[%s420_s17] sm:$0x3] %vm147_vm0, %v385_v0  ;;  %v316_v1 = vld [vmem:[%s137_s14] sm:$0xff]   ;;  %v331_v2 = vld [vmem:[%s137_s14 + $0x8] sm:$0xff]   ;;  %v332_v3 = vld [vmem:[%s137_s14 + $0x10] sm:$0xff]  }
  0x12   : > { %v317_v4 = vunpack.c.l.bf16 %v316_v1  ;;  %v318_v5 = vunpack.c.h.bf16 %v316_v1  ;;  %v321_v6 = vunpack.c.l.bf16 %v331_v2  ;;  %v322_v7 = vunpack.c.h.bf16 %v331_v2  ;;  %v333_v9 = vld [vmem:[%s137_s14 + $0x18] sm:$0xff]  }
  0x13   : > { %v325_v8 = vunpack.c.l.bf16 %v332_v3  ;;  %v326_v13 = vunpack.c.h.bf16 %v332_v3  ;;  %v329_v19 = vunpack.c.l.bf16 %v333_v9  ;;  %v330_v29 = vunpack.c.h.bf16 %v333_v9 }
  0x14   : > { %v166_v10 = vsel %vm165_vm1, %v317_v4, 0.0  ;;  %v167_v11 = vsel %vm165_vm1, %v318_v5, 0.0  ;;  %v169_v12 = vsel %vm165_vm1, %v321_v6, 0.0  ;;  %v171_v15 = vsel %vm165_vm1, %v322_v7, 0.0 }
  0x15   : > { %v168_v14 = vadd.f32 %v167_v11, %v166_v10  ;;  %v187_v16 = vmul.f32 %v317_v4, %v317_v4  ;;  %v188_v17 = vmul.f32 %v318_v5, %v318_v5  ;;  %v189_v18 = vmul.f32 %v321_v6, %v321_v6 }
  0x16   : > { %v190_v21 = vmul.f32 %v322_v7, %v322_v7  ;;  %v173_v22 = vsel %vm165_vm1, %v325_v8, 0.0  ;;  %v191_v23 = vmul.f32 %v325_v8, %v325_v8  ;;  %v175_v30 = vsel %vm165_vm1, %v326_v13, 0.0 }
  0x17   : > { %v170_v20 = vadd.f32 %v169_v12, %v168_v14  ;;  %v195_v24 = vsel %vm165_vm1, %v187_v16, 0.0  ;;  %v196_v25 = vsel %vm165_vm1, %v188_v17, 0.0  ;;  %v198_v28 = vsel %vm165_vm1, %v189_v18, 0.0 }
  0x18   : > { %v197_v27 = vadd.f32 %v196_v25, %v195_v24  ;;  %v192_v31 = vmul.f32 %v326_v13, %v326_v13  ;;  %v200_v32 = vsel %vm165_vm1, %v190_v21, 0.0  ;;  %v177_v35 = vsel %vm165_vm1, %v329_v19, 0.0  ;;  %v216_v63 = vld [vmem:[%s420_s17] sm:$0x3] }
  0x19   : > { %v172_v26 = vadd.f32 %v171_v15, %v170_v20  ;;  %v193_v36 = vmul.f32 %v329_v19, %v329_v19  ;;  %v202_v37 = vsel %vm165_vm1, %v191_v23, 0.0  ;;  %v179_v40 = vsel %vm165_vm1, %v330_v29, 0.0 }
  0x1a   : > { %v199_v34 = vadd.f32 %v198_v28, %v197_v27  ;;  %v194_v41 = vmul.f32 %v330_v29, %v330_v29  ;;  %v204_v42 = vsel %vm165_vm1, %v192_v31, 0.0 }
  0x1b   : > { %v174_v33 = vadd.f32 %v173_v22, %v172_v26  ;;  %v206_v45 = vsel %vm165_vm1, %v193_v36, 0.0 }
  0x1c   : > { %v201_v39 = vadd.f32 %v200_v32, %v199_v34  ;;  %v208_v48 = vsel %vm165_vm1, %v194_v41, 0.0 }
  0x1d   : > { %v176_v38 = vadd.f32 %v175_v30, %v174_v33 }
  0x1e   : > { %v203_v44 = vadd.f32 %v202_v37, %v201_v39 }
  0x1f   : > { %v178_v43 = vadd.f32 %v177_v35, %v176_v38 }
  0x20   : > { %v205_v47 = vadd.f32 %v204_v42, %v203_v44 }
  0x21   : > { %v180_v46 = vadd.f32 %v179_v40, %v178_v43 }
  0x22   : > { %v207_v49 = vadd.f32 %v206_v45, %v205_v47 }
  0x23   : > { %v181_v50 = vrot.slane %v180_v46, 4 }
  0x24   : > { %v209_v52 = vadd.f32 %v208_v48, %v207_v49 }
  0x25   : > { %v182_v51 = vadd.f32 %v181_v50, %v180_v46 }
  0x26   : > { %v210_v54 = vrot.slane %v209_v52, 4 }
  0x27   : > { %v183_v53 = vrot.slane %v182_v51, 2 }
  0x28   : > { %v211_v56 = vadd.f32 %v210_v54, %v209_v52 }
  0x29   : > { %v184_v55 = vadd.f32 %v183_v53, %v182_v51 }
  0x2a   : > { %v212_v58 = vrot.slane %v211_v56, 2 }
  0x2b   : > { %v185_v57 = vrot.slane %v184_v55, 1 }
  0x2c   : > { %v213_v59 = vadd.f32 %v212_v58, %v211_v56 }
  0x2d   : > { %v186_v60 = vadd.f32 %v185_v57, %v184_v55 }
  0x2e   : > { %v214_v61 = vrot.slane %v213_v59, 1 }
  0x30   : > { %v215_v62 = vadd.f32 %v214_v61, %v213_v59 }
  0x32   : > { %v218_v0 = vsel %vm217_vm2, %v186_v60, %v215_v62 }
  0x33   : > { %v219_v1 = vadd.f32 %v218_v0, %v216_v63 }
  0x35   : > { %221 = vst.msk [vmem:[%s420_s17] sm:$0x3] %vm147_vm0, %v219_v1 }
  0x3c   : > { %v225_v2 = vld [vmem:[%s420_s17] sm:$0x3] }
  0x3d   : > { %v226_v3 = vmul.f32 0.015625, %v225_v2 }
  0x3f   : > { %v227_v4 = vmul.f32 %v226_v3, %v226_v3 }
  0x41   : > { %v229_v5 = vrot.slane %v227_v4, 7 }
  0x43   : > { %v231_v6 = vsub.f32 %v226_v3, %v229_v5 }
  0x45   : > { %v232_v7 = vmax.f32 %v231_v6, 0.0 }
  0x47   : > { %v233_v8 = vadd.f32 1e-05, %v232_v7 }
  0x49   : > { %359 = vrsqrt.f32 %v233_v8 }
  0x53   : > { %v360_v9 = vpop.eup %359 }
  0x54   : > { %v235_v10 = vsel %vm217_vm2, %v226_v3, %v360_v9 }
  0x55   : > { %236 = vst.msk [vmem:[%s420_s17] sm:$0x3] %vm147_vm0, %v235_v10 }
  0x56 PF: > { %s11_s8 = sadd.s32 1, %s383_s8   ;;  %s457_s6 = smov %s379_s7 }
  0x57   : > { %p8_p5 = scmp.ge.s32.totalorder %s11_s8, 4   ;;  %s458_s7 = smov %s460_s9 }
  0x59   :  { %10 = sbr.rel (!%p8_p5) target bundleno = 2 (0x2), region = 62 }

// kernel: _lambda_.18
= control target key start
LH: loop header
LB: loop body
LE: loop exit
PB: predicated region body
PF: predicated region fallthrough
CT: control target
= control target key end

     0   :  { %s1136_s15 = smov 0   ;;  %s1138_s16 = smov 0   ;;  %s1304_s0 = inlined_call_operand.vmem [shape: bf16[2,9,9,32], index: 0, kind: input, shape index: {}, may-alias: {0,1}]   ;;  %s1305_s1 = inlined_call_operand.vmem [shape: bf16[2,9,9,32], index: 1, kind: input, shape index: {}, may-alias: {0,1}]   ;;  %s1306_s2 = inlined_call_operand.vmem [shape: bf16[4,32,16], index: 2, kind: input, shape index: {}]   ;;  %s1307_s3 = inlined_call_operand.vmem [shape: f32[1,16], index: 3, kind: input, shape index: {}]   ;;  %s1308_s4 = inlined_call_operand.vmem [shape: bf16[2,8,8,16], index: 4, kind: output, shape index: {}]  }
   0x1   :  { %s1140_s17 = smov 0   ;;  %s1142_s18 = smov 0  }
   0x2   :  { %s1144_s19 = smov 0  }
   0x3 LB: > { %s23_s20 = sadd.s32 1, %s1101_s17  ;;  %s26_s21 = sadd.s32 1, %s1105_s18  ;;  %s1109_s19 = sphi %s1144_s19, %s14_s19   ;;  %s1105_s18 = sphi %s1142_s18, %s1314_s18   ;;  %s1101_s17 = sphi %s1140_s17, %s1313_s17   ;;  %s1097_s16 = sphi %s1138_s16, %s1312_s16   ;;  %s1093_s15 = sphi %s1136_s15, %s1311_s15  }
   0x4   : > { %p24_p0 = scmp.ge.s32.totalorder %s23_s20, 2  ;;  %p907_p1 = scmp.ge.s32.totalorder %s1109_s19, 1 }
   0x5   : > { %p218_p2 = scmp.lt.s32.totalorder %s1109_s19, 5 }
   0x6   : > { %s1316_s20 = smov (%p24_p0, %s23_s20), 0  ;;  %s1318_s21 = smov (!%p24_p0, %s26_s21), %s1105_s18 }
   0x7   : > { %p219_p3 = pnand %p907_p1, %p218_p2  ;;  %p28_p4 = scmp.ge.s32.totalorder %s1318_s21, 2 }
   0x8   : > { %v1063_v0 = vld [vmem:[%s1306_s2 + $0x20] sm:$0xff] (!%p219_p3)   ;;  %s1169_s24 = sshll.u32 (!%p219_p3), %s1093_s15, 2  ;;  %v1064_v1 = vld [vmem:[%s1306_s2 + $0x28] sm:$0xff] (!%p219_p3)   ;;  %p275_p5 = scmp.lt.s32.totalorder (!%p219_p3), %s1097_s16, 1  ;;  %v1065_v2 = vld [vmem:[%s1306_s2 + $0x10] sm:$0xff] (!%p219_p3)   ;;  %vm366_vm4 = vcmask (!%p219_p3), 261120  }
   0x9   : > { %s1320_s21 = smov (%p28_p4, %s1318_s21), 0  ;;  %222 = sbr.rel (%p219_p3) target bundleno = 288 (0x120), region = 36 }
   0xa   : > { %978 = vmatprep.subr.bf16.mxu1 (!%p219_p3), %v1063_v0  ;;  %p277_p6 = scmp.lt.s32.totalorder (!%p219_p3), %s1169_s24, 8  ;;  %s961_s27 = sadd.s32 (!%p219_p3), 4, %s1169_s24  ;;  %v1184_v3 = vld [vmem:[%s1306_s2] sm:$0xff] (!%p219_p3)   ;;  %994 = vmatprep.subr.bf16.mxu0 (!%p219_p3), %v1065_v2  ;;  %v1067_v4 = vld [vmem:[%s1306_s2 + $0x18] sm:$0xff] (!%p219_p3)   ;;  %v1195_v5 = vld [vmem:[%s1306_s2 + $0x30] sm:$0xff] (!%p219_p3)  }
   0xb   : > { %979 = vmatpush3.bf16.msra.mxu1 (!%p219_p3), %v1063_v0  ;;  %995 = vmatpush3.bf16.msra.mxu0 (!%p219_p3), %v1065_v2  ;;  %p294_p7 = scmp.lt.s32.totalorder (!%p219_p3), %s961_s27, 8  ;;  %v1068_v34 = vld [vmem:[%s1306_s2 + $0x8] sm:$0xff] (!%p219_p3)   ;;  %vm533_vm11 = vsmask.f32 (!%p219_p3), 3328  ;;  %vm534_vm12 = vsmask.f32 (!%p219_p3), 7440 }
   0xc   : > { %980 = vmatprep.subr.bf16.mxu1 (!%p219_p3), %v1064_v1  ;;  %996 = vmatprep.subr.bf16.mxu0 (!%p219_p3), %v1067_v4  ;;  %p306_p8 = scmp.lt.s32.totalorder (!%p219_p3), %s1169_s24, 7 }
   0xf   : > { %981 = vmatpush3.bf16.msra.mxu1 (!%p219_p3), %v1064_v1  ;;  %997 = vmatpush3.bf16.msra.mxu0 (!%p219_p3), %v1067_v4 }
  0x10   : > { %s1322_s16 = smov (!%p275_p5, %s1097_s16), 1  ;;  %986 = vmatprep.subr.bf16.mxu1 %v1184_v3  ;;  %s1324_s27 = smov (!%p294_p7, %s961_s27), 8  ;;  %1002 = vmatprep.subr.bf16.mxu0 %v1195_v5 }
  0x11   : > { %s278_s6 = scalar_select %p277_p6, %s1169_s24, 8 }
  0x12   : > { %s1022_s9 = smul.u32 18, %s1322_s16  ;;  %s912_s25 = sshll.u32 %s1324_s27, 1 }
  0x13   : > { %s909_s10 = sshll.u32 %s278_s6, 1  ;;  %s1326_s24 = smov (!%p306_p8, %s1169_s24), 7 }
  0x14   : > { %s281_s11 = sadd.s32 %s1022_s9, %s909_s10  ;;  %s298_s26 = sadd.s32 %s1022_s9, %s912_s25 }
  0x15   : > { %s910_s12 = sshll.u32 %s281_s11, 2  ;;  %s913_s28 = sshll.u32 %s298_s26, 2 }
  0x16   : > { %s1200_s23 = scalar_lea.vmem %s1304_s0, %s910_s12  ;;  %s1210_s5 = scalar_lea.vmem %s1305_s1, %s913_s28 }
  0x17   : > { %v315_v6 = vld [vmem:[%s1200_s23] sm:$0xf]  ;;  %v316_v7 = vld [vmem:[%s1200_s23 + $0x8] sm:$0xf]  ;;  %v317_v8 = vld [vmem:[%s1200_s23 + $0x10] sm:$0xf] }
  0x18   : > { %v318_v9 = vld [vmem:[%s1200_s23 + $0x18] sm:$0xf]  ;;  %vm320_vm0 = vcmp.gt.bf16.partialorder %v315_v6, 0  ;;  %vm321_vm1 = vcmp.gt.bf16.partialorder %v316_v7, 0  ;;  %vm322_vm2 = vcmp.gt.bf16.partialorder %v317_v8, 0  ;;  %s915_s9 = sshll.u32 %s1322_s16, 3 }
  0x19   : > { %v325_v10 = vmul.bf16 1045249613, %v315_v6  ;;  %v326_v11 = vmul.bf16 1045249613, %v316_v7  ;;  %v327_v12 = vmul.bf16 1045249613, %v317_v8  ;;  %s309_s10 = sadd.s32 %s915_s9, %s1326_s24 }
  0x1a   : > { %v328_v13 = vmul.bf16 1045249613, %v318_v9  ;;  %vm323_vm3 = vcmp.gt.bf16.partialorder %v318_v9, 0  ;;  %v493_v16 = vld [vmem:[%s1200_s23] sm:$0xf]  ;;  %s916_s13 = sshll.u32 %s309_s10, 2 }
  0x1b   : > { %v331_v14 = vsel %vm321_vm1, %v316_v7, %v326_v11  ;;  %v1212_v15 = vsel %vm322_vm2, %v317_v8, %v327_v12  ;;  %v494_v17 = vld [vmem:[%s1200_s23 + $0x4] sm:$0x1]  ;;  %v319_v18 = vld [vmem:[%s1210_s5] sm:$0xf]  ;;  %v330_v19 = vsel %vm320_vm0, %v315_v6, %v325_v10  ;;  %v495_v22 = vld [vmem:[%s1200_s23 + $0x8] sm:$0xf]  ;;  %s311_s22 = scalar_lea.vmem %s1308_s4, %s916_s13 }
  0x1c   : > { %v921_v20 = vcombine.low %v331_v14, %v1212_v15  ;;  %v501_v21 = vld [vmem:[%s1210_s5] sm:$0xf]  ;;  %vm324_vm5 = vcmp.gt.bf16.partialorder %v319_v18, 0  ;;  %v329_v23 = vmul.bf16 1045249613, %v319_v18  ;;  %v1221_v24 = vsel %vm323_vm3, %v318_v9, %v328_v13  ;;  %vm1253_vm2 = vmor %vm533_vm11, %vm534_vm12 }
  0x1d   : > { %v496_v25 = vld [vmem:[%s1200_s23 + $0xc] sm:$0x1]  ;;  %v521_v26 = vmul.bf16 1045249613, %v501_v21  ;;  %v497_v27 = vld [vmem:[%s1200_s23 + $0x10] sm:$0xf]  ;;  %v927_v30 = vcombine.low %v330_v19, %v331_v14  ;;  %v928_v36 = vcombine.low %v1212_v15, %v1221_v24 }
  0x1e   : > { %982 = vmatprep.mubr.msk.bf16.mxu1 %vm366_vm4, %v921_v20  ;;  %v498_v28 = vld [vmem:[%s1200_s23 + $0x14] sm:$0x1]  ;;  %v334_v29 = vsel %vm324_vm5, %v319_v18, %v329_v23  ;;  %vm511_vm6 = vcmp.gt.bf16.partialorder %v501_v21, 0  ;;  %v499_v31 = vld [vmem:[%s1200_s23 + $0x18] sm:$0xf]  ;;  %vm503_vm7 = vcmp.gt.bf16.partialorder %v493_v16, 0 }
  0x1f   : > { %v500_v32 = vld [vmem:[%s1200_s23 + $0x1c] sm:$0x1]  ;;  %v922_v33 = vcombine.low %v1221_v24, %v334_v29  ;;  %vm504_vm8 = vcmp.gt.bf16.partialorder %v494_v17, 0  ;;  %vm505_vm9 = vcmp.gt.bf16.partialorder %v495_v22, 0  ;;  %vm506_vm10 = vcmp.gt.bf16.partialorder %v496_v25, 0 }
  0x20   : > { %v1234_v35 = vld [vmem:[%s1210_s5 + $0x4] sm:$0x1]  ;;  %vm507_vm13 = vcmp.gt.bf16.partialorder %v497_v27, 0  ;;  %vm508_vm14 = vcmp.gt.bf16.partialorder %v498_v28, 0  ;;  %vm509_vm15 = vcmp.gt.bf16.partialorder %v499_v31, 0  ;;  %vm510_vm0 = vcmp.gt.bf16.partialorder %v500_v32, 0 }
  0x21   : > { %983 = vmatmul.mubr.msk.bf16.vlgmr.msra.gmra.mrb[0].mxu1 %vm366_vm4, %v922_v33  ;;  %v513_v37 = vmul.bf16 1045249613, %v493_v16  ;;  %v514_v38 = vmul.bf16 1045249613, %v494_v17  ;;  %v515_v39 = vmul.bf16 1045249613, %v495_v22  ;;  %v531_v40 = vsel %vm511_vm6, %v501_v21, %v521_v26 }
  0x22   : > { %987 = vmatpush3.bf16.msra.mxu1 %v1184_v3  ;;  %v516_v41 = vmul.bf16 1045249613, %v496_v25  ;;  %v517_v42 = vmul.bf16 1045249613, %v497_v27  ;;  %v518_v43 = vmul.bf16 1045249613, %v498_v28  ;;  %990 = vmatprep.mubr.msk.bf16.mxu1 %vm366_vm4, %v927_v30 }
  0x23   : > { %988 = vmatprep.subr.bf16.mxu1 %v1068_v34  ;;  %v519_v44 = vmul.bf16 1045249613, %v499_v31  ;;  %v520_v45 = vmul.bf16 1045249613, %v500_v32  ;;  %v523_v46 = vsel %vm503_vm7, %v493_v16, %v513_v37  ;;  %v524_v47 = vsel %vm504_vm8, %v494_v17, %v514_v38 }
  0x24   : > { %vm512_vm1 = vcmp.gt.bf16.partialorder %v1234_v35, 0  ;;  %v525_v48 = vsel %vm505_vm9, %v495_v22, %v515_v39  ;;  %v526_v49 = vsel %vm506_vm10, %v496_v25, %v516_v41  ;;  %v527_v50 = vsel %vm507_vm13, %v497_v27, %v517_v42 }
  0x25   : > { %v528_v51 = vsel %vm508_vm14, %v498_v28, %v518_v43  ;;  %v529_v52 = vsel %vm509_vm15, %v499_v31, %v519_v44  ;;  %v530_v53 = vsel %vm510_vm0, %v500_v32, %v520_v45  ;;  %v537_v54 = vshrl.u32 %v523_v46, 16 }
  0x26   : > { %v540_v55 = vshll.u32 %v523_v46, 16  ;;  %v546_v56 = vshll.u32 %v524_v47, 16  ;;  %v551_v57 = vshrl.u32 %v525_v48, 16  ;;  %v554_v58 = vshll.u32 %v525_v48, 16  ;;  %989 = vmatpush3.bf16.msra.mxu1 %v1068_v34 }
  0x27   : > { %v560_v59 = vshll.u32 %v526_v49, 16  ;;  %v539_v60 = vrot.slane %v537_v54, 4  ;;  %v565_v62 = vshrl.u32 %v527_v50, 16  ;;  %v568_v63 = vshll.u32 %v527_v50, 16 }
  0x28   : > { %v542_v61 = vrot.slane %v540_v55, 5  ;;  %v548_v0 = vrot.slane %v546_v56, 5  ;;  %v553_v1 = vrot.slane %v551_v57, 4  ;;  %v556_v2 = vrot.slane %v554_v58, 5 }
  0x29   : > { %v562_v3 = vrot.slane %v560_v59, 5  ;;  %v567_v6 = vrot.slane %v565_v62, 4  ;;  %v570_v7 = vrot.slane %v568_v63, 5  ;;  %v574_v8 = vshll.u32 %v528_v51, 16 }
  0x2a   : > { %v543_v4 = vor.u32 %v542_v61, %v539_v60  ;;  %v557_v10 = vor.u32 %v556_v2, %v553_v1  ;;  %v579_v11 = vshrl.u32 %v529_v52, 16  ;;  %v582_v12 = vshll.u32 %v529_v52, 16 }
  0x2b   : > { %v588_v13 = vshll.u32 %v530_v53, 16  ;;  %v522_v14 = vmul.bf16 1045249613, %v1234_v35  ;;  %v571_v16 = vor.u32 %v570_v7, %v567_v6  ;;  %v675_v17 = vshrl.u32 %v531_v40, 16 }
  0x2c   : > { %v544_v15 = vrot.slane %v543_v4, 4  ;;  %v558_v18 = vrot.slane %v557_v10, 4  ;;  %v576_v19 = vrot.slane %v574_v8, 5  ;;  %v581_v20 = vrot.slane %v579_v11, 4 }
  0x2d   : > { %v584_v21 = vrot.slane %v582_v12, 5  ;;  %v572_v23 = vrot.slane %v571_v16, 4  ;;  %v678_v24 = vshll.u32 %v531_v40, 16  ;;  %991 = vmatmul.mubr.msk.bf16.vlgmr.msra.gmra.mrb[0].mxu1 %vm366_vm4, %v928_v36  ;;  %v590_v27 = vrot.slane %v588_v13, 5 }
  0x2e   : > { %v549_v22 = vsel %vm1253_vm2, %v544_v15, %v548_v0  ;;  %v563_v25 = vsel %vm1253_vm2, %v558_v18, %v562_v3  ;;  %v677_v28 = vrot.slane %v675_v17, 4  ;;  %v532_v29 = vsel %vm512_vm1, %v1234_v35, %v522_v14  ;;  %v1070_v35 = vld [vmem:[%s1306_s2 + $0x38] sm:$0xff]  }
  0x2f   : > { %v585_v26 = vor.u32 %v584_v21, %v581_v20  ;;  %v937_v30 = vcombine.low %v549_v22, %v563_v25  ;;  %v680_v31 = vrot.slane %v678_v24, 5  ;;  %v577_v32 = vsel %vm1253_vm2, %v572_v23, %v576_v19 }
  0x30   : > { %v684_v37 = vshll.u32 %v532_v29, 16  ;;  %v947_v38 = vcombine.low %v563_v25, %v577_v32  ;;  %vm782_vm3 = vcmask 125952  }
  0x31   : > { %v586_v33 = vrot.slane %v585_v26, 4  ;;  %998 = vmatprep.mubr.msk.bf16.mxu0 %vm366_vm4, %v937_v30  ;;  %v681_v36 = vor.u32 %v680_v31, %v677_v28 }
  0x32   : > { %v686_v41 = vrot.slane %v684_v37, 5 }
  0x33   : > { %v591_v34 = vsel %vm1253_vm2, %v586_v33, %v590_v27  ;;  %v682_v40 = vrot.slane %v681_v36, 4 }
  0x34   : > { %v938_v39 = vcombine.low %v577_v32, %v591_v34 }
  0x35   : > { %v687_v42 = vsel %vm1253_vm2, %v682_v40, %v686_v41 }
  0x36   : > { %999 = vmatmul.mubr.msk.bf16.vlgmr.msra.gmra.mrb[0].mxu0 %vm366_vm4, %v938_v39  ;;  %v948_v43 = vcombine.low %v591_v34, %v687_v42 }
  0x37   : > { %1003 = vmatpush3.bf16.msra.mxu0 %v1195_v5  ;;  %1006 = vmatprep.mubr.msk.bf16.mxu0 %vm366_vm4, %v947_v38  ;;  %v953_v5 = vld [vmem:[%s1307_s3] ss:$0 sm:$0xff] }
  0x38   : > { %1004 = vmatprep.subr.bf16.mxu0 %v1070_v35 }
  0x3b   : > { %1005 = vmatpush3.bf16.msra.mxu0 %v1070_v35 }
  0x42   : > { %1007 = vmatmul.mubr.msk.bf16.vlgmr.msra.gmra.mrb[0].mxu0 %vm366_vm4, %v948_v43 }
 0x100   : > { %v992_v44 = vpop.f32.mrb[0].mxu1 }
 0x101   : > { %v478_v45 = vpop.f32.mrb[1].mxu1 }
 0x102   : > { %v993_v46 = vpop.f32.mrb[2].mxu1 }
 0x103   : > { %v481_v47 = vpop.f32.mrb[3].mxu1 }
 0x115   : > { %v1008_v48 = vpop.f32.mrb[0].mxu0 }
 0x116   : > { %v1010_v49 = vadd.f32 %v1008_v48, %v992_v44  ;;  %v748_v50 = vpop.f32.mrb[1].mxu0 }
 0x117   : > { %v1011_v51 = vadd.f32 %v748_v50, %v478_v45  ;;  %v1009_v52 = vpop.f32.mrb[2].mxu0 }
 0x118   : > { %v776_v53 = vadd.f32 %v1010_v49, %v953_v5  ;;  %v1012_v54 = vadd.f32 %v1009_v52, %v993_v46  ;;  %v751_v55 = vpop.f32.mrb[3].mxu0 }
 0x119   : > { %v774_v56 = vadd.f32 %v1011_v51, %v953_v5  ;;  %v1013_v57 = vadd.f32 %v751_v55, %v481_v47 }
 0x11a   : > { %v780_v58 = vpack.c.bf16 %v776_v53, %v776_v53  ;;  %v777_v59 = vadd.f32 %v1012_v54, %v953_v5 }
 0x11b   : > { %v778_v60 = vpack.c.bf16 %v774_v56, %v774_v56  ;;  %v775_v61 = vadd.f32 %v1013_v57, %v953_v5 }
 0x11c   : > { %785 = vst.msk [vmem:[%s311_s22 + $0x8] sm:$0xf] %vm782_vm3, %v780_v58  ;;  %v781_v62 = vpack.c.bf16 %v777_v59, %v777_v59 }
 0x11d   : > { %783 = vst.msk [vmem:[%s311_s22] sm:$0xf] %vm782_vm3, %v778_v60  ;;  %v779_v63 = vpack.c.bf16 %v775_v61, %v775_v61 }
 0x11e   : > { %786 = vst.msk [vmem:[%s311_s22 + $0xc] sm:$0xf] %vm782_vm3, %v781_v62 }
 0x11f   : > { %784 = vst.msk [vmem:[%s311_s22 + $0x4] sm:$0xf] %vm782_vm3, %v779_v63 }
 0x120 PF: > { %s14_s19 = sadd.s32 1, %s1109_s19   ;;  %s1311_s15 = smov %s1101_s17 }
 0x121   : > { %p11_p9 = scmp.ge.s32.totalorder %s14_s19, 6   ;;  %s1312_s16 = smov %s1105_s18 }
 0x122   : > { %s1313_s17 = smov %s1316_s20  ;;  %s1314_s18 = smov %s1320_s21 }
 0x123   :  { %13 = sbr.rel (!%p11_p9) target bundleno = 3 (0x3), region = 72 }

// kernel: _lambda_.20
= control target key start
LH: loop header
LB: loop body
LE: loop exit
PB: predicated region body
PF: predicated region fallthrough
CT: control target
= control target key end

     0   :  { %vm252_vm4 = vcmask 257024   ;;  %s445_s1 = inlined_call_operand.vmem [shape: bf16[1,256,32], index: 1, kind: input, shape index: {}]   ;;  %s446_s0 = inlined_call_operand.vmem [shape: bf16[1,32,256], index: 0, kind: input, shape index: {}]   ;;  %s447_s2 = inlined_call_operand.vmem [shape: f32[1,32], index: 2, kind: input, shape index: {}]   ;;  %s448_s3 = inlined_call_operand.vmem [shape: bf16[1,32,32], index: 3, kind: output, shape index: {}]  }
   0x1   :  { %v334_v0 = vld [vmem:[%s445_s1 + $0x40] sm:$0xff]   ;;  %v336_v2 = vld [vmem:[%s445_s1 + $0x48] sm:$0xff]   ;;  %v338_v4 = vld [vmem:[%s445_s1 + $0x50] sm:$0xff]  }
   0x2   :  { %v335_v1 = vld [vmem:[%s445_s1] sm:$0xff]   ;;  %290 = vmatprep.subr.bf16.mxu0 %v334_v0  ;;  %318 = vmatprep.subr.bf16.mxu1 %v334_v0  ;;  %v337_v3 = vld [vmem:[%s445_s1 + $0x8] sm:$0xff]   ;;  %v339_v5 = vld [vmem:[%s445_s1 + $0x10] sm:$0xff]  }
   0x3   :  { %291 = vmatpush3.bf16.msra.mxu0 %v335_v1  ;;  %326 = vmatpush3.bf16.msra.mxu1 %v335_v1  ;;  %v340_v6 = vld [vmem:[%s445_s1 + $0x58] sm:$0xff]   ;;  %v342_v8 = vld [vmem:[%s445_s1 + $0x60] sm:$0xff]   ;;  %v344_v10 = vld [vmem:[%s445_s1 + $0x68] sm:$0xff]  }
   0x4   :  { %292 = vmatprep.subr.bf16.mxu0 %v336_v2  ;;  %319 = vmatprep.subr.bf16.mxu1 %v336_v2  ;;  %v341_v7 = vld [vmem:[%s445_s1 + $0x18] sm:$0xff]   ;;  %v343_v9 = vld [vmem:[%s445_s1 + $0x20] sm:$0xff]   ;;  %v17_v12 = vld [vmem:[%s446_s0 + $0x8] sm:$0xff] }
   0x5   :  { %v16_v11 = vld [vmem:[%s446_s0] sm:$0xff]  ;;  %v18_v13 = vld [vmem:[%s446_s0 + $0x10] sm:$0xff]  ;;  %vm21_vm1 = vcmp.gt.bf16.partialorder %v17_v12, 0  ;;  %v25_v15 = vmul.bf16 1045249613, %v17_v12  ;;  %v19_v16 = vld [vmem:[%s446_s0 + $0x18] sm:$0xff] }
   0x6   :  { %vm20_vm0 = vcmp.gt.bf16.partialorder %v16_v11, 0  ;;  %v24_v14 = vmul.bf16 1045249613, %v16_v11  ;;  %vm22_vm2 = vcmp.gt.bf16.partialorder %v18_v13, 0  ;;  %v26_v17 = vmul.bf16 1045249613, %v18_v13 }
   0x7   :  { %293 = vmatpush3.bf16.msra.mxu0 %v337_v3  ;;  %327 = vmatpush3.bf16.msra.mxu1 %v337_v3  ;;  %v345_v18 = vld [vmem:[%s445_s1 + $0x28] sm:$0xff]   ;;  %v29_v20 = vsel %vm21_vm1, %v17_v12, %v25_v15  ;;  %vm23_vm3 = vcmp.gt.bf16.partialorder %v19_v16, 0  ;;  %v27_v21 = vmul.bf16 1045249613, %v19_v16  ;;  %v346_v22 = vld [vmem:[%s445_s1 + $0x70] sm:$0xff]   ;;  %v348_v28 = vld [vmem:[%s445_s1 + $0x78] sm:$0xff]  }
   0x8   :  { %294 = vmatprep.subr.bf16.mxu0 %v338_v4  ;;  %320 = vmatprep.subr.bf16.mxu1 %v338_v4  ;;  %v28_v19 = vsel %vm20_vm0, %v16_v11, %v24_v14  ;;  %v30_v24 = vsel %vm22_vm2, %v18_v13, %v26_v17  ;;  %v347_v27 = vld [vmem:[%s445_s1 + $0x30] sm:$0xff]   ;;  %v349_v29 = vld [vmem:[%s445_s1 + $0x38] sm:$0xff]   ;;  %v261_v34 = vld [vmem:[%s447_s2] ss:$0 sm:$0xff] }
   0x9   :  { %v263_v23 = vcombine.high %v28_v19, %v29_v20  ;;  %v31_v25 = vsel %vm23_vm3, %v19_v16, %v27_v21  ;;  %v262_v30 = vcombine.low %v28_v19, %v29_v20 }
   0xa   :  { %v265_v26 = vcombine.high %v30_v24, %v31_v25  ;;  %v264_v31 = vcombine.low %v30_v24, %v31_v25 }
   0xb   :  { %295 = vmatpush3.bf16.msra.mxu0 %v339_v5  ;;  %328 = vmatpush3.bf16.msra.mxu1 %v339_v5 }
   0xc   :  { %296 = vmatprep.subr.bf16.mxu0 %v340_v6  ;;  %321 = vmatprep.subr.bf16.mxu1 %v340_v6 }
   0xd   :  { %219 = vmatprep.mubr.bf16.mxu0 %v263_v23  ;;  %227 = vmatprep.mubr.bf16.mxu1 %v265_v26 }
   0xf   :  { %297 = vmatpush3.bf16.msra.mxu0 %v341_v7  ;;  %329 = vmatpush3.bf16.msra.mxu1 %v341_v7 }
  0x10   :  { %298 = vmatprep.subr.bf16.mxu0 %v342_v8  ;;  %322 = vmatprep.subr.bf16.mxu1 %v342_v8 }
  0x13   :  { %299 = vmatpush3.bf16.msra.mxu0 %v343_v9  ;;  %330 = vmatpush3.bf16.msra.mxu1 %v343_v9 }
  0x14   :  { %300 = vmatprep.subr.bf16.mxu0 %v344_v10  ;;  %323 = vmatprep.subr.bf16.mxu1 %v344_v10 }
  0x17   :  { %301 = vmatpush3.bf16.msra.mxu0 %v345_v18  ;;  %331 = vmatpush3.bf16.msra.mxu1 %v345_v18 }
  0x18   :  { %302 = vmatprep.subr.bf16.mxu0 %v346_v22  ;;  %324 = vmatprep.subr.bf16.mxu1 %v346_v22 }
  0x1b   :  { %303 = vmatpush3.bf16.msra.mxu0 %v347_v27  ;;  %332 = vmatpush3.bf16.msra.mxu1 %v347_v27 }
  0x1c   :  { %304 = vmatprep.subr.bf16.mxu0 %v348_v28  ;;  %325 = vmatprep.subr.bf16.mxu1 %v348_v28 }
  0x1f   :  { %305 = vmatpush3.bf16.msra.mxu0 %v349_v29  ;;  %333 = vmatpush3.bf16.msra.mxu1 %v349_v29 }
  0x22   :  { %220 = vmatmul.mubr.bf16.vlgmr.msra.gmra.mrb[0].mxu0 %v262_v30  ;;  %228 = vmatmul.mubr.bf16.vlgmr.msra.gmra.mrb[0].mxu1 %v264_v31 }
  0xf5   :  { %v306_v32 = vpop.f32.mrb[0].mxu0  ;;  %v312_v33 = vpop.f32.mrb[0].mxu1 }
  0xf6   :  { %v307_v35 = vpop.f32.mrb[1].mxu0  ;;  %v313_v36 = vpop.f32.mrb[1].mxu1 }
  0xf7   :  { %v308_v37 = vadd.f32 %v307_v35, %v306_v32  ;;  %v314_v38 = vadd.f32 %v313_v36, %v312_v33  ;;  %v309_v39 = vpop.f32.mrb[2].mxu0  ;;  %v315_v40 = vpop.f32.mrb[2].mxu1 }
  0xf8   :  { %v310_v41 = vpop.f32.mrb[3].mxu0  ;;  %v316_v42 = vpop.f32.mrb[3].mxu1 }
  0xf9   :  { %v222_v43 = vadd.f32 %v308_v37, %v261_v34  ;;  %v230_v44 = vadd.f32 %v314_v38, %v261_v34  ;;  %v311_v45 = vadd.f32 %v310_v41, %v309_v39  ;;  %v317_v46 = vadd.f32 %v316_v42, %v315_v40 }
  0xfb   :  { %v286_v47 = vpack.c.bf16 %v222_v43, %v222_v43  ;;  %v288_v48 = vpack.c.bf16 %v230_v44, %v230_v44  ;;  %v225_v49 = vadd.f32 %v311_v45, %v261_v34  ;;  %v233_v50 = vadd.f32 %v317_v46, %v261_v34 }
  0xfd   :  { %253 = vst.msk [vmem:[%s448_s3] sm:$0xf] %vm252_vm4, %v286_v47  ;;  %255 = vst.msk [vmem:[%s448_s3 + $0x8] sm:$0xf] %vm252_vm4, %v288_v48  ;;  %v287_v51 = vpack.c.bf16 %v225_v49, %v225_v49  ;;  %v289_v52 = vpack.c.bf16 %v233_v50, %v233_v50 }
  0xff   :  { %254 = vst.msk [vmem:[%s448_s3 + $0x4] sm:$0xf] %vm252_vm4, %v287_v51  ;;  %256 = vst.msk [vmem:[%s448_s3 + $0xc] sm:$0xf] %vm252_vm4, %v289_v52 }

// kernel: _lambda_.21
= control target key start
LH: loop header
LB: loop body
LE: loop exit
PB: predicated region body
PF: predicated region fallthrough
CT: control target
= control target key end

     0   :  { %s339_s6 = smov 0   ;;  %s341_s7 = smov 0   ;;  %s382_s0 = inlined_call_operand.vmem [shape: bf16[2,16,32], index: 0, kind: input, shape index: {}]   ;;  %s383_s1 = inlined_call_operand.vmem [shape: f32[2,2,32], index: 1, kind: output, shape index: {}]  }
   0x1   :  { %s343_s8 = smov 0  }
   0x2 LB: > { %s23_s9 = sadd.s32 1, %s322_s7  ;;  %p266_p0 = scmp.ge.s32.totalorder %s326_s8, 1  ;;  %s326_s8 = sphi %s343_s8, %s11_s8   ;;  %s322_s7 = sphi %s341_s7, %s385_s7   ;;  %s318_s6 = sphi %s339_s6, %s384_s6  }
   0x3   : > { %p25_p1 = scmp.ge.s32.totalorder %s23_s9, 2  ;;  %p106_p2 = scmp.lt.s32.totalorder %s326_s8, 3 }
   0x5   : > { %s387_s9 = smov (%p25_p1, %s23_s9), 0  ;;  %p107_p3 = pnand %p266_p0, %p106_p2 }
   0x6   : > { %p130_p4 = scmp.lt.s32.totalorder (!%p107_p3), %s318_s6, 1  ;;  %vm147_vm0 = vcmask (!%p107_p3), 254976   ;;  %v328_v0 = vmov (!%p107_p3), 0.0   ;;  %vm153_vm1 = vcmask (!%p107_p3), 261120   ;;  %vm175_vm2 = vcmask (!%p107_p3), 1040384  }
   0x7   : > { %110 = sbr.rel (%p107_p3) target bundleno = 73 (0x49), region = 24 }
   0xe   : > { %s389_s6 = smov (!%p130_p4, %s318_s6), 1 }
   0xf   : > { %s272_s10 = sshll.u32 %s389_s6, 3  ;;  %s269_s11 = sshll.u32 %s389_s6, 1 }
  0x10   : > { %s137_s14 = scalar_lea.vmem %s382_s0, %s272_s10  ;;  %s363_s17 = scalar_lea.vmem %s383_s1, %s269_s11 }
  0x11   : > { %148 = vst.msk [vmem:[%s363_s17] sm:$0x3] %vm147_vm0, %v328_v0  ;;  %v274_v1 = vld [vmem:[%s137_s14] sm:$0xff]  }
  0x12   : > { %v275_v2 = vunpack.c.l.bf16 %v274_v1  ;;  %v276_v3 = vunpack.c.h.bf16 %v274_v1 }
  0x14   : > { %v154_v4 = vsel %vm153_vm1, %v275_v2, 0.0  ;;  %v155_v5 = vsel %vm153_vm1, %v276_v3, 0.0  ;;  %v163_v6 = vmul.f32 %v275_v2, %v275_v2  ;;  %v164_v7 = vmul.f32 %v276_v3, %v276_v3 }
  0x15   : > { %v156_v8 = vadd.f32 %v155_v5, %v154_v4 }
  0x16   : > { %v165_v9 = vsel %vm153_vm1, %v163_v6, 0.0  ;;  %v166_v10 = vsel %vm153_vm1, %v164_v7, 0.0 }
  0x17   : > { %v157_v11 = vrot.slane %v156_v8, 4  ;;  %v167_v12 = vadd.f32 %v166_v10, %v165_v9 }
  0x18   : > { %v174_v24 = vld [vmem:[%s363_s17] sm:$0x3] }
  0x19   : > { %v158_v13 = vadd.f32 %v157_v11, %v156_v8  ;;  %v168_v14 = vrot.slane %v167_v12, 4 }
  0x1b   : > { %v159_v15 = vrot.slane %v158_v13, 2  ;;  %v169_v16 = vadd.f32 %v168_v14, %v167_v12 }
  0x1d   : > { %v160_v17 = vadd.f32 %v159_v15, %v158_v13  ;;  %v170_v18 = vrot.slane %v169_v16, 2 }
  0x1f   : > { %v161_v19 = vrot.slane %v160_v17, 1  ;;  %v171_v20 = vadd.f32 %v170_v18, %v169_v16 }
  0x21   : > { %v162_v21 = vadd.f32 %v161_v19, %v160_v17  ;;  %v172_v22 = vrot.slane %v171_v20, 1 }
  0x23   : > { %v173_v23 = vadd.f32 %v172_v22, %v171_v20 }
  0x25   : > { %v176_v25 = vsel %vm175_vm2, %v162_v21, %v173_v23 }
  0x26   : > { %v177_v26 = vadd.f32 %v176_v25, %v174_v24 }
  0x28   : > { %179 = vst.msk [vmem:[%s363_s17] sm:$0x3] %vm147_vm0, %v177_v26 }
  0x2f   : > { %v183_v27 = vld [vmem:[%s363_s17] sm:$0x3] }
  0x30   : > { %v184_v28 = vmul.f32 0.0625, %v183_v27 }
  0x32   : > { %v185_v29 = vmul.f32 %v184_v28, %v184_v28 }
  0x34   : > { %v187_v30 = vrot.slane %v185_v29, 7 }
  0x36   : > { %v189_v31 = vsub.f32 %v184_v28, %v187_v30 }
  0x38   : > { %v190_v32 = vmax.f32 %v189_v31, 0.0 }
  0x3a   : > { %v191_v33 = vadd.f32 1e-05, %v190_v32 }
  0x3c   : > { %302 = vrsqrt.f32 %v191_v33 }
  0x46   : > { %v303_v34 = vpop.eup %302 }
  0x47   : > { %v193_v35 = vsel %vm175_vm2, %v184_v28, %v303_v34 }
  0x48   : > { %194 = vst.msk [vmem:[%s363_s17] sm:$0x3] %vm147_vm0, %v193_v35 }
  0x49 PF: > { %s11_s8 = sadd.s32 1, %s326_s8   ;;  %s384_s6 = smov %s322_s7 }
  0x4a   : > { %p8_p5 = scmp.ge.s32.totalorder %s11_s8, 4   ;;  %s385_s7 = smov %s387_s9 }
  0x4c   :  { %10 = sbr.rel (!%p8_p5) target bundleno = 2 (0x2), region = 62 }

// kernel: _lambda_.23
= control target key start
LH: loop header
LB: loop body
LE: loop exit
PB: predicated region body
PF: predicated region fallthrough
CT: control target
= control target key end

     0   :  { %s315_s6 = smov 0   ;;  %s317_s7 = smov 0   ;;  %s358_s0 = inlined_call_operand.vmem [shape: bf16[2,4,64], index: 0, kind: input, shape index: {}]   ;;  %s359_s1 = inlined_call_operand.vmem [shape: f32[2,2,64], index: 1, kind: output, shape index: {}]  }
   0x1   :  { %s319_s8 = smov 0  }
   0x2 LB: > { %s23_s9 = sadd.s32 1, %s298_s7  ;;  %p248_p0 = scmp.ge.s32.totalorder %s302_s8, 1  ;;  %s302_s8 = sphi %s319_s8, %s11_s8   ;;  %s298_s7 = sphi %s317_s7, %s361_s7   ;;  %s294_s6 = sphi %s315_s6, %s360_s6  }
   0x3   : > { %p25_p1 = scmp.ge.s32.totalorder %s23_s9, 2  ;;  %p103_p2 = scmp.lt.s32.totalorder %s302_s8, 3 }
   0x5   : > { %s363_s9 = smov (%p25_p1, %s23_s9), 0  ;;  %p104_p3 = pnand %p248_p0, %p103_p2 }
   0x6   : > { %p124_p4 = scmp.lt.s32.totalorder (!%p104_p3), %s294_s6, 1  ;;  %vm139_vm0 = vcmask (!%p104_p3), 517120   ;;  %v304_v0 = vmov (!%p104_p3), 0.0   ;;  %vm143_vm1 = vcmask (!%p104_p3), 519168   ;;  %vm160_vm2 = vcmask (!%p104_p3), 1040384  }
   0x7   : > { %107 = sbr.rel (%p104_p3) target bundleno = 71 (0x47), region = 24 }
   0xe   : > { %s365_s6 = smov (!%p124_p4, %s294_s6), 1 }
   0xf   : > { %s249_s10 = sshll.u32 %s365_s6, 1 }
  0x10   : > { %s130_s13 = scalar_lea.vmem %s358_s0, %s249_s10  ;;  %s339_s16 = scalar_lea.vmem %s359_s1, %s249_s10 }
  0x11   : > { %140 = vst.msk [vmem:[%s339_s16] sm:$0x3] %vm139_vm0, %v304_v0  ;;  %v141_v1 = vld [vmem:[%s130_s13] sm:$0x3] }
  0x12   : > { %v142_v2 = vunpack.c.l.bf16 %v141_v1 }
  0x14   : > { %v144_v3 = vsel %vm143_vm1, %v142_v2, 0.0  ;;  %v151_v4 = vmul.f32 %v142_v2, %v142_v2 }
  0x15   : > { %v145_v5 = vrot.slane %v144_v3, 4 }
  0x16   : > { %v152_v6 = vsel %vm143_vm1, %v151_v4, 0.0 }
  0x17   : > { %v146_v7 = vadd.f32 %v145_v5, %v144_v3  ;;  %v153_v8 = vrot.slane %v152_v6, 4 }
  0x18   : > { %v159_v18 = vld [vmem:[%s339_s16] sm:$0x3] }
  0x19   : > { %v147_v9 = vrot.slane %v146_v7, 2  ;;  %v154_v10 = vadd.f32 %v153_v8, %v152_v6 }
  0x1b   : > { %v148_v11 = vadd.f32 %v147_v9, %v146_v7  ;;  %v155_v12 = vrot.slane %v154_v10, 2 }
  0x1d   : > { %v149_v13 = vrot.slane %v148_v11, 1  ;;  %v156_v14 = vadd.f32 %v155_v12, %v154_v10 }
  0x1f   : > { %v150_v15 = vadd.f32 %v149_v13, %v148_v11  ;;  %v157_v16 = vrot.slane %v156_v14, 1 }
  0x21   : > { %v158_v17 = vadd.f32 %v157_v16, %v156_v14 }
  0x23   : > { %v161_v19 = vsel %vm160_vm2, %v150_v15, %v158_v17 }
  0x24   : > { %v162_v20 = vadd.f32 %v161_v19, %v159_v18 }
  0x26   : > { %164 = vst.msk [vmem:[%s339_s16] sm:$0x3] %vm139_vm0, %v162_v20 }
  0x2d   : > { %v168_v21 = vld [vmem:[%s339_s16] sm:$0x3] }
  0x2e   : > { %v169_v22 = vmul.f32 0.25, %v168_v21 }
  0x30   : > { %v170_v23 = vmul.f32 %v169_v22, %v169_v22 }
  0x32   : > { %v172_v24 = vrot.slane %v170_v23, 7 }
  0x34   : > { %v174_v25 = vsub.f32 %v169_v22, %v172_v24 }
  0x36   : > { %v175_v26 = vmax.f32 %v174_v25, 0.0 }
  0x38   : > { %v176_v27 = vadd.f32 1e-05, %v175_v26 }
  0x3a   : > { %278 = vrsqrt.f32 %v176_v27 }
  0x44   : > { %v279_v28 = vpop.eup %278 }
  0x45   : > { %v178_v29 = vsel %vm160_vm2, %v169_v22, %v279_v28 }
  0x46   : > { %179 = vst.msk [vmem:[%s339_s16] sm:$0x3] %vm139_vm0, %v178_v29 }
  0x47 PF: > { %s11_s8 = sadd.s32 1, %s302_s8   ;;  %s360_s6 = smov %s298_s7 }
  0x48   : > { %p8_p5 = scmp.ge.s32.totalorder %s11_s8, 4   ;;  %s361_s7 = smov %s363_s9 }
  0x4a   :  { %10 = sbr.rel (!%p8_p5) target bundleno = 2 (0x2), region = 62 }

// kernel: _lambda_.22
= control target key start
LH: loop header
LB: loop body
LE: loop exit
PB: predicated region body
PF: predicated region fallthrough
CT: control target
= control target key end

     0   :  { %vm382_vm2 = vcmask 519168   ;;  %s629_s1 = inlined_call_operand.vmem [shape: bf16[1,512,64], index: 1, kind: input, shape index: {}]   ;;  %s630_s0 = inlined_call_operand.vmem [shape: bf16[1,8,512], index: 0, kind: input, shape index: {}]   ;;  %s631_s2 = inlined_call_operand.vmem [shape: f32[1,64], index: 2, kind: input, shape index: {}]   ;;  %s632_s3 = inlined_call_operand.vmem [shape: bf16[1,8,64], index: 3, kind: output, shape index: {}]  }
   0x1   :  { %v469_v0 = vld [vmem:[%s629_s1 + $0x40] sm:$0xff]   ;;  %v473_v4 = vld [vmem:[%s629_s1 + $0x48] sm:$0xff]   ;;  %v477_v8 = vld [vmem:[%s629_s1 + $0x50] sm:$0xff]  }
   0x2   :  { %v470_v1 = vld [vmem:[%s629_s1 + $0xc0] sm:$0xff]   ;;  %425 = vmatprep.subr.bf16.mxu0 %v469_v0  ;;  %v474_v5 = vld [vmem:[%s629_s1 + $0xc8] sm:$0xff]   ;;  %v478_v9 = vld [vmem:[%s629_s1 + $0xd0] sm:$0xff]  }
   0x3   :  { %v471_v2 = vld [vmem:[%s629_s1] sm:$0xff]   ;;  %447 = vmatprep.subr.bf16.mxu1 %v470_v1  ;;  %v475_v6 = vld [vmem:[%s629_s1 + $0x8] sm:$0xff]   ;;  %v479_v10 = vld [vmem:[%s629_s1 + $0x10] sm:$0xff]  }
   0x4   :  { %v472_v3 = vld [vmem:[%s629_s1 + $0x80] sm:$0xff]   ;;  %426 = vmatpush3.bf16.msra.mxu0 %v471_v2  ;;  %v476_v7 = vld [vmem:[%s629_s1 + $0x88] sm:$0xff]   ;;  %v480_v11 = vld [vmem:[%s629_s1 + $0x90] sm:$0xff]  }
   0x5   :  { %448 = vmatpush3.bf16.msra.mxu1 %v472_v3  ;;  %427 = vmatprep.subr.bf16.mxu0 %v473_v4  ;;  %v481_v12 = vld [vmem:[%s629_s1 + $0x58] sm:$0xff]   ;;  %v485_v16 = vld [vmem:[%s629_s1 + $0x60] sm:$0xff]   ;;  %v489_v20 = vld [vmem:[%s629_s1 + $0x68] sm:$0xff]  }
   0x6   :  { %449 = vmatprep.subr.bf16.mxu1 %v474_v5  ;;  %v482_v13 = vld [vmem:[%s629_s1 + $0xd8] sm:$0xff]   ;;  %v486_v17 = vld [vmem:[%s629_s1 + $0xe0] sm:$0xff]   ;;  %v490_v21 = vld [vmem:[%s629_s1 + $0xe8] sm:$0xff]  }
   0x7   :  { %v483_v14 = vld [vmem:[%s629_s1 + $0x18] sm:$0xff]   ;;  %v487_v18 = vld [vmem:[%s629_s1 + $0x20] sm:$0xff]   ;;  %v491_v22 = vld [vmem:[%s629_s1 + $0x28] sm:$0xff]  }
   0x8   :  { %428 = vmatpush3.bf16.msra.mxu0 %v475_v6  ;;  %v484_v15 = vld [vmem:[%s629_s1 + $0x98] sm:$0xff]   ;;  %v488_v19 = vld [vmem:[%s629_s1 + $0xa0] sm:$0xff]   ;;  %v492_v23 = vld [vmem:[%s629_s1 + $0xa8] sm:$0xff]  }
   0x9   :  { %450 = vmatpush3.bf16.msra.mxu1 %v476_v7  ;;  %429 = vmatprep.subr.bf16.mxu0 %v477_v8  ;;  %v493_v24 = vld [vmem:[%s629_s1 + $0x70] sm:$0xff]   ;;  %v497_v28 = vld [vmem:[%s629_s1 + $0x78] sm:$0xff]   ;;  %v16_v32 = vld [vmem:[%s630_s0] sm:$0xff] }
   0xa   :  { %451 = vmatprep.subr.bf16.mxu1 %v478_v9  ;;  %v494_v25 = vld [vmem:[%s629_s1 + $0xf0] sm:$0xff]   ;;  %v498_v29 = vld [vmem:[%s629_s1 + $0xf8] sm:$0xff]   ;;  %v17_v33 = vld [vmem:[%s630_s0 + $0x8] sm:$0xff]  ;;  %vm18_vm0 = vcmp.gt.bf16.partialorder %v16_v32, 0  ;;  %v20_v34 = vmul.bf16 1045249613, %v16_v32 }
   0xb   :  { %v495_v26 = vld [vmem:[%s629_s1 + $0x30] sm:$0xff]   ;;  %v499_v30 = vld [vmem:[%s629_s1 + $0x38] sm:$0xff]   ;;  %vm19_vm1 = vcmp.gt.bf16.partialorder %v17_v33, 0  ;;  %v21_v35 = vmul.bf16 1045249613, %v17_v33 }
   0xc   :  { %430 = vmatpush3.bf16.msra.mxu0 %v479_v10  ;;  %v496_v27 = vld [vmem:[%s629_s1 + $0xb0] sm:$0xff]   ;;  %v500_v31 = vld [vmem:[%s629_s1 + $0xb8] sm:$0xff]   ;;  %v22_v36 = vsel %vm18_vm0, %v16_v32, %v20_v34  ;;  %v388_v44 = vld [vmem:[%s631_s2] ss:$0 sm:$0xff] }
   0xd   :  { %452 = vmatpush3.bf16.msra.mxu1 %v480_v11  ;;  %431 = vmatprep.subr.bf16.mxu0 %v481_v12  ;;  %v23_v37 = vsel %vm19_vm1, %v17_v33, %v21_v35  ;;  %v389_v38 = vcombine.low %v22_v36, %v22_v36  ;;  %v390_v39 = vcombine.high %v22_v36, %v22_v36 }
   0xe   :  { %453 = vmatprep.subr.bf16.mxu1 %v482_v13  ;;  %v391_v40 = vcombine.low %v23_v37, %v23_v37  ;;  %v392_v41 = vcombine.high %v23_v37, %v23_v37 }
   0xf   :  { %333 = vmatprep.mubr.bf16.mxu0 %v390_v39 }
  0x10   :  { %432 = vmatpush3.bf16.msra.mxu0 %v483_v14  ;;  %373 = vmatprep.mubr.bf16.mxu1 %v392_v41 }
  0x11   :  { %454 = vmatpush3.bf16.msra.mxu1 %v484_v15  ;;  %433 = vmatprep.subr.bf16.mxu0 %v485_v16 }
  0x12   :  { %455 = vmatprep.subr.bf16.mxu1 %v486_v17 }
  0x14   :  { %434 = vmatpush3.bf16.msra.mxu0 %v487_v18 }
  0x15   :  { %456 = vmatpush3.bf16.msra.mxu1 %v488_v19  ;;  %435 = vmatprep.subr.bf16.mxu0 %v489_v20 }
  0x16   :  { %457 = vmatprep.subr.bf16.mxu1 %v490_v21 }
  0x18   :  { %436 = vmatpush3.bf16.msra.mxu0 %v491_v22 }
  0x19   :  { %458 = vmatpush3.bf16.msra.mxu1 %v492_v23  ;;  %437 = vmatprep.subr.bf16.mxu0 %v493_v24 }
  0x1a   :  { %459 = vmatprep.subr.bf16.mxu1 %v494_v25 }
  0x1c   :  { %438 = vmatpush3.bf16.msra.mxu0 %v495_v26 }
  0x1d   :  { %460 = vmatpush3.bf16.msra.mxu1 %v496_v27  ;;  %439 = vmatprep.subr.bf16.mxu0 %v497_v28 }
  0x1e   :  { %461 = vmatprep.subr.bf16.mxu1 %v498_v29 }
  0x20   :  { %440 = vmatpush3.bf16.msra.mxu0 %v499_v30 }
  0x21   :  { %462 = vmatpush3.bf16.msra.mxu1 %v500_v31 }
  0x23   :  { %334 = vmatmul.mubr.bf16.vlgmr.msra.gmra.mrb[0].mxu0 %v389_v38 }
  0x24   :  { %374 = vmatmul.mubr.bf16.vlgmr.msra.gmra.mrb[0].mxu1 %v391_v40 }
  0xf6   :  { %v441_v42 = vpop.f32.mrb[0].mxu0 }
  0xf7   :  { %v463_v43 = vpop.f32.mrb[0].mxu1  ;;  %v442_v45 = vpop.f32.mrb[1].mxu0 }
  0xf8   :  { %v464_v46 = vpop.f32.mrb[1].mxu1  ;;  %v443_v47 = vadd.f32 %v442_v45, %v441_v42  ;;  %v444_v49 = vpop.f32.mrb[2].mxu0 }
  0xf9   :  { %v465_v48 = vadd.f32 %v464_v46, %v463_v43  ;;  %v466_v50 = vpop.f32.mrb[2].mxu1  ;;  %v445_v51 = vpop.f32.mrb[3].mxu0 }
  0xfa   :  { %v467_v52 = vpop.f32.mrb[3].mxu1  ;;  %v336_v53 = vadd.f32 %v443_v47, %v388_v44 }
  0xfc   :  { %v376_v54 = vadd.f32 %v465_v48, %v336_v53 }
  0xfe   :  { %v381_v55 = vpack.c.bf16 %v376_v54, %v376_v54 }
 0x100   :  { %383 = vst.msk [vmem:[%s632_s3] sm:$0xf] %vm382_vm2, %v381_v55 }

// kernel: _lambda_.25
= control target key start
LH: loop header
LB: loop body
LE: loop exit
PB: predicated region body
PF: predicated region fallthrough
CT: control target
= control target key end

     0   :  { %s644_s12 = smov 0   ;;  %s646_s13 = smov 0   ;;  %s706_s0 = inlined_call_operand.vmem [shape: bf16[4,8,256], index: 0, kind: input, shape index: {}]   ;;  %s707_s1 = inlined_call_operand.vmem [shape: bf16[4,256,64], index: 1, kind: input, shape index: {}]   ;;  %s708_s2 = inlined_call_operand.vmem [shape: f32[1,64], index: 2, kind: input, shape index: {}]   ;;  %s709_s3 = inlined_call_operand.vmem [shape: bf16[4,8,64], index: 3, kind: output, shape index: {}]  }
   0x1   :  { %s648_s14 = smov 0  }
   0x2 LB: > { %s25_s15 = sadd.s32 1, %s617_s13  ;;  %p507_p0 = scmp.ge.s32.totalorder %s621_s14, 1  ;;  %s621_s14 = sphi %s648_s14, %s13_s14   ;;  %s617_s13 = sphi %s646_s13, %s711_s13   ;;  %s613_s12 = sphi %s644_s12, %s710_s12  }
   0x3   : > { %p27_p1 = scmp.ge.s32.totalorder %s25_s15, 4  ;;  %p167_p2 = scmp.lt.s32.totalorder %s621_s14, 5 }
   0x5   : > { %s713_s15 = smov (%p27_p1, %s25_s15), 0  ;;  %p168_p3 = pnand %p507_p0, %p167_p2 }
   0x6   : > { %p202_p4 = scmp.lt.s32.totalorder (!%p168_p3), %s613_s12, 3  ;;  %v623_v12 = vmov (!%p168_p3), 0   ;;  %v513_v22 = vld [vmem:[%s708_s2] ss:$0 sm:$0xff] (!%p168_p3)  ;;  %vm409_vm0 = vcmask (!%p168_p3), 519168  }
   0x7   : > { %171 = sbr.rel (%p168_p3) target bundleno = 270 (0x10e), region = 32 }
   0xe   : > { %s715_s12 = smov (!%p202_p4, %s613_s12), 3 }
   0xf   : > { %s535_s16 = sshll.u32 %s715_s12, 7  ;;  %s534_s20 = sshll.u32 %s715_s12, 3 }
  0x10   : > { %s668_s19 = scalar_lea.vmem %s707_s1, %s535_s16  ;;  %s210_s23 = scalar_lea.vmem %s706_s0, %s534_s20 }
  0x11   : > { %v583_v0 = vld [vmem:[%s668_s19 + $0x40] sm:$0xff]   ;;  %v585_v2 = vld [vmem:[%s668_s19 + $0x48] sm:$0xff]   ;;  %v587_v4 = vld [vmem:[%s668_s19 + $0x50] sm:$0xff]   ;;  %s512_s26 = sshll.u32 %s715_s12, 2 }
  0x12   : > { %v584_v1 = vld [vmem:[%s668_s19] sm:$0xff]   ;;  %536 = vmatprep.subr.bf16.mxu0 %v583_v0  ;;  %v586_v3 = vld [vmem:[%s668_s19 + $0x8] sm:$0xff]   ;;  %v588_v5 = vld [vmem:[%s668_s19 + $0x10] sm:$0xff]   ;;  %s222_s29 = scalar_lea.vmem %s709_s3, %s512_s26 }
  0x13   : > { %537 = vmatpush3.bf16.msra.mxu0 %v584_v1  ;;  %v589_v6 = vld [vmem:[%s668_s19 + $0x58] sm:$0xff]   ;;  %v591_v8 = vld [vmem:[%s668_s19 + $0x60] sm:$0xff]   ;;  %v593_v10 = vld [vmem:[%s668_s19 + $0x68] sm:$0xff]  }
  0x14   : > { %538 = vmatprep.subr.bf16.mxu0 %v585_v2  ;;  %v590_v7 = vld [vmem:[%s668_s19 + $0x18] sm:$0xff]   ;;  %v592_v9 = vld [vmem:[%s668_s19 + $0x20] sm:$0xff]   ;;  %v594_v14 = vld [vmem:[%s668_s19 + $0x28] sm:$0xff]  }
  0x15   : > { %v224_v11 = vld [vmem:[%s210_s23] sm:$0xff]  ;;  %v595_v16 = vld [vmem:[%s668_s19 + $0x70] sm:$0xff]   ;;  %v597_v18 = vld [vmem:[%s668_s19 + $0x78] sm:$0xff]  }
  0x16   : > { %v225_v13 = vmax.bf16 %v623_v12, %v224_v11  ;;  %v596_v17 = vld [vmem:[%s668_s19 + $0x30] sm:$0xff]   ;;  %v598_v19 = vld [vmem:[%s668_s19 + $0x38] sm:$0xff]  }
  0x17   : > { %539 = vmatpush3.bf16.msra.mxu0 %v586_v3 }
  0x18   : > { %540 = vmatprep.subr.bf16.mxu0 %v587_v4  ;;  %v515_v15 = vcombine.high %v225_v13, %v225_v13  ;;  %v514_v20 = vcombine.low %v225_v13, %v225_v13 }
  0x1a   : > { %400 = vmatprep.mubr.bf16.mxu0 %v515_v15 }
  0x1b   : > { %541 = vmatpush3.bf16.msra.mxu0 %v588_v5 }
  0x1c   : > { %542 = vmatprep.subr.bf16.mxu0 %v589_v6 }
  0x1f   : > { %543 = vmatpush3.bf16.msra.mxu0 %v590_v7 }
  0x20   : > { %544 = vmatprep.subr.bf16.mxu0 %v591_v8 }
  0x23   : > { %545 = vmatpush3.bf16.msra.mxu0 %v592_v9 }
  0x24   : > { %546 = vmatprep.subr.bf16.mxu0 %v593_v10 }
  0x27   : > { %547 = vmatpush3.bf16.msra.mxu0 %v594_v14 }
  0x28   : > { %548 = vmatprep.subr.bf16.mxu0 %v595_v16 }
  0x2b   : > { %549 = vmatpush3.bf16.msra.mxu0 %v596_v17 }
  0x2c   : > { %550 = vmatprep.subr.bf16.mxu0 %v597_v18 }
  0x2f   : > { %551 = vmatpush3.bf16.msra.mxu0 %v598_v19 }
  0x32   : > { %401 = vmatmul.mubr.bf16.vlgmr.msra.gmra.mrb[0].mxu0 %v514_v20 }
 0x105   : > { %v552_v21 = vpop.f32.mrb[0].mxu0 }
 0x106   : > { %v553_v23 = vpop.f32.mrb[1].mxu0 }
 0x107   : > { %v554_v24 = vadd.f32 %v553_v23, %v552_v21  ;;  %v555_v25 = vpop.f32.mrb[2].mxu0 }
 0x108   : > { %v556_v26 = vpop.f32.mrb[3].mxu0 }
 0x109   : > { %v403_v27 = vadd.f32 %v554_v24, %v513_v22 }
 0x10b   : > { %v408_v28 = vpack.c.bf16 %v403_v27, %v403_v27 }
 0x10d   : > { %410 = vst.msk [vmem:[%s222_s29] sm:$0xf] %vm409_vm0, %v408_v28 }
 0x10e PF: > { %s13_s14 = sadd.s32 1, %s621_s14   ;;  %s710_s12 = smov %s617_s13 }
 0x10f   : > { %p10_p5 = scmp.ge.s32.totalorder %s13_s14, 6   ;;  %s711_s13 = smov %s713_s15 }
 0x111   :  { %12 = sbr.rel (!%p10_p5) target bundleno = 2 (0x2), region = 65 }

// kernel: _lambda_.24
= control target key start
LH: loop header
LB: loop body
LE: loop exit
PB: predicated region body
PF: predicated region fallthrough
CT: control target
= control target key end

     0   :  { %vm740_vm4 = vcmask 519168   ;;  %s1201_s1 = inlined_call_operand.vmem [shape: bf16[1,1024,64], index: 1, kind: input, shape index: {}]   ;;  %s1202_s0 = inlined_call_operand.vmem [shape: bf16[1,8,1024], index: 0, kind: input, shape index: {}]   ;;  %s1203_s2 = inlined_call_operand.vmem [shape: f32[1,64], index: 2, kind: input, shape index: {}]   ;;  %s1204_s3 = inlined_call_operand.vmem [shape: bf16[1,8,64], index: 3, kind: output, shape index: {}]  }
   0x1   :  { %v907_v0 = vld [vmem:[%s1201_s1 + $0x40] sm:$0xff]   ;;  %v911_v4 = vld [vmem:[%s1201_s1 + $0x48] sm:$0xff]   ;;  %v915_v8 = vld [vmem:[%s1201_s1 + $0x50] sm:$0xff]  }
   0x2   :  { %v908_v1 = vld [vmem:[%s1201_s1 + $0xc0] sm:$0xff]   ;;  %819 = vmatprep.subr.bf16.mxu0 %v907_v0  ;;  %v912_v5 = vld [vmem:[%s1201_s1 + $0xc8] sm:$0xff]   ;;  %v916_v9 = vld [vmem:[%s1201_s1 + $0xd0] sm:$0xff]  }
   0x3   :  { %v909_v2 = vld [vmem:[%s1201_s1] sm:$0xff]   ;;  %841 = vmatprep.subr.bf16.mxu1 %v908_v1  ;;  %v913_v6 = vld [vmem:[%s1201_s1 + $0x8] sm:$0xff]   ;;  %v917_v10 = vld [vmem:[%s1201_s1 + $0x10] sm:$0xff]  }
   0x4   :  { %v910_v3 = vld [vmem:[%s1201_s1 + $0x80] sm:$0xff]   ;;  %820 = vmatpush3.bf16.msra.mxu0 %v909_v2  ;;  %v914_v7 = vld [vmem:[%s1201_s1 + $0x88] sm:$0xff]   ;;  %v918_v11 = vld [vmem:[%s1201_s1 + $0x90] sm:$0xff]  }
   0x5   :  { %842 = vmatpush3.bf16.msra.mxu1 %v910_v3  ;;  %821 = vmatprep.subr.bf16.mxu0 %v911_v4  ;;  %v919_v12 = vld [vmem:[%s1201_s1 + $0x58] sm:$0xff]   ;;  %v923_v16 = vld [vmem:[%s1201_s1 + $0x60] sm:$0xff]   ;;  %v927_v20 = vld [vmem:[%s1201_s1 + $0x68] sm:$0xff]  }
   0x6   :  { %843 = vmatprep.subr.bf16.mxu1 %v912_v5  ;;  %v920_v13 = vld [vmem:[%s1201_s1 + $0xd8] sm:$0xff]   ;;  %v924_v17 = vld [vmem:[%s1201_s1 + $0xe0] sm:$0xff]   ;;  %v928_v21 = vld [vmem:[%s1201_s1 + $0xe8] sm:$0xff]  }
   0x7   :  { %v921_v14 = vld [vmem:[%s1201_s1 + $0x18] sm:$0xff]   ;;  %v925_v18 = vld [vmem:[%s1201_s1 + $0x20] sm:$0xff]   ;;  %v929_v22 = vld [vmem:[%s1201_s1 + $0x28] sm:$0xff]  }
   0x8   :  { %822 = vmatpush3.bf16.msra.mxu0 %v913_v6  ;;  %v922_v15 = vld [vmem:[%s1201_s1 + $0x98] sm:$0xff]   ;;  %v926_v19 = vld [vmem:[%s1201_s1 + $0xa0] sm:$0xff]   ;;  %v930_v23 = vld [vmem:[%s1201_s1 + $0xa8] sm:$0xff]  }
   0x9   :  { %844 = vmatpush3.bf16.msra.mxu1 %v914_v7  ;;  %823 = vmatprep.subr.bf16.mxu0 %v915_v8  ;;  %v931_v24 = vld [vmem:[%s1201_s1 + $0x70] sm:$0xff]   ;;  %v935_v28 = vld [vmem:[%s1201_s1 + $0x78] sm:$0xff]   ;;  %v16_v32 = vld [vmem:[%s1202_s0] sm:$0xff] }
   0xa   :  { %845 = vmatprep.subr.bf16.mxu1 %v916_v9  ;;  %v932_v25 = vld [vmem:[%s1201_s1 + $0xf0] sm:$0xff]   ;;  %v936_v29 = vld [vmem:[%s1201_s1 + $0xf8] sm:$0xff]   ;;  %v17_v33 = vld [vmem:[%s1202_s0 + $0x8] sm:$0xff]  ;;  %vm20_vm0 = vcmp.gt.bf16.partialorder %v16_v32, 0  ;;  %v24_v34 = vmul.bf16 1045249613, %v16_v32 }
   0xb   :  { %v933_v26 = vld [vmem:[%s1201_s1 + $0x30] sm:$0xff]   ;;  %v937_v30 = vld [vmem:[%s1201_s1 + $0x38] sm:$0xff]   ;;  %vm21_vm1 = vcmp.gt.bf16.partialorder %v17_v33, 0  ;;  %v25_v35 = vmul.bf16 1045249613, %v17_v33  ;;  %v939_v36 = vld [vmem:[%s1201_s1 + $0x140] sm:$0xff]  }
   0xc   :  { %824 = vmatpush3.bf16.msra.mxu0 %v917_v10  ;;  %v934_v27 = vld [vmem:[%s1201_s1 + $0xb0] sm:$0xff]   ;;  %v938_v31 = vld [vmem:[%s1201_s1 + $0xb8] sm:$0xff]   ;;  %v28_v37 = vsel %vm20_vm0, %v16_v32, %v24_v34  ;;  %v940_v39 = vld [vmem:[%s1201_s1 + $0x1c0] sm:$0xff]  }
   0xd   :  { %846 = vmatpush3.bf16.msra.mxu1 %v918_v11  ;;  %825 = vmatprep.subr.bf16.mxu0 %v919_v12  ;;  %v29_v38 = vsel %vm21_vm1, %v17_v33, %v25_v35  ;;  %v747_v40 = vcombine.low %v28_v37, %v28_v37  ;;  %v748_v41 = vcombine.high %v28_v37, %v28_v37  ;;  %v941_v44 = vld [vmem:[%s1201_s1 + $0x100] sm:$0xff]   ;;  %v943_v46 = vld [vmem:[%s1201_s1 + $0x148] sm:$0xff]   ;;  %v947_v50 = vld [vmem:[%s1201_s1 + $0x150] sm:$0xff]  }
   0xe   :  { %847 = vmatprep.subr.bf16.mxu1 %v920_v13  ;;  %v749_v42 = vcombine.low %v29_v38, %v29_v38  ;;  %v750_v43 = vcombine.high %v29_v38, %v29_v38  ;;  %v942_v45 = vld [vmem:[%s1201_s1 + $0x180] sm:$0xff]   ;;  %v944_v47 = vld [vmem:[%s1201_s1 + $0x1c8] sm:$0xff]   ;;  %v948_v51 = vld [vmem:[%s1201_s1 + $0x1d0] sm:$0xff]  }
   0xf   :  { %611 = vmatprep.mubr.bf16.mxu0 %v748_v41  ;;  %v945_v48 = vld [vmem:[%s1201_s1 + $0x108] sm:$0xff]   ;;  %v949_v52 = vld [vmem:[%s1201_s1 + $0x110] sm:$0xff]   ;;  %v951_v54 = vld [vmem:[%s1201_s1 + $0x158] sm:$0xff]  }
  0x10   :  { %826 = vmatpush3.bf16.msra.mxu0 %v921_v14  ;;  %651 = vmatprep.mubr.bf16.mxu1 %v750_v43  ;;  %v946_v49 = vld [vmem:[%s1201_s1 + $0x188] sm:$0xff]   ;;  %v950_v53 = vld [vmem:[%s1201_s1 + $0x190] sm:$0xff]   ;;  %v952_v55 = vld [vmem:[%s1201_s1 + $0x1d8] sm:$0xff]  }
  0x11   :  { %848 = vmatpush3.bf16.msra.mxu1 %v922_v15  ;;  %827 = vmatprep.subr.bf16.mxu0 %v923_v16  ;;  %v953_v56 = vld [vmem:[%s1201_s1 + $0x118] sm:$0xff]   ;;  %v955_v58 = vld [vmem:[%s1201_s1 + $0x160] sm:$0xff]   ;;  %v959_v62 = vld [vmem:[%s1201_s1 + $0x168] sm:$0xff]  }
  0x12   :  { %849 = vmatprep.subr.bf16.mxu1 %v924_v17  ;;  %v954_v57 = vld [vmem:[%s1201_s1 + $0x198] sm:$0xff]   ;;  %v956_v59 = vld [vmem:[%s1201_s1 + $0x1e0] sm:$0xff]   ;;  %v960_v63 = vld [vmem:[%s1201_s1 + $0x1e8] sm:$0xff]  }
  0x13   :  { %v957_v60 = vld [vmem:[%s1201_s1 + $0x120] sm:$0xff]   ;;  %v961_v0 = vld [vmem:[%s1201_s1 + $0x128] sm:$0xff]   ;;  %v963_v2 = vld [vmem:[%s1201_s1 + $0x170] sm:$0xff]  }
  0x14   :  { %828 = vmatpush3.bf16.msra.mxu0 %v925_v18  ;;  %v958_v61 = vld [vmem:[%s1201_s1 + $0x1a0] sm:$0xff]   ;;  %v962_v1 = vld [vmem:[%s1201_s1 + $0x1a8] sm:$0xff]   ;;  %v964_v3 = vld [vmem:[%s1201_s1 + $0x1f0] sm:$0xff]  }
  0x15   :  { %850 = vmatpush3.bf16.msra.mxu1 %v926_v19  ;;  %829 = vmatprep.subr.bf16.mxu0 %v927_v20  ;;  %v965_v4 = vld [vmem:[%s1201_s1 + $0x130] sm:$0xff]   ;;  %v967_v6 = vld [vmem:[%s1201_s1 + $0x178] sm:$0xff]  }
  0x16   :  { %851 = vmatprep.subr.bf16.mxu1 %v928_v21  ;;  %v966_v5 = vld [vmem:[%s1201_s1 + $0x1b0] sm:$0xff]   ;;  %v968_v7 = vld [vmem:[%s1201_s1 + $0x1f8] sm:$0xff]  }
  0x17   :  { %v969_v8 = vld [vmem:[%s1201_s1 + $0x138] sm:$0xff]   ;;  %v18_v10 = vld [vmem:[%s1202_s0 + $0x10] sm:$0xff] }
  0x18   :  { %830 = vmatpush3.bf16.msra.mxu0 %v929_v22  ;;  %v970_v9 = vld [vmem:[%s1201_s1 + $0x1b8] sm:$0xff]   ;;  %vm22_vm2 = vcmp.gt.bf16.partialorder %v18_v10, 0  ;;  %v26_v11 = vmul.bf16 1045249613, %v18_v10  ;;  %v746_v22 = vld [vmem:[%s1203_s2] ss:$0 sm:$0xff] }
  0x19   :  { %852 = vmatpush3.bf16.msra.mxu1 %v930_v23  ;;  %831 = vmatprep.subr.bf16.mxu0 %v931_v24  ;;  %v19_v12 = vld [vmem:[%s1202_s0 + $0x18] sm:$0xff] }
  0x1a   :  { %853 = vmatprep.subr.bf16.mxu1 %v932_v25  ;;  %vm23_vm3 = vcmp.gt.bf16.partialorder %v19_v12, 0  ;;  %v27_v13 = vmul.bf16 1045249613, %v19_v12  ;;  %v30_v14 = vsel %vm22_vm2, %v18_v10, %v26_v11 }
  0x1b   :  { %v751_v15 = vcombine.low %v30_v14, %v30_v14  ;;  %v752_v16 = vcombine.high %v30_v14, %v30_v14 }
  0x1c   :  { %832 = vmatpush3.bf16.msra.mxu0 %v933_v26  ;;  %v31_v17 = vsel %vm23_vm3, %v19_v12, %v27_v13 }
  0x1d   :  { %854 = vmatpush3.bf16.msra.mxu1 %v934_v27  ;;  %833 = vmatprep.subr.bf16.mxu0 %v935_v28  ;;  %v753_v18 = vcombine.low %v31_v17, %v31_v17  ;;  %v754_v19 = vcombine.high %v31_v17, %v31_v17 }
  0x1e   :  { %855 = vmatprep.subr.bf16.mxu1 %v936_v29 }
  0x20   :  { %834 = vmatpush3.bf16.msra.mxu0 %v937_v30 }
  0x21   :  { %856 = vmatpush3.bf16.msra.mxu1 %v938_v31  ;;  %863 = vmatprep.subr.bf16.mxu0 %v939_v36 }
  0x22   :  { %885 = vmatprep.subr.bf16.mxu1 %v940_v39 }
  0x23   :  { %612 = vmatmul.mubr.bf16.vlgmr.msra.gmra.mrb[0].mxu0 %v747_v40 }
  0x24   :  { %652 = vmatmul.mubr.bf16.vlgmr.msra.gmra.mrb[0].mxu1 %v749_v42  ;;  %864 = vmatpush3.bf16.msra.mxu0 %v941_v44 }
  0x25   :  { %886 = vmatpush3.bf16.msra.mxu1 %v942_v45  ;;  %865 = vmatprep.subr.bf16.mxu0 %v943_v46 }
  0x26   :  { %887 = vmatprep.subr.bf16.mxu1 %v944_v47  ;;  %691 = vmatprep.mubr.bf16.mxu0 %v752_v16 }
  0x27   :  { %731 = vmatprep.mubr.bf16.mxu1 %v754_v19 }
  0x28   :  { %866 = vmatpush3.bf16.msra.mxu0 %v945_v48 }
  0x29   :  { %888 = vmatpush3.bf16.msra.mxu1 %v946_v49  ;;  %867 = vmatprep.subr.bf16.mxu0 %v947_v50 }
  0x2a   :  { %889 = vmatprep.subr.bf16.mxu1 %v948_v51 }
  0x2c   :  { %868 = vmatpush3.bf16.msra.mxu0 %v949_v52 }
  0x2d   :  { %890 = vmatpush3.bf16.msra.mxu1 %v950_v53  ;;  %869 = vmatprep.subr.bf16.mxu0 %v951_v54 }
  0x2e   :  { %891 = vmatprep.subr.bf16.mxu1 %v952_v55 }
  0x30   :  { %870 = vmatpush3.bf16.msra.mxu0 %v953_v56 }
  0x31   :  { %892 = vmatpush3.bf16.msra.mxu1 %v954_v57  ;;  %871 = vmatprep.subr.bf16.mxu0 %v955_v58 }
  0x32   :  { %893 = vmatprep.subr.bf16.mxu1 %v956_v59 }
  0x34   :  { %872 = vmatpush3.bf16.msra.mxu0 %v957_v60 }
  0x35   :  { %894 = vmatpush3.bf16.msra.mxu1 %v958_v61  ;;  %873 = vmatprep.subr.bf16.mxu0 %v959_v62 }
  0x36   :  { %895 = vmatprep.subr.bf16.mxu1 %v960_v63 }
  0x38   :  { %874 = vmatpush3.bf16.msra.mxu0 %v961_v0 }
  0x39   :  { %896 = vmatpush3.bf16.msra.mxu1 %v962_v1  ;;  %875 = vmatprep.subr.bf16.mxu0 %v963_v2 }
  0x3a   :  { %897 = vmatprep.subr.bf16.mxu1 %v964_v3 }
  0x3c   :  { %876 = vmatpush3.bf16.msra.mxu0 %v965_v4 }
  0x3d   :  { %898 = vmatpush3.bf16.msra.mxu1 %v966_v5  ;;  %877 = vmatprep.subr.bf16.mxu0 %v967_v6 }
  0x3e   :  { %899 = vmatprep.subr.bf16.mxu1 %v968_v7 }
  0x40   :  { %878 = vmatpush3.bf16.msra.mxu0 %v969_v8 }
  0x41   :  { %900 = vmatpush3.bf16.msra.mxu1 %v970_v9 }
  0x43   :  { %692 = vmatmul.mubr.bf16.vlgmr.msra.gmra.mrb[4].mxu0 %v751_v15 }
  0x44   :  { %732 = vmatmul.mubr.bf16.vlgmr.msra.gmra.mrb[4].mxu1 %v753_v18 }
  0xf6   :  { %v835_v20 = vpop.f32.mrb[0].mxu0 }
  0xf7   :  { %v857_v21 = vpop.f32.mrb[0].mxu1  ;;  %v836_v23 = vpop.f32.mrb[1].mxu0 }
  0xf8   :  { %v858_v24 = vpop.f32.mrb[1].mxu1  ;;  %v837_v25 = vadd.f32 %v836_v23, %v835_v20  ;;  %v838_v27 = vpop.f32.mrb[2].mxu0 }
  0xf9   :  { %v859_v26 = vadd.f32 %v858_v24, %v857_v21  ;;  %v860_v28 = vpop.f32.mrb[2].mxu1  ;;  %v839_v29 = vpop.f32.mrb[3].mxu0 }
  0xfa   :  { %v861_v30 = vpop.f32.mrb[3].mxu1  ;;  %v614_v31 = vadd.f32 %v837_v25, %v746_v22 }
  0xfc   :  { %v654_v32 = vadd.f32 %v859_v26, %v614_v31 }
 0x116   :  { %v879_v33 = vpop.f32.mrb[4].mxu0 }
 0x117   :  { %v901_v34 = vpop.f32.mrb[4].mxu1  ;;  %v880_v35 = vpop.f32.mrb[5].mxu0 }
 0x118   :  { %v881_v36 = vadd.f32 %v880_v35, %v879_v33  ;;  %v902_v37 = vpop.f32.mrb[5].mxu1  ;;  %v882_v38 = vpop.f32.mrb[6].mxu0 }
 0x119   :  { %v903_v39 = vadd.f32 %v902_v37, %v901_v34  ;;  %v904_v40 = vpop.f32.mrb[6].mxu1  ;;  %v883_v41 = vpop.f32.mrb[7].mxu0 }
 0x11a   :  { %v694_v42 = vadd.f32 %v881_v36, %v654_v32  ;;  %v905_v43 = vpop.f32.mrb[7].mxu1 }
 0x11c   :  { %v734_v44 = vadd.f32 %v903_v39, %v694_v42 }
 0x11e   :  { %v739_v45 = vpack.c.bf16 %v734_v44, %v734_v44 }
 0x120   :  { %741 = vst.msk [vmem:[%s1204_s3] sm:$0xf] %vm740_vm4, %v739_v45 }

// kernel: _lambda_.27
= control target key start
LH: loop header
LB: loop body
LE: loop exit
PB: predicated region body
PF: predicated region fallthrough
CT: control target
= control target key end

     0   :  { %s877_s12 = smov 0   ;;  %s879_s13 = smov 0   ;;  %s955_s0 = inlined_call_operand.vmem [shape: bf16[4,8,512], index: 0, kind: input, shape index: {}]   ;;  %s956_s1 = inlined_call_operand.vmem [shape: bf16[4,512,32], index: 1, kind: input, shape index: {}]   ;;  %s957_s2 = inlined_call_operand.vmem [shape: f32[1,32], index: 2, kind: input, shape index: {}]   ;;  %s958_s3 = inlined_call_operand.vmem [shape: bf16[4,8,32], index: 3, kind: output, shape index: {}]  }
   0x1   :  { %s881_s14 = smov 0  }
   0x2 LB: > { %s25_s15 = sadd.s32 1, %s850_s13  ;;  %p684_p0 = scmp.ge.s32.totalorder %s854_s14, 1  ;;  %s854_s14 = sphi %s881_s14, %s13_s14   ;;  %s850_s13 = sphi %s879_s13, %s960_s13   ;;  %s846_s12 = sphi %s877_s12, %s959_s12  }
   0x3   : > { %p27_p1 = scmp.ge.s32.totalorder %s25_s15, 4  ;;  %p167_p2 = scmp.lt.s32.totalorder %s854_s14, 5 }
   0x5   : > { %s962_s15 = smov (%p27_p1, %s25_s15), 0  ;;  %p168_p3 = pnand %p684_p0, %p167_p2 }
   0x6   : > { %p202_p4 = scmp.lt.s32.totalorder (!%p168_p3), %s846_s12, 3  ;;  %v856_v34 = vmov (!%p168_p3), 0   ;;  %v690_v43 = vld [vmem:[%s957_s2] ss:$0 sm:$0xff] (!%p168_p3)  ;;  %vm586_vm0 = vcmask (!%p168_p3), 257024  }
   0x7   : > { %171 = sbr.rel (%p168_p3) target bundleno = 273 (0x111), region = 32 }
   0xe   : > { %s964_s12 = smov (!%p202_p4, %s846_s12), 3 }
   0xf   : > { %s730_s16 = sshll.u32 %s964_s12, 8  ;;  %s729_s20 = sshll.u32 %s964_s12, 4 }
  0x10   : > { %s901_s19 = scalar_lea.vmem %s956_s1, %s730_s16  ;;  %s210_s23 = scalar_lea.vmem %s955_s0, %s729_s20 }
  0x11   : > { %v800_v0 = vld [vmem:[%s901_s19 + $0x40] sm:$0xff]   ;;  %v804_v4 = vld [vmem:[%s901_s19 + $0x48] sm:$0xff]   ;;  %v808_v8 = vld [vmem:[%s901_s19 + $0x50] sm:$0xff]   ;;  %s689_s26 = sshll.u32 %s964_s12, 2 }
  0x12   : > { %v801_v1 = vld [vmem:[%s901_s19 + $0xc0] sm:$0xff]   ;;  %731 = vmatprep.subr.bf16.mxu0 %v800_v0  ;;  %v805_v5 = vld [vmem:[%s901_s19 + $0xc8] sm:$0xff]   ;;  %v809_v9 = vld [vmem:[%s901_s19 + $0xd0] sm:$0xff]   ;;  %s222_s29 = scalar_lea.vmem %s958_s3, %s689_s26 }
  0x13   : > { %v802_v2 = vld [vmem:[%s901_s19] sm:$0xff]   ;;  %753 = vmatprep.subr.bf16.mxu1 %v801_v1  ;;  %v806_v6 = vld [vmem:[%s901_s19 + $0x8] sm:$0xff]   ;;  %v810_v10 = vld [vmem:[%s901_s19 + $0x10] sm:$0xff]  }
  0x14   : > { %v803_v3 = vld [vmem:[%s901_s19 + $0x80] sm:$0xff]   ;;  %732 = vmatpush3.bf16.msra.mxu0 %v802_v2  ;;  %v807_v7 = vld [vmem:[%s901_s19 + $0x88] sm:$0xff]   ;;  %v811_v11 = vld [vmem:[%s901_s19 + $0x90] sm:$0xff]  }
  0x15   : > { %754 = vmatpush3.bf16.msra.mxu1 %v803_v3  ;;  %733 = vmatprep.subr.bf16.mxu0 %v804_v4  ;;  %v812_v12 = vld [vmem:[%s901_s19 + $0x58] sm:$0xff]   ;;  %v816_v16 = vld [vmem:[%s901_s19 + $0x60] sm:$0xff]   ;;  %v820_v20 = vld [vmem:[%s901_s19 + $0x68] sm:$0xff]  }
  0x16   : > { %755 = vmatprep.subr.bf16.mxu1 %v805_v5  ;;  %v813_v13 = vld [vmem:[%s901_s19 + $0xd8] sm:$0xff]   ;;  %v817_v17 = vld [vmem:[%s901_s19 + $0xe0] sm:$0xff]   ;;  %v821_v21 = vld [vmem:[%s901_s19 + $0xe8] sm:$0xff]  }
  0x17   : > { %v814_v14 = vld [vmem:[%s901_s19 + $0x18] sm:$0xff]   ;;  %v818_v18 = vld [vmem:[%s901_s19 + $0x20] sm:$0xff]   ;;  %v822_v22 = vld [vmem:[%s901_s19 + $0x28] sm:$0xff]  }
  0x18   : > { %734 = vmatpush3.bf16.msra.mxu0 %v806_v6  ;;  %v815_v15 = vld [vmem:[%s901_s19 + $0x98] sm:$0xff]   ;;  %v819_v19 = vld [vmem:[%s901_s19 + $0xa0] sm:$0xff]   ;;  %v823_v23 = vld [vmem:[%s901_s19 + $0xa8] sm:$0xff]  }
  0x19   : > { %756 = vmatpush3.bf16.msra.mxu1 %v807_v7  ;;  %735 = vmatprep.subr.bf16.mxu0 %v808_v8  ;;  %v824_v24 = vld [vmem:[%s901_s19 + $0x70] sm:$0xff]   ;;  %v828_v28 = vld [vmem:[%s901_s19 + $0x78] sm:$0xff]   ;;  %v224_v32 = vld [vmem:[%s210_s23] sm:$0xff] }
  0x1a   : > { %757 = vmatprep.subr.bf16.mxu1 %v809_v9  ;;  %v825_v25 = vld [vmem:[%s901_s19 + $0xf0] sm:$0xff]   ;;  %v829_v29 = vld [vmem:[%s901_s19 + $0xf8] sm:$0xff]   ;;  %v225_v33 = vld [vmem:[%s210_s23 + $0x8] sm:$0xff]  ;;  %v226_v35 = vmax.bf16 %v856_v34, %v224_v32 }
  0x1b   : > { %v826_v26 = vld [vmem:[%s901_s19 + $0x30] sm:$0xff]   ;;  %v830_v30 = vld [vmem:[%s901_s19 + $0x38] sm:$0xff]   ;;  %v227_v36 = vmax.bf16 %v856_v34, %v225_v33 }
  0x1c   : > { %736 = vmatpush3.bf16.msra.mxu0 %v810_v10  ;;  %v827_v27 = vld [vmem:[%s901_s19 + $0xb0] sm:$0xff]   ;;  %v831_v31 = vld [vmem:[%s901_s19 + $0xb8] sm:$0xff]   ;;  %v692_v37 = vcombine.high %v226_v35, %v226_v35  ;;  %v691_v39 = vcombine.low %v226_v35, %v226_v35 }
  0x1d   : > { %758 = vmatpush3.bf16.msra.mxu1 %v811_v11  ;;  %737 = vmatprep.subr.bf16.mxu0 %v812_v12  ;;  %v694_v38 = vcombine.high %v227_v36, %v227_v36  ;;  %v693_v40 = vcombine.low %v227_v36, %v227_v36 }
  0x1e   : > { %759 = vmatprep.subr.bf16.mxu1 %v813_v13  ;;  %537 = vmatprep.mubr.bf16.mxu0 %v692_v37 }
  0x1f   : > { %577 = vmatprep.mubr.bf16.mxu1 %v694_v38 }
  0x20   : > { %738 = vmatpush3.bf16.msra.mxu0 %v814_v14 }
  0x21   : > { %760 = vmatpush3.bf16.msra.mxu1 %v815_v15  ;;  %739 = vmatprep.subr.bf16.mxu0 %v816_v16 }
  0x22   : > { %761 = vmatprep.subr.bf16.mxu1 %v817_v17 }
  0x24   : > { %740 = vmatpush3.bf16.msra.mxu0 %v818_v18 }
  0x25   : > { %762 = vmatpush3.bf16.msra.mxu1 %v819_v19  ;;  %741 = vmatprep.subr.bf16.mxu0 %v820_v20 }
  0x26   : > { %763 = vmatprep.subr.bf16.mxu1 %v821_v21 }
  0x28   : > { %742 = vmatpush3.bf16.msra.mxu0 %v822_v22 }
  0x29   : > { %764 = vmatpush3.bf16.msra.mxu1 %v823_v23  ;;  %743 = vmatprep.subr.bf16.mxu0 %v824_v24 }
  0x2a   : > { %765 = vmatprep.subr.bf16.mxu1 %v825_v25 }
  0x2c   : > { %744 = vmatpush3.bf16.msra.mxu0 %v826_v26 }
  0x2d   : > { %766 = vmatpush3.bf16.msra.mxu1 %v827_v27  ;;  %745 = vmatprep.subr.bf16.mxu0 %v828_v28 }
  0x2e   : > { %767 = vmatprep.subr.bf16.mxu1 %v829_v29 }
  0x30   : > { %746 = vmatpush3.bf16.msra.mxu0 %v830_v30 }
  0x31   : > { %768 = vmatpush3.bf16.msra.mxu1 %v831_v31 }
  0x33   : > { %538 = vmatmul.mubr.bf16.vlgmr.msra.gmra.mrb[0].mxu0 %v691_v39 }
  0x34   : > { %578 = vmatmul.mubr.bf16.vlgmr.msra.gmra.mrb[0].mxu1 %v693_v40 }
 0x106   : > { %v747_v41 = vpop.f32.mrb[0].mxu0 }
 0x107   : > { %v769_v42 = vpop.f32.mrb[0].mxu1  ;;  %v748_v44 = vpop.f32.mrb[1].mxu0 }
 0x108   : > { %v770_v45 = vpop.f32.mrb[1].mxu1  ;;  %v749_v46 = vadd.f32 %v748_v44, %v747_v41  ;;  %v750_v48 = vpop.f32.mrb[2].mxu0 }
 0x109   : > { %v771_v47 = vadd.f32 %v770_v45, %v769_v42  ;;  %v772_v49 = vpop.f32.mrb[2].mxu1  ;;  %v751_v50 = vpop.f32.mrb[3].mxu0 }
 0x10a   : > { %v773_v51 = vpop.f32.mrb[3].mxu1  ;;  %v540_v52 = vadd.f32 %v749_v46, %v690_v43 }
 0x10c   : > { %v580_v53 = vadd.f32 %v771_v47, %v540_v52 }
 0x10e   : > { %v585_v54 = vpack.c.bf16 %v580_v53, %v580_v53 }
 0x110   : > { %587 = vst.msk [vmem:[%s222_s29] sm:$0xf] %vm586_vm0, %v585_v54 }
 0x111 PF: > { %s13_s14 = sadd.s32 1, %s854_s14   ;;  %s959_s12 = smov %s850_s13 }
 0x112   : > { %p10_p5 = scmp.ge.s32.totalorder %s13_s14, 6   ;;  %s960_s13 = smov %s962_s15 }
 0x114   :  { %12 = sbr.rel (!%p10_p5) target bundleno = 2 (0x2), region = 65 }

// kernel: _lambda_.29
= control target key start
LH: loop header
LB: loop body
LE: loop exit
PB: predicated region body
PF: predicated region fallthrough
CT: control target
= control target key end

     0   :  { %s744_s12 = smov 0   ;;  %s746_s13 = smov 0   ;;  %s806_s0 = inlined_call_operand.vmem [shape: bf16[4,32,256], index: 0, kind: input, shape index: {}]   ;;  %s807_s1 = inlined_call_operand.vmem [shape: bf16[4,256,16], index: 1, kind: input, shape index: {}]   ;;  %s808_s2 = inlined_call_operand.vmem [shape: f32[1,16], index: 2, kind: input, shape index: {}]   ;;  %s809_s3 = inlined_call_operand.vmem [shape: bf16[4,32,16], index: 3, kind: output, shape index: {}]  }
   0x1   :  { %s748_s14 = smov 0  }
   0x2 LB: > { %s25_s15 = sadd.s32 1, %s717_s13  ;;  %p573_p0 = scmp.ge.s32.totalorder %s721_s14, 1  ;;  %s721_s14 = sphi %s748_s14, %s13_s14   ;;  %s717_s13 = sphi %s746_s13, %s811_s13   ;;  %s713_s12 = sphi %s744_s12, %s810_s12  }
   0x3   : > { %p27_p1 = scmp.ge.s32.totalorder %s25_s15, 4  ;;  %p169_p2 = scmp.lt.s32.totalorder %s721_s14, 5 }
   0x5   : > { %s813_s15 = smov (%p27_p1, %s25_s15), 0  ;;  %p170_p3 = pnand %p573_p0, %p169_p2 }
   0x6   : > { %p208_p4 = scmp.lt.s32.totalorder (!%p170_p3), %s713_s12, 3  ;;  %v723_v14 = vmov (!%p170_p3), 0   ;;  %v580_v31 = vld [vmem:[%s808_s2] ss:$0 sm:$0xff] (!%p170_p3)  ;;  %vm462_vm0 = vcmask (!%p170_p3), 125952  }
   0x7   : > { %173 = sbr.rel (%p170_p3) target bundleno = 272 (0x110), region = 32 }
   0xe   : > { %s815_s12 = smov (!%p208_p4, %s713_s12), 3 }
   0xf   : > { %s608_s16 = sshll.u32 %s815_s12, 7  ;;  %s607_s20 = sshll.u32 %s815_s12, 5 }
  0x10   : > { %s768_s19 = scalar_lea.vmem %s807_s1, %s608_s16  ;;  %s216_s23 = scalar_lea.vmem %s806_s0, %s607_s20 }
  0x11   : > { %v683_v0 = vld [vmem:[%s768_s19 + $0x40] sm:$0xff]   ;;  %v685_v2 = vld [vmem:[%s768_s19 + $0x48] sm:$0xff]   ;;  %v687_v4 = vld [vmem:[%s768_s19 + $0x50] sm:$0xff]   ;;  %s609_s26 = sshll.u32 %s815_s12, 4 }
  0x12   : > { %v684_v1 = vld [vmem:[%s768_s19] sm:$0xff]   ;;  %614 = vmatprep.subr.bf16.mxu0 %v683_v0  ;;  %642 = vmatprep.subr.bf16.mxu1 %v683_v0  ;;  %v686_v3 = vld [vmem:[%s768_s19 + $0x8] sm:$0xff]   ;;  %v688_v5 = vld [vmem:[%s768_s19 + $0x10] sm:$0xff]   ;;  %s231_s29 = scalar_lea.vmem %s809_s3, %s609_s26 }
  0x13   : > { %615 = vmatpush3.bf16.msra.mxu0 %v684_v1  ;;  %650 = vmatpush3.bf16.msra.mxu1 %v684_v1  ;;  %v689_v6 = vld [vmem:[%s768_s19 + $0x58] sm:$0xff]   ;;  %v691_v8 = vld [vmem:[%s768_s19 + $0x60] sm:$0xff]   ;;  %v693_v10 = vld [vmem:[%s768_s19 + $0x68] sm:$0xff]  }
  0x14   : > { %616 = vmatprep.subr.bf16.mxu0 %v685_v2  ;;  %643 = vmatprep.subr.bf16.mxu1 %v685_v2  ;;  %v690_v7 = vld [vmem:[%s768_s19 + $0x18] sm:$0xff]   ;;  %v692_v9 = vld [vmem:[%s768_s19 + $0x20] sm:$0xff]   ;;  %v235_v12 = vld [vmem:[%s216_s23 + $0x8] sm:$0xff] }
  0x15   : > { %v234_v11 = vld [vmem:[%s216_s23] sm:$0xff]  ;;  %v236_v13 = vld [vmem:[%s216_s23 + $0x10] sm:$0xff]  ;;  %v239_v16 = vmax.bf16 %v723_v14, %v235_v12  ;;  %v237_v17 = vld [vmem:[%s216_s23 + $0x18] sm:$0xff] }
  0x16   : > { %v238_v15 = vmax.bf16 %v723_v14, %v234_v11  ;;  %v240_v18 = vmax.bf16 %v723_v14, %v236_v13  ;;  %v241_v19 = vmax.bf16 %v723_v14, %v237_v17  ;;  %v694_v20 = vld [vmem:[%s768_s19 + $0x28] sm:$0xff]   ;;  %v695_v22 = vld [vmem:[%s768_s19 + $0x70] sm:$0xff]   ;;  %v697_v25 = vld [vmem:[%s768_s19 + $0x78] sm:$0xff]  }
  0x17   : > { %617 = vmatpush3.bf16.msra.mxu0 %v686_v3  ;;  %651 = vmatpush3.bf16.msra.mxu1 %v686_v3  ;;  %v696_v24 = vld [vmem:[%s768_s19 + $0x30] sm:$0xff]   ;;  %v698_v26 = vld [vmem:[%s768_s19 + $0x38] sm:$0xff]  }
  0x18   : > { %618 = vmatprep.subr.bf16.mxu0 %v687_v4  ;;  %644 = vmatprep.subr.bf16.mxu1 %v687_v4  ;;  %v582_v21 = vcombine.high %v238_v15, %v239_v16  ;;  %v584_v23 = vcombine.high %v240_v18, %v241_v19  ;;  %v581_v27 = vcombine.low %v238_v15, %v239_v16 }
  0x19   : > { %v583_v28 = vcombine.low %v240_v18, %v241_v19 }
  0x1a   : > { %429 = vmatprep.mubr.bf16.mxu0 %v582_v21  ;;  %437 = vmatprep.mubr.bf16.mxu1 %v584_v23 }
  0x1b   : > { %619 = vmatpush3.bf16.msra.mxu0 %v688_v5  ;;  %652 = vmatpush3.bf16.msra.mxu1 %v688_v5 }
  0x1c   : > { %620 = vmatprep.subr.bf16.mxu0 %v689_v6  ;;  %645 = vmatprep.subr.bf16.mxu1 %v689_v6 }
  0x1f   : > { %621 = vmatpush3.bf16.msra.mxu0 %v690_v7  ;;  %653 = vmatpush3.bf16.msra.mxu1 %v690_v7 }
  0x20   : > { %622 = vmatprep.subr.bf16.mxu0 %v691_v8  ;;  %646 = vmatprep.subr.bf16.mxu1 %v691_v8 }
  0x23   : > { %623 = vmatpush3.bf16.msra.mxu0 %v692_v9  ;;  %654 = vmatpush3.bf16.msra.mxu1 %v692_v9 }
  0x24   : > { %624 = vmatprep.subr.bf16.mxu0 %v693_v10  ;;  %647 = vmatprep.subr.bf16.mxu1 %v693_v10 }
  0x27   : > { %625 = vmatpush3.bf16.msra.mxu0 %v694_v20  ;;  %655 = vmatpush3.bf16.msra.mxu1 %v694_v20 }
  0x28   : > { %626 = vmatprep.subr.bf16.mxu0 %v695_v22  ;;  %648 = vmatprep.subr.bf16.mxu1 %v695_v22 }
  0x2b   : > { %627 = vmatpush3.bf16.msra.mxu0 %v696_v24  ;;  %656 = vmatpush3.bf16.msra.mxu1 %v696_v24 }
  0x2c   : > { %628 = vmatprep.subr.bf16.mxu0 %v697_v25  ;;  %649 = vmatprep.subr.bf16.mxu1 %v697_v25 }
  0x2f   : > { %629 = vmatpush3.bf16.msra.mxu0 %v698_v26  ;;  %657 = vmatpush3.bf16.msra.mxu1 %v698_v26 }
  0x32   : > { %430 = vmatmul.mubr.bf16.vlgmr.msra.gmra.mrb[0].mxu0 %v581_v27  ;;  %438 = vmatmul.mubr.bf16.vlgmr.msra.gmra.mrb[0].mxu1 %v583_v28 }
 0x105   : > { %v630_v29 = vpop.f32.mrb[0].mxu0  ;;  %v636_v30 = vpop.f32.mrb[0].mxu1 }
 0x106   : > { %v631_v32 = vpop.f32.mrb[1].mxu0  ;;  %v637_v33 = vpop.f32.mrb[1].mxu1 }
 0x107   : > { %v632_v34 = vadd.f32 %v631_v32, %v630_v29  ;;  %v638_v35 = vadd.f32 %v637_v33, %v636_v30  ;;  %v633_v36 = vpop.f32.mrb[2].mxu0  ;;  %v639_v37 = vpop.f32.mrb[2].mxu1 }
 0x108   : > { %v634_v38 = vpop.f32.mrb[3].mxu0  ;;  %v640_v39 = vpop.f32.mrb[3].mxu1 }
 0x109   : > { %v432_v40 = vadd.f32 %v632_v34, %v580_v31  ;;  %v440_v41 = vadd.f32 %v638_v35, %v580_v31  ;;  %v635_v42 = vadd.f32 %v634_v38, %v633_v36  ;;  %v641_v43 = vadd.f32 %v640_v39, %v639_v37 }
 0x10b   : > { %v610_v44 = vpack.c.bf16 %v432_v40, %v432_v40  ;;  %v612_v45 = vpack.c.bf16 %v440_v41, %v440_v41  ;;  %v435_v46 = vadd.f32 %v635_v42, %v580_v31  ;;  %v443_v47 = vadd.f32 %v641_v43, %v580_v31 }
 0x10d   : > { %463 = vst.msk [vmem:[%s231_s29] sm:$0xf] %vm462_vm0, %v610_v44  ;;  %465 = vst.msk [vmem:[%s231_s29 + $0x8] sm:$0xf] %vm462_vm0, %v612_v45  ;;  %v611_v48 = vpack.c.bf16 %v435_v46, %v435_v46  ;;  %v613_v49 = vpack.c.bf16 %v443_v47, %v443_v47 }
 0x10f   : > { %464 = vst.msk [vmem:[%s231_s29 + $0x4] sm:$0xf] %vm462_vm0, %v611_v48  ;;  %466 = vst.msk [vmem:[%s231_s29 + $0xc] sm:$0xf] %vm462_vm0, %v613_v49 }
 0x110 PF: > { %s13_s14 = sadd.s32 1, %s721_s14   ;;  %s810_s12 = smov %s717_s13 }
 0x111   : > { %p10_p5 = scmp.ge.s32.totalorder %s13_s14, 6   ;;  %s811_s13 = smov %s813_s15 }
 0x113   :  { %12 = sbr.rel (!%p10_p5) target bundleno = 2 (0x2), region = 65 }

// kernel: _lambda_.32
= control target key start
LH: loop header
LB: loop body
LE: loop exit
PB: predicated region body
PF: predicated region fallthrough
CT: control target
= control target key end

     0   :  { %s624_s6 = smov 0   ;;  %s626_s7 = smov 0   ;;  %s749_s0 = inlined_call_operand.vmem [shape: bf16[2,256,8], index: 0, kind: input, shape index: {}]   ;;  %s750_s1 = inlined_call_operand.vmem [shape: f32[2,2,8], index: 1, kind: output, shape index: {}]  }
   0x1   :  { %s628_s8 = smov 0  }
   0x2 LB: > { %s23_s9 = sadd.s32 1, %s607_s7  ;;  %p476_p0 = scmp.ge.s32.totalorder %s611_s8, 1  ;;  %s611_s8 = sphi %s628_s8, %s11_s8   ;;  %s607_s7 = sphi %s626_s7, %s752_s7   ;;  %s603_s6 = sphi %s624_s6, %s751_s6  }
   0x3   : > { %p25_p1 = scmp.ge.s32.totalorder %s23_s9, 2  ;;  %p106_p2 = scmp.lt.s32.totalorder %s611_s8, 3 }
   0x5   : > { %s754_s9 = smov (%p25_p1, %s23_s9), 0  ;;  %p107_p3 = pnand %p476_p0, %p106_p2 }
   0x6   : > { %p130_p4 = scmp.lt.s32.totalorder (!%p107_p3), %s603_s6, 1  ;;  %vm147_vm0 = vcmask (!%p107_p3), 58368   ;;  %v613_v0 = vmov (!%p107_p3), 0.0   ;;  %vm213_vm1 = vcmask (!%p107_p3), 64512   ;;  %vm385_vm2 = vcmask (!%p107_p3), 1040384  }
   0x7   : > { %110 = sbr.rel (%p107_p3) target bundleno = 137 (0x89), region = 24 }
   0xe   : > { %s756_s6 = smov (!%p130_p4, %s603_s6), 1 }
   0xf   : > { %s482_s10 = sshll.u32 %s756_s6, 7  ;;  %s479_s11 = sshll.u32 %s756_s6, 1 }
  0x10   : > { %s645_s14 = scalar_lea.vmem %s750_s1, %s479_s11  ;;  %s652_s17 = scalar_lea.vmem %s749_s0, %s482_s10 }
  0x11   : > { %148 = vst.msk [vmem:[%s645_s14] sm:$0x3] %vm147_vm0, %v613_v0  ;;  %v484_v1 = vld [vmem:[%s652_s17] sm:$0xff]   ;;  %v547_v2 = vld [vmem:[%s652_s17 + $0x8] sm:$0xff]   ;;  %v548_v6 = vld [vmem:[%s652_s17 + $0x10] sm:$0xff]  }
  0x12   : > { %v485_v3 = vunpack.c.l.bf16 %v484_v1  ;;  %v486_v4 = vunpack.c.h.bf16 %v484_v1  ;;  %v489_v5 = vunpack.c.l.bf16 %v547_v2  ;;  %v490_v7 = vunpack.c.h.bf16 %v547_v2  ;;  %v549_v14 = vld [vmem:[%s652_s17 + $0x18] sm:$0xff]   ;;  %v550_v21 = vld [vmem:[%s652_s17 + $0x20] sm:$0xff]   ;;  %v551_v27 = vld [vmem:[%s652_s17 + $0x28] sm:$0xff]  }
  0x13   : > { %v493_v12 = vunpack.c.l.bf16 %v548_v6  ;;  %v494_v16 = vunpack.c.h.bf16 %v548_v6  ;;  %v497_v19 = vunpack.c.l.bf16 %v549_v14  ;;  %v498_v23 = vunpack.c.h.bf16 %v549_v14  ;;  %v552_v34 = vld [vmem:[%s652_s17 + $0x30] sm:$0xff]   ;;  %v553_v50 = vld [vmem:[%s652_s17 + $0x38] sm:$0xff]   ;;  %v554_v63 = vld [vmem:[%s652_s17 + $0x40] sm:$0xff]  }
  0x14   : > { %v214_v8 = vsel %vm213_vm1, %v485_v3, 0.0  ;;  %v215_v9 = vsel %vm213_vm1, %v486_v4, 0.0  ;;  %v217_v10 = vsel %vm213_vm1, %v489_v5, 0.0  ;;  %v219_v13 = vsel %vm213_vm1, %v490_v7, 0.0 }
  0x15   : > { %v216_v11 = vadd.f32 %v215_v9, %v214_v8  ;;  %v221_v17 = vsel %vm213_vm1, %v493_v12, 0.0  ;;  %v223_v20 = vsel %vm213_vm1, %v494_v16, 0.0  ;;  %v225_v24 = vsel %vm213_vm1, %v497_v19, 0.0 }
  0x16   : > { %v501_v26 = vunpack.c.l.bf16 %v550_v21  ;;  %v227_v28 = vsel %vm213_vm1, %v498_v23, 0.0  ;;  %v502_v30 = vunpack.c.h.bf16 %v550_v21  ;;  %v505_v32 = vunpack.c.l.bf16 %v551_v27 }
  0x17   : > { %v218_v15 = vadd.f32 %v217_v10, %v216_v11  ;;  %v283_v36 = vmul.f32 %v485_v3, %v485_v3  ;;  %v284_v37 = vmul.f32 %v486_v4, %v486_v4  ;;  %v285_v38 = vmul.f32 %v489_v5, %v489_v5 }
  0x18   : > { %v229_v31 = vsel %vm213_vm1, %v501_v26, 0.0  ;;  %v231_v35 = vsel %vm213_vm1, %v502_v30, 0.0  ;;  %v506_v39 = vunpack.c.h.bf16 %v551_v27  ;;  %v233_v41 = vsel %vm213_vm1, %v505_v32, 0.0 }
  0x19   : > { %v220_v18 = vadd.f32 %v219_v13, %v218_v15  ;;  %v286_v42 = vmul.f32 %v490_v7, %v490_v7  ;;  %v509_v43 = vunpack.c.l.bf16 %v552_v34  ;;  %v287_v46 = vmul.f32 %v493_v12, %v493_v12  ;;  %v555_v12 = vld [vmem:[%s652_s17 + $0x48] sm:$0xff]  }
  0x1a   : > { %v235_v45 = vsel %vm213_vm1, %v506_v39, 0.0  ;;  %v315_v47 = vsel %vm213_vm1, %v283_v36, 0.0  ;;  %v316_v48 = vsel %vm213_vm1, %v284_v37, 0.0  ;;  %v318_v49 = vsel %vm213_vm1, %v285_v38, 0.0  ;;  %v557_v38 = vld [vmem:[%s652_s17 + $0x58] sm:$0xff]  }
  0x1b   : > { %v222_v22 = vadd.f32 %v221_v17, %v220_v18  ;;  %v317_v52 = vadd.f32 %v316_v48, %v315_v47  ;;  %v510_v53 = vunpack.c.h.bf16 %v552_v34  ;;  %v237_v54 = vsel %vm213_vm1, %v509_v43, 0.0 }
  0x1c   : > { %v288_v55 = vmul.f32 %v494_v16, %v494_v16  ;;  %v320_v56 = vsel %vm213_vm1, %v286_v42, 0.0  ;;  %v513_v59 = vunpack.c.l.bf16 %v553_v50  ;;  %v289_v61 = vmul.f32 %v497_v19, %v497_v19 }
  0x1d   : > { %v224_v25 = vadd.f32 %v223_v20, %v222_v22  ;;  %v319_v58 = vadd.f32 %v318_v49, %v317_v52  ;;  %v239_v60 = vsel %vm213_vm1, %v510_v53, 0.0  ;;  %v322_v62 = vsel %vm213_vm1, %v287_v46, 0.0 }
  0x1e   : > { %v514_v2 = vunpack.c.h.bf16 %v553_v50  ;;  %v241_v3 = vsel %vm213_vm1, %v513_v59, 0.0  ;;  %v290_v4 = vmul.f32 %v498_v23, %v498_v23  ;;  %v324_v5 = vsel %vm213_vm1, %v288_v55, 0.0 }
  0x1f   : > { %v226_v29 = vadd.f32 %v225_v24, %v224_v25  ;;  %v321_v1 = vadd.f32 %v320_v56, %v319_v58  ;;  %v517_v8 = vunpack.c.l.bf16 %v554_v63  ;;  %v291_v10 = vmul.f32 %v501_v26, %v501_v26  ;;  %v556_v25 = vld [vmem:[%s652_s17 + $0x50] sm:$0xff]  }
  0x20   : > { %v243_v9 = vsel %vm213_vm1, %v514_v2, 0.0  ;;  %v326_v11 = vsel %vm213_vm1, %v289_v61, 0.0  ;;  %v518_v15 = vunpack.c.h.bf16 %v554_v63  ;;  %v292_v17 = vmul.f32 %v502_v30, %v502_v30 }
  0x21   : > { %v228_v33 = vadd.f32 %v227_v28, %v226_v29  ;;  %v323_v7 = vadd.f32 %v322_v62, %v321_v1  ;;  %v245_v16 = vsel %vm213_vm1, %v517_v8, 0.0  ;;  %v328_v18 = vsel %vm213_vm1, %v290_v4, 0.0 }
  0x22   : > { %v521_v21 = vunpack.c.l.bf16 %v555_v12  ;;  %v247_v22 = vsel %vm213_vm1, %v518_v15, 0.0  ;;  %v293_v23 = vmul.f32 %v505_v32, %v505_v32  ;;  %v330_v24 = vsel %vm213_vm1, %v291_v10, 0.0 }
  0x23   : > { %v230_v40 = vadd.f32 %v229_v31, %v228_v33  ;;  %v325_v14 = vadd.f32 %v324_v5, %v323_v7  ;;  %v522_v28 = vunpack.c.h.bf16 %v555_v12  ;;  %v294_v31 = vmul.f32 %v506_v39, %v506_v39 }
  0x24   : > { %v249_v29 = vsel %vm213_vm1, %v521_v21, 0.0  ;;  %v332_v30 = vsel %vm213_vm1, %v292_v17, 0.0  ;;  %v295_v37 = vmul.f32 %v509_v43, %v509_v43  ;;  %v334_v32 = vsel %vm213_vm1, %v293_v23, 0.0 }
  0x25   : > { %v232_v44 = vadd.f32 %v231_v35, %v230_v40  ;;  %v327_v20 = vadd.f32 %v326_v11, %v325_v14  ;;  %v525_v35 = vunpack.c.l.bf16 %v556_v25  ;;  %v251_v36 = vsel %vm213_vm1, %v522_v28, 0.0 }
  0x26   : > { %v526_v42 = vunpack.c.h.bf16 %v556_v25  ;;  %v336_v39 = vsel %vm213_vm1, %v294_v31, 0.0  ;;  %v529_v48 = vunpack.c.l.bf16 %v557_v38  ;;  %v297_v50 = vmul.f32 %v513_v59, %v513_v59 }
  0x27   : > { %v234_v51 = vadd.f32 %v233_v41, %v232_v44  ;;  %v329_v27 = vadd.f32 %v328_v18, %v327_v20  ;;  %v253_v44 = vsel %vm213_vm1, %v525_v35, 0.0  ;;  %v338_v43 = vsel %vm213_vm1, %v295_v37, 0.0 }
  0x28   : > { %v255_v49 = vsel %vm213_vm1, %v526_v42, 0.0  ;;  %v530_v55 = vunpack.c.h.bf16 %v557_v38  ;;  %v257_v56 = vsel %vm213_vm1, %v529_v48, 0.0  ;;  %v299_v63 = vmul.f32 %v517_v8, %v517_v8  ;;  %v560_v8 = vld [vmem:[%s652_s17 + $0x70] sm:$0xff]  }
  0x29   : > { %v236_v57 = vadd.f32 %v235_v45, %v234_v51  ;;  %v331_v34 = vadd.f32 %v330_v24, %v329_v27  ;;  %v296_v45 = vmul.f32 %v510_v53, %v510_v53  ;;  %v558_v51 = vld [vmem:[%s652_s17 + $0x60] sm:$0xff]   ;;  %v342_v59 = vsel %vm213_vm1, %v297_v50, 0.0 }
  0x2a   : > { %v533_v61 = vunpack.c.l.bf16 %v558_v51  ;;  %v259_v62 = vsel %vm213_vm1, %v530_v55, 0.0  ;;  %v534_v4 = vunpack.c.h.bf16 %v558_v51  ;;  %v301_v12 = vmul.f32 %v521_v21, %v521_v21 }
  0x2b   : > { %v238_v0 = vadd.f32 %v237_v54, %v236_v57  ;;  %v333_v41 = vadd.f32 %v332_v30, %v331_v34  ;;  %v298_v57 = vmul.f32 %v514_v2, %v514_v2  ;;  %v340_v53 = vsel %vm213_vm1, %v296_v45, 0.0  ;;  %v561_v34 = vld [vmem:[%s652_s17 + $0x78] sm:$0xff]  }
  0x2c   : > { %v261_v5 = vsel %vm213_vm1, %v533_v61, 0.0  ;;  %v263_v11 = vsel %vm213_vm1, %v534_v4, 0.0  ;;  %v541_v23 = vunpack.c.l.bf16 %v560_v8  ;;  %v303_v25 = vmul.f32 %v525_v35, %v525_v35 }
  0x2d   : > { %v240_v6 = vadd.f32 %v239_v60, %v238_v0  ;;  %v335_v47 = vadd.f32 %v334_v32, %v333_v41  ;;  %v559_v0 = vld [vmem:[%s652_s17 + $0x68] sm:$0xff]   ;;  %v344_v2 = vsel %vm213_vm1, %v298_v57, 0.0  ;;  %v350_v21 = vsel %vm213_vm1, %v301_v12, 0.0 }
  0x2e   : > { %v537_v10 = vunpack.c.l.bf16 %v559_v0  ;;  %v538_v17 = vunpack.c.h.bf16 %v559_v0  ;;  %v269_v31 = vsel %vm213_vm1, %v541_v23, 0.0  ;;  %v304_v30 = vmul.f32 %v526_v42, %v526_v42 }
  0x2f   : > { %v242_v13 = vadd.f32 %v241_v3, %v240_v6  ;;  %v337_v54 = vadd.f32 %v336_v39, %v335_v47  ;;  %v300_v6 = vmul.f32 %v518_v15, %v518_v15  ;;  %v305_v32 = vmul.f32 %v529_v48, %v529_v48 }
  0x30   : > { %v265_v18 = vsel %vm213_vm1, %v537_v10, 0.0  ;;  %v267_v24 = vsel %vm213_vm1, %v538_v17, 0.0  ;;  %v354_v38 = vsel %vm213_vm1, %v303_v25, 0.0  ;;  %v545_v41 = vunpack.c.l.bf16 %v561_v34 }
  0x31   : > { %v244_v19 = vadd.f32 %v243_v9, %v242_v13  ;;  %v339_v60 = vadd.f32 %v338_v43, %v337_v54  ;;  %v346_v13 = vsel %vm213_vm1, %v299_v63, 0.0  ;;  %v348_v15 = vsel %vm213_vm1, %v300_v6, 0.0 }
  0x32   : > { %v356_v45 = vsel %vm213_vm1, %v304_v30, 0.0  ;;  %v273_v42 = vsel %vm213_vm1, %v545_v41, 0.0  ;;  %v307_v47 = vmul.f32 %v533_v61, %v533_v61  ;;  %v546_v43 = vunpack.c.h.bf16 %v561_v34 }
  0x33   : > { %v246_v26 = vadd.f32 %v245_v16, %v244_v19  ;;  %v341_v3 = vadd.f32 %v340_v53, %v339_v60  ;;  %v302_v19 = vmul.f32 %v522_v28, %v522_v28  ;;  %v308_v51 = vmul.f32 %v534_v4, %v534_v4 }
  0x34   : > { %v309_v57 = vmul.f32 %v537_v10, %v537_v10  ;;  %v311_v63 = vmul.f32 %v541_v23, %v541_v23  ;;  %v313_v6 = vmul.f32 %v545_v41, %v545_v41 }
  0x35   : > { %v248_v33 = vadd.f32 %v247_v22, %v246_v26  ;;  %v343_v9 = vadd.f32 %v342_v59, %v341_v3  ;;  %v364_v60 = vsel %vm213_vm1, %v308_v51, 0.0 }
  0x36   : > { %v366_v59 = vsel %vm213_vm1, %v309_v57, 0.0 }
  0x37   : > { %v250_v40 = vadd.f32 %v249_v29, %v248_v33  ;;  %v345_v16 = vadd.f32 %v344_v2, %v343_v9  ;;  %v542_v29 = vunpack.c.h.bf16 %v560_v8  ;;  %v352_v33 = vsel %vm213_vm1, %v302_v19, 0.0 }
  0x38   : > { %v370_v2 = vsel %vm213_vm1, %v311_v63, 0.0  ;;  %v314_v9 = vmul.f32 %v546_v43, %v546_v43 }
  0x39   : > { %v252_v46 = vadd.f32 %v251_v36, %v250_v40  ;;  %v347_v22 = vadd.f32 %v346_v13, %v345_v16  ;;  %v271_v37 = vsel %vm213_vm1, %v542_v29, 0.0  ;;  %v374_v13 = vsel %vm213_vm1, %v313_v6, 0.0 }
  0x3b   : > { %v254_v52 = vadd.f32 %v253_v44, %v252_v46  ;;  %v349_v27 = vadd.f32 %v348_v15, %v347_v22  ;;  %v306_v44 = vmul.f32 %v530_v55, %v530_v55  ;;  %v362_v55 = vsel %vm213_vm1, %v307_v47, 0.0 }
  0x3d   : > { %v256_v58 = vadd.f32 %v255_v49, %v254_v52  ;;  %v351_v36 = vadd.f32 %v350_v21, %v349_v27  ;;  %v358_v49 = vsel %vm213_vm1, %v305_v32, 0.0  ;;  %v360_v48 = vsel %vm213_vm1, %v306_v44, 0.0  ;;  %v384_v27 = vld [vmem:[%s645_s14] sm:$0x3] }
  0x3f   : > { %v258_v1 = vadd.f32 %v257_v56, %v256_v58  ;;  %v353_v35 = vadd.f32 %v352_v33, %v351_v36  ;;  %v275_v56 = vsel %vm213_vm1, %v546_v43, 0.0  ;;  %v310_v58 = vmul.f32 %v538_v17, %v538_v17 }
  0x41   : > { %v260_v7 = vadd.f32 %v259_v62, %v258_v1  ;;  %v355_v46 = vadd.f32 %v354_v38, %v353_v35  ;;  %v312_v1 = vmul.f32 %v542_v29, %v542_v29  ;;  %v368_v3 = vsel %vm213_vm1, %v310_v58, 0.0 }
  0x43   : > { %v262_v14 = vadd.f32 %v261_v5, %v260_v7  ;;  %v357_v50 = vadd.f32 %v356_v45, %v355_v46  ;;  %v372_v10 = vsel %vm213_vm1, %v312_v1, 0.0 }
  0x45   : > { %v264_v20 = vadd.f32 %v263_v11, %v262_v14  ;;  %v359_v54 = vadd.f32 %v358_v49, %v357_v50  ;;  %v376_v14 = vsel %vm213_vm1, %v314_v9, 0.0 }
  0x47   : > { %v266_v26 = vadd.f32 %v265_v18, %v264_v20  ;;  %v361_v53 = vadd.f32 %v360_v48, %v359_v54 }
  0x49   : > { %v268_v28 = vadd.f32 %v267_v24, %v266_v26  ;;  %v363_v61 = vadd.f32 %v362_v55, %v361_v53 }
  0x4b   : > { %v270_v40 = vadd.f32 %v269_v31, %v268_v28  ;;  %v365_v0 = vadd.f32 %v364_v60, %v363_v61 }
  0x4d   : > { %v272_v39 = vadd.f32 %v271_v37, %v270_v40  ;;  %v367_v5 = vadd.f32 %v366_v59, %v365_v0 }
  0x4f   : > { %v274_v52 = vadd.f32 %v273_v42, %v272_v39  ;;  %v369_v7 = vadd.f32 %v368_v3, %v367_v5 }
  0x51   : > { %v276_v62 = vadd.f32 %v275_v56, %v274_v52  ;;  %v371_v12 = vadd.f32 %v370_v2, %v369_v7 }
  0x53   : > { %v277_v4 = vrot.slane %v276_v62, 4  ;;  %v373_v8 = vadd.f32 %v372_v10, %v371_v12 }
  0x55   : > { %v278_v11 = vadd.f32 %v277_v4, %v276_v62  ;;  %v375_v17 = vadd.f32 %v374_v13, %v373_v8 }
  0x57   : > { %v279_v16 = vrot.slane %v278_v11, 2  ;;  %v377_v18 = vadd.f32 %v376_v14, %v375_v17 }
  0x59   : > { %v280_v19 = vadd.f32 %v279_v16, %v278_v11  ;;  %v378_v15 = vrot.slane %v377_v18, 4 }
  0x5b   : > { %v379_v20 = vadd.f32 %v378_v15, %v377_v18  ;;  %v281_v22 = vrot.slane %v280_v19, 1 }
  0x5d   : > { %v380_v23 = vrot.slane %v379_v20, 2  ;;  %v282_v25 = vadd.f32 %v281_v22, %v280_v19 }
  0x5f   : > { %v381_v24 = vadd.f32 %v380_v23, %v379_v20 }
  0x61   : > { %v382_v21 = vrot.slane %v381_v24, 1 }
  0x63   : > { %v383_v26 = vadd.f32 %v382_v21, %v381_v24 }
  0x65   : > { %v386_v29 = vsel %vm385_vm2, %v282_v25, %v383_v26 }
  0x66   : > { %v387_v31 = vadd.f32 %v386_v29, %v384_v27 }
  0x68   : > { %389 = vst.msk [vmem:[%s645_s14] sm:$0x3] %vm147_vm0, %v387_v31 }
  0x6f   : > { %v393_v30 = vld [vmem:[%s645_s14] sm:$0x3] }
  0x70   : > { %v394_v33 = vmul.f32 0.00390625, %v393_v30 }
  0x72   : > { %v395_v34 = vmul.f32 %v394_v33, %v394_v33 }
  0x74   : > { %v397_v28 = vrot.slane %v395_v34, 7 }
  0x76   : > { %v399_v36 = vsub.f32 %v394_v33, %v397_v28 }
  0x78   : > { %v400_v37 = vmax.f32 %v399_v36, 0.0 }
  0x7a   : > { %v401_v32 = vadd.f32 1e-05, %v400_v37 }
  0x7c   : > { %587 = vrsqrt.f32 %v401_v32 }
  0x86   : > { %v588_v38 = vpop.eup %587 }
  0x87   : > { %v403_v40 = vsel %vm385_vm2, %v394_v33, %v588_v38 }
  0x88   : > { %404 = vst.msk [vmem:[%s645_s14] sm:$0x3] %vm147_vm0, %v403_v40 }
  0x89 PF: > { %s11_s8 = sadd.s32 1, %s611_s8   ;;  %s751_s6 = smov %s607_s7 }
  0x8a   : > { %p8_p5 = scmp.ge.s32.totalorder %s11_s8, 4   ;;  %s752_s7 = smov %s754_s9 }
  0x8c   :  { %10 = sbr.rel (!%p8_p5) target bundleno = 2 (0x2), region = 62 }

// kernel: _lambda_.31
= control target key start
LH: loop header
LB: loop body
LE: loop exit
PB: predicated region body
PF: predicated region fallthrough
CT: control target
= control target key end

     0   :  { %s2112_s18 = smov 0   ;;  %s2114_s19 = smov 0   ;;  %s2476_s0 = inlined_call_operand.vmem [shape: bf16[2,10,10,32], index: 0, kind: input, shape index: {}, may-alias: {0,1,2}]   ;;  %s2477_s1 = inlined_call_operand.vmem [shape: bf16[2,10,10,32], index: 1, kind: input, shape index: {}, may-alias: {0,1,2}]   ;;  %s2478_s2 = inlined_call_operand.vmem [shape: bf16[2,10,10,32], index: 2, kind: input, shape index: {}, may-alias: {0,1,2}]   ;;  %s2479_s3 = inlined_call_operand.vmem [shape: bf16[12,32,16], index: 3, kind: input, shape index: {}]   ;;  %s2480_s4 = inlined_call_operand.vmem [shape: f32[1,16], index: 4, kind: input, shape index: {}]   ;;  %s2481_s5 = inlined_call_operand.vmem [shape: bf16[2,8,2,8,16], index: 5, kind: output, shape index: {}]  }
   0x1   :  { %s2116_s20 = smov 0   ;;  %s2118_s21 = smov 0  }
   0x2   :  { %s2120_s22 = smov 0  }
   0x3 LB: > { %s24_s23 = sadd.s32 1, %s2071_s20  ;;  %s27_s24 = sadd.s32 1, %s2075_s21  ;;  %s2079_s22 = sphi %s2120_s22, %s15_s22   ;;  %s2075_s21 = sphi %s2118_s21, %s2490_s21   ;;  %s2071_s20 = sphi %s2116_s20, %s2489_s20   ;;  %s2067_s19 = sphi %s2114_s19, %s2488_s19   ;;  %s2063_s18 = sphi %s2112_s18, %s2487_s18  }
   0x4   : > { %p25_p0 = scmp.ge.s32.totalorder %s24_s23, 2  ;;  %p1649_p1 = scmp.ge.s32.totalorder %s2079_s22, 1 }
   0x5   : > { %p271_p2 = scmp.lt.s32.totalorder %s2079_s22, 5 }
   0x6   : > { %s2492_s23 = smov (%p25_p0, %s24_s23), 0  ;;  %s2494_s24 = smov (!%p25_p0, %s27_s24), %s2075_s21 }
   0x7   : > { %p272_p3 = pnand %p1649_p1, %p271_p2  ;;  %p29_p4 = scmp.ge.s32.totalorder %s2494_s24, 2 }
   0x8   : > { %v2017_v0 = vld [vmem:[%s2479_s3 + $0x10] sm:$0xff] (!%p272_p3)   ;;  %s2145_s27 = sshll.u32 (!%p272_p3), %s2063_s18, 2  ;;  %p343_p5 = scmp.lt.s32.totalorder (!%p272_p3), %s2067_s19, 1  ;;  %v2019_v2 = vld [vmem:[%s2479_s3 + $0x18] sm:$0xff] (!%p272_p3)   ;;  %v2166_v4 = vld [vmem:[%s2479_s3] sm:$0xff] (!%p272_p3)   ;;  %v2081_v9 = vmov (!%p272_p3), 0  }
   0x9   : > { %s2496_s24 = smov (%p29_p4, %s2494_s24), 0  ;;  %275 = sbr.rel (%p272_p3) target bundleno = 326 (0x146), region = 40 }
   0xa   : > { %v2018_v1 = vld [vmem:[%s2479_s3 + $0x70] sm:$0xff] (!%p272_p3)   ;;  %1839 = vmatprep.subr.bf16.mxu0 (!%p272_p3), %v2017_v0  ;;  %p345_p6 = scmp.lt.s32.totalorder (!%p272_p3), %s2145_s27, 9  ;;  %v2020_v3 = vld [vmem:[%s2479_s3 + $0x78] sm:$0xff] (!%p272_p3)   ;;  %s2169_s14 = sadd.s32 (!%p272_p3), 4, %s2145_s27  ;;  %v2174_v5 = vld [vmem:[%s2479_s3 + $0x60] sm:$0xff] (!%p272_p3)   ;;  %vm520_vm3 = vcmask (!%p272_p3), 261120  }
   0xb   : > { %1887 = vmatprep.subr.bf16.mxu1 (!%p272_p3), %v2018_v1  ;;  %1840 = vmatpush3.bf16.msra.mxu0 (!%p272_p3), %v2017_v0  ;;  %p362_p7 = scmp.lt.s32.totalorder (!%p272_p3), %s2169_s14, 9  ;;  %vm438_vm0 = vsmask.f32 (!%p272_p3), 3328  ;;  %vm439_vm1 = vsmask.f32 (!%p272_p3), 7440  ;;  %s373_s12 = sadd.s32 (!%p272_p3), 1, %s2169_s14 }
   0xc   : > { %1888 = vmatpush3.bf16.msra.mxu1 (!%p272_p3), %v2018_v1  ;;  %1841 = vmatprep.subr.bf16.mxu0 (!%p272_p3), %v2019_v2  ;;  %vm2238_vm2 = vmor (!%p272_p3), %vm438_vm0, %vm439_vm1  ;;  %p2264_p8 = scmp.lt.s32.totalorder (!%p272_p3), %s373_s12, 9  ;;  %vm661_vm4 = vcmask (!%p272_p3), 1042432   ;;  %vm662_vm5 = vcmask (!%p272_p3), 1046532   ;;  %p389_p9 = scmp.lt.s32.totalorder (!%p272_p3), %s2145_s27, 7  ;;  %v2040_v39 = vld [vmem:[%s2479_s3 + $0xb8] sm:$0xff] (!%p272_p3)   ;;  %vm1491_vm7 = vcmask (!%p272_p3), 125952  }
   0xd   : > { %1889 = vmatprep.subr.bf16.mxu1 (!%p272_p3), %v2020_v3  ;;  %vm2319_vm6 = vmor (!%p272_p3), %vm661_vm4, %vm662_vm5 }
   0xf   : > { %1842 = vmatpush3.bf16.msra.mxu0 (!%p272_p3), %v2019_v2 }
  0x10   : > { %s2498_s19 = smov (!%p343_p5, %s2067_s19), 1  ;;  %1890 = vmatpush3.bf16.msra.mxu1 %v2020_v3  ;;  %1847 = vmatprep.subr.bf16.mxu0 %v2166_v4  ;;  %s2500_s12 = smov (!%p2264_p8, %s373_s12), 9 }
  0x11   : > { %s346_s9 = scalar_select %p345_p6, %s2145_s27, 9  ;;  %1895 = vmatprep.subr.bf16.mxu1 %v2174_v5 }
  0x12   : > { %s2161_s10 = smul.u32 20, %s2498_s19  ;;  %s2502_s27 = smov (!%p389_p9, %s2145_s27), 7 }
  0x13   : > { %s1651_s11 = sshll.u32 %s346_s9, 1  ;;  %s1657_s8 = sshll.u32 %s2500_s12, 1 }
  0x14   : > { %s349_s17 = sadd.s32 %s2161_s10, %s1651_s11 }
  0x15   : > { %s1652_s18 = sshll.u32 %s349_s17, 2 }
  0x16   : > { %s2182_s28 = scalar_lea.vmem %s2476_s0, %s1652_s18 }
  0x17   : > { %v398_v6 = vld [vmem:[%s2182_s28] sm:$0xf]  ;;  %v399_v7 = vld [vmem:[%s2182_s28 + $0x8] sm:$0xf]  ;;  %v410_v8 = vld [vmem:[%s2182_s28 + $0x4] sm:$0x1] }
  0x18   : > { %v2189_v10 = vmax.bf16 %v2081_v9, %v398_v6  ;;  %v2192_v11 = vmax.bf16 %v2081_v9, %v399_v7  ;;  %v411_v12 = vld [vmem:[%s2182_s28 + $0xc] sm:$0x1]  ;;  %v2196_v13 = vmax.bf16 %v2081_v9, %v410_v8  ;;  %s363_s29 = scalar_select %p362_p7, %s2169_s14, 9  ;;  %v400_v14 = vld [vmem:[%s2182_s28 + $0x10] sm:$0xf] }
  0x19   : > { %v2203_v15 = vmax.bf16 %v2081_v9, %v411_v12  ;;  %v401_v16 = vld [vmem:[%s2182_s28 + $0x18] sm:$0xf]  ;;  %v2207_v17 = vmax.bf16 %v2081_v9, %v400_v14  ;;  %v412_v18 = vld [vmem:[%s2182_s28 + $0x14] sm:$0x1]  ;;  %v413_v31 = vld [vmem:[%s2182_s28 + $0x1c] sm:$0x1] }
  0x1a   : > { %v442_v19 = vshrl.u32 %v2189_v10, 16  ;;  %v445_v20 = vshll.u32 %v2189_v10, 16  ;;  %v451_v21 = vshll.u32 %v2196_v13, 16  ;;  %v456_v22 = vshrl.u32 %v2192_v11, 16  ;;  %s1654_s30 = sshll.u32 %s363_s29, 1 }
  0x1b   : > { %v459_v23 = vshll.u32 %v2192_v11, 16  ;;  %v465_v24 = vshll.u32 %v2203_v15, 16  ;;  %s366_s6 = sadd.s32 %s2161_s10, %s1654_s30  ;;  %v2223_v30 = vmax.bf16 %v2081_v9, %v401_v16  ;;  %v2227_v32 = vmax.bf16 %v2081_v9, %v412_v18  ;;  %v422_v6 = vld [vmem:[%s2182_s28] sm:$0xe]  ;;  %v423_v12 = vld [vmem:[%s2182_s28 + $0x8] sm:$0xe] }
  0x1c   : > { %v444_v25 = vrot.slane %v442_v19, 4  ;;  %v447_v26 = vrot.slane %v445_v20, 5  ;;  %v458_v27 = vrot.slane %v456_v22, 4  ;;  %s1655_s7 = sshll.u32 %s366_s6, 2  ;;  %v453_v28 = vrot.slane %v451_v21, 5  ;;  %s1661_s30 = sshll.u32 %s2498_s19, 4 }
  0x1d   : > { %v461_v29 = vrot.slane %v459_v23, 5  ;;  %s2220_s11 = scalar_lea.vmem %s2477_s1, %s1655_s7  ;;  %v2232_v36 = vmax.bf16 %v2081_v9, %v413_v31  ;;  %v470_v37 = vshrl.u32 %v2207_v17, 16  ;;  %v473_v38 = vshll.u32 %v2207_v17, 16  ;;  %v424_v18 = vld [vmem:[%s2182_s28 + $0x10] sm:$0xe]  ;;  %v2023_v23 = vld [vmem:[%s2479_s3 + $0x8] sm:$0xff]  }
  0x1e   : > { %v448_v33 = vor.u32 %v447_v26, %v444_v25  ;;  %v402_v34 = vld [vmem:[%s2220_s11] sm:$0xf]  ;;  %v414_v35 = vld [vmem:[%s2220_s11 + $0x4] sm:$0x1]  ;;  %v467_v41 = vrot.slane %v465_v24, 5  ;;  %v479_v42 = vshll.u32 %v2227_v32, 16  ;;  %v1673_v20 = vcombine.low %v2189_v10, %v2192_v11 }
  0x1f   : > { %v462_v40 = vor.u32 %v461_v29, %v458_v27  ;;  %v2244_v44 = vmax.bf16 %v2081_v9, %v402_v34  ;;  %v472_v45 = vrot.slane %v470_v37, 4  ;;  %v2247_v47 = vmax.bf16 %v2081_v9, %v414_v35  ;;  %v2024_v10 = vld [vmem:[%s2479_s3 + $0x68] sm:$0xff]   ;;  %s1660_s19 = sshll.u32 %s2502_s27, 1 }
  0x20   : > { %v449_v43 = vrot.slane %v448_v33, 4  ;;  %v475_v48 = vrot.slane %v473_v38, 5  ;;  %v484_v49 = vshrl.u32 %v2223_v30, 16  ;;  %v487_v51 = vshll.u32 %v2223_v30, 16  ;;  %s2343_s7 = sadd.s32 %s1661_s30, %s1660_s19 }
  0x21   : > { %v463_v46 = vrot.slane %v462_v40, 4  ;;  %v493_v52 = vshll.u32 %v2232_v36, 16  ;;  %v481_v55 = vrot.slane %v479_v42, 5  ;;  %v843_v59 = vshrl.u32 %v2244_v44, 16  ;;  %v426_v42 = vld [vmem:[%s2220_s11] sm:$0xe]  ;;  %s380_s11 = sadd.s32 %s2161_s10, %s1657_s8 }
  0x22   : > { %v454_v50 = vsel %vm2238_vm2, %v449_v43, %v453_v28  ;;  %v476_v54 = vor.u32 %v475_v48, %v472_v45  ;;  %v486_v56 = vrot.slane %v484_v49, 4  ;;  %v489_v58 = vrot.slane %v487_v51, 5  ;;  %v2028_v51 = vld [vmem:[%s2479_s3 + $0x88] sm:$0xff]   ;;  %s1658_s14 = sshll.u32 %s380_s11, 2  ;;  %s1662_s30 = sshll.u32 %s2343_s7, 2 }
  0x23   : > { %v468_v53 = vsel %vm2238_vm2, %v463_v46, %v467_v41  ;;  %v846_v61 = vshll.u32 %v2244_v44, 16  ;;  %v852_v62 = vshll.u32 %v2247_v47, 16  ;;  %v495_v0 = vrot.slane %v493_v52, 5  ;;  %v2027_v46 = vld [vmem:[%s2479_s3 + $0x28] sm:$0xff]   ;;  %s2373_s18 = scalar_lea.vmem %s2478_s2, %s1658_s14  ;;  %s395_s6 = scalar_lea.vmem %s2481_s5, %s1662_s30 }
  0x24   : > { %v1667_v57 = vcombine.low %v454_v50, %v468_v53  ;;  %v477_v60 = vrot.slane %v476_v54, 4  ;;  %v490_v63 = vor.u32 %v489_v58, %v486_v56  ;;  %v845_v1 = vrot.slane %v843_v59, 4  ;;  %v403_v58 = vld [vmem:[%s2373_s18] sm:$0xf] }
  0x25   : > { %v848_v3 = vrot.slane %v846_v61, 5  ;;  %v854_v16 = vrot.slane %v852_v62, 5  ;;  %v428_v24 = vmax.bf16 %v2081_v9, %v422_v6  ;;  %v429_v25 = vmax.bf16 %v2081_v9, %v423_v12  ;;  %v2033_v62 = vld [vmem:[%s2479_s3 + $0x40] sm:$0xff]   ;;  %v2035_v12 = vld [vmem:[%s2479_s3 + $0x48] sm:$0xff]  }
  0x26   : > { %1843 = vmatprep.mubr.msk.bf16.mxu0 %vm520_vm3, %v1667_v57  ;;  %v482_v2 = vsel %vm2238_vm2, %v477_v60, %v481_v55  ;;  %v491_v7 = vrot.slane %v490_v63, 4  ;;  %v666_v26 = vrot.slane %v2196_v13, 5  ;;  %v670_v27 = vrot.slane %v2203_v15, 5  ;;  %v2025_v13 = vld [vmem:[%s2479_s3 + $0x20] sm:$0xff]   ;;  %v2030_v55 = vld [vmem:[%s2479_s3 + $0x90] sm:$0xff]   ;;  %v2031_v57 = vld [vmem:[%s2479_s3 + $0x38] sm:$0xff]  }
  0x27   : > { %v2268_v8 = vcombine.low %v468_v53, %v482_v2  ;;  %v849_v14 = vor.u32 %v848_v3, %v845_v1  ;;  %v430_v28 = vmax.bf16 %v2081_v9, %v424_v18  ;;  %v2306_v15 = vcombine.low %v2192_v11, %v2207_v17  ;;  %v2026_v11 = vld [vmem:[%s2479_s3 + $0x80] sm:$0xff]   ;;  %v2032_v60 = vld [vmem:[%s2479_s3 + $0x98] sm:$0xff]  }
  0x28   : > { %v496_v19 = vsel %vm2238_vm2, %v491_v7, %v495_v0  ;;  %v674_v31 = vrot.slane %v2227_v32, 5  ;;  %v1679_v34 = vrot.slane %v428_v24, 9  ;;  %v1680_v35 = vrot.slane %v429_v25, 9  ;;  %v415_v1 = vld [vmem:[%s2373_s18 + $0x4] sm:$0x1]  ;;  %v2039_v25 = vld [vmem:[%s2479_s3 + $0x58] sm:$0xff]  }
  0x29   : > { %1891 = vmatprep.mubr.msk.bf16.mxu1 %vm520_vm3, %v2268_v8  ;;  %v2278_v21 = vcombine.low %v482_v2, %v496_v19  ;;  %v850_v22 = vrot.slane %v849_v14, 4  ;;  %v1681_v37 = vrot.slane %v430_v28, 9  ;;  %v1674_v41 = vcombine.low %v2207_v17, %v2223_v30  ;;  %v2034_v2 = vld [vmem:[%s2479_s3 + $0xa0] sm:$0xff]  }
  0x2a   : > { %v667_v38 = vsel %vm2319_vm6, %v1679_v34, %v666_v26  ;;  %v671_v40 = vsel %vm2319_vm6, %v1680_v35, %v670_v27  ;;  %v1698_v17 = vcombine.low %v2223_v30, %v2244_v44  ;;  %v432_v48 = vmax.bf16 %v2081_v9, %v426_v42  ;;  %v2029_v30 = vld [vmem:[%s2479_s3 + $0x30] sm:$0xff]   ;;  %v427_v24 = vld [vmem:[%s2373_s18] sm:$0xe] }
  0x2b   : > { %v2297_v29 = vsel %vm2238_vm2, %v850_v22, %v854_v16  ;;  %1844 = vmatmul.mubr.msk.bf16.vlgmr.msra.gmra.mrb[0].mxu0 %vm520_vm3, %v2278_v21  ;;  %v675_v45 = vsel %vm2319_vm6, %v1681_v37, %v674_v31  ;;  %v678_v50 = vrot.slane %v2232_v36, 5  ;;  %v939_v53 = vrot.slane %v2247_v47, 5 }
  0x2c   : > { %v2310_v33 = vcombine.low %v496_v19, %v2297_v29  ;;  %1848 = vmatpush3.bf16.msra.mxu0 %v2166_v4  ;;  %1851 = vmatprep.mubr.msk.bf16.mxu0 %vm520_vm3, %v1673_v20  ;;  %v425_v4 = vld [vmem:[%s2182_s28 + $0x18] sm:$0xe]  ;;  %v2350_v49 = vcombine.low %v671_v40, %v675_v45  ;;  %v1713_v36 = vrot.slane %v432_v48, 9  ;;  %v409_v61 = vmax.bf16 %v2081_v9, %v403_v58  ;;  %v2036_v19 = vld [vmem:[%s2479_s3 + $0xa8] sm:$0xff]   ;;  %v2037_v20 = vld [vmem:[%s2479_s3 + $0x50] sm:$0xff]  }
  0x2d   : > { %1849 = vmatprep.subr.bf16.mxu0 %v2023_v23  ;;  %v431_v43 = vmax.bf16 %v2081_v9, %v425_v4  ;;  %v421_v3 = vmax.bf16 %v2081_v9, %v415_v1 }
  0x2e   : > { %1892 = vmatmul.mubr.msk.bf16.vlgmr.msra.gmra.mrb[0].mxu1 %vm520_vm3, %v2310_v33  ;;  %v2377_v56 = vsel %vm2319_vm6, %v1713_v36, %v939_v53  ;;  %v1310_v63 = vshrl.u32 %v409_v61, 16  ;;  %v1313_v0 = vshll.u32 %v409_v61, 16  ;;  %v1753_v14 = vcombine.low %v2244_v44, %v409_v61 }
  0x2f   : > { %1896 = vmatpush3.bf16.msra.mxu1 %v2174_v5  ;;  %1899 = vmatprep.mubr.msk.bf16.mxu1 %vm520_vm3, %v2306_v15  ;;  %v1687_v5 = vcombine.low %v667_v38, %v671_v40  ;;  %v1682_v52 = vrot.slane %v431_v43, 9  ;;  %v1319_v18 = vshll.u32 %v421_v3, 16 }
  0x30   : > { %1897 = vmatprep.subr.bf16.mxu1 %v2024_v10  ;;  %1850 = vmatpush3.bf16.msra.mxu0 %v2023_v23  ;;  %v1312_v6 = vrot.slane %v1310_v63, 4  ;;  %v1315_v7 = vrot.slane %v1313_v0, 5  ;;  %v2038_v23 = vld [vmem:[%s2479_s3 + $0xb0] sm:$0xff]  }
  0x31   : > { %1855 = vmatprep.subr.bf16.mxu0 %v2025_v13  ;;  %v679_v54 = vsel %vm2319_vm6, %v1682_v52, %v678_v50  ;;  %v1321_v22 = vrot.slane %v1319_v18, 5 }
  0x32   : > { %v1688_v47 = vcombine.low %v675_v45, %v679_v54  ;;  %v2384_v59 = vcombine.low %v679_v54, %v2377_v56  ;;  %v1316_v16 = vor.u32 %v1315_v7, %v1312_v6 }
  0x33   : > { %1898 = vmatpush3.bf16.msra.mxu1 %v2024_v10  ;;  %v1402_v10 = vrot.slane %v421_v3, 5 }
  0x34   : > { %1903 = vmatprep.subr.bf16.mxu1 %v2026_v11  ;;  %v1317_v44 = vrot.slane %v1316_v16, 4 }
  0x37   : > { %1852 = vmatmul.mubr.msk.bf16.vlgmr.msra.gmra.mrb[0].mxu0 %vm520_vm3, %v1674_v41 }
  0x38   : > { %1856 = vmatpush3.bf16.msra.mxu0 %v2025_v13  ;;  %1859 = vmatprep.mubr.msk.bf16.mxu0 %vm520_vm3, %v1687_v5 }
  0x39   : > { %1857 = vmatprep.subr.bf16.mxu0 %v2027_v46 }
  0x3a   : > { %1900 = vmatmul.mubr.msk.bf16.vlgmr.msra.gmra.mrb[0].mxu1 %vm520_vm3, %v1698_v17 }
  0x3b   : > { %1904 = vmatpush3.bf16.msra.mxu1 %v2026_v11  ;;  %1907 = vmatprep.mubr.msk.bf16.mxu1 %vm520_vm3, %v2350_v49 }
  0x3c   : > { %1905 = vmatprep.subr.bf16.mxu1 %v2028_v51  ;;  %1858 = vmatpush3.bf16.msra.mxu0 %v2027_v46 }
  0x3d   : > { %1863 = vmatprep.subr.bf16.mxu0 %v2029_v30 }
  0x3f   : > { %1906 = vmatpush3.bf16.msra.mxu1 %v2028_v51 }
  0x40   : > { %1911 = vmatprep.subr.bf16.mxu1 %v2030_v55 }
  0x43   : > { %1860 = vmatmul.mubr.msk.bf16.vlgmr.msra.gmra.mrb[0].mxu0 %vm520_vm3, %v1688_v47 }
  0x44   : > { %1864 = vmatpush3.bf16.msra.mxu0 %v2029_v30  ;;  %1867 = vmatprep.mubr.msk.bf16.mxu0 %vm520_vm3, %v2306_v15 }
  0x45   : > { %1865 = vmatprep.subr.bf16.mxu0 %v2031_v57 }
  0x46   : > { %1908 = vmatmul.mubr.msk.bf16.vlgmr.msra.gmra.mrb[0].mxu1 %vm520_vm3, %v2384_v59 }
  0x47   : > { %1912 = vmatpush3.bf16.msra.mxu1 %v2030_v55  ;;  %1915 = vmatprep.mubr.msk.bf16.mxu1 %vm520_vm3, %v1674_v41 }
  0x48   : > { %1913 = vmatprep.subr.bf16.mxu1 %v2032_v60  ;;  %1866 = vmatpush3.bf16.msra.mxu0 %v2031_v57 }
  0x49   : > { %1871 = vmatprep.subr.bf16.mxu0 %v2033_v62 }
  0x4b   : > { %1914 = vmatpush3.bf16.msra.mxu1 %v2032_v60 }
  0x4c   : > { %1919 = vmatprep.subr.bf16.mxu1 %v2034_v2 }
  0x4f   : > { %1868 = vmatmul.mubr.msk.bf16.vlgmr.msra.gmra.mrb[0].mxu0 %vm520_vm3, %v1698_v17 }
  0x50   : > { %1872 = vmatpush3.bf16.msra.mxu0 %v2033_v62  ;;  %1875 = vmatprep.mubr.msk.bf16.mxu0 %vm520_vm3, %v2268_v8  ;;  %v1322_v8 = vsel %vm2238_vm2, %v1317_v44, %v1321_v22 }
  0x51   : > { %1873 = vmatprep.subr.bf16.mxu0 %v2035_v12  ;;  %v1762_v26 = vcombine.low %v2297_v29, %v1322_v8  ;;  %v1724_v29 = vld [vmem:[%s2480_s4] ss:$0 sm:$0xff] }
  0x52   : > { %1916 = vmatmul.mubr.msk.bf16.vlgmr.msra.gmra.mrb[0].mxu1 %vm520_vm3, %v1753_v14 }
  0x53   : > { %1920 = vmatpush3.bf16.msra.mxu1 %v2034_v2  ;;  %1923 = vmatprep.mubr.msk.bf16.mxu1 %vm520_vm3, %v2278_v21  ;;  %v433_v21 = vmax.bf16 %v2081_v9, %v427_v24 }
  0x54   : > { %1921 = vmatprep.subr.bf16.mxu1 %v2036_v19  ;;  %1874 = vmatpush3.bf16.msra.mxu0 %v2035_v12 }
  0x55   : > { %1879 = vmatprep.subr.bf16.mxu0 %v2037_v20  ;;  %v1767_v27 = vrot.slane %v433_v21, 9 }
  0x57   : > { %1922 = vmatpush3.bf16.msra.mxu1 %v2036_v19  ;;  %v1403_v9 = vsel %vm2319_vm6, %v1767_v27, %v1402_v10 }
  0x58   : > { %1927 = vmatprep.subr.bf16.mxu1 %v2038_v23  ;;  %v1772_v28 = vcombine.low %v2377_v56, %v1403_v9 }
  0x5b   : > { %1876 = vmatmul.mubr.msk.bf16.vlgmr.msra.gmra.mrb[0].mxu0 %vm520_vm3, %v2310_v33 }
  0x5c   : > { %1880 = vmatpush3.bf16.msra.mxu0 %v2037_v20  ;;  %1883 = vmatprep.mubr.msk.bf16.mxu0 %vm520_vm3, %v2350_v49 }
  0x5d   : > { %1881 = vmatprep.subr.bf16.mxu0 %v2039_v25 }
  0x5e   : > { %1924 = vmatmul.mubr.msk.bf16.vlgmr.msra.gmra.mrb[0].mxu1 %vm520_vm3, %v1762_v26 }
  0x5f   : > { %1928 = vmatpush3.bf16.msra.mxu1 %v2038_v23  ;;  %1931 = vmatprep.mubr.msk.bf16.mxu1 %vm520_vm3, %v1688_v47 }
  0x60   : > { %1929 = vmatprep.subr.bf16.mxu1 %v2040_v39  ;;  %1882 = vmatpush3.bf16.msra.mxu0 %v2039_v25 }
  0x63   : > { %1930 = vmatpush3.bf16.msra.mxu1 %v2040_v39 }
  0x67   : > { %1884 = vmatmul.mubr.msk.bf16.vlgmr.msra.gmra.mrb[0].mxu0 %vm520_vm3, %v2384_v59 }
  0x6a   : > { %1932 = vmatmul.mubr.msk.bf16.vlgmr.msra.gmra.mrb[0].mxu1 %vm520_vm3, %v1772_v28 }
 0x13a   : > { %v1885_v13 = vpop.f32.mrb[0].mxu0 }
 0x13b   : > { %v1029_v15 = vadd.f32 %v1885_v13, %v1724_v29  ;;  %v1001_v31 = vpop.f32.mrb[1].mxu0 }
 0x13c   : > { %v1027_v33 = vadd.f32 %v1724_v29, %v1001_v31  ;;  %v1886_v34 = vpop.f32.mrb[2].mxu0 }
 0x13d   : > { %v1487_v35 = vpack.c.bf16 %v1029_v15, %v1029_v15  ;;  %v1933_v37 = vpop.f32.mrb[0].mxu1  ;;  %v1030_v11 = vadd.f32 %v1886_v34, %v1724_v29  ;;  %v1004_v32 = vpop.f32.mrb[3].mxu0 }
 0x13e   : > { %v1481_v4 = vadd.f32 %v1933_v37, %v1724_v29  ;;  %v1483_v38 = vpack.c.bf16 %v1027_v33, %v1027_v33  ;;  %v1460_v40 = vpop.f32.mrb[1].mxu1  ;;  %v1028_v41 = vadd.f32 %v1724_v29, %v1004_v32 }
 0x13f   : > { %1496 = vst.msk [vmem:[%s395_s6 + $0x10] sm:$0xf] %vm1491_vm7, %v1487_v35  ;;  %v1479_v5 = vadd.f32 %v1724_v29, %v1460_v40  ;;  %v1489_v42 = vpack.c.bf16 %v1030_v11, %v1030_v11  ;;  %v1934_v43 = vpop.f32.mrb[2].mxu1 }
 0x140   : > { %v1488_v45 = vpack.c.bf16 %v1481_v4, %v1481_v4  ;;  %1492 = vst.msk [vmem:[%s395_s6] sm:$0xf] %vm1491_vm7, %v1483_v38  ;;  %v1482_v46 = vadd.f32 %v1934_v43, %v1724_v29  ;;  %v1485_v17 = vpack.c.bf16 %v1028_v41, %v1028_v41  ;;  %v1463_v48 = vpop.f32.mrb[3].mxu1 }
 0x141   : > { %v1484_v49 = vpack.c.bf16 %v1479_v5, %v1479_v5  ;;  %1498 = vst.msk [vmem:[%s395_s6 + $0x18] sm:$0xf] %vm1491_vm7, %v1489_v42  ;;  %v1480_v50 = vadd.f32 %v1724_v29, %v1463_v48 }
 0x142   : > { %1497 = vst.msk [vmem:[%s395_s6 + $0x14] sm:$0xf] %vm1491_vm7, %v1488_v45  ;;  %v1490_v51 = vpack.c.bf16 %v1482_v46, %v1482_v46  ;;  %1494 = vst.msk [vmem:[%s395_s6 + $0x8] sm:$0xf] %vm1491_vm7, %v1485_v17 }
 0x143   : > { %1493 = vst.msk [vmem:[%s395_s6 + $0x4] sm:$0xf] %vm1491_vm7, %v1484_v49  ;;  %v1486_v52 = vpack.c.bf16 %v1480_v50, %v1480_v50 }
 0x144   : > { %1499 = vst.msk [vmem:[%s395_s6 + $0x1c] sm:$0xf] %vm1491_vm7, %v1490_v51 }
 0x145   : > { %1495 = vst.msk [vmem:[%s395_s6 + $0xc] sm:$0xf] %vm1491_vm7, %v1486_v52 }
 0x146 PF: > { %s15_s22 = sadd.s32 1, %s2079_s22   ;;  %s2487_s18 = smov %s2071_s20 }
 0x147   : > { %p12_p10 = scmp.ge.s32.totalorder %s15_s22, 6   ;;  %s2488_s19 = smov %s2075_s21 }
 0x148   : > { %s2489_s20 = smov %s2492_s23  ;;  %s2490_s21 = smov %s2496_s24 }
 0x149   :  { %14 = sbr.rel (!%p12_p10) target bundleno = 3 (0x3), region = 87 }

// kernel: _lambda_.33
= control target key start
LH: loop header
LB: loop body
LE: loop exit
PB: predicated region body
PF: predicated region fallthrough
CT: control target
= control target key end

     0   :  { %s3539_s18 = smov 0   ;;  %s3541_s19 = smov 0   ;;  %s4358_s0 = inlined_call_operand.vmem [shape: bf16[2,18,18,16], index: 0, kind: input, shape index: {}, may-alias: {0,1,2}]   ;;  %s4359_s1 = inlined_call_operand.vmem [shape: bf16[2,18,18,16], index: 1, kind: input, shape index: {}, may-alias: {0,1,2}]   ;;  %s4360_s2 = inlined_call_operand.vmem [shape: bf16[2,18,18,16], index: 2, kind: input, shape index: {}, may-alias: {0,1,2}]   ;;  %s4361_s3 = inlined_call_operand.vmem [shape: bf16[12,16,6], index: 3, kind: input, shape index: {}]   ;;  %s4362_s4 = inlined_call_operand.vmem [shape: f32[1,6], index: 4, kind: input, shape index: {}]   ;;  %s4363_s5 = inlined_call_operand.vmem [shape: f32[2,16,2,16,6], index: 5, kind: output, shape index: {}]  }
   0x1   :  { %s3543_s20 = smov 0   ;;  %s3545_s21 = smov 0  }
   0x2   :  { %s3547_s22 = smov 0  }
   0x3 LB: > { %s24_s23 = sadd.s32 1, %s3498_s20  ;;  %s27_s24 = sadd.s32 1, %s3502_s21  ;;  %s3506_s22 = sphi %s3547_s22, %s15_s22   ;;  %s3502_s21 = sphi %s3545_s21, %s4372_s21   ;;  %s3498_s20 = sphi %s3543_s20, %s4371_s20   ;;  %s3494_s19 = sphi %s3541_s19, %s4370_s19   ;;  %s3490_s18 = sphi %s3539_s18, %s4369_s18  }
   0x4   : > { %p25_p0 = scmp.ge.s32.totalorder %s24_s23, 2  ;;  %p2667_p1 = scmp.ge.s32.totalorder %s3506_s22, 1 }
   0x5   : > { %p271_p2 = scmp.lt.s32.totalorder %s3506_s22, 5 }
   0x6   : > { %s4374_s23 = smov (%p25_p0, %s24_s23), 0  ;;  %s4376_s24 = smov (!%p25_p0, %s27_s24), %s3502_s21 }
   0x7   : > { %p272_p3 = pnand %p2667_p1, %p271_p2  ;;  %p29_p4 = scmp.ge.s32.totalorder %s4376_s24, 2 }
   0x8   : > { %v3392_v0 = vld [vmem:[%s4361_s3 + $0x8] sm:$0xff] (!%p272_p3)   ;;  %s3572_s27 = sshll.u32 (!%p272_p3), %s3490_s18, 3  ;;  %v3393_v1 = vld [vmem:[%s4361_s3 + $0x38] sm:$0xff] (!%p272_p3)   ;;  %p343_p5 = scmp.lt.s32.totalorder (!%p272_p3), %s3494_s19, 1  ;;  %v3582_v2 = vld [vmem:[%s4361_s3] sm:$0xff] (!%p272_p3)   ;;  %v3508_v6 = vmov (!%p272_p3), 0  }
   0x9   : > { %s4378_s24 = smov (%p29_p4, %s4376_s24), 0  ;;  %275 = sbr.rel (%p272_p3) target bundleno = 465 (0x1d1), region = 40 }
   0xa   : > { %2971 = vmatprep.subr.bf16.mxu0 (!%p272_p3), %v3392_v0  ;;  %p345_p6 = scmp.lt.s32.totalorder (!%p272_p3), %s3572_s27, 17  ;;  %p389_p7 = scmp.lt.s32.totalorder (!%p272_p3), %s3572_s27, 15  ;;  %3079 = vmatprep.subr.bf16.mxu1 (!%p272_p3), %v3393_v1  ;;  %v3591_v3 = vld [vmem:[%s4361_s3 + $0x30] sm:$0xff] (!%p272_p3)   ;;  %vm480_vm0 = vsmask.f32 (!%p272_p3), 3328  ;;  %vm708_vm1 = vcmask (!%p272_p3), 130048  }
   0xb   : > { %2972 = vmatpush3.bf16.msra.mxu0 (!%p272_p3), %v3392_v0  ;;  %3080 = vmatpush3.bf16.msra.mxu1 (!%p272_p3), %v3393_v1  ;;  %vm481_vm2 = vsmask.f32 (!%p272_p3), 7440  ;;  %vm1013_vm4 = vcmask (!%p272_p3), 1042432   ;;  %vm1014_vm5 = vcmask (!%p272_p3), 1046532   ;;  %v4239_v38 = vld [vmem:[%s4362_s4] ss:$0 sm:$0xff] (!%p272_p3) }
   0xc   : > { %2989 = vmatprep.subr.bf16.mxu0 (!%p272_p3), %v3582_v2  ;;  %3097 = vmatprep.subr.bf16.mxu1 (!%p272_p3), %v3591_v3  ;;  %vm3642_vm3 = vmor (!%p272_p3), %vm480_vm0, %vm481_vm2  ;;  %vm2485_vm7 = vcmask (!%p272_p3), 48128  }
   0xd   : > { %vm3911_vm6 = vmor (!%p272_p3), %vm1013_vm4, %vm1014_vm5 }
  0x10   : > { %s4380_s19 = smov (!%p343_p5, %s3494_s19), 1 }
  0x11   : > { %s346_s7 = scalar_select %p345_p6, %s3572_s27, 17 }
  0x12   : > { %s3585_s8 = smul.u32 54, %s4380_s19  ;;  %s2676_s12 = sshll.u32 %s4380_s19, 6 }
  0x13   : > { %s3347_s11 = smul.u32 3, %s346_s7  ;;  %s3653_s19 = sadd.s32 8, %s3572_s27 }
  0x14   : > { %s390_s13 = scalar_select %p389_p7, %s3572_s27, 15 }
  0x15   : > { %s349_s14 = sadd.s32 %s3585_s8, %s3347_s11  ;;  %p362_p8 = scmp.lt.s32.totalorder %s3653_s19, 17 }
  0x16   : > { %s2669_s15 = sshll.u32 %s349_s14, 2  ;;  %s2675_s16 = sshll.u32 %s390_s13, 2 }
  0x17   : > { %s3599_s25 = scalar_lea.vmem %s4358_s0, %s2669_s15  ;;  %s3601_s26 = sadd.s32 %s2676_s12, %s2675_s16 }
  0x18   : > { %v398_v4 = vld [vmem:[%s3599_s25] sm:$0xf]  ;;  %v399_v5 = vld [vmem:[%s3599_s25 + $0x4] sm:$0xf]  ;;  %v438_v9 = vld [vmem:[%s3599_s25 + $0x8] sm:$0x1] }
  0x19   : > { %v3606_v7 = vmax.bf16 %v3508_v6, %v398_v4  ;;  %v3609_v8 = vmax.bf16 %v3508_v6, %v399_v5  ;;  %v400_v10 = vld [vmem:[%s3599_s25 + $0xc] sm:$0xf]  ;;  %v401_v11 = vld [vmem:[%s3599_s25 + $0x10] sm:$0xf]  ;;  %v3615_v12 = vmax.bf16 %v3508_v6, %v438_v9  ;;  %v439_v15 = vld [vmem:[%s3599_s25 + $0x14] sm:$0x1] }
  0x1a   : > { %v3618_v13 = vmax.bf16 %v3508_v6, %v400_v10  ;;  %v3621_v14 = vmax.bf16 %v3508_v6, %v401_v11  ;;  %v3630_v21 = vmax.bf16 %v3508_v6, %v439_v15  ;;  %v402_v23 = vld [vmem:[%s3599_s25 + $0x18] sm:$0xf]  ;;  %v403_v28 = vld [vmem:[%s3599_s25 + $0x1c] sm:$0xf]  ;;  %v440_v37 = vld [vmem:[%s3599_s25 + $0x20] sm:$0x1] }
  0x1b   : > { %v484_v16 = vshrl.u32 %v3606_v7, 16  ;;  %v487_v17 = vshll.u32 %v3606_v7, 16  ;;  %v493_v18 = vshll.u32 %v3609_v8, 16  ;;  %v497_v19 = vshrl.u32 %v3609_v8, 16  ;;  %v404_v55 = vld [vmem:[%s3599_s25 + $0x24] sm:$0xf] }
  0x1c   : > { %v503_v20 = vshll.u32 %v3615_v12, 16  ;;  %v508_v22 = vshrl.u32 %v3618_v13, 16  ;;  %v511_v31 = vshll.u32 %v3618_v13, 16  ;;  %v517_v32 = vshll.u32 %v3621_v14, 16  ;;  %v405_v60 = vld [vmem:[%s3599_s25 + $0x28] sm:$0xf] }
  0x1d   : > { %v486_v24 = vrot.slane %v484_v16, 4  ;;  %v489_v25 = vrot.slane %v487_v17, 5  ;;  %v495_v26 = vrot.slane %v493_v18, 5  ;;  %v499_v27 = vrot.slane %v497_v19, 4  ;;  %v441_v1 = vld [vmem:[%s3599_s25 + $0x2c] sm:$0x1] }
  0x1e   : > { %v505_v29 = vrot.slane %v503_v20, 5  ;;  %v510_v30 = vrot.slane %v508_v22, 4  ;;  %v521_v35 = vshrl.u32 %v3621_v14, 16  ;;  %v527_v36 = vshll.u32 %v3630_v21, 16  ;;  %v406_v17 = vld [vmem:[%s3599_s25 + $0x30] sm:$0xf] }
  0x1f   : > { %v490_v33 = vor.u32 %v489_v25, %v486_v24  ;;  %v500_v34 = vor.u32 %v499_v27, %v495_v26  ;;  %v513_v39 = vrot.slane %v511_v31, 5  ;;  %v519_v40 = vrot.slane %v517_v32, 5  ;;  %v3693_v24 = vld [vmem:[%s4361_s3 + $0x10] sm:$0xff]   ;;  %s3702_s29 = scalar_select %p362_p8, %s3653_s19, 17 }
  0x20   : > { %v3647_v41 = vmax.bf16 %v3508_v6, %v402_v23  ;;  %v3650_v42 = vmax.bf16 %v3508_v6, %v403_v28  ;;  %v523_v45 = vrot.slane %v521_v35, 4  ;;  %v529_v46 = vrot.slane %v527_v36, 5  ;;  %v407_v23 = vld [vmem:[%s3599_s25 + $0x34] sm:$0xf]  ;;  %s373_s30 = sadd.s32 1, %s3653_s19 }
  0x21   : > { %v491_v43 = vrot.slane %v490_v33, 4  ;;  %v501_v44 = vrot.slane %v500_v34, 4  ;;  %v514_v47 = vor.u32 %v513_v39, %v510_v30  ;;  %v3656_v48 = vmax.bf16 %v3508_v6, %v440_v37  ;;  %p3737_p9 = scmp.lt.s32.totalorder %s373_s30, 17  ;;  %s3349_s10 = smul.u32 3, %s3702_s29 }
  0x22   : > { %v532_v49 = vshrl.u32 %v3647_v41, 16  ;;  %v535_v50 = vshll.u32 %v3647_v41, 16  ;;  %v524_v53 = vor.u32 %v523_v45, %v519_v40  ;;  %v541_v54 = vshll.u32 %v3650_v42, 16  ;;  %v408_v45 = vld [vmem:[%s3599_s25 + $0x3c] sm:$0xf] }
  0x23   : > { %v496_v51 = vsel %vm3642_vm3, %v491_v43, %v495_v26  ;;  %v506_v52 = vsel %vm3642_vm3, %v501_v44, %v505_v29  ;;  %v515_v57 = vrot.slane %v514_v47, 4  ;;  %v545_v63 = vshrl.u32 %v3650_v42, 16  ;;  %v442_v29 = vld [vmem:[%s3599_s25 + $0x38] sm:$0x1]  ;;  %s4382_s30 = smov (!%p3737_p9, %s373_s30), 17  ;;  %s3775_s11 = sadd.s32 %s3349_s10, %s3585_s8 }
  0x24   : > { %v2680_v56 = vcombine.low %v496_v51, %v506_v52  ;;  %v534_v58 = vrot.slane %v532_v49, 4  ;;  %v537_v59 = vrot.slane %v535_v50, 5  ;;  %v525_v61 = vrot.slane %v524_v53, 4  ;;  %v443_v52 = vld [vmem:[%s3599_s25 + $0x44] sm:$0x1]  ;;  %s3350_s12 = smul.u32 3, %s4382_s30 }
  0x25   : > { %v543_v62 = vrot.slane %v541_v54, 5  ;;  %v551_v0 = vshll.u32 %v3656_v48, 16  ;;  %v520_v4 = vsel %vm3642_vm3, %v515_v57, %v519_v40  ;;  %v3675_v9 = vmax.bf16 %v3508_v6, %v404_v55  ;;  %s2671_s14 = sshll.u32 %s3775_s11, 2 }
  0x26   : > { %2973 = vmatprep.mubr.msk.bf16.mxu0 %vm708_vm1, %v2680_v56  ;;  %v538_v5 = vor.u32 %v537_v59, %v534_v58  ;;  %v530_v10 = vsel %vm3642_vm3, %v525_v61, %v529_v46  ;;  %v547_v11 = vrot.slane %v545_v63, 4  ;;  %v3680_v16 = vmax.bf16 %v3508_v6, %v405_v60  ;;  %v409_v46 = vld [vmem:[%s3599_s25 + $0x40] sm:$0xf]  ;;  %v410_v61 = vld [vmem:[%s3599_s25 + $0x48] sm:$0xf]  ;;  %s3791_s13 = sadd.s32 %s3350_s12, %s3585_s8  ;;  %s3817_s16 = scalar_lea.vmem %s4359_s1, %s2671_s14 }
  0x27   : > { %v553_v15 = vrot.slane %v551_v0, 5  ;;  %v3683_v18 = vcombine.low %v520_v4, %v530_v10  ;;  %v3686_v20 = vmax.bf16 %v3508_v6, %v441_v1  ;;  %v556_v22 = vshrl.u32 %v3675_v9, 16 }
  0x28   : > { %v539_v19 = vrot.slane %v538_v5, 4  ;;  %v548_v25 = vor.u32 %v547_v11, %v543_v62  ;;  %v559_v26 = vshll.u32 %v3675_v9, 16  ;;  %v565_v27 = vshll.u32 %v3680_v16, 16 }
  0x29   : > { %v569_v28 = vshrl.u32 %v3680_v16, 16  ;;  %3081 = vmatprep.mubr.msk.bf16.mxu1 %vm708_vm1, %v3683_v18  ;;  %2974 = vmatmul.mubr.msk.bf16.vlgmr.msra.gmra.mrb[0].mxu0 %vm708_vm1, %v3683_v18  ;;  %v558_v31 = vrot.slane %v556_v22, 4  ;;  %v575_v32 = vshll.u32 %v3686_v20, 16  ;;  %v3712_v33 = vmax.bf16 %v3508_v6, %v406_v17 }
  0x2a   : > { %v544_v30 = vsel %vm3642_vm3, %v539_v19, %v543_v62  ;;  %2990 = vmatpush3.bf16.msra.mxu0 %v3582_v2  ;;  %v549_v34 = vrot.slane %v548_v25, 4  ;;  %v561_v35 = vrot.slane %v559_v26, 5  ;;  %v567_v36 = vrot.slane %v565_v27, 5  ;;  %v3729_v2 = vld [vmem:[%s4361_s3 + $0x40] sm:$0xff]  }
  0x2b   : > { %v571_v37 = vrot.slane %v569_v28, 4  ;;  %v577_v39 = vrot.slane %v575_v32, 5  ;;  %v3717_v40 = vmax.bf16 %v3508_v6, %v407_v23  ;;  %v3720_v43 = vmax.bf16 %v3508_v6, %v442_v29  ;;  %3007 = vmatprep.subr.bf16.mxu0 %v3693_v24  ;;  %v411_v23 = vld [vmem:[%s3599_s25 + $0x4c] sm:$0xf]  ;;  %v444_v28 = vld [vmem:[%s3599_s25 + $0x50] sm:$0x1] }
  0x2c   : > { %v580_v44 = vshrl.u32 %v3712_v33, 16  ;;  %v554_v47 = vsel %vm3642_vm3, %v549_v34, %v553_v15  ;;  %v562_v49 = vor.u32 %v561_v35, %v558_v31  ;;  %v583_v51 = vshll.u32 %v3712_v33, 16 }
  0x2d   : > { %v572_v50 = vor.u32 %v571_v37, %v567_v36  ;;  %v3741_v53 = vcombine.low %v544_v30, %v554_v47  ;;  %v589_v55 = vshll.u32 %v3717_v40, 16  ;;  %v593_v56 = vshrl.u32 %v3717_v40, 16  ;;  %v412_v47 = vld [vmem:[%s3599_s25 + $0x54] sm:$0xf] }
  0x2e   : > { %v582_v54 = vrot.slane %v580_v44, 4  ;;  %v563_v57 = vrot.slane %v562_v49, 4  ;;  %v585_v59 = vrot.slane %v583_v51, 5  ;;  %v599_v60 = vshll.u32 %v3720_v43, 16 }
  0x2f   : > { %v573_v58 = vrot.slane %v572_v50, 4  ;;  %3082 = vmatmul.mubr.msk.bf16.vlgmr.msra.gmra.mrb[0].mxu1 %vm708_vm1, %v3741_v53  ;;  %2977 = vmatprep.mubr.msk.bf16.mxu0 %vm708_vm1, %v3741_v53  ;;  %v591_v62 = vrot.slane %v589_v55, 5  ;;  %v595_v63 = vrot.slane %v593_v56, 4  ;;  %v3753_v0 = vmax.bf16 %v3508_v6, %v408_v45 }
  0x30   : > { %v3756_v1 = vmax.bf16 %v3508_v6, %v409_v46  ;;  %3098 = vmatpush3.bf16.msra.mxu1 %v3591_v3  ;;  %v568_v4 = vsel %vm3642_vm3, %v563_v57, %v567_v36  ;;  %v586_v10 = vor.u32 %v585_v59, %v582_v54  ;;  %v601_v11 = vrot.slane %v599_v60, 5  ;;  %v413_v54 = vld [vmem:[%s3599_s25 + $0x58] sm:$0xf]  ;;  %v445_v59 = vld [vmem:[%s3599_s25 + $0x5c] sm:$0x1] }
  0x31   : > { %v578_v5 = vsel %vm3642_vm3, %v573_v58, %v577_v39  ;;  %v596_v17 = vor.u32 %v595_v63, %v591_v62  ;;  %v3770_v19 = vmax.bf16 %v3508_v6, %v443_v52  ;;  %v604_v22 = vshrl.u32 %v3753_v0, 16  ;;  %3115 = vmatprep.subr.bf16.mxu1 %v3729_v2 }
  0x32   : > { %v3767_v15 = vcombine.low %v568_v4, %v578_v5  ;;  %v587_v3 = vrot.slane %v586_v10, 4  ;;  %v607_v25 = vshll.u32 %v3753_v0, 16  ;;  %v613_v26 = vshll.u32 %v3756_v1, 16 }
  0x33   : > { %v617_v27 = vshrl.u32 %v3756_v1, 16  ;;  %v597_v29 = vrot.slane %v596_v17, 4  ;;  %v606_v30 = vrot.slane %v604_v22, 4  ;;  %v623_v31 = vshll.u32 %v3770_v19, 16 }
  0x34   : > { %3085 = vmatprep.mubr.msk.bf16.mxu1 %vm708_vm1, %v3767_v15  ;;  %2978 = vmatmul.mubr.msk.bf16.gmra.mrb[4].mxu0 %vm708_vm1, %v3767_v15  ;;  %v3788_v32 = vmax.bf16 %v3508_v6, %v410_v61  ;;  %v592_v34 = vsel %vm3642_vm3, %v587_v3, %v591_v62  ;;  %v609_v35 = vrot.slane %v607_v25, 5  ;;  %v615_v36 = vrot.slane %v613_v26, 5  ;;  %v414_v25 = vld [vmem:[%s3817_s16] sm:$0xf] }
  0x35   : > { %v619_v37 = vrot.slane %v617_v27, 4  ;;  %v602_v39 = vsel %vm3642_vm3, %v597_v29, %v601_v11  ;;  %v625_v44 = vrot.slane %v623_v31, 5  ;;  %v3799_v45 = vmax.bf16 %v3508_v6, %v411_v23 }
  0x36   : > { %v3802_v46 = vmax.bf16 %v3508_v6, %v444_v28  ;;  %v3805_v49 = vcombine.low %v592_v34, %v602_v39  ;;  %v610_v50 = vor.u32 %v609_v35, %v606_v30  ;;  %v628_v52 = vshrl.u32 %v3788_v32, 16  ;;  %v415_v30 = vld [vmem:[%s3817_s16 + $0x4] sm:$0xf] }
  0x37   : > { %v620_v51 = vor.u32 %v619_v37, %v615_v36  ;;  %v631_v55 = vshll.u32 %v3788_v32, 16  ;;  %v637_v56 = vshll.u32 %v3799_v45, 16  ;;  %v641_v57 = vshrl.u32 %v3799_v45, 16  ;;  %v446_v37 = vld [vmem:[%s3817_s16 + $0x8] sm:$0x1] }
  0x38   : > { %v647_v58 = vshll.u32 %v3802_v46, 16  ;;  %3086 = vmatmul.mubr.msk.bf16.gmra.mrb[4].mxu1 %vm708_vm1, %v3805_v49  ;;  %2981 = vmatprep.mubr.msk.bf16.mxu0 %vm708_vm1, %v3805_v49  ;;  %v611_v60 = vrot.slane %v610_v50, 4  ;;  %v630_v62 = vrot.slane %v628_v52, 4  ;;  %v3824_v63 = vmax.bf16 %v3508_v6, %v412_v47 }
  0x39   : > { %v621_v61 = vrot.slane %v620_v51, 4  ;;  %v633_v4 = vrot.slane %v631_v55, 5  ;;  %v639_v5 = vrot.slane %v637_v56, 5  ;;  %v643_v10 = vrot.slane %v641_v57, 4 }
  0x3a   : > { %v649_v11 = vrot.slane %v647_v58, 5  ;;  %v616_v17 = vsel %vm3642_vm3, %v611_v60, %v615_v36  ;;  %v3831_v23 = vmax.bf16 %v3508_v6, %v413_v54  ;;  %v3834_v3 = vmax.bf16 %v3508_v6, %v445_v59 }
  0x3b   : > { %v626_v22 = vsel %vm3642_vm3, %v621_v61, %v625_v44  ;;  %v634_v27 = vor.u32 %v633_v4, %v630_v62  ;;  %v644_v28 = vor.u32 %v643_v10, %v639_v5  ;;  %v652_v29 = vshrl.u32 %v3824_v63, 16 }
  0x3c   : > { %v3837_v26 = vcombine.low %v616_v17, %v626_v22  ;;  %v655_v31 = vshll.u32 %v3824_v63, 16  ;;  %v661_v34 = vshll.u32 %v3831_v23, 16  ;;  %v665_v35 = vshrl.u32 %v3831_v23, 16 }
  0x3d   : > { %v671_v36 = vshll.u32 %v3834_v3, 16  ;;  %v635_v39 = vrot.slane %v634_v27, 4  ;;  %v645_v44 = vrot.slane %v644_v28, 4  ;;  %v654_v47 = vrot.slane %v652_v29, 4 }
  0x3e   : > { %3089 = vmatprep.mubr.msk.bf16.mxu1 %vm708_vm1, %v3837_v26  ;;  %2982 = vmatmul.mubr.msk.bf16.gmra.mrb[8].mxu0 %vm708_vm1, %v3837_v26  ;;  %v3851_v50 = vmax.bf16 %v3508_v6, %v414_v25  ;;  %v657_v51 = vrot.slane %v655_v31, 5  ;;  %v663_v52 = vrot.slane %v661_v34, 5  ;;  %v667_v54 = vrot.slane %v665_v35, 4 }
  0x3f   : > { %v673_v55 = vrot.slane %v671_v36, 5  ;;  %v640_v56 = vsel %vm3642_vm3, %v635_v39, %v639_v5  ;;  %v650_v57 = vsel %vm3642_vm3, %v645_v44, %v649_v11  ;;  %v3858_v58 = vmax.bf16 %v3508_v6, %v415_v30 }
  0x40   : > { %v3861_v59 = vmax.bf16 %v3508_v6, %v446_v37  ;;  %v3863_v60 = vcombine.low %v640_v56, %v650_v57  ;;  %v658_v61 = vor.u32 %v657_v51, %v654_v47  ;;  %v668_v62 = vor.u32 %v667_v54, %v663_v52  ;;  %v458_v37 = vld [vmem:[%s3599_s25] sm:$0xe]  ;;  %v459_v54 = vld [vmem:[%s3599_s25 + $0xc] sm:$0xe] }
  0x41   : > { %v1373_v4 = vshrl.u32 %v3851_v50, 16  ;;  %v1376_v10 = vshll.u32 %v3851_v50, 16  ;;  %v1382_v17 = vshll.u32 %v3858_v58, 16  ;;  %v1386_v5 = vshrl.u32 %v3858_v58, 16 }
  0x42   : > { %v1392_v11 = vshll.u32 %v3861_v59, 16  ;;  %3090 = vmatmul.mubr.msk.bf16.gmra.mrb[8].mxu1 %vm708_vm1, %v3863_v60  ;;  %2985 = vmatprep.mubr.msk.bf16.mxu0 %vm708_vm1, %v3863_v60  ;;  %v659_v22 = vrot.slane %v658_v61, 4  ;;  %v669_v25 = vrot.slane %v668_v62, 4  ;;  %v1021_v31 = vrot.slane %v3615_v12, 5 }
  0x43   : > { %v1375_v27 = vrot.slane %v1373_v4, 4  ;;  %v1378_v28 = vrot.slane %v1376_v10, 5  ;;  %v1384_v29 = vrot.slane %v1382_v17, 5  ;;  %v1388_v30 = vrot.slane %v1386_v5, 4  ;;  %v461_v10 = vld [vmem:[%s3599_s25 + $0x24] sm:$0xe] }
  0x44   : > { %v664_v34 = vsel %vm3642_vm3, %v659_v22, %v663_v52  ;;  %v674_v35 = vsel %vm3642_vm3, %v669_v25, %v673_v55  ;;  %v2697_v36 = vcombine.low %v3606_v7, %v3609_v8  ;;  %v1394_v51 = vrot.slane %v1392_v11, 5  ;;  %v460_v55 = vld [vmem:[%s3599_s25 + $0x18] sm:$0xe] }
  0x45   : > { %v3882_v39 = vcombine.low %v664_v34, %v674_v35  ;;  %v1379_v44 = vor.u32 %v1378_v28, %v1375_v27  ;;  %v1389_v47 = vor.u32 %v1388_v30, %v1384_v29  ;;  %v1035_v56 = vrot.slane %v3656_v48, 5  ;;  %v462_v34 = vld [vmem:[%s3599_s25 + $0x30] sm:$0xe] }
  0x46   : > { %v3888_v12 = vcombine.low %v3618_v13, %v3621_v14  ;;  %v3892_v52 = vcombine.low %v3647_v41, %v3650_v42  ;;  %v3896_v7 = vcombine.low %v3675_v9, %v3680_v16  ;;  %v3905_v13 = vcombine.low %v3712_v33, %v3717_v40  ;;  %v3402_v9 = vld [vmem:[%s4361_s3 + $0x28] sm:$0xff]  }
  0x47   : > { %3093 = vmatprep.mubr.msk.bf16.mxu1 %vm708_vm1, %v3882_v39  ;;  %2986 = vmatmul.mubr.msk.bf16.gmra.mrb[12].mxu0 %vm708_vm1, %v3882_v39  ;;  %v1380_v48 = vrot.slane %v1379_v44, 4  ;;  %v1390_v57 = vrot.slane %v1389_v47, 4  ;;  %v468_v41 = vmax.bf16 %v3508_v6, %v458_v37  ;;  %v1018_v61 = vrot.slane %v3609_v8, 5  ;;  %v463_v47 = vld [vmem:[%s3599_s25 + $0x3c] sm:$0xe] }
  0x48   : > { %2991 = vmatprep.mubr.msk.bf16.mxu0 %vm708_vm1, %v2697_v36  ;;  %v469_v62 = vmax.bf16 %v3508_v6, %v459_v54  ;;  %v1025_v4 = vrot.slane %v3621_v14, 5  ;;  %v1028_v33 = vrot.slane %v3630_v21, 5  ;;  %v470_v22 = vmax.bf16 %v3508_v6, %v460_v55 }
  0x49   : > { %v1385_v17 = vsel %vm3642_vm3, %v1380_v48, %v1384_v29  ;;  %v1395_v5 = vsel %vm3642_vm3, %v1390_v57, %v1394_v51  ;;  %v2714_v11 = vrot.slane %v468_v41, 9  ;;  %v1020_v8 = vrot.slane %v1018_v61, 4 }
  0x4a   : > { %v3925_v25 = vcombine.low %v1385_v17, %v1395_v5  ;;  %v2715_v27 = vrot.slane %v469_v62, 9  ;;  %v1027_v28 = vrot.slane %v1025_v4, 4  ;;  %v2716_v21 = vrot.slane %v470_v22, 9  ;;  %v465_v22 = vld [vmem:[%s3599_s25 + $0x54] sm:$0xe] }
  0x4b   : > { %v3929_v14 = vsel %vm3911_vm6, %v2714_v11, %v1018_v61  ;;  %v1032_v30 = vrot.slane %v3650_v42, 5  ;;  %v471_v29 = vmax.bf16 %v3508_v6, %v461_v10  ;;  %v3938_v35 = vsel %vm3911_vm6, %v1020_v8, %v1021_v31  ;;  %v3953_v31 = vld [vmem:[%s4361_s3 + $0x18] sm:$0xff]   ;;  %v464_v10 = vld [vmem:[%s3599_s25 + $0x48] sm:$0xe]  ;;  %s2673_s25 = sshll.u32 %s3791_s13, 2 }
  0x4c   : > { %3094 = vmatmul.mubr.msk.bf16.gmra.mrb[12].mxu1 %vm708_vm1, %v3925_v25  ;;  %v1026_v36 = vsel %vm3911_vm6, %v2715_v27, %v1025_v4  ;;  %v1029_v37 = vsel %vm3911_vm6, %v1027_v28, %v1028_v33  ;;  %v1039_v44 = vrot.slane %v3680_v16, 5  ;;  %v2724_v42 = vcombine.low %v3929_v14, %v3938_v35  ;;  %v3986_v8 = vld [vmem:[%s4361_s3 + $0x48] sm:$0xff]   ;;  %s4051_s30 = scalar_lea.vmem %s4360_s2, %s2673_s25 }
  0x4d   : > { %3099 = vmatprep.mubr.msk.bf16.mxu1 %vm708_vm1, %v3888_v12  ;;  %v3955_v51 = vcombine.low %v1026_v36, %v1029_v37  ;;  %v1033_v54 = vsel %vm3911_vm6, %v2716_v21, %v1032_v30  ;;  %v1034_v55 = vrot.slane %v1032_v30, 4  ;;  %v2717_v16 = vrot.slane %v471_v29, 9  ;;  %v466_v29 = vld [vmem:[%s3817_s16] sm:$0xe]  ;;  %s2677_s16 = sshll.u32 %s3601_s26, 3 }
  0x4e   : > { %v1041_v48 = vrot.slane %v1039_v44, 4  ;;  %v1042_v57 = vrot.slane %v3686_v20, 5  ;;  %v472_v41 = vmax.bf16 %v3508_v6, %v462_v34  ;;  %v1046_v62 = vrot.slane %v3717_v40, 5  ;;  %s4255_s19 = scalar_lea.vmem %s4363_s5, %s2677_s16 }
  0x4f   : > { %2992 = vmatmul.mubr.msk.bf16.vlgmr.msra.gmra.mrb[0].mxu0 %vm708_vm1, %v3888_v12  ;;  %v1036_v61 = vsel %vm3911_vm6, %v1034_v55, %v1035_v56  ;;  %v1049_v4 = vrot.slane %v3720_v43, 5  ;;  %v473_v33 = vmax.bf16 %v3508_v6, %v463_v47  ;;  %v1040_v17 = vsel %vm3911_vm6, %v2717_v16, %v1039_v44 }
  0x50   : > { %3008 = vmatpush3.bf16.msra.mxu0 %v3693_v24  ;;  %2995 = vmatprep.mubr.msk.bf16.mxu0 %vm708_vm1, %v3892_v52  ;;  %v3972_v20 = vcombine.low %v1033_v54, %v1036_v61  ;;  %v1043_v56 = vsel %vm3911_vm6, %v1041_v48, %v1042_v57  ;;  %v2718_v40 = vrot.slane %v472_v41, 9  ;;  %v1048_v5 = vrot.slane %v1046_v62, 4 }
  0x51   : > { %3025 = vmatprep.subr.bf16.mxu0 %v3953_v31  ;;  %v3979_v43 = vcombine.low %v1040_v17, %v1043_v56  ;;  %v2719_v11 = vrot.slane %v473_v33, 9  ;;  %v1053_v24 = vrot.slane %v3756_v1, 5  ;;  %v1056_v28 = vrot.slane %v3770_v19, 5 }
  0x52   : > { %v1047_v27 = vsel %vm3911_vm6, %v2718_v40, %v1046_v62  ;;  %v474_v21 = vmax.bf16 %v3508_v6, %v464_v10  ;;  %v1060_v30 = vrot.slane %v3799_v45, 5  ;;  %v1050_v34 = vsel %vm3911_vm6, %v1048_v5, %v1049_v4 }
  0x53   : > { %v1054_v36 = vsel %vm3911_vm6, %v2719_v11, %v1053_v24  ;;  %v1055_v37 = vrot.slane %v1053_v24, 4  ;;  %v1063_v44 = vrot.slane %v3802_v46, 5  ;;  %v4001_v47 = vcombine.low %v1047_v27, %v1050_v34 }
  0x54   : > { %3100 = vmatmul.mubr.msk.bf16.vlgmr.msra.gmra.mrb[0].mxu1 %vm708_vm1, %v3892_v52  ;;  %v2720_v19 = vrot.slane %v474_v21, 9  ;;  %v1062_v54 = vrot.slane %v1060_v30, 4  ;;  %v475_v55 = vmax.bf16 %v3508_v6, %v465_v22  ;;  %v1067_v48 = vrot.slane %v3831_v23, 5  ;;  %v447_v21 = vld [vmem:[%s4051_s30 + $0x8] sm:$0x1] }
  0x55   : > { %3116 = vmatpush3.bf16.msra.mxu1 %v3729_v2  ;;  %3103 = vmatprep.mubr.msk.bf16.mxu1 %vm708_vm1, %v3896_v7  ;;  %v1057_v16 = vsel %vm3911_vm6, %v1055_v37, %v1056_v28  ;;  %v1070_v46 = vrot.slane %v3834_v3, 5  ;;  %v476_v57 = vmax.bf16 %v3508_v6, %v466_v29  ;;  %v1528_v10 = vrot.slane %v3858_v58, 5  ;;  %v467_v29 = vld [vmem:[%s4051_s30] sm:$0xe] }
  0x56   : > { %3133 = vmatprep.subr.bf16.mxu1 %v3986_v8  ;;  %v4013_v41 = vcombine.low %v1054_v36, %v1057_v16  ;;  %v1061_v61 = vsel %vm3911_vm6, %v2720_v19, %v1060_v30  ;;  %v1064_v2 = vsel %vm3911_vm6, %v1062_v54, %v1063_v44  ;;  %v2721_v62 = vrot.slane %v475_v55, 9 }
  0x57   : > { %2996 = vmatmul.mubr.msk.bf16.gmra.mrb[4].mxu0 %vm708_vm1, %v3896_v7  ;;  %v4021_v4 = vcombine.low %v1061_v61, %v1064_v2  ;;  %v1069_v3 = vrot.slane %v1067_v48, 4  ;;  %v2765_v33 = vrot.slane %v476_v57, 9  ;;  %v1531_v56 = vrot.slane %v3861_v59, 5 }
  0x58   : > { %2999 = vmatprep.mubr.msk.bf16.mxu0 %vm708_vm1, %v3905_v13  ;;  %v1068_v17 = vsel %vm3911_vm6, %v2721_v62, %v1067_v48  ;;  %v4031_v40 = vcombine.low %v3753_v0, %v3756_v1  ;;  %v1530_v24 = vrot.slane %v1528_v10, 4  ;;  %v2703_v0 = vcombine.low %v3788_v32, %v3799_v45  ;;  %v417_v1 = vld [vmem:[%s4051_s30 + $0x4] sm:$0xf] }
  0x59   : > { %v1071_v5 = vsel %vm3911_vm6, %v1069_v3, %v1070_v46  ;;  %v1529_v11 = vsel %vm3911_vm6, %v2765_v33, %v1528_v10  ;;  %v2704_v28 = vcombine.low %v3824_v63, %v3831_v23  ;;  %v4063_v30 = vmax.bf16 %v3508_v6, %v417_v1 }
  0x5a   : > { %v4037_v22 = vcombine.low %v1068_v17, %v1071_v5  ;;  %v1532_v27 = vsel %vm3911_vm6, %v1530_v24, %v1531_v56  ;;  %v4069_v32 = vmax.bf16 %v3508_v6, %v447_v21  ;;  %v477_v45 = vmax.bf16 %v3508_v6, %v467_v29 }
  0x5b   : > { %v4044_v59 = vcombine.low %v1529_v11, %v1532_v27  ;;  %v2320_v34 = vrot.slane %v4063_v30, 5  ;;  %v2743_v37 = vcombine.low %v3851_v50, %v3858_v58  ;;  %v3400_v50 = vld [vmem:[%s4361_s3 + $0x20] sm:$0xff]   ;;  %v3401_v58 = vld [vmem:[%s4361_s3 + $0x50] sm:$0xff]   ;;  %v2174_v14 = vshll.u32 %v4063_v30, 16 }
  0x5c   : > { %3104 = vmatmul.mubr.msk.bf16.gmra.mrb[4].mxu1 %vm708_vm1, %v3905_v13  ;;  %v2836_v36 = vrot.slane %v477_v45, 9  ;;  %v2323_v23 = vrot.slane %v4069_v32, 5  ;;  %v2178_v35 = vshrl.u32 %v4063_v30, 16  ;;  %v2184_v16 = vshll.u32 %v4069_v32, 16 }
  0x5d   : > { %3107 = vmatprep.mubr.msk.bf16.mxu1 %vm708_vm1, %v4031_v40  ;;  %v2322_v63 = vrot.slane %v2320_v34, 4 }
  0x5e   : > { %v4083_v44 = vsel %vm3911_vm6, %v2836_v36, %v2320_v34  ;;  %v2186_v46 = vrot.slane %v2184_v16, 5 }
  0x5f   : > { %3000 = vmatmul.mubr.msk.bf16.gmra.mrb[8].mxu0 %vm708_vm1, %v4031_v40  ;;  %v4087_v19 = vsel %vm3911_vm6, %v2322_v63, %v2323_v23 }
  0x60   : > { %3003 = vmatprep.mubr.msk.bf16.mxu0 %vm708_vm1, %v2703_v0  ;;  %v2839_v54 = vcombine.low %v4083_v44, %v4087_v19 }
  0x64   : > { %3108 = vmatmul.mubr.msk.bf16.gmra.mrb[8].mxu1 %vm708_vm1, %v2703_v0 }
  0x65   : > { %3111 = vmatprep.mubr.msk.bf16.mxu1 %vm708_vm1, %v2704_v28 }
  0x67   : > { %3004 = vmatmul.mubr.msk.bf16.gmra.mrb[12].mxu0 %vm708_vm1, %v2704_v28 }
  0x68   : > { %3009 = vmatprep.mubr.msk.bf16.mxu0 %vm708_vm1, %v2724_v42 }
  0x6c   : > { %3112 = vmatmul.mubr.msk.bf16.gmra.mrb[12].mxu1 %vm708_vm1, %v2743_v37 }
  0x6d   : > { %3117 = vmatprep.mubr.msk.bf16.mxu1 %vm708_vm1, %v3955_v51 }
  0x6f   : > { %3010 = vmatmul.mubr.msk.bf16.vlgmr.msra.gmra.mrb[0].mxu0 %vm708_vm1, %v3955_v51 }
  0x70   : > { %3026 = vmatpush3.bf16.msra.mxu0 %v3953_v31  ;;  %3013 = vmatprep.mubr.msk.bf16.mxu0 %vm708_vm1, %v3972_v20  ;;  %v2176_v31 = vrot.slane %v2174_v14, 5 }
  0x71   : > { %3043 = vmatprep.subr.bf16.mxu0 %v3400_v50 }
  0x74   : > { %3118 = vmatmul.mubr.msk.bf16.vlgmr.msra.gmra.mrb[0].mxu1 %vm708_vm1, %v3972_v20 }
  0x75   : > { %3134 = vmatpush3.bf16.msra.mxu1 %v3986_v8  ;;  %3121 = vmatprep.mubr.msk.bf16.mxu1 %vm708_vm1, %v3979_v43 }
  0x76   : > { %3151 = vmatprep.subr.bf16.mxu1 %v3401_v58 }
  0x77   : > { %3014 = vmatmul.mubr.msk.bf16.gmra.mrb[4].mxu0 %vm708_vm1, %v3979_v43 }
  0x78   : > { %3017 = vmatprep.mubr.msk.bf16.mxu0 %vm708_vm1, %v4001_v47 }
  0x7c   : > { %3122 = vmatmul.mubr.msk.bf16.gmra.mrb[4].mxu1 %vm708_vm1, %v4001_v47 }
  0x7d   : > { %3125 = vmatprep.mubr.msk.bf16.mxu1 %vm708_vm1, %v4013_v41 }
  0x7f   : > { %3018 = vmatmul.mubr.msk.bf16.gmra.mrb[8].mxu0 %vm708_vm1, %v4013_v41 }
  0x80   : > { %3021 = vmatprep.mubr.msk.bf16.mxu0 %vm708_vm1, %v4021_v4 }
  0x84   : > { %3126 = vmatmul.mubr.msk.bf16.gmra.mrb[8].mxu1 %vm708_vm1, %v4021_v4 }
  0x85   : > { %3129 = vmatprep.mubr.msk.bf16.mxu1 %vm708_vm1, %v4037_v22 }
  0x87   : > { %3022 = vmatmul.mubr.msk.bf16.gmra.mrb[12].mxu0 %vm708_vm1, %v4037_v22 }
  0x88   : > { %3027 = vmatprep.mubr.msk.bf16.mxu0 %vm708_vm1, %v3888_v12  ;;  %v3403_v12 = vld [vmem:[%s4361_s3 + $0x58] sm:$0xff]  }
  0x8c   : > { %3130 = vmatmul.mubr.msk.bf16.gmra.mrb[12].mxu1 %vm708_vm1, %v4044_v59 }
  0x8d   : > { %3135 = vmatprep.mubr.msk.bf16.mxu1 %vm708_vm1, %v3892_v52 }
  0x8f   : > { %3028 = vmatmul.mubr.msk.bf16.vlgmr.msra.gmra.mrb[0].mxu0 %vm708_vm1, %v3892_v52  ;;  %v416_v52 = vld [vmem:[%s4051_s30] sm:$0xf] }
  0x90   : > { %3044 = vmatpush3.bf16.msra.mxu0 %v3400_v50  ;;  %3031 = vmatprep.mubr.msk.bf16.mxu0 %vm708_vm1, %v3896_v7 }
  0x91   : > { %3061 = vmatprep.subr.bf16.mxu0 %v3402_v9 }
  0x94   : > { %3136 = vmatmul.mubr.msk.bf16.vlgmr.msra.gmra.mrb[0].mxu1 %vm708_vm1, %v3896_v7  ;;  %v436_v7 = vmax.bf16 %v3508_v6, %v416_v52 }
  0x95   : > { %3152 = vmatpush3.bf16.msra.mxu1 %v3401_v58  ;;  %3139 = vmatprep.mubr.msk.bf16.mxu1 %vm708_vm1, %v3905_v13 }
  0x96   : > { %3169 = vmatprep.subr.bf16.mxu1 %v3403_v12  ;;  %v2165_v6 = vshrl.u32 %v436_v7, 16 }
  0x97   : > { %3032 = vmatmul.mubr.msk.bf16.gmra.mrb[4].mxu0 %vm708_vm1, %v3905_v13  ;;  %v2814_v13 = vcombine.low %v436_v7, %v4063_v30 }
  0x98   : > { %3035 = vmatprep.mubr.msk.bf16.mxu0 %vm708_vm1, %v4031_v40 }
  0x9c   : > { %3140 = vmatmul.mubr.msk.bf16.gmra.mrb[4].mxu1 %vm708_vm1, %v4031_v40 }
  0x9d   : > { %3143 = vmatprep.mubr.msk.bf16.mxu1 %vm708_vm1, %v2703_v0 }
  0x9f   : > { %3036 = vmatmul.mubr.msk.bf16.gmra.mrb[8].mxu0 %vm708_vm1, %v2703_v0 }
  0xa0   : > { %3039 = vmatprep.mubr.msk.bf16.mxu0 %vm708_vm1, %v2704_v28 }
  0xa4   : > { %3144 = vmatmul.mubr.msk.bf16.gmra.mrb[8].mxu1 %vm708_vm1, %v2704_v28 }
  0xa5   : > { %3147 = vmatprep.mubr.msk.bf16.mxu1 %vm708_vm1, %v2743_v37 }
  0xa7   : > { %3040 = vmatmul.mubr.msk.bf16.gmra.mrb[12].mxu0 %vm708_vm1, %v2743_v37 }
  0xa8   : > { %3045 = vmatprep.mubr.msk.bf16.mxu0 %vm708_vm1, %v3683_v18  ;;  %v2168_v18 = vshll.u32 %v436_v7, 16 }
  0xaa   : > { %v2170_v42 = vrot.slane %v2168_v18, 5 }
  0xac   : > { %3148 = vmatmul.mubr.msk.bf16.gmra.mrb[12].mxu1 %vm708_vm1, %v2814_v13 }
  0xad   : > { %3153 = vmatprep.mubr.msk.bf16.mxu1 %vm708_vm1, %v3741_v53 }
  0xaf   : > { %3046 = vmatmul.mubr.msk.bf16.vlgmr.msra.gmra.mrb[0].mxu0 %vm708_vm1, %v3741_v53  ;;  %v2167_v53 = vrot.slane %v2165_v6, 4 }
  0xb0   : > { %3062 = vmatpush3.bf16.msra.mxu0 %v3402_v9  ;;  %3049 = vmatprep.mubr.msk.bf16.mxu0 %vm708_vm1, %v3767_v15 }
  0xb1   : > { %v2171_v8 = vor.u32 %v2170_v42, %v2167_v53 }
  0xb4   : > { %3154 = vmatmul.mubr.msk.bf16.vlgmr.msra.gmra.mrb[0].mxu1 %vm708_vm1, %v3767_v15  ;;  %v2180_v15 = vrot.slane %v2178_v35, 4 }
  0xb5   : > { %3170 = vmatpush3.bf16.msra.mxu1 %v3403_v12  ;;  %3157 = vmatprep.mubr.msk.bf16.mxu1 %vm708_vm1, %v3805_v49 }
  0xb6   : > { %v2181_v55 = vor.u32 %v2180_v15, %v2176_v31 }
  0xb7   : > { %3050 = vmatmul.mubr.msk.bf16.gmra.mrb[4].mxu0 %vm708_vm1, %v3805_v49  ;;  %v2172_v49 = vrot.slane %v2171_v8, 4 }
  0xb8   : > { %3053 = vmatprep.mubr.msk.bf16.mxu0 %vm708_vm1, %v3837_v26  ;;  %v2182_v48 = vrot.slane %v2181_v55, 4 }
  0xba   : > { %v2187_v57 = vsel %vm3642_vm3, %v2182_v48, %v2186_v46 }
  0xbc   : > { %3158 = vmatmul.mubr.msk.bf16.gmra.mrb[4].mxu1 %vm708_vm1, %v3837_v26  ;;  %v2177_v26 = vsel %vm3642_vm3, %v2172_v49, %v2176_v31 }
  0xbd   : > { %3161 = vmatprep.mubr.msk.bf16.mxu1 %vm708_vm1, %v3863_v60 }
  0xbf   : > { %3054 = vmatmul.mubr.msk.bf16.gmra.mrb[8].mxu0 %vm708_vm1, %v3863_v60  ;;  %v2826_v60 = vcombine.low %v2177_v26, %v2187_v57 }
  0xc0   : > { %3057 = vmatprep.mubr.msk.bf16.mxu0 %vm708_vm1, %v3882_v39 }
  0xc4   : > { %3162 = vmatmul.mubr.msk.bf16.gmra.mrb[8].mxu1 %vm708_vm1, %v3882_v39 }
  0xc5   : > { %3165 = vmatprep.mubr.msk.bf16.mxu1 %vm708_vm1, %v3925_v25 }
  0xc7   : > { %3058 = vmatmul.mubr.msk.bf16.gmra.mrb[12].mxu0 %vm708_vm1, %v3925_v25 }
  0xc8   : > { %3063 = vmatprep.mubr.msk.bf16.mxu0 %vm708_vm1, %v3955_v51 }
  0xcc   : > { %3166 = vmatmul.mubr.msk.bf16.gmra.mrb[12].mxu1 %vm708_vm1, %v2826_v60 }
  0xcd   : > { %3171 = vmatprep.mubr.msk.bf16.mxu1 %vm708_vm1, %v3972_v20 }
  0xcf   : > { %3064 = vmatmul.mubr.msk.bf16.vlgmr.msra.gmra.mrb[0].mxu0 %vm708_vm1, %v3972_v20 }
  0xd0   : > { %3067 = vmatprep.mubr.msk.bf16.mxu0 %vm708_vm1, %v3979_v43 }
  0xd4   : > { %3172 = vmatmul.mubr.msk.bf16.vlgmr.msra.gmra.mrb[0].mxu1 %vm708_vm1, %v3979_v43 }
  0xd5   : > { %3175 = vmatprep.mubr.msk.bf16.mxu1 %vm708_vm1, %v4001_v47 }
  0xd7   : > { %3068 = vmatmul.mubr.msk.bf16.gmra.mrb[4].mxu0 %vm708_vm1, %v4001_v47 }
  0xd8   : > { %3071 = vmatprep.mubr.msk.bf16.mxu0 %vm708_vm1, %v4013_v41 }
  0xdc   : > { %3176 = vmatmul.mubr.msk.bf16.gmra.mrb[4].mxu1 %vm708_vm1, %v4013_v41 }
  0xdd   : > { %3179 = vmatprep.mubr.msk.bf16.mxu1 %vm708_vm1, %v4021_v4 }
  0xdf   : > { %3072 = vmatmul.mubr.msk.bf16.gmra.mrb[8].mxu0 %vm708_vm1, %v4021_v4 }
  0xe0   : > { %3075 = vmatprep.mubr.msk.bf16.mxu0 %vm708_vm1, %v4037_v22 }
  0xe4   : > { %3180 = vmatmul.mubr.msk.bf16.gmra.mrb[8].mxu1 %vm708_vm1, %v4037_v22 }
  0xe5   : > { %3183 = vmatprep.mubr.msk.bf16.mxu1 %vm708_vm1, %v4044_v59 }
  0xe7   : > { %3076 = vmatmul.mubr.msk.bf16.gmra.mrb[12].mxu0 %vm708_vm1, %v4044_v59 }
  0xec   : > { %3184 = vmatmul.mubr.msk.bf16.gmra.mrb[12].mxu1 %vm708_vm1, %v2839_v54 }
 0x1a2   : > { %v3065_v39 = vpop.f32.mrb[0].mxu0 }
 0x1a3   : > { %v1670_v25 = vadd.f32 %v3065_v39, %v4239_v38  ;;  %v1582_v51 = vpop.f32.mrb[1].mxu0 }
 0x1a4   : > { %v1668_v20 = vadd.f32 %v4239_v38, %v1582_v51  ;;  %v3066_v43 = vpop.f32.mrb[2].mxu0 }
 0x1a5   : > { %3404 = vtanh.f32 %v1670_v25  ;;  %v1671_v47 = vadd.f32 %v3066_v43, %v4239_v38  ;;  %v1585_v41 = vpop.f32.mrb[3].mxu0 }
 0x1a6   : > { %3406 = vtanh.f32 %v1668_v20  ;;  %v1669_v61 = vadd.f32 %v4239_v38, %v1585_v41 }
 0x1a7   : > { %v3173_v2 = vpop.f32.mrb[0].mxu1  ;;  %3408 = vtanh.f32 %v1671_v47 }
 0x1a8   : > { %v2455_v62 = vadd.f32 %v3173_v2, %v4239_v38  ;;  %v2374_v4 = vpop.f32.mrb[1].mxu1  ;;  %3410 = vtanh.f32 %v1669_v61 }
 0x1a9   : > { %v2453_v3 = vadd.f32 %v4239_v38, %v2374_v4  ;;  %v3174_v33 = vpop.f32.mrb[2].mxu1 }
 0x1aa   : > { %3412 = vtanh.f32 %v2455_v62  ;;  %v2456_v10 = vadd.f32 %v3174_v33, %v4239_v38  ;;  %v2377_v17 = vpop.f32.mrb[3].mxu1  ;;  %v3069_v56 = vpop.f32.mrb[4].mxu0 }
 0x1ab   : > { %3414 = vtanh.f32 %v2453_v3  ;;  %v2454_v40 = vadd.f32 %v4239_v38, %v2377_v17  ;;  %v1674_v5 = vadd.f32 %v3069_v56, %v4239_v38  ;;  %v1598_v11 = vpop.f32.mrb[5].mxu0 }
 0x1ac   : > { %3416 = vtanh.f32 %v2456_v10  ;;  %v1672_v24 = vadd.f32 %v4239_v38, %v1598_v11  ;;  %v3070_v22 = vpop.f32.mrb[6].mxu0 }
 0x1ad   : > { %3418 = vtanh.f32 %v2454_v40  ;;  %v1675_v27 = vadd.f32 %v3070_v22, %v4239_v38  ;;  %v1601_v59 = vpop.f32.mrb[7].mxu0 }
 0x1ae   : > { %3420 = vtanh.f32 %v1674_v5  ;;  %v1673_v0 = vadd.f32 %v4239_v38, %v1601_v59 }
 0x1af   : > { %v3405_v1 = vpop.eup %3404  ;;  %v3177_v28 = vpop.f32.mrb[4].mxu1  ;;  %3422 = vtanh.f32 %v1672_v24 }
 0x1b0   : > { %v3407_v21 = vpop.eup %3406  ;;  %2490 = vst.msk [vmem:[%s4255_s19 + $0x20] sm:$0xff] %vm2485_vm7, %v3405_v1  ;;  %v2459_v30 = vadd.f32 %v3177_v28, %v4239_v38  ;;  %v2390_v29 = vpop.f32.mrb[5].mxu1  ;;  %3424 = vtanh.f32 %v1675_v27 }
 0x1b1   : > { %v3409_v32 = vpop.eup %3408  ;;  %2486 = vst.msk [vmem:[%s4255_s19] sm:$0xff] %vm2485_vm7, %v3407_v21  ;;  %v2457_v45 = vadd.f32 %v4239_v38, %v2390_v29  ;;  %v3178_v34 = vpop.f32.mrb[6].mxu1  ;;  %3426 = vtanh.f32 %v1673_v0 }
 0x1b2   : > { %v3411_v36 = vpop.eup %3410  ;;  %2491 = vst.msk [vmem:[%s4255_s19 + $0x28] sm:$0xff] %vm2485_vm7, %v3409_v32  ;;  %3428 = vtanh.f32 %v2459_v30  ;;  %v2460_v63 = vadd.f32 %v3178_v34, %v4239_v38  ;;  %v2393_v23 = vpop.f32.mrb[7].mxu1 }
 0x1b3   : > { %v3073_v37 = vpop.f32.mrb[8].mxu0  ;;  %2487 = vst.msk [vmem:[%s4255_s19 + $0x8] sm:$0xff] %vm2485_vm7, %v3411_v36  ;;  %3430 = vtanh.f32 %v2457_v45  ;;  %v2458_v44 = vadd.f32 %v4239_v38, %v2393_v23 }
 0x1b4   : > { %v1678_v19 = vadd.f32 %v3073_v37, %v4239_v38  ;;  %v1614_v54 = vpop.f32.mrb[9].mxu0  ;;  %v3413_v50 = vpop.eup %3412  ;;  %3432 = vtanh.f32 %v2460_v63 }
 0x1b5   : > { %v1676_v58 = vadd.f32 %v4239_v38, %v1614_v54  ;;  %v3074_v9 = vpop.f32.mrb[10].mxu0  ;;  %v3415_v12 = vpop.eup %3414  ;;  %2492 = vst.msk [vmem:[%s4255_s19 + $0x30] sm:$0xff] %vm2485_vm7, %v3413_v50  ;;  %3434 = vtanh.f32 %v2458_v44 }
 0x1b6   : > { %v1679_v52 = vadd.f32 %v3074_v9, %v4239_v38  ;;  %v1617_v7 = vpop.f32.mrb[11].mxu0  ;;  %v3417_v13 = vpop.eup %3416  ;;  %2488 = vst.msk [vmem:[%s4255_s19 + $0x10] sm:$0xff] %vm2485_vm7, %v3415_v12  ;;  %3436 = vtanh.f32 %v1678_v19 }
 0x1b7   : > { %v1677_v6 = vadd.f32 %v4239_v38, %v1617_v7  ;;  %v3419_v18 = vpop.eup %3418  ;;  %2493 = vst.msk [vmem:[%s4255_s19 + $0x38] sm:$0xff] %vm2485_vm7, %v3417_v13  ;;  %v3181_v14 = vpop.f32.mrb[8].mxu1  ;;  %3438 = vtanh.f32 %v1676_v58 }
 0x1b8   : > { %v3421_v35 = vpop.eup %3420  ;;  %2489 = vst.msk [vmem:[%s4255_s19 + $0x18] sm:$0xff] %vm2485_vm7, %v3419_v18  ;;  %v2463_v53 = vadd.f32 %v3181_v14, %v4239_v38  ;;  %v2406_v42 = vpop.f32.mrb[9].mxu1  ;;  %3440 = vtanh.f32 %v1679_v52 }
 0x1b9   : > { %v3423_v31 = vpop.eup %3422  ;;  %2498 = vst.msk [vmem:[%s4255_s19 + $0x60] sm:$0xff] %vm2485_vm7, %v3421_v35  ;;  %v2461_v15 = vadd.f32 %v4239_v38, %v2406_v42  ;;  %v3182_v8 = vpop.f32.mrb[10].mxu1  ;;  %3442 = vtanh.f32 %v1677_v6 }
 0x1ba   : > { %v3425_v55 = vpop.eup %3424  ;;  %2494 = vst.msk [vmem:[%s4255_s19 + $0x40] sm:$0xff] %vm2485_vm7, %v3423_v31  ;;  %3444 = vtanh.f32 %v2463_v53  ;;  %v2464_v16 = vadd.f32 %v3182_v8, %v4239_v38  ;;  %v2409_v49 = vpop.f32.mrb[11].mxu1 }
 0x1bb   : > { %v3077_v48 = vpop.f32.mrb[12].mxu0  ;;  %v3427_v46 = vpop.eup %3426  ;;  %2499 = vst.msk [vmem:[%s4255_s19 + $0x68] sm:$0xff] %vm2485_vm7, %v3425_v55  ;;  %3446 = vtanh.f32 %v2461_v15  ;;  %v2462_v26 = vadd.f32 %v4239_v38, %v2409_v49 }
 0x1bc   : > { %v1682_v57 = vadd.f32 %v3077_v48, %v4239_v38  ;;  %v1630_v60 = vpop.f32.mrb[13].mxu0  ;;  %v3429_v39 = vpop.eup %3428  ;;  %2495 = vst.msk [vmem:[%s4255_s19 + $0x48] sm:$0xff] %vm2485_vm7, %v3427_v46  ;;  %3448 = vtanh.f32 %v2464_v16 }
 0x1bd   : > { %v1680_v25 = vadd.f32 %v4239_v38, %v1630_v60  ;;  %v3078_v51 = vpop.f32.mrb[14].mxu0  ;;  %v3431_v20 = vpop.eup %3430  ;;  %2500 = vst.msk [vmem:[%s4255_s19 + $0x70] sm:$0xff] %vm2485_vm7, %v3429_v39  ;;  %3450 = vtanh.f32 %v2462_v26 }
 0x1be   : > { %v1683_v43 = vadd.f32 %v3078_v51, %v4239_v38  ;;  %v1633_v47 = vpop.f32.mrb[15].mxu0  ;;  %v3433_v41 = vpop.eup %3432  ;;  %2496 = vst.msk [vmem:[%s4255_s19 + $0x50] sm:$0xff] %vm2485_vm7, %v3431_v20  ;;  %3452 = vtanh.f32 %v1682_v57 }
 0x1bf   : > { %v1681_v61 = vadd.f32 %v4239_v38, %v1633_v47  ;;  %v3435_v2 = vpop.eup %3434  ;;  %2501 = vst.msk [vmem:[%s4255_s19 + $0x78] sm:$0xff] %vm2485_vm7, %v3433_v41  ;;  %v3185_v62 = vpop.f32.mrb[12].mxu1  ;;  %3454 = vtanh.f32 %v1680_v25 }
 0x1c0   : > { %v3437_v4 = vpop.eup %3436  ;;  %2497 = vst.msk [vmem:[%s4255_s19 + $0x58] sm:$0xff] %vm2485_vm7, %v3435_v2  ;;  %v2467_v3 = vadd.f32 %v3185_v62, %v4239_v38  ;;  %v2422_v33 = vpop.f32.mrb[13].mxu1  ;;  %3456 = vtanh.f32 %v1683_v43 }
 0x1c1   : > { %v3439_v10 = vpop.eup %3438  ;;  %2506 = vst.msk [vmem:[%s4255_s19 + $0xa0] sm:$0xff] %vm2485_vm7, %v3437_v4  ;;  %v2465_v17 = vadd.f32 %v4239_v38, %v2422_v33  ;;  %v3186_v56 = vpop.f32.mrb[14].mxu1  ;;  %3458 = vtanh.f32 %v1681_v61 }
 0x1c2   : > { %v3441_v40 = vpop.eup %3440  ;;  %2502 = vst.msk [vmem:[%s4255_s19 + $0x80] sm:$0xff] %vm2485_vm7, %v3439_v10  ;;  %3460 = vtanh.f32 %v2467_v3  ;;  %v2468_v5 = vadd.f32 %v3186_v56, %v4239_v38  ;;  %v2425_v11 = vpop.f32.mrb[15].mxu1 }
 0x1c3   : > { %v3443_v24 = vpop.eup %3442  ;;  %2507 = vst.msk [vmem:[%s4255_s19 + $0xa8] sm:$0xff] %vm2485_vm7, %v3441_v40  ;;  %3462 = vtanh.f32 %v2465_v17  ;;  %v2466_v22 = vadd.f32 %v4239_v38, %v2425_v11 }
 0x1c4   : > { %v3445_v27 = vpop.eup %3444  ;;  %2503 = vst.msk [vmem:[%s4255_s19 + $0x88] sm:$0xff] %vm2485_vm7, %v3443_v24  ;;  %3464 = vtanh.f32 %v2468_v5 }
 0x1c5   : > { %v3447_v59 = vpop.eup %3446  ;;  %2508 = vst.msk [vmem:[%s4255_s19 + $0xb0] sm:$0xff] %vm2485_vm7, %v3445_v27  ;;  %3466 = vtanh.f32 %v2466_v22 }
 0x1c6   : > { %v3449_v0 = vpop.eup %3448  ;;  %2504 = vst.msk [vmem:[%s4255_s19 + $0x90] sm:$0xff] %vm2485_vm7, %v3447_v59 }
 0x1c7   : > { %v3451_v1 = vpop.eup %3450  ;;  %2509 = vst.msk [vmem:[%s4255_s19 + $0xb8] sm:$0xff] %vm2485_vm7, %v3449_v0 }
 0x1c8   : > { %v3453_v38 = vpop.eup %3452  ;;  %2505 = vst.msk [vmem:[%s4255_s19 + $0x98] sm:$0xff] %vm2485_vm7, %v3451_v1 }
 0x1c9   : > { %v3455_v28 = vpop.eup %3454  ;;  %2514 = vst.msk [vmem:[%s4255_s19 + $0xe0] sm:$0xff] %vm2485_vm7, %v3453_v38 }
 0x1ca   : > { %v3457_v21 = vpop.eup %3456  ;;  %2510 = vst.msk [vmem:[%s4255_s19 + $0xc0] sm:$0xff] %vm2485_vm7, %v3455_v28 }
 0x1cb   : > { %v3459_v30 = vpop.eup %3458  ;;  %2515 = vst.msk [vmem:[%s4255_s19 + $0xe8] sm:$0xff] %vm2485_vm7, %v3457_v21 }
 0x1cc   : > { %v3461_v29 = vpop.eup %3460  ;;  %2511 = vst.msk [vmem:[%s4255_s19 + $0xc8] sm:$0xff] %vm2485_vm7, %v3459_v30 }
 0x1cd   : > { %v3463_v32 = vpop.eup %3462  ;;  %2516 = vst.msk [vmem:[%s4255_s19 + $0xf0] sm:$0xff] %vm2485_vm7, %v3461_v29 }
 0x1ce   : > { %v3465_v45 = vpop.eup %3464  ;;  %2512 = vst.msk [vmem:[%s4255_s19 + $0xd0] sm:$0xff] %vm2485_vm7, %v3463_v32 }
 0x1cf   : > { %v3467_v34 = vpop.eup %3466  ;;  %2517 = vst.msk [vmem:[%s4255_s19 + $0xf8] sm:$0xff] %vm2485_vm7, %v3465_v45 }
 0x1d0   : > { %2513 = vst.msk [vmem:[%s4255_s19 + $0xd8] sm:$0xff] %vm2485_vm7, %v3467_v34 }
 0x1d1 PF: > { %s15_s22 = sadd.s32 1, %s3506_s22   ;;  %s4369_s18 = smov %s3498_s20 }
 0x1d2   : > { %p12_p10 = scmp.ge.s32.totalorder %s15_s22, 6   ;;  %s4370_s19 = smov %s3502_s21 }
 0x1d3   : > { %s4371_s20 = smov %s4374_s23  ;;  %s4372_s21 = smov %s4378_s24 }
 0x1d4   :  { %14 = sbr.rel (!%p12_p10) target bundleno = 3 (0x3), region = 87 }

</bundles_post_ra>
